<compile_context>
chip_gen: v7x
topology: tpu7x:2x2x1
jax: 0.10.0
libtpu: 0.0.40
codegen_flags: <defaults>
</compile_context>

<pallas_src>
import numpy as np
import jax
import jax.numpy as jnp
from jax.experimental import pallas as pl
from jax.experimental.pallas import tpu as pltpu

_PADL = 8  # left margin in the padded-tile scratch so the data store stays tile-aligned


# ---------------------------------------------------------------------------
# Kernel 1: fused 1x1 conv (+bias) -> ReLU -> PixelShuffle(r=2)
# ---------------------------------------------------------------------------
def _shuf_kernel(x_ref, w_ref, b_ref, o_ref):
    # x_ref: (1, TH, W, Cin) bf16
    # w_ref: (Cin, 4C) bf16, columns pre-permuted to [i, j, c] order
    #        (i = output-row parity, j = output-col parity, c = shuffled channel)
    # b_ref: (1, 4C) f32 (same permutation)
    # o_ref: (1, 2*TH, W, 2C) bf16 -- tile of the (N, 2H, W, 2C) output which reshapes
    #        for free (row-major) to the pixel-shuffled (N, 2H, 2W, C).
    th, wsp, cin = x_ref.shape[1], x_ref.shape[2], x_ref.shape[3]
    c2 = o_ref.shape[3]                                   # = 2*C
    x = x_ref[0].reshape(th * wsp, cin)
    y = jnp.dot(x, w_ref[...], preferred_element_type=jnp.float32)
    y = jnp.maximum(y + b_ref[...], 0.0).astype(o_ref.dtype)          # (TH*W, 4C)
    # Scatter the two row parities; the column parity j is already laid out so that
    # out[..., w, j*C + c] == shuffled[..., 2*w + j, c].
    for h in range(th):
        rows = y[h * wsp:(h + 1) * wsp, :]                             # (W, 4C)
        for i in range(2):
            o_ref[0, 2 * h + i, :, :] = rows[:, i * c2:(i + 1) * c2]


def pixel_shuffle_conv1x1(x_bf16, w_re, b_re):
    """Fused PixelShuffle_ICNR conv: 1x1 conv + bias + ReLU + PixelShuffle(2)."""
    N, H, W, Cin = x_bf16.shape
    C4 = w_re.shape[1]
    C = C4 // 4
    TH = max(1, min(H, 16, 512 // max(W, 1)))
    while H % TH:
        TH -= 1
    y = pl.pallas_call(
        _shuf_kernel,
        out_shape=jax.ShapeDtypeStruct((N, 2 * H, W, 2 * C), jnp.bfloat16),
        grid=(N, H // TH),
        in_specs=[
            pl.BlockSpec((1, TH, W, Cin), lambda n, t: (n, t, 0, 0)),
            pl.BlockSpec((Cin, C4), lambda n, t: (0, 0)),
            pl.BlockSpec((1, C4), lambda n, t: (0, 0)),
        ],
        out_specs=pl.BlockSpec((1, 2 * TH, W, 2 * C), lambda n, t: (n, t, 0, 0)),
        compiler_params=pltpu.CompilerParams(
            dimension_semantics=("parallel", "parallel"),
            vmem_limit_bytes=32 * 1024 * 1024),
    )(x_bf16, w_re, b_re)
    # Free (row-major) reshape: (N, 2H, W, 2C) -> (N, 2H, 2W, C).  No data movement.
    return y.reshape(N, 2 * H, 2 * W, C)


# ---------------------------------------------------------------------------
# Kernel 2: 3x3 "same" conv (bias=False) -> ReLU -> folded eval-BatchNorm
# ---------------------------------------------------------------------------
def _conv3x3_relu_bn_kernel(top_ref, mid_ref, bot_ref, w_ref, scale_ref, shift_ref,
                            o_ref, xpad_ref, acc_ref):
    th, w2, cin = mid_ref.shape[1], mid_ref.shape[2], mid_ref.shape[3]
    cout = o_ref.shape[3]
    t = pl.program_id(1)
    nt = pl.num_programs(1)
    f32 = jnp.float32

    # Assemble a zero-padded (rows: halo, cols: conv padding) tile in VMEM scratch.
    mid = mid_ref[0].astype(f32)                                       # (TH, W2, Cin)
    top = jnp.where(t > 0, top_ref[0].astype(f32), 0.0)                # (1,  W2, Cin)
    bot = jnp.where(t < nt - 1, bot_ref[0].astype(f32), 0.0)           # (1,  W2, Cin)
    zeros_margin = jnp.zeros((th + 2, _PADL, cin), f32)
    xpad_ref[:, 0:_PADL, :] = zeros_margin                             # left zero margin
    xpad_ref[:, _PADL + w2:, :] = zeros_margin                         # right zero margin
    xpad_ref[0:1, _PADL:_PADL + w2, :] = top
    xpad_ref[1:th + 1, _PADL:_PADL + w2, :] = mid
    xpad_ref[th + 1:th + 2, _PADL:_PADL + w2, :] = bot

    # Three W-shifted views, built once (not 9 strided slice+reshape copies).
    x_by_b = [
        xpad_ref[:, _PADL - 1 + b:_PADL - 1 + b + w2, :].astype(jnp.bfloat16)
        for b in range(3)
    ]

    # 9 taps = 9 MXU matmuls accumulated into an f32 VMEM scratch.
    first = True
    for a in range(3):
        for b in range(3):
            v = x_by_b[b][a:a + th].reshape(th * w2, cin)              # bf16
            contrib = jnp.dot(v, w_ref[a, b], preferred_element_type=jnp.float32)
            if first:
                acc_ref[...] = contrib
                first = False
            else:
                acc_ref[...] += contrib

    y = jnp.maximum(acc_ref[...], 0.0)                                 # Conv -> ReLU
    y = y * scale_ref[...] + shift_ref[...]                            # BN (eval, folded)
    o_ref[0] = y.reshape(th, w2, cout).astype(o_ref.dtype)


def conv3x3_relu_bn(x, w, scale, shift, out_dtype):
    """x: (N, H2, W2, Cin) bf16 NHWC; w: (3,3,Cin,Cout) bf16 HWIO; scale/shift: (1,Cout) f32."""
    N, H2, W2, Cin = x.shape
    Cout = w.shape[3]
    TH = max(1, min(H2, 512 // max(W2, 1)))
    while H2 % TH:
        TH -= 1

    def mid_map(n, t):
        return (n, t, 0, 0)

    def top_map(n, t):   # 1-row top halo (row-block size 1 => block index == row index)
        return (n, jnp.maximum(t * TH - 1, 0), 0, 0)

    def bot_map(n, t):   # 1-row bottom halo
        return (n, jnp.minimum((t + 1) * TH, H2 - 1), 0, 0)

    return pl.pallas_call(
        _conv3x3_relu_bn_kernel,
        out_shape=jax.ShapeDtypeStruct((N, H2, W2, Cout), out_dtype),
        grid=(N, H2 // TH),
        in_specs=[
            pl.BlockSpec((1, 1, W2, Cin), top_map),
            pl.BlockSpec((1, TH, W2, Cin), mid_map),
            pl.BlockSpec((1, 1, W2, Cin), bot_map),
            pl.BlockSpec((3, 3, Cin, Cout), lambda n, t: (0, 0, 0, 0)),
            pl.BlockSpec((1, Cout), lambda n, t: (0, 0)),
            pl.BlockSpec((1, Cout), lambda n, t: (0, 0)),
        ],
        out_specs=pl.BlockSpec((1, TH, W2, Cout), lambda n, t: (n, t, 0, 0)),
        scratch_shapes=[
            pltpu.VMEM((TH + 2, W2 + 2 * _PADL, Cin), jnp.float32),   # padded tile
            pltpu.VMEM((TH * W2, Cout), jnp.float32),                 # f32 accumulator
        ],
        compiler_params=pltpu.CompilerParams(
            dimension_semantics=("parallel", "parallel"),
            vmem_limit_bytes=32 * 1024 * 1024),
    )(x, x, x, w, scale, shift)


# ---------------------------------------------------------------------------
# UpBlock forward (NCHW in / NCHW out, like the PyTorch module)
# ---------------------------------------------------------------------------
def up_block_forward(x_nchw, kp):
    x = jnp.transpose(x_nchw, (0, 2, 3, 1)).astype(jnp.bfloat16)   # NCHW -> NHWC (bf16)
    y = pixel_shuffle_conv1x1(x, kp["w_shuf_re"], kp["b_shuf_re"])  # (N, 2H, 2W, ni) bf16
    y = conv3x3_relu_bn(y, kp["w1"], kp["bn1_scale"], kp["bn1_shift"],
                        out_dtype=jnp.bfloat16)
    y = conv3x3_relu_bn(y, kp["w2"], kp["bn2_scale"], kp["bn2_shift"],
                        out_dtype=jnp.float32)
    return jnp.transpose(y, (0, 3, 1, 2))                           # NHWC -> NCHW


def _pixel_shuffle_col_perm(C):
    # New column index k = i*2C + j*C + c  <-  original 1x1-conv output channel c*4+2i+j
    k = np.arange(4 * C)
    i = k // (2 * C)
    j = (k // C) % 2
    c = k % C
    return (c * 4 + i * 2 + j).astype(np.int32)


def init_params(key, up_in_c, final_div=True):
    ni = up_in_c // 2
    nf = ni if final_div else ni // 2
    k = jax.random.split(key, 4)
    eps = 1e-5
    # PixelShuffle_ICNR 1x1 conv (weight-norm folded): up_in_c -> 4*ni, with bias.
    w_shuf = (jax.random.normal(k[0], (up_in_c, 4 * ni), jnp.float32) * 0.1
              ).astype(jnp.bfloat16)
    b_shuf = jax.random.normal(k[1], (1, 4 * ni), jnp.float32) * 0.1
    # 3x3 convs, bias=False, HWIO, kaiming-like scale, stored bf16 for the MXU.
    w1 = (jax.random.normal(k[2], (3, 3, ni, nf), jnp.float32)
          * (2.0 / (9 * ni)) ** 0.5).astype(jnp.bfloat16)
    w2 = (jax.random.normal(k[3], (3, 3, nf, nf), jnp.float32)
          * (2.0 / (9 * nf)) ** 0.5).astype(jnp.bfloat16)
    # BatchNorm2d eval-mode defaults (gamma=1, beta=0, mean=0, var=1) folded.
    bn_scale = jnp.full((1, nf), 1.0 / np.sqrt(1.0 + eps), jnp.float32)
    bn_shift = jnp.zeros((1, nf), jnp.float32)
    return dict(w_shuf=w_shuf, b_shuf=b_shuf, w1=w1, w2=w2,
                bn1_scale=bn_scale, bn1_shift=bn_shift,
                bn2_scale=bn_scale, bn2_shift=bn_shift)


def prepare_kernel_params(params, up_in_c):
    ni = up_in_c // 2
    perm = _pixel_shuffle_col_perm(ni)
    return dict(
        w_shuf_re=params["w_shuf"][:, perm],
        b_shuf_re=params["b_shuf"][:, perm],
        w1=params["w1"], w2=params["w2"],
        bn1_scale=params["bn1_scale"], bn1_shift=params["bn1_shift"],
        bn2_scale=params["bn2_scale"], bn2_shift=params["bn2_shift"])


# ---------------------------------------------------------------------------
# Pure-JAX reference (same math, same bf16 matmul policy, lax.conv)
# ---------------------------------------------------------------------------
def up_block_reference(x_nchw, p):
    x = jnp.transpose(x_nchw, (0, 2, 3, 1)).astype(jnp.bfloat16)
    N, H, W, Cin = x.shape
    C = Cin // 2
    y = jnp.dot(x.reshape(-1, Cin), p["w_shuf"],
                preferred_element_type=jnp.float32) + p["b_shuf"]
    y = jnp.maximum(y, 0.0).reshape(N, H, W, 4 * C)
    # PixelShuffle(2), PyTorch channel order: ch = c*4 + i*2 + j
    y = y.reshape(N, H, W, C, 2, 2).transpose(0, 1, 4, 2, 5, 3).reshape(N, 2 * H, 2 * W, C)
    y = y.astype(jnp.bfloat16)

    def conv_block(z, w, s, b):
        z = jax.lax.conv_general_dilated(
            z, w, window_strides=(1, 1), padding="SAME",
            dimension_numbers=("NHWC", "HWIO", "NHWC"),
            preferred_element_type=jnp.float32)
        return jnp.maximum(z, 0.0) * s + b

    y = conv_block(y, p["w1"], p["bn1_scale"], p["bn1_shift"]).astype(jnp.bfloat16)
    y = conv_block(y, p["w2"], p["bn2_scale"], p["bn2_shift"])
    return jnp.transpose(y, (0, 3, 1, 2))


if __name__ == "__main__":
    up_in_c, N, H, W = 256, 2, 16, 16           # lane-dense channels (ni = nf = 128)
    key = jax.random.PRNGKey(0)
    kx, kp = jax.random.split(key)
    x = jax.random.normal(kx, (N, up_in_c, H, W), jnp.float32)   # NCHW like PyTorch
    params = init_params(kp, up_in_c)
    kparams = prepare_kernel_params(params, up_in_c)

    out = jax.jit(up_block_forward)(x, kparams)
    out = jax.block_until_ready(out)
    assert out.shape == (N, up_in_c // 2, 2 * H, 2 * W), out.shape

    ref = jax.block_until_ready(up_block_reference(x, params))
    np.testing.assert_allclose(np.asarray(out, dtype=np.float32),
                               np.asarray(ref, dtype=np.float32),
                               rtol=1e-2, atol=1e-2)
    print("KERNEL_OK")
</pallas_src>

<mosaic_0001>
module attributes {stable_mosaic.version = 11 : i64} {
  func.func @_shuf_kernel(%arg0: i32, %arg1: i32, %arg2: memref<1x16x16x256xbf16, #tpu.memory_space<vmem>>, %arg3: memref<256x512xbf16, #tpu.memory_space<vmem>>, %arg4: memref<1x512xf32, #tpu.memory_space<vmem>>, %arg5: memref<1x32x16x256xbf16, #tpu.memory_space<vmem>>) attributes {dimension_semantics = [#tpu.dimension_semantics<parallel>, #tpu.dimension_semantics<parallel>], iteration_bounds = array<i64: 2, 1>, scalar_prefetch = 0 : i64, scratch_operands = 0 : i64, tpu.core_type = #tpu.core_type<tc>, window_params = [{transform_indices = @transform_0, window_bounds = array<i64: 1, 16, 16, 256>}, {pipeline_mode = #tpu.pipeline_mode<synchronous>, transform_indices = @transform_1, window_bounds = array<i64: 256, 512>}, {pipeline_mode = #tpu.pipeline_mode<synchronous>, transform_indices = @transform_2, window_bounds = array<i64: 1, 512>}, {transform_indices = @transform_3, window_bounds = array<i64: 1, 32, 16, 256>}]} {
    %c0 = arith.constant 0 : index
    %c0_0 = arith.constant 0 : index
    %c0_1 = arith.constant 0 : index
    %c0_2 = arith.constant 0 : index
    %0 = vector.load %arg2[%c0, %c0_0, %c0_1, %c0_2] : memref<1x16x16x256xbf16, #tpu.memory_space<vmem>>, vector<1x16x16x256xbf16>
    %1 = vector.shape_cast %0 : vector<1x16x16x256xbf16> to vector<16x16x256xbf16>
    %2 = vector.shape_cast %1 : vector<16x16x256xbf16> to vector<256x256xbf16>
    %c0_3 = arith.constant 0 : index
    %c0_4 = arith.constant 0 : index
    %3 = vector.load %arg3[%c0_3, %c0_4] : memref<256x512xbf16, #tpu.memory_space<vmem>>, vector<256x512xbf16>
    %cst = arith.constant dense<0.000000e+00> : vector<256x512xf32>
    %4 = tpu.matmul %2, %3, %cst {dimension_numbers = #tpu.dot_dimension_numbers<[1], [0], [0], [1], [0, 0, 1, 1], [], []>} : vector<256x256xbf16>, vector<256x512xbf16>, vector<256x512xf32> -> vector<256x512xf32>
    %c0_5 = arith.constant 0 : index
    %c0_6 = arith.constant 0 : index
    %5 = vector.load %arg4[%c0_5, %c0_6] : memref<1x512xf32, #tpu.memory_space<vmem>>, vector<1x512xf32>
    %6 = vector.broadcast %5 : vector<1x512xf32> to vector<256x512xf32>
    %7 = arith.addf %4, %6 : vector<256x512xf32>
    %cst_7 = arith.constant 0.000000e+00 : f32
    %8 = vector.broadcast %cst_7 : f32 to vector<256x512xf32>
    %9 = arith.maximumf %7, %8 : vector<256x512xf32>
    %10 = arith.truncf %9 : vector<256x512xf32> to vector<256x512xbf16>
    %11 = vector.extract_strided_slice %10 {offsets = [0, 0], sizes = [16, 512], strides = [1, 1]} : vector<256x512xbf16> to vector<16x512xbf16>
    %12 = vector.extract_strided_slice %11 {offsets = [0, 0], sizes = [16, 256], strides = [1, 1]} : vector<16x512xbf16> to vector<16x256xbf16>
    %c0_8 = arith.constant 0 : index
    %c0_9 = arith.constant 0 : index
    %c0_10 = arith.constant 0 : index
    %c0_11 = arith.constant 0 : index
    %13 = vector.load %arg5[%c0_8, %c0_9, %c0_10, %c0_11] : memref<1x32x16x256xbf16, #tpu.memory_space<vmem>>, vector<1x1x16x256xbf16>
    %14 = vector.shape_cast %13 : vector<1x1x16x256xbf16> to vector<16x256xbf16>
    %15 = vector.shape_cast %12 : vector<16x256xbf16> to vector<1x1x16x256xbf16>
    tpu.vector_store %arg5[%c0_8, %c0_9, %c0_10, %c0_11], %15 {strides = array<i32>} : memref<1x32x16x256xbf16, #tpu.memory_space<vmem>>, vector<1x1x16x256xbf16>,
    %16 = vector.extract_strided_slice %11 {offsets = [0, 256], sizes = [16, 256], strides = [1, 1]} : vector<16x512xbf16> to vector<16x256xbf16>
    %c0_12 = arith.constant 0 : index
    %c1 = arith.constant 1 : index
    %c0_13 = arith.constant 0 : index
    %c0_14 = arith.constant 0 : index
    %17 = vector.load %arg5[%c0_12, %c1, %c0_13, %c0_14] : memref<1x32x16x256xbf16, #tpu.memory_space<vmem>>, vector<1x1x16x256xbf16>
    %18 = vector.shape_cast %17 : vector<1x1x16x256xbf16> to vector<16x256xbf16>
    %19 = vector.shape_cast %16 : vector<16x256xbf16> to vector<1x1x16x256xbf16>
    tpu.vector_store %arg5[%c0_12, %c1, %c0_13, %c0_14], %19 {strides = array<i32>} : memref<1x32x16x256xbf16, #tpu.memory_space<vmem>>, vector<1x1x16x256xbf16>,
    %20 = vector.extract_strided_slice %10 {offsets = [16, 0], sizes = [16, 512], strides = [1, 1]} : vector<256x512xbf16> to vector<16x512xbf16>
    %21 = vector.extract_strided_slice %20 {offsets = [0, 0], sizes = [16, 256], strides = [1, 1]} : vector<16x512xbf16> to vector<16x256xbf16>
    %c0_15 = arith.constant 0 : index
    %c2 = arith.constant 2 : index
    %c0_16 = arith.constant 0 : index
    %c0_17 = arith.constant 0 : index
    %22 = vector.load %arg5[%c0_15, %c2, %c0_16, %c0_17] : memref<1x32x16x256xbf16, #tpu.memory_space<vmem>>, vector<1x1x16x256xbf16>
    %23 = vector.shape_cast %22 : vector<1x1x16x256xbf16> to vector<16x256xbf16>
    %24 = vector.shape_cast %21 : vector<16x256xbf16> to vector<1x1x16x256xbf16>
    tpu.vector_store %arg5[%c0_15, %c2, %c0_16, %c0_17], %24 {strides = array<i32>} : memref<1x32x16x256xbf16, #tpu.memory_space<vmem>>, vector<1x1x16x256xbf16>,
    %25 = vector.extract_strided_slice %20 {offsets = [0, 256], sizes = [16, 256], strides = [1, 1]} : vector<16x512xbf16> to vector<16x256xbf16>
    %c0_18 = arith.constant 0 : index
    %c3 = arith.constant 3 : index
    %c0_19 = arith.constant 0 : index
    %c0_20 = arith.constant 0 : index
    %26 = vector.load %arg5[%c0_18, %c3, %c0_19, %c0_20] : memref<1x32x16x256xbf16, #tpu.memory_space<vmem>>, vector<1x1x16x256xbf16>
    %27 = vector.shape_cast %26 : vector<1x1x16x256xbf16> to vector<16x256xbf16>
    %28 = vector.shape_cast %25 : vector<16x256xbf16> to vector<1x1x16x256xbf16>
    tpu.vector_store %arg5[%c0_18, %c3, %c0_19, %c0_20], %28 {strides = array<i32>} : memref<1x32x16x256xbf16, #tpu.memory_space<vmem>>, vector<1x1x16x256xbf16>,
    %29 = vector.extract_strided_slice %10 {offsets = [32, 0], sizes = [16, 512], strides = [1, 1]} : vector<256x512xbf16> to vector<16x512xbf16>
    %30 = vector.extract_strided_slice %29 {offsets = [0, 0], sizes = [16, 256], strides = [1, 1]} : vector<16x512xbf16> to vector<16x256xbf16>
    %c0_21 = arith.constant 0 : index
    %c4 = arith.constant 4 : index
    %c0_22 = arith.constant 0 : index
    %c0_23 = arith.constant 0 : index
    %31 = vector.load %arg5[%c0_21, %c4, %c0_22, %c0_23] : memref<1x32x16x256xbf16, #tpu.memory_space<vmem>>, vector<1x1x16x256xbf16>
    %32 = vector.shape_cast %31 : vector<1x1x16x256xbf16> to vector<16x256xbf16>
    %33 = vector.shape_cast %30 : vector<16x256xbf16> to vector<1x1x16x256xbf16>
    tpu.vector_store %arg5[%c0_21, %c4, %c0_22, %c0_23], %33 {strides = array<i32>} : memref<1x32x16x256xbf16, #tpu.memory_space<vmem>>, vector<1x1x16x256xbf16>,
    %34 = vector.extract_strided_slice %29 {offsets = [0, 256], sizes = [16, 256], strides = [1, 1]} : vector<16x512xbf16> to vector<16x256xbf16>
    %c0_24 = arith.constant 0 : index
    %c5 = arith.constant 5 : index
    %c0_25 = arith.constant 0 : index
    %c0_26 = arith.constant 0 : index
    %35 = vector.load %arg5[%c0_24, %c5, %c0_25, %c0_26] : memref<1x32x16x256xbf16, #tpu.memory_space<vmem>>, vector<1x1x16x256xbf16>
    %36 = vector.shape_cast %35 : vector<1x1x16x256xbf16> to vector<16x256xbf16>
    %37 = vector.shape_cast %34 : vector<16x256xbf16> to vector<1x1x16x256xbf16>
    tpu.vector_store %arg5[%c0_24, %c5, %c0_25, %c0_26], %37 {strides = array<i32>} : memref<1x32x16x256xbf16, #tpu.memory_space<vmem>>, vector<1x1x16x256xbf16>,
    %38 = vector.extract_strided_slice %10 {offsets = [48, 0], sizes = [16, 512], strides = [1, 1]} : vector<256x512xbf16> to vector<16x512xbf16>
    %39 = vector.extract_strided_slice %38 {offsets = [0, 0], sizes = [16, 256], strides = [1, 1]} : vector<16x512xbf16> to vector<16x256xbf16>
    %c0_27 = arith.constant 0 : index
    %c6 = arith.constant 6 : index
    %c0_28 = arith.constant 0 : index
    %c0_29 = arith.constant 0 : index
    %40 = vector.load %arg5[%c0_27, %c6, %c0_28, %c0_29] : memref<1x32x16x256xbf16, #tpu.memory_space<vmem>>, vector<1x1x16x256xbf16>
    %41 = vector.shape_cast %40 : vector<1x1x16x256xbf16> to vector<16x256xbf16>
    %42 = vector.shape_cast %39 : vector<16x256xbf16> to vector<1x1x16x256xbf16>
    tpu.vector_store %arg5[%c0_27, %c6, %c0_28, %c0_29], %42 {strides = array<i32>} : memref<1x32x16x256xbf16, #tpu.memory_space<vmem>>, vector<1x1x16x256xbf16>,
    %43 = vector.extract_strided_slice %38 {offsets = [0, 256], sizes = [16, 256], strides = [1, 1]} : vector<16x512xbf16> to vector<16x256xbf16>
    %c0_30 = arith.constant 0 : index
    %c7 = arith.constant 7 : index
    %c0_31 = arith.constant 0 : index
    %c0_32 = arith.constant 0 : index
    %44 = vector.load %arg5[%c0_30, %c7, %c0_31, %c0_32] : memref<1x32x16x256xbf16, #tpu.memory_space<vmem>>, vector<1x1x16x256xbf16>
    %45 = vector.shape_cast %44 : vector<1x1x16x256xbf16> to vector<16x256xbf16>
    %46 = vector.shape_cast %43 : vector<16x256xbf16> to vector<1x1x16x256xbf16>
    tpu.vector_store %arg5[%c0_30, %c7, %c0_31, %c0_32], %46 {strides = array<i32>} : memref<1x32x16x256xbf16, #tpu.memory_space<vmem>>, vector<1x1x16x256xbf16>,
    %47 = vector.extract_strided_slice %10 {offsets = [64, 0], sizes = [16, 512], strides = [1, 1]} : vector<256x512xbf16> to vector<16x512xbf16>
    %48 = vector.extract_strided_slice %47 {offsets = [0, 0], sizes = [16, 256], strides = [1, 1]} : vector<16x512xbf16> to vector<16x256xbf16>
    %c0_33 = arith.constant 0 : index
    %c8 = arith.constant 8 : index
    %c0_34 = arith.constant 0 : index
    %c0_35 = arith.constant 0 : index
    %49 = vector.load %arg5[%c0_33, %c8, %c0_34, %c0_35] : memref<1x32x16x256xbf16, #tpu.memory_space<vmem>>, vector<1x1x16x256xbf16>
    %50 = vector.shape_cast %49 : vector<1x1x16x256xbf16> to vector<16x256xbf16>
    %51 = vector.shape_cast %48 : vector<16x256xbf16> to vector<1x1x16x256xbf16>
    tpu.vector_store %arg5[%c0_33, %c8, %c0_34, %c0_35], %51 {strides = array<i32>} : memref<1x32x16x256xbf16, #tpu.memory_space<vmem>>, vector<1x1x16x256xbf16>,
    %52 = vector.extract_strided_slice %47 {offsets = [0, 256], sizes = [16, 256], strides = [1, 1]} : vector<16x512xbf16> to vector<16x256xbf16>
    %c0_36 = arith.constant 0 : index
    %c9 = arith.constant 9 : index
    %c0_37 = arith.constant 0 : index
    %c0_38 = arith.constant 0 : index
    %53 = vector.load %arg5[%c0_36, %c9, %c0_37, %c0_38] : memref<1x32x16x256xbf16, #tpu.memory_space<vmem>>, vector<1x1x16x256xbf16>
    %54 = vector.shape_cast %53 : vector<1x1x16x256xbf16> to vector<16x256xbf16>
    %55 = vector.shape_cast %52 : vector<16x256xbf16> to vector<1x1x16x256xbf16>
    tpu.vector_store %arg5[%c0_36, %c9, %c0_37, %c0_38], %55 {strides = array<i32>} : memref<1x32x16x256xbf16, #tpu.memory_space<vmem>>, vector<1x1x16x256xbf16>,
    %56 = vector.extract_strided_slice %10 {offsets = [80, 0], sizes = [16, 512], strides = [1, 1]} : vector<256x512xbf16> to vector<16x512xbf16>
    %57 = vector.extract_strided_slice %56 {offsets = [0, 0], sizes = [16, 256], strides = [1, 1]} : vector<16x512xbf16> to vector<16x256xbf16>
    %c0_39 = arith.constant 0 : index
    %c10 = arith.constant 10 : index
    %c0_40 = arith.constant 0 : index
    %c0_41 = arith.constant 0 : index
    %58 = vector.load %arg5[%c0_39, %c10, %c0_40, %c0_41] : memref<1x32x16x256xbf16, #tpu.memory_space<vmem>>, vector<1x1x16x256xbf16>
    %59 = vector.shape_cast %58 : vector<1x1x16x256xbf16> to vector<16x256xbf16>
    %60 = vector.shape_cast %57 : vector<16x256xbf16> to vector<1x1x16x256xbf16>
    tpu.vector_store %arg5[%c0_39, %c10, %c0_40, %c0_41], %60 {strides = array<i32>} : memref<1x32x16x256xbf16, #tpu.memory_space<vmem>>, vector<1x1x16x256xbf16>,
    %61 = vector.extract_strided_slice %56 {offsets = [0, 256], sizes = [16, 256], strides = [1, 1]} : vector<16x512xbf16> to vector<16x256xbf16>
    %c0_42 = arith.constant 0 : index
    %c11 = arith.constant 11 : index
    %c0_43 = arith.constant 0 : index
    %c0_44 = arith.constant 0 : index
    %62 = vector.load %arg5[%c0_42, %c11, %c0_43, %c0_44] : memref<1x32x16x256xbf16, #tpu.memory_space<vmem>>, vector<1x1x16x256xbf16>
    %63 = vector.shape_cast %62 : vector<1x1x16x256xbf16> to vector<16x256xbf16>
    %64 = vector.shape_cast %61 : vector<16x256xbf16> to vector<1x1x16x256xbf16>
    tpu.vector_store %arg5[%c0_42, %c11, %c0_43, %c0_44], %64 {strides = array<i32>} : memref<1x32x16x256xbf16, #tpu.memory_space<vmem>>, vector<1x1x16x256xbf16>,
    %65 = vector.extract_strided_slice %10 {offsets = [96, 0], sizes = [16, 512], strides = [1, 1]} : vector<256x512xbf16> to vector<16x512xbf16>
    %66 = vector.extract_strided_slice %65 {offsets = [0, 0], sizes = [16, 256], strides = [1, 1]} : vector<16x512xbf16> to vector<16x256xbf16>
    %c0_45 = arith.constant 0 : index
    %c12 = arith.constant 12 : index
    %c0_46 = arith.constant 0 : index
    %c0_47 = arith.constant 0 : index
    %67 = vector.load %arg5[%c0_45, %c12, %c0_46, %c0_47] : memref<1x32x16x256xbf16, #tpu.memory_space<vmem>>, vector<1x1x16x256xbf16>
    %68 = vector.shape_cast %67 : vector<1x1x16x256xbf16> to vector<16x256xbf16>
    %69 = vector.shape_cast %66 : vector<16x256xbf16> to vector<1x1x16x256xbf16>
    tpu.vector_store %arg5[%c0_45, %c12, %c0_46, %c0_47], %69 {strides = array<i32>} : memref<1x32x16x256xbf16, #tpu.memory_space<vmem>>, vector<1x1x16x256xbf16>,
    %70 = vector.extract_strided_slice %65 {offsets = [0, 256], sizes = [16, 256], strides = [1, 1]} : vector<16x512xbf16> to vector<16x256xbf16>
    %c0_48 = arith.constant 0 : index
    %c13 = arith.constant 13 : index
    %c0_49 = arith.constant 0 : index
    %c0_50 = arith.constant 0 : index
    %71 = vector.load %arg5[%c0_48, %c13, %c0_49, %c0_50] : memref<1x32x16x256xbf16, #tpu.memory_space<vmem>>, vector<1x1x16x256xbf16>
    %72 = vector.shape_cast %71 : vector<1x1x16x256xbf16> to vector<16x256xbf16>
    %73 = vector.shape_cast %70 : vector<16x256xbf16> to vector<1x1x16x256xbf16>
    tpu.vector_store %arg5[%c0_48, %c13, %c0_49, %c0_50], %73 {strides = array<i32>} : memref<1x32x16x256xbf16, #tpu.memory_space<vmem>>, vector<1x1x16x256xbf16>,
    %74 = vector.extract_strided_slice %10 {offsets = [112, 0], sizes = [16, 512], strides = [1, 1]} : vector<256x512xbf16> to vector<16x512xbf16>
    %75 = vector.extract_strided_slice %74 {offsets = [0, 0], sizes = [16, 256], strides = [1, 1]} : vector<16x512xbf16> to vector<16x256xbf16>
    %c0_51 = arith.constant 0 : index
    %c14 = arith.constant 14 : index
    %c0_52 = arith.constant 0 : index
    %c0_53 = arith.constant 0 : index
    %76 = vector.load %arg5[%c0_51, %c14, %c0_52, %c0_53] : memref<1x32x16x256xbf16, #tpu.memory_space<vmem>>, vector<1x1x16x256xbf16>
    %77 = vector.shape_cast %76 : vector<1x1x16x256xbf16> to vector<16x256xbf16>
    %78 = vector.shape_cast %75 : vector<16x256xbf16> to vector<1x1x16x256xbf16>
    tpu.vector_store %arg5[%c0_51, %c14, %c0_52, %c0_53], %78 {strides = array<i32>} : memref<1x32x16x256xbf16, #tpu.memory_space<vmem>>, vector<1x1x16x256xbf16>,
    %79 = vector.extract_strided_slice %74 {offsets = [0, 256], sizes = [16, 256], strides = [1, 1]} : vector<16x512xbf16> to vector<16x256xbf16>
    %c0_54 = arith.constant 0 : index
    %c15 = arith.constant 15 : index
    %c0_55 = arith.constant 0 : index
    %c0_56 = arith.constant 0 : index
    %80 = vector.load %arg5[%c0_54, %c15, %c0_55, %c0_56] : memref<1x32x16x256xbf16, #tpu.memory_space<vmem>>, vector<1x1x16x256xbf16>
    %81 = vector.shape_cast %80 : vector<1x1x16x256xbf16> to vector<16x256xbf16>
    %82 = vector.shape_cast %79 : vector<16x256xbf16> to vector<1x1x16x256xbf16>
    tpu.vector_store %arg5[%c0_54, %c15, %c0_55, %c0_56], %82 {strides = array<i32>} : memref<1x32x16x256xbf16, #tpu.memory_space<vmem>>, vector<1x1x16x256xbf16>,
    %83 = vector.extract_strided_slice %10 {offsets = [128, 0], sizes = [16, 512], strides = [1, 1]} : vector<256x512xbf16> to vector<16x512xbf16>
    %84 = vector.extract_strided_slice %83 {offsets = [0, 0], sizes = [16, 256], strides = [1, 1]} : vector<16x512xbf16> to vector<16x256xbf16>
    %c0_57 = arith.constant 0 : index
    %c16 = arith.constant 16 : index
    %c0_58 = arith.constant 0 : index
    %c0_59 = arith.constant 0 : index
    %85 = vector.load %arg5[%c0_57, %c16, %c0_58, %c0_59] : memref<1x32x16x256xbf16, #tpu.memory_space<vmem>>, vector<1x1x16x256xbf16>
    %86 = vector.shape_cast %85 : vector<1x1x16x256xbf16> to vector<16x256xbf16>
    %87 = vector.shape_cast %84 : vector<16x256xbf16> to vector<1x1x16x256xbf16>
    tpu.vector_store %arg5[%c0_57, %c16, %c0_58, %c0_59], %87 {strides = array<i32>} : memref<1x32x16x256xbf16, #tpu.memory_space<vmem>>, vector<1x1x16x256xbf16>,
    %88 = vector.extract_strided_slice %83 {offsets = [0, 256], sizes = [16, 256], strides = [1, 1]} : vector<16x512xbf16> to vector<16x256xbf16>
    %c0_60 = arith.constant 0 : index
    %c17 = arith.constant 17 : index
    %c0_61 = arith.constant 0 : index
    %c0_62 = arith.constant 0 : index
    %89 = vector.load %arg5[%c0_60, %c17, %c0_61, %c0_62] : memref<1x32x16x256xbf16, #tpu.memory_space<vmem>>, vector<1x1x16x256xbf16>
    %90 = vector.shape_cast %89 : vector<1x1x16x256xbf16> to vector<16x256xbf16>
    %91 = vector.shape_cast %88 : vector<16x256xbf16> to vector<1x1x16x256xbf16>
    tpu.vector_store %arg5[%c0_60, %c17, %c0_61, %c0_62], %91 {strides = array<i32>} : memref<1x32x16x256xbf16, #tpu.memory_space<vmem>>, vector<1x1x16x256xbf16>,
    %92 = vector.extract_strided_slice %10 {offsets = [144, 0], sizes = [16, 512], strides = [1, 1]} : vector<256x512xbf16> to vector<16x512xbf16>
    %93 = vector.extract_strided_slice %92 {offsets = [0, 0], sizes = [16, 256], strides = [1, 1]} : vector<16x512xbf16> to vector<16x256xbf16>
    %c0_63 = arith.constant 0 : index
    %c18 = arith.constant 18 : index
    %c0_64 = arith.constant 0 : index
    %c0_65 = arith.constant 0 : index
    %94 = vector.load %arg5[%c0_63, %c18, %c0_64, %c0_65] : memref<1x32x16x256xbf16, #tpu.memory_space<vmem>>, vector<1x1x16x256xbf16>
    %95 = vector.shape_cast %94 : vector<1x1x16x256xbf16> to vector<16x256xbf16>
    %96 = vector.shape_cast %93 : vector<16x256xbf16> to vector<1x1x16x256xbf16>
    tpu.vector_store %arg5[%c0_63, %c18, %c0_64, %c0_65], %96 {strides = array<i32>} : memref<1x32x16x256xbf16, #tpu.memory_space<vmem>>, vector<1x1x16x256xbf16>,
    %97 = vector.extract_strided_slice %92 {offsets = [0, 256], sizes = [16, 256], strides = [1, 1]} : vector<16x512xbf16> to vector<16x256xbf16>
    %c0_66 = arith.constant 0 : index
    %c19 = arith.constant 19 : index
    %c0_67 = arith.constant 0 : index
    %c0_68 = arith.constant 0 : index
    %98 = vector.load %arg5[%c0_66, %c19, %c0_67, %c0_68] : memref<1x32x16x256xbf16, #tpu.memory_space<vmem>>, vector<1x1x16x256xbf16>
    %99 = vector.shape_cast %98 : vector<1x1x16x256xbf16> to vector<16x256xbf16>
    %100 = vector.shape_cast %97 : vector<16x256xbf16> to vector<1x1x16x256xbf16>
    tpu.vector_store %arg5[%c0_66, %c19, %c0_67, %c0_68], %100 {strides = array<i32>} : memref<1x32x16x256xbf16, #tpu.memory_space<vmem>>, vector<1x1x16x256xbf16>,
    %101 = vector.extract_strided_slice %10 {offsets = [160, 0], sizes = [16, 512], strides = [1, 1]} : vector<256x512xbf16> to vector<16x512xbf16>
    %102 = vector.extract_strided_slice %101 {offsets = [0, 0], sizes = [16, 256], strides = [1, 1]} : vector<16x512xbf16> to vector<16x256xbf16>
    %c0_69 = arith.constant 0 : index
    %c20 = arith.constant 20 : index
    %c0_70 = arith.constant 0 : index
    %c0_71 = arith.constant 0 : index
    %103 = vector.load %arg5[%c0_69, %c20, %c0_70, %c0_71] : memref<1x32x16x256xbf16, #tpu.memory_space<vmem>>, vector<1x1x16x256xbf16>
    %104 = vector.shape_cast %103 : vector<1x1x16x256xbf16> to vector<16x256xbf16>
    %105 = vector.shape_cast %102 : vector<16x256xbf16> to vector<1x1x16x256xbf16>
    tpu.vector_store %arg5[%c0_69, %c20, %c0_70, %c0_71], %105 {strides = array<i32>} : memref<1x32x16x256xbf16, #tpu.memory_space<vmem>>, vector<1x1x16x256xbf16>,
    %106 = vector.extract_strided_slice %101 {offsets = [0, 256], sizes = [16, 256], strides = [1, 1]} : vector<16x512xbf16> to vector<16x256xbf16>
    %c0_72 = arith.constant 0 : index
    %c21 = arith.constant 21 : index
    %c0_73 = arith.constant 0 : index
    %c0_74 = arith.constant 0 : index
    %107 = vector.load %arg5[%c0_72, %c21, %c0_73, %c0_74] : memref<1x32x16x256xbf16, #tpu.memory_space<vmem>>, vector<1x1x16x256xbf16>
    %108 = vector.shape_cast %107 : vector<1x1x16x256xbf16> to vector<16x256xbf16>
    %109 = vector.shape_cast %106 : vector<16x256xbf16> to vector<1x1x16x256xbf16>
    tpu.vector_store %arg5[%c0_72, %c21, %c0_73, %c0_74], %109 {strides = array<i32>} : memref<1x32x16x256xbf16, #tpu.memory_space<vmem>>, vector<1x1x16x256xbf16>,
    %110 = vector.extract_strided_slice %10 {offsets = [176, 0], sizes = [16, 512], strides = [1, 1]} : vector<256x512xbf16> to vector<16x512xbf16>
    %111 = vector.extract_strided_slice %110 {offsets = [0, 0], sizes = [16, 256], strides = [1, 1]} : vector<16x512xbf16> to vector<16x256xbf16>
    %c0_75 = arith.constant 0 : index
    %c22 = arith.constant 22 : index
    %c0_76 = arith.constant 0 : index
    %c0_77 = arith.constant 0 : index
    %112 = vector.load %arg5[%c0_75, %c22, %c0_76, %c0_77] : memref<1x32x16x256xbf16, #tpu.memory_space<vmem>>, vector<1x1x16x256xbf16>
    %113 = vector.shape_cast %112 : vector<1x1x16x256xbf16> to vector<16x256xbf16>
    %114 = vector.shape_cast %111 : vector<16x256xbf16> to vector<1x1x16x256xbf16>
    tpu.vector_store %arg5[%c0_75, %c22, %c0_76, %c0_77], %114 {strides = array<i32>} : memref<1x32x16x256xbf16, #tpu.memory_space<vmem>>, vector<1x1x16x256xbf16>,
    %115 = vector.extract_strided_slice %110 {offsets = [0, 256], sizes = [16, 256], strides = [1, 1]} : vector<16x512xbf16> to vector<16x256xbf16>
    %c0_78 = arith.constant 0 : index
    %c23 = arith.constant 23 : index
    %c0_79 = arith.constant 0 : index
    %c0_80 = arith.constant 0 : index
    %116 = vector.load %arg5[%c0_78, %c23, %c0_79, %c0_80] : memref<1x32x16x256xbf16, #tpu.memory_space<vmem>>, vector<1x1x16x256xbf16>
    %117 = vector.shape_cast %116 : vector<1x1x16x256xbf16> to vector<16x256xbf16>
    %118 = vector.shape_cast %115 : vector<16x256xbf16> to vector<1x1x16x256xbf16>
    tpu.vector_store %arg5[%c0_78, %c23, %c0_79, %c0_80], %118 {strides = array<i32>} : memref<1x32x16x256xbf16, #tpu.memory_space<vmem>>, vector<1x1x16x256xbf16>,
    %119 = vector.extract_strided_slice %10 {offsets = [192, 0], sizes = [16, 512], strides = [1, 1]} : vector<256x512xbf16> to vector<16x512xbf16>
    %120 = vector.extract_strided_slice %119 {offsets = [0, 0], sizes = [16, 256], strides = [1, 1]} : vector<16x512xbf16> to vector<16x256xbf16>
    %c0_81 = arith.constant 0 : index
    %c24 = arith.constant 24 : index
    %c0_82 = arith.constant 0 : index
    %c0_83 = arith.constant 0 : index
    %121 = vector.load %arg5[%c0_81, %c24, %c0_82, %c0_83] : memref<1x32x16x256xbf16, #tpu.memory_space<vmem>>, vector<1x1x16x256xbf16>
    %122 = vector.shape_cast %121 : vector<1x1x16x256xbf16> to vector<16x256xbf16>
    %123 = vector.shape_cast %120 : vector<16x256xbf16> to vector<1x1x16x256xbf16>
    tpu.vector_store %arg5[%c0_81, %c24, %c0_82, %c0_83], %123 {strides = array<i32>} : memref<1x32x16x256xbf16, #tpu.memory_space<vmem>>, vector<1x1x16x256xbf16>,
    %124 = vector.extract_strided_slice %119 {offsets = [0, 256], sizes = [16, 256], strides = [1, 1]} : vector<16x512xbf16> to vector<16x256xbf16>
    %c0_84 = arith.constant 0 : index
    %c25 = arith.constant 25 : index
    %c0_85 = arith.constant 0 : index
    %c0_86 = arith.constant 0 : index
    %125 = vector.load %arg5[%c0_84, %c25, %c0_85, %c0_86] : memref<1x32x16x256xbf16, #tpu.memory_space<vmem>>, vector<1x1x16x256xbf16>
    %126 = vector.shape_cast %125 : vector<1x1x16x256xbf16> to vector<16x256xbf16>
    %127 = vector.shape_cast %124 : vector<16x256xbf16> to vector<1x1x16x256xbf16>
    tpu.vector_store %arg5[%c0_84, %c25, %c0_85, %c0_86], %127 {strides = array<i32>} : memref<1x32x16x256xbf16, #tpu.memory_space<vmem>>, vector<1x1x16x256xbf16>,
    %128 = vector.extract_strided_slice %10 {offsets = [208, 0], sizes = [16, 512], strides = [1, 1]} : vector<256x512xbf16> to vector<16x512xbf16>
    %129 = vector.extract_strided_slice %128 {offsets = [0, 0], sizes = [16, 256], strides = [1, 1]} : vector<16x512xbf16> to vector<16x256xbf16>
    %c0_87 = arith.constant 0 : index
    %c26 = arith.constant 26 : index
    %c0_88 = arith.constant 0 : index
    %c0_89 = arith.constant 0 : index
    %130 = vector.load %arg5[%c0_87, %c26, %c0_88, %c0_89] : memref<1x32x16x256xbf16, #tpu.memory_space<vmem>>, vector<1x1x16x256xbf16>
    %131 = vector.shape_cast %130 : vector<1x1x16x256xbf16> to vector<16x256xbf16>
    %132 = vector.shape_cast %129 : vector<16x256xbf16> to vector<1x1x16x256xbf16>
    tpu.vector_store %arg5[%c0_87, %c26, %c0_88, %c0_89], %132 {strides = array<i32>} : memref<1x32x16x256xbf16, #tpu.memory_space<vmem>>, vector<1x1x16x256xbf16>,
    %133 = vector.extract_strided_slice %128 {offsets = [0, 256], sizes = [16, 256], strides = [1, 1]} : vector<16x512xbf16> to vector<16x256xbf16>
    %c0_90 = arith.constant 0 : index
    %c27 = arith.constant 27 : index
    %c0_91 = arith.constant 0 : index
    %c0_92 = arith.constant 0 : index
    %134 = vector.load %arg5[%c0_90, %c27, %c0_91, %c0_92] : memref<1x32x16x256xbf16, #tpu.memory_space<vmem>>, vector<1x1x16x256xbf16>
    %135 = vector.shape_cast %134 : vector<1x1x16x256xbf16> to vector<16x256xbf16>
    %136 = vector.shape_cast %133 : vector<16x256xbf16> to vector<1x1x16x256xbf16>
    tpu.vector_store %arg5[%c0_90, %c27, %c0_91, %c0_92], %136 {strides = array<i32>} : memref<1x32x16x256xbf16, #tpu.memory_space<vmem>>, vector<1x1x16x256xbf16>,
    %137 = vector.extract_strided_slice %10 {offsets = [224, 0], sizes = [16, 512], strides = [1, 1]} : vector<256x512xbf16> to vector<16x512xbf16>
    %138 = vector.extract_strided_slice %137 {offsets = [0, 0], sizes = [16, 256], strides = [1, 1]} : vector<16x512xbf16> to vector<16x256xbf16>
    %c0_93 = arith.constant 0 : index
    %c28 = arith.constant 28 : index
    %c0_94 = arith.constant 0 : index
    %c0_95 = arith.constant 0 : index
    %139 = vector.load %arg5[%c0_93, %c28, %c0_94, %c0_95] : memref<1x32x16x256xbf16, #tpu.memory_space<vmem>>, vector<1x1x16x256xbf16>
    %140 = vector.shape_cast %139 : vector<1x1x16x256xbf16> to vector<16x256xbf16>
    %141 = vector.shape_cast %138 : vector<16x256xbf16> to vector<1x1x16x256xbf16>
    tpu.vector_store %arg5[%c0_93, %c28, %c0_94, %c0_95], %141 {strides = array<i32>} : memref<1x32x16x256xbf16, #tpu.memory_space<vmem>>, vector<1x1x16x256xbf16>,
    %142 = vector.extract_strided_slice %137 {offsets = [0, 256], sizes = [16, 256], strides = [1, 1]} : vector<16x512xbf16> to vector<16x256xbf16>
    %c0_96 = arith.constant 0 : index
    %c29 = arith.constant 29 : index
    %c0_97 = arith.constant 0 : index
    %c0_98 = arith.constant 0 : index
    %143 = vector.load %arg5[%c0_96, %c29, %c0_97, %c0_98] : memref<1x32x16x256xbf16, #tpu.memory_space<vmem>>, vector<1x1x16x256xbf16>
    %144 = vector.shape_cast %143 : vector<1x1x16x256xbf16> to vector<16x256xbf16>
    %145 = vector.shape_cast %142 : vector<16x256xbf16> to vector<1x1x16x256xbf16>
    tpu.vector_store %arg5[%c0_96, %c29, %c0_97, %c0_98], %145 {strides = array<i32>} : memref<1x32x16x256xbf16, #tpu.memory_space<vmem>>, vector<1x1x16x256xbf16>,
    %146 = vector.extract_strided_slice %10 {offsets = [240, 0], sizes = [16, 512], strides = [1, 1]} : vector<256x512xbf16> to vector<16x512xbf16>
    %147 = vector.extract_strided_slice %146 {offsets = [0, 0], sizes = [16, 256], strides = [1, 1]} : vector<16x512xbf16> to vector<16x256xbf16>
    %c0_99 = arith.constant 0 : index
    %c30 = arith.constant 30 : index
    %c0_100 = arith.constant 0 : index
    %c0_101 = arith.constant 0 : index
    %148 = vector.load %arg5[%c0_99, %c30, %c0_100, %c0_101] : memref<1x32x16x256xbf16, #tpu.memory_space<vmem>>, vector<1x1x16x256xbf16>
    %149 = vector.shape_cast %148 : vector<1x1x16x256xbf16> to vector<16x256xbf16>
    %150 = vector.shape_cast %147 : vector<16x256xbf16> to vector<1x1x16x256xbf16>
    tpu.vector_store %arg5[%c0_99, %c30, %c0_100, %c0_101], %150 {strides = array<i32>} : memref<1x32x16x256xbf16, #tpu.memory_space<vmem>>, vector<1x1x16x256xbf16>,
    %151 = vector.extract_strided_slice %146 {offsets = [0, 256], sizes = [16, 256], strides = [1, 1]} : vector<16x512xbf16> to vector<16x256xbf16>
    %c0_102 = arith.constant 0 : index
    %c31 = arith.constant 31 : index
    %c0_103 = arith.constant 0 : index
    %c0_104 = arith.constant 0 : index
    %152 = vector.load %arg5[%c0_102, %c31, %c0_103, %c0_104] : memref<1x32x16x256xbf16, #tpu.memory_space<vmem>>, vector<1x1x16x256xbf16>
    %153 = vector.shape_cast %152 : vector<1x1x16x256xbf16> to vector<16x256xbf16>
    %154 = vector.shape_cast %151 : vector<16x256xbf16> to vector<1x1x16x256xbf16>
    tpu.vector_store %arg5[%c0_102, %c31, %c0_103, %c0_104], %154 {strides = array<i32>} : memref<1x32x16x256xbf16, #tpu.memory_space<vmem>>, vector<1x1x16x256xbf16>,
    return
  }
  func.func @transform_0(%arg0: i32, %arg1: i32) -> (i32, i32, i32, i32) {
    %c0_i32 = arith.constant 0 : i32
    %c0_i32_0 = arith.constant 0 : i32
    %c0_i32_1 = arith.constant 0 : i32
    return %arg0, %arg1, %c0_i32, %c0_i32_0 : i32, i32, i32, i32
  }
  func.func @transform_1(%arg0: i32, %arg1: i32) -> (i32, i32) {
    %c0_i32 = arith.constant 0 : i32
    %c0_i32_0 = arith.constant 0 : i32
    %c0_i32_1 = arith.constant 0 : i32
    return %c0_i32, %c0_i32_0 : i32, i32
  }
  func.func @transform_2(%arg0: i32, %arg1: i32) -> (i32, i32) {
    %c0_i32 = arith.constant 0 : i32
    %c0_i32_0 = arith.constant 0 : i32
    %c0_i32_1 = arith.constant 0 : i32
    return %c0_i32, %c0_i32_0 : i32, i32
  }
  func.func @transform_3(%arg0: i32, %arg1: i32) -> (i32, i32, i32, i32) {
    %c0_i32 = arith.constant 0 : i32
    %c0_i32_0 = arith.constant 0 : i32
    %c0_i32_1 = arith.constant 0 : i32
    return %arg0, %arg1, %c0_i32, %c0_i32_0 : i32, i32, i32, i32
  }
}

module attributes {stable_mosaic.version = 11 : i64} {
  func.func @_conv3x3_relu_bn_kernel(%arg0: i32, %arg1: i32, %arg2: memref<1x1x32x128xbf16, #tpu.memory_space<vmem>>, %arg3: memref<1x16x32x128xbf16, #tpu.memory_space<vmem>>, %arg4: memref<1x1x32x128xbf16, #tpu.memory_space<vmem>>, %arg5: memref<3x3x128x128xbf16, #tpu.memory_space<vmem>>, %arg6: memref<1x128xf32, #tpu.memory_space<vmem>>, %arg7: memref<1x128xf32, #tpu.memory_space<vmem>>, %arg8: memref<1x16x32x128xbf16, #tpu.memory_space<vmem>>, %arg9: memref<18x48x128xf32, #tpu.memory_space<vmem>>, %arg10: memref<512x128xf32, #tpu.memory_space<vmem>>) attributes {dimension_semantics = [#tpu.dimension_semantics<parallel>, #tpu.dimension_semantics<parallel>], iteration_bounds = array<i64: 2, 2>, scalar_prefetch = 0 : i64, scratch_operands = 2 : i64, tpu.core_type = #tpu.core_type<tc>, window_params = [{transform_indices = @transform_0, window_bounds = array<i64: 1, 1, 32, 128>}, {transform_indices = @transform_1, window_bounds = array<i64: 1, 16, 32, 128>}, {transform_indices = @transform_2, window_bounds = array<i64: 1, 1, 32, 128>}, {pipeline_mode = #tpu.pipeline_mode<synchronous>, transform_indices = @transform_3, window_bounds = array<i64: 3, 3, 128, 128>}, {pipeline_mode = #tpu.pipeline_mode<synchronous>, transform_indices = @transform_4, window_bounds = array<i64: 1, 128>}, {pipeline_mode = #tpu.pipeline_mode<synchronous>, transform_indices = @transform_5, window_bounds = array<i64: 1, 128>}, {transform_indices = @transform_6, window_bounds = array<i64: 1, 16, 32, 128>}]} {
    %c0 = arith.constant 0 : index
    %c0_0 = arith.constant 0 : index
    %c0_1 = arith.constant 0 : index
    %c0_2 = arith.constant 0 : index
    %0 = vector.load %arg3[%c0, %c0_0, %c0_1, %c0_2] : memref<1x16x32x128xbf16, #tpu.memory_space<vmem>>, vector<1x16x32x128xbf16>
    %1 = vector.shape_cast %0 : vector<1x16x32x128xbf16> to vector<16x32x128xbf16>
    %2 = arith.extf %1 : vector<16x32x128xbf16> to vector<16x32x128xf32>
    %c0_i32 = arith.constant 0 : i32
    %3 = arith.cmpi sgt, %arg1, %c0_i32 : i32
    %c0_3 = arith.constant 0 : index
    %c0_4 = arith.constant 0 : index
    %c0_5 = arith.constant 0 : index
    %c0_6 = arith.constant 0 : index
    %4 = vector.load %arg2[%c0_3, %c0_4, %c0_5, %c0_6] : memref<1x1x32x128xbf16, #tpu.memory_space<vmem>>, vector<1x1x32x128xbf16>
    %5 = vector.shape_cast %4 : vector<1x1x32x128xbf16> to vector<1x32x128xbf16>
    %6 = arith.extf %5 : vector<1x32x128xbf16> to vector<1x32x128xf32>
    %cst = arith.constant 0.000000e+00 : f32
    %7 = vector.broadcast %cst : f32 to vector<1x32x128xf32>
    %8 = arith.select %3, %6, %7 : vector<1x32x128xf32>
    %c1_i32 = arith.constant 1 : i32
    %9 = arith.cmpi slt, %arg1, %c1_i32 : i32
    %c0_7 = arith.constant 0 : index
    %c0_8 = arith.constant 0 : index
    %c0_9 = arith.constant 0 : index
    %c0_10 = arith.constant 0 : index
    %10 = vector.load %arg4[%c0_7, %c0_8, %c0_9, %c0_10] : memref<1x1x32x128xbf16, #tpu.memory_space<vmem>>, vector<1x1x32x128xbf16>
    %11 = vector.shape_cast %10 : vector<1x1x32x128xbf16> to vector<1x32x128xbf16>
    %12 = arith.extf %11 : vector<1x32x128xbf16> to vector<1x32x128xf32>
    %cst_11 = arith.constant 0.000000e+00 : f32
    %13 = vector.broadcast %cst_11 : f32 to vector<1x32x128xf32>
    %14 = arith.select %9, %12, %13 : vector<1x32x128xf32>
    %cst_12 = arith.constant 0.000000e+00 : f32
    %15 = vector.broadcast %cst_12 : f32 to vector<18x8x128xf32>
    %c0_13 = arith.constant 0 : index
    %c0_14 = arith.constant 0 : index
    %c0_15 = arith.constant 0 : index
    %16 = vector.load %arg9[%c0_13, %c0_14, %c0_15] : memref<18x48x128xf32, #tpu.memory_space<vmem>>, vector<18x8x128xf32>
    tpu.vector_store %arg9[%c0_13, %c0_14, %c0_15], %15 {strides = array<i32>} : memref<18x48x128xf32, #tpu.memory_space<vmem>>, vector<18x8x128xf32>,
    %c0_16 = arith.constant 0 : index
    %c40 = arith.constant 40 : index
    %c0_17 = arith.constant 0 : index
    %17 = vector.load %arg9[%c0_16, %c40, %c0_17] : memref<18x48x128xf32, #tpu.memory_space<vmem>>, vector<18x8x128xf32>
    tpu.vector_store %arg9[%c0_16, %c40, %c0_17], %15 {strides = array<i32>} : memref<18x48x128xf32, #tpu.memory_space<vmem>>, vector<18x8x128xf32>,
    %c0_18 = arith.constant 0 : index
    %c8 = arith.constant 8 : index
    %c0_19 = arith.constant 0 : index
    %18 = vector.load %arg9[%c0_18, %c8, %c0_19] : memref<18x48x128xf32, #tpu.memory_space<vmem>>, vector<1x32x128xf32>
    tpu.vector_store %arg9[%c0_18, %c8, %c0_19], %8 {strides = array<i32>} : memref<18x48x128xf32, #tpu.memory_space<vmem>>, vector<1x32x128xf32>,
    %c1 = arith.constant 1 : index
    %c8_20 = arith.constant 8 : index
    %c0_21 = arith.constant 0 : index
    %19 = vector.load %arg9[%c1, %c8_20, %c0_21] : memref<18x48x128xf32, #tpu.memory_space<vmem>>, vector<16x32x128xf32>
    tpu.vector_store %arg9[%c1, %c8_20, %c0_21], %2 {strides = array<i32>} : memref<18x48x128xf32, #tpu.memory_space<vmem>>, vector<16x32x128xf32>,
    %c17 = arith.constant 17 : index
    %c8_22 = arith.constant 8 : index
    %c0_23 = arith.constant 0 : index
    %20 = vector.load %arg9[%c17, %c8_22, %c0_23] : memref<18x48x128xf32, #tpu.memory_space<vmem>>, vector<1x32x128xf32>
    tpu.vector_store %arg9[%c17, %c8_22, %c0_23], %14 {strides = array<i32>} : memref<18x48x128xf32, #tpu.memory_space<vmem>>, vector<1x32x128xf32>,
    %c0_24 = arith.constant 0 : index
    %c7 = arith.constant 7 : index
    %c0_25 = arith.constant 0 : index
    %21 = vector.load %arg9[%c0_24, %c7, %c0_25] : memref<18x48x128xf32, #tpu.memory_space<vmem>>, vector<18x32x128xf32>
    %22 = arith.truncf %21 : vector<18x32x128xf32> to vector<18x32x128xbf16>
    %c0_26 = arith.constant 0 : index
    %c8_27 = arith.constant 8 : index
    %c0_28 = arith.constant 0 : index
    %23 = vector.load %arg9[%c0_26, %c8_27, %c0_28] : memref<18x48x128xf32, #tpu.memory_space<vmem>>, vector<18x32x128xf32>
    %24 = arith.truncf %23 : vector<18x32x128xf32> to vector<18x32x128xbf16>
    %c0_29 = arith.constant 0 : index
    %c9 = arith.constant 9 : index
    %c0_30 = arith.constant 0 : index
    %25 = vector.load %arg9[%c0_29, %c9, %c0_30] : memref<18x48x128xf32, #tpu.memory_space<vmem>>, vector<18x32x128xf32>
    %26 = arith.truncf %25 : vector<18x32x128xf32> to vector<18x32x128xbf16>
    %27 = vector.extract_strided_slice %22 {offsets = [0, 0, 0], sizes = [16, 32, 128], strides = [1, 1, 1]} : vector<18x32x128xbf16> to vector<16x32x128xbf16>
    %28 = vector.shape_cast %27 : vector<16x32x128xbf16> to vector<512x128xbf16>
    %c0_31 = arith.constant 0 : index
    %c0_32 = arith.constant 0 : index
    %c0_33 = arith.constant 0 : index
    %c0_34 = arith.constant 0 : index
    %29 = vector.load %arg5[%c0_31, %c0_32, %c0_33, %c0_34] : memref<3x3x128x128xbf16, #tpu.memory_space<vmem>>, vector<1x1x128x128xbf16>
    %30 = vector.shape_cast %29 : vector<1x1x128x128xbf16> to vector<128x128xbf16>
    %cst_35 = arith.constant dense<0.000000e+00> : vector<512x128xf32>
    %31 = tpu.matmul %28, %30, %cst_35 {dimension_numbers = #tpu.dot_dimension_numbers<[1], [0], [0], [1], [0, 0, 1, 1], [], []>} : vector<512x128xbf16>, vector<128x128xbf16>, vector<512x128xf32> -> vector<512x128xf32>
    %c0_36 = arith.constant 0 : index
    %c0_37 = arith.constant 0 : index
    %32 = vector.load %arg10[%c0_36, %c0_37] : memref<512x128xf32, #tpu.memory_space<vmem>>, vector<512x128xf32>
    tpu.vector_store %arg10[%c0_36, %c0_37], %31 {strides = array<i32>} : memref<512x128xf32, #tpu.memory_space<vmem>>, vector<512x128xf32>,
    %33 = vector.extract_strided_slice %24 {offsets = [0, 0, 0], sizes = [16, 32, 128], strides = [1, 1, 1]} : vector<18x32x128xbf16> to vector<16x32x128xbf16>
    %34 = vector.shape_cast %33 : vector<16x32x128xbf16> to vector<512x128xbf16>
    %c0_38 = arith.constant 0 : index
    %c1_39 = arith.constant 1 : index
    %c0_40 = arith.constant 0 : index
    %c0_41 = arith.constant 0 : index
    %35 = vector.load %arg5[%c0_38, %c1_39, %c0_40, %c0_41] : memref<3x3x128x128xbf16, #tpu.memory_space<vmem>>, vector<1x1x128x128xbf16>
    %36 = vector.shape_cast %35 : vector<1x1x128x128xbf16> to vector<128x128xbf16>
    %cst_42 = arith.constant dense<0.000000e+00> : vector<512x128xf32>
    %37 = tpu.matmul %34, %36, %cst_42 {dimension_numbers = #tpu.dot_dimension_numbers<[1], [0], [0], [1], [0, 0, 1, 1], [], []>} : vector<512x128xbf16>, vector<128x128xbf16>, vector<512x128xf32> -> vector<512x128xf32>
    %c0_43 = arith.constant 0 : index
    %c0_44 = arith.constant 0 : index
    %38 = vector.load %arg10[%c0_43, %c0_44] : memref<512x128xf32, #tpu.memory_space<vmem>>, vector<512x128xf32>
    %39 = arith.addf %38, %37 : vector<512x128xf32>
    %c0_45 = arith.constant 0 : index
    %c0_46 = arith.constant 0 : index
    %40 = vector.load %arg10[%c0_45, %c0_46] : memref<512x128xf32, #tpu.memory_space<vmem>>, vector<512x128xf32>
    tpu.vector_store %arg10[%c0_45, %c0_46], %39 {strides = array<i32>} : memref<512x128xf32, #tpu.memory_space<vmem>>, vector<512x128xf32>,
    %41 = vector.extract_strided_slice %26 {offsets = [0, 0, 0], sizes = [16, 32, 128], strides = [1, 1, 1]} : vector<18x32x128xbf16> to vector<16x32x128xbf16>
    %42 = vector.shape_cast %41 : vector<16x32x128xbf16> to vector<512x128xbf16>
    %c0_47 = arith.constant 0 : index
    %c2 = arith.constant 2 : index
    %c0_48 = arith.constant 0 : index
    %c0_49 = arith.constant 0 : index
    %43 = vector.load %arg5[%c0_47, %c2, %c0_48, %c0_49] : memref<3x3x128x128xbf16, #tpu.memory_space<vmem>>, vector<1x1x128x128xbf16>
    %44 = vector.shape_cast %43 : vector<1x1x128x128xbf16> to vector<128x128xbf16>
    %cst_50 = arith.constant dense<0.000000e+00> : vector<512x128xf32>
    %45 = tpu.matmul %42, %44, %cst_50 {dimension_numbers = #tpu.dot_dimension_numbers<[1], [0], [0], [1], [0, 0, 1, 1], [], []>} : vector<512x128xbf16>, vector<128x128xbf16>, vector<512x128xf32> -> vector<512x128xf32>
    %c0_51 = arith.constant 0 : index
    %c0_52 = arith.constant 0 : index
    %46 = vector.load %arg10[%c0_51, %c0_52] : memref<512x128xf32, #tpu.memory_space<vmem>>, vector<512x128xf32>
    %47 = arith.addf %46, %45 : vector<512x128xf32>
    %c0_53 = arith.constant 0 : index
    %c0_54 = arith.constant 0 : index
    %48 = vector.load %arg10[%c0_53, %c0_54] : memref<512x128xf32, #tpu.memory_space<vmem>>, vector<512x128xf32>
    tpu.vector_store %arg10[%c0_53, %c0_54], %47 {strides = array<i32>} : memref<512x128xf32, #tpu.memory_space<vmem>>, vector<512x128xf32>,
    %49 = vector.extract_strided_slice %22 {offsets = [1, 0, 0], sizes = [16, 32, 128], strides = [1, 1, 1]} : vector<18x32x128xbf16> to vector<16x32x128xbf16>
    %50 = vector.shape_cast %49 : vector<16x32x128xbf16> to vector<512x128xbf16>
    %c1_55 = arith.constant 1 : index
    %c0_56 = arith.constant 0 : index
    %c0_57 = arith.constant 0 : index
    %c0_58 = arith.constant 0 : index
    %51 = vector.load %arg5[%c1_55, %c0_56, %c0_57, %c0_58] : memref<3x3x128x128xbf16, #tpu.memory_space<vmem>>, vector<1x1x128x128xbf16>
    %52 = vector.shape_cast %51 : vector<1x1x128x128xbf16> to vector<128x128xbf16>
    %cst_59 = arith.constant dense<0.000000e+00> : vector<512x128xf32>
    %53 = tpu.matmul %50, %52, %cst_59 {dimension_numbers = #tpu.dot_dimension_numbers<[1], [0], [0], [1], [0, 0, 1, 1], [], []>} : vector<512x128xbf16>, vector<128x128xbf16>, vector<512x128xf32> -> vector<512x128xf32>
    %c0_60 = arith.constant 0 : index
    %c0_61 = arith.constant 0 : index
    %54 = vector.load %arg10[%c0_60, %c0_61] : memref<512x128xf32, #tpu.memory_space<vmem>>, vector<512x128xf32>
    %55 = arith.addf %54, %53 : vector<512x128xf32>
    %c0_62 = arith.constant 0 : index
    %c0_63 = arith.constant 0 : index
    %56 = vector.load %arg10[%c0_62, %c0_63] : memref<512x128xf32, #tpu.memory_space<vmem>>, vector<512x128xf32>
    tpu.vector_store %arg10[%c0_62, %c0_63], %55 {strides = array<i32>} : memref<512x128xf32, #tpu.memory_space<vmem>>, vector<512x128xf32>,
    %57 = vector.extract_strided_slice %24 {offsets = [1, 0, 0], sizes = [16, 32, 128], strides = [1, 1, 1]} : vector<18x32x128xbf16> to vector<16x32x128xbf16>
    %58 = vector.shape_cast %57 : vector<16x32x128xbf16> to vector<512x128xbf16>
    %c1_64 = arith.constant 1 : index
    %c1_65 = arith.constant 1 : index
    %c0_66 = arith.constant 0 : index
    %c0_67 = arith.constant 0 : index
    %59 = vector.load %arg5[%c1_64, %c1_65, %c0_66, %c0_67] : memref<3x3x128x128xbf16, #tpu.memory_space<vmem>>, vector<1x1x128x128xbf16>
    %60 = vector.shape_cast %59 : vector<1x1x128x128xbf16> to vector<128x128xbf16>
    %cst_68 = arith.constant dense<0.000000e+00> : vector<512x128xf32>
    %61 = tpu.matmul %58, %60, %cst_68 {dimension_numbers = #tpu.dot_dimension_numbers<[1], [0], [0], [1], [0, 0, 1, 1], [], []>} : vector<512x128xbf16>, vector<128x128xbf16>, vector<512x128xf32> -> vector<512x128xf32>
    %c0_69 = arith.constant 0 : index
    %c0_70 = arith.constant 0 : index
    %62 = vector.load %arg10[%c0_69, %c0_70] : memref<512x128xf32, #tpu.memory_space<vmem>>, vector<512x128xf32>
    %63 = arith.addf %62, %61 : vector<512x128xf32>
    %c0_71 = arith.constant 0 : index
    %c0_72 = arith.constant 0 : index
    %64 = vector.load %arg10[%c0_71, %c0_72] : memref<512x128xf32, #tpu.memory_space<vmem>>, vector<512x128xf32>
    tpu.vector_store %arg10[%c0_71, %c0_72], %63 {strides = array<i32>} : memref<512x128xf32, #tpu.memory_space<vmem>>, vector<512x128xf32>,
    %65 = vector.extract_strided_slice %26 {offsets = [1, 0, 0], sizes = [16, 32, 128], strides = [1, 1, 1]} : vector<18x32x128xbf16> to vector<16x32x128xbf16>
    %66 = vector.shape_cast %65 : vector<16x32x128xbf16> to vector<512x128xbf16>
    %c1_73 = arith.constant 1 : index
    %c2_74 = arith.constant 2 : index
    %c0_75 = arith.constant 0 : index
    %c0_76 = arith.constant 0 : index
    %67 = vector.load %arg5[%c1_73, %c2_74, %c0_75, %c0_76] : memref<3x3x128x128xbf16, #tpu.memory_space<vmem>>, vector<1x1x128x128xbf16>
    %68 = vector.shape_cast %67 : vector<1x1x128x128xbf16> to vector<128x128xbf16>
    %cst_77 = arith.constant dense<0.000000e+00> : vector<512x128xf32>
    %69 = tpu.matmul %66, %68, %cst_77 {dimension_numbers = #tpu.dot_dimension_numbers<[1], [0], [0], [1], [0, 0, 1, 1], [], []>} : vector<512x128xbf16>, vector<128x128xbf16>, vector<512x128xf32> -> vector<512x128xf32>
    %c0_78 = arith.constant 0 : index
    %c0_79 = arith.constant 0 : index
    %70 = vector.load %arg10[%c0_78, %c0_79] : memref<512x128xf32, #tpu.memory_space<vmem>>, vector<512x128xf32>
    %71 = arith.addf %70, %69 : vector<512x128xf32>
    %c0_80 = arith.constant 0 : index
    %c0_81 = arith.constant 0 : index
    %72 = vector.load %arg10[%c0_80, %c0_81] : memref<512x128xf32, #tpu.memory_space<vmem>>, vector<512x128xf32>
    tpu.vector_store %arg10[%c0_80, %c0_81], %71 {strides = array<i32>} : memref<512x128xf32, #tpu.memory_space<vmem>>, vector<512x128xf32>,
    %73 = vector.extract_strided_slice %22 {offsets = [2, 0, 0], sizes = [16, 32, 128], strides = [1, 1, 1]} : vector<18x32x128xbf16> to vector<16x32x128xbf16>
    %74 = vector.shape_cast %73 : vector<16x32x128xbf16> to vector<512x128xbf16>
    %c2_82 = arith.constant 2 : index
    %c0_83 = arith.constant 0 : index
    %c0_84 = arith.constant 0 : index
    %c0_85 = arith.constant 0 : index
    %75 = vector.load %arg5[%c2_82, %c0_83, %c0_84, %c0_85] : memref<3x3x128x128xbf16, #tpu.memory_space<vmem>>, vector<1x1x128x128xbf16>
    %76 = vector.shape_cast %75 : vector<1x1x128x128xbf16> to vector<128x128xbf16>
    %cst_86 = arith.constant dense<0.000000e+00> : vector<512x128xf32>
    %77 = tpu.matmul %74, %76, %cst_86 {dimension_numbers = #tpu.dot_dimension_numbers<[1], [0], [0], [1], [0, 0, 1, 1], [], []>} : vector<512x128xbf16>, vector<128x128xbf16>, vector<512x128xf32> -> vector<512x128xf32>
    %c0_87 = arith.constant 0 : index
    %c0_88 = arith.constant 0 : index
    %78 = vector.load %arg10[%c0_87, %c0_88] : memref<512x128xf32, #tpu.memory_space<vmem>>, vector<512x128xf32>
    %79 = arith.addf %78, %77 : vector<512x128xf32>
    %c0_89 = arith.constant 0 : index
    %c0_90 = arith.constant 0 : index
    %80 = vector.load %arg10[%c0_89, %c0_90] : memref<512x128xf32, #tpu.memory_space<vmem>>, vector<512x128xf32>
    tpu.vector_store %arg10[%c0_89, %c0_90], %79 {strides = array<i32>} : memref<512x128xf32, #tpu.memory_space<vmem>>, vector<512x128xf32>,
    %81 = vector.extract_strided_slice %24 {offsets = [2, 0, 0], sizes = [16, 32, 128], strides = [1, 1, 1]} : vector<18x32x128xbf16> to vector<16x32x128xbf16>
    %82 = vector.shape_cast %81 : vector<16x32x128xbf16> to vector<512x128xbf16>
    %c2_91 = arith.constant 2 : index
    %c1_92 = arith.constant 1 : index
    %c0_93 = arith.constant 0 : index
    %c0_94 = arith.constant 0 : index
    %83 = vector.load %arg5[%c2_91, %c1_92, %c0_93, %c0_94] : memref<3x3x128x128xbf16, #tpu.memory_space<vmem>>, vector<1x1x128x128xbf16>
    %84 = vector.shape_cast %83 : vector<1x1x128x128xbf16> to vector<128x128xbf16>
    %cst_95 = arith.constant dense<0.000000e+00> : vector<512x128xf32>
    %85 = tpu.matmul %82, %84, %cst_95 {dimension_numbers = #tpu.dot_dimension_numbers<[1], [0], [0], [1], [0, 0, 1, 1], [], []>} : vector<512x128xbf16>, vector<128x128xbf16>, vector<512x128xf32> -> vector<512x128xf32>
    %c0_96 = arith.constant 0 : index
    %c0_97 = arith.constant 0 : index
    %86 = vector.load %arg10[%c0_96, %c0_97] : memref<512x128xf32, #tpu.memory_space<vmem>>, vector<512x128xf32>
    %87 = arith.addf %86, %85 : vector<512x128xf32>
    %c0_98 = arith.constant 0 : index
    %c0_99 = arith.constant 0 : index
    %88 = vector.load %arg10[%c0_98, %c0_99] : memref<512x128xf32, #tpu.memory_space<vmem>>, vector<512x128xf32>
    tpu.vector_store %arg10[%c0_98, %c0_99], %87 {strides = array<i32>} : memref<512x128xf32, #tpu.memory_space<vmem>>, vector<512x128xf32>,
    %89 = vector.extract_strided_slice %26 {offsets = [2, 0, 0], sizes = [16, 32, 128], strides = [1, 1, 1]} : vector<18x32x128xbf16> to vector<16x32x128xbf16>
    %90 = vector.shape_cast %89 : vector<16x32x128xbf16> to vector<512x128xbf16>
    %c2_100 = arith.constant 2 : index
    %c2_101 = arith.constant 2 : index
    %c0_102 = arith.constant 0 : index
    %c0_103 = arith.constant 0 : index
    %91 = vector.load %arg5[%c2_100, %c2_101, %c0_102, %c0_103] : memref<3x3x128x128xbf16, #tpu.memory_space<vmem>>, vector<1x1x128x128xbf16>
    %92 = vector.shape_cast %91 : vector<1x1x128x128xbf16> to vector<128x128xbf16>
    %cst_104 = arith.constant dense<0.000000e+00> : vector<512x128xf32>
    %93 = tpu.matmul %90, %92, %cst_104 {dimension_numbers = #tpu.dot_dimension_numbers<[1], [0], [0], [1], [0, 0, 1, 1], [], []>} : vector<512x128xbf16>, vector<128x128xbf16>, vector<512x128xf32> -> vector<512x128xf32>
    %c0_105 = arith.constant 0 : index
    %c0_106 = arith.constant 0 : index
    %94 = vector.load %arg10[%c0_105, %c0_106] : memref<512x128xf32, #tpu.memory_space<vmem>>, vector<512x128xf32>
    %95 = arith.addf %94, %93 : vector<512x128xf32>
    %c0_107 = arith.constant 0 : index
    %c0_108 = arith.constant 0 : index
    %96 = vector.load %arg10[%c0_107, %c0_108] : memref<512x128xf32, #tpu.memory_space<vmem>>, vector<512x128xf32>
    tpu.vector_store %arg10[%c0_107, %c0_108], %95 {strides = array<i32>} : memref<512x128xf32, #tpu.memory_space<vmem>>, vector<512x128xf32>,
    %c0_109 = arith.constant 0 : index
    %c0_110 = arith.constant 0 : index
    %97 = vector.load %arg10[%c0_109, %c0_110] : memref<512x128xf32, #tpu.memory_space<vmem>>, vector<512x128xf32>
    %cst_111 = arith.constant 0.000000e+00 : f32
    %98 = vector.broadcast %cst_111 : f32 to vector<512x128xf32>
    %99 = arith.maximumf %97, %98 : vector<512x128xf32>
    %c0_112 = arith.constant 0 : index
    %c0_113 = arith.constant 0 : index
    %100 = vector.load %arg6[%c0_112, %c0_113] : memref<1x128xf32, #tpu.memory_space<vmem>>, vector<1x128xf32>
    %101 = vector.broadcast %100 : vector<1x128xf32> to vector<512x128xf32>
    %102 = arith.mulf %99, %101 : vector<512x128xf32>
    %c0_114 = arith.constant 0 : index
    %c0_115 = arith.constant 0 : index
    %103 = vector.load %arg7[%c0_114, %c0_115] : memref<1x128xf32, #tpu.memory_space<vmem>>, vector<1x128xf32>
    %104 = vector.broadcast %103 : vector<1x128xf32> to vector<512x128xf32>
    %105 = arith.addf %102, %104 : vector<512x128xf32>
    %106 = vector.shape_cast %105 : vector<512x128xf32> to vector<16x32x128xf32>
    %107 = arith.truncf %106 : vector<16x32x128xf32> to vector<16x32x128xbf16>
    %c0_116 = arith.constant 0 : index
    %c0_117 = arith.constant 0 : index
    %c0_118 = arith.constant 0 : index
    %c0_119 = arith.constant 0 : index
    %108 = vector.load %arg8[%c0_116, %c0_117, %c0_118, %c0_119] : memref<1x16x32x128xbf16, #tpu.memory_space<vmem>>, vector<1x16x32x128xbf16>
    %109 = vector.shape_cast %108 : vector<1x16x32x128xbf16> to vector<16x32x128xbf16>
    %110 = vector.shape_cast %107 : vector<16x32x128xbf16> to vector<1x16x32x128xbf16>
    tpu.vector_store %arg8[%c0_116, %c0_117, %c0_118, %c0_119], %110 {strides = array<i32>} : memref<1x16x32x128xbf16, #tpu.memory_space<vmem>>, vector<1x16x32x128xbf16>,
    return
  }
  func.func @transform_0(%arg0: i32, %arg1: i32) -> (i32, i32, i32, i32) {
    %c16_i32 = arith.constant 16 : i32
    %0 = arith.muli %arg1, %c16_i32 : i32
    %c1_i32 = arith.constant 1 : i32
    %1 = arith.subi %0, %c1_i32 : i32
    %c0_i32 = arith.constant 0 : i32
    %2 = arith.maxsi %1, %c0_i32 : i32
    %c0_i32_0 = arith.constant 0 : i32
    %c0_i32_1 = arith.constant 0 : i32
    %c0_i32_2 = arith.constant 0 : i32
    return %arg0, %2, %c0_i32_0, %c0_i32_1 : i32, i32, i32, i32
  }
  func.func @transform_1(%arg0: i32, %arg1: i32) -> (i32, i32, i32, i32) {
    %c0_i32 = arith.constant 0 : i32
    %c0_i32_0 = arith.constant 0 : i32
    %c0_i32_1 = arith.constant 0 : i32
    return %arg0, %arg1, %c0_i32, %c0_i32_0 : i32, i32, i32, i32
  }
  func.func @transform_2(%arg0: i32, %arg1: i32) -> (i32, i32, i32, i32) {
    %c1_i32 = arith.constant 1 : i32
    %0 = arith.addi %arg1, %c1_i32 : i32
    %c16_i32 = arith.constant 16 : i32
    %1 = arith.muli %0, %c16_i32 : i32
    %c31_i32 = arith.constant 31 : i32
    %2 = arith.minsi %1, %c31_i32 : i32
    %c0_i32 = arith.constant 0 : i32
    %c0_i32_0 = arith.constant 0 : i32
    %c0_i32_1 = arith.constant 0 : i32
    return %arg0, %2, %c0_i32, %c0_i32_0 : i32, i32, i32, i32
  }
  func.func @transform_3(%arg0: i32, %arg1: i32) -> (i32, i32, i32, i32) {
    %c0_i32 = arith.constant 0 : i32
    %c0_i32_0 = arith.constant 0 : i32
    %c0_i32_1 = arith.constant 0 : i32
    %c0_i32_2 = arith.constant 0 : i32
    %c0_i32_3 = arith.constant 0 : i32
    return %c0_i32, %c0_i32_0, %c0_i32_1, %c0_i32_2 : i32, i32, i32, i32
  }
  func.func @transform_4(%arg0: i32, %arg1: i32) -> (i32, i32) {
    %c0_i32 = arith.constant 0 : i32
    %c0_i32_0 = arith.constant 0 : i32
    %c0_i32_1 = arith.constant 0 : i32
    return %c0_i32, %c0_i32_0 : i32, i32
  }
  func.func @transform_5(%arg0: i32, %arg1: i32) -> (i32, i32) {
    %c0_i32 = arith.constant 0 : i32
    %c0_i32_0 = arith.constant 0 : i32
    %c0_i32_1 = arith.constant 0 : i32
    return %c0_i32, %c0_i32_0 : i32, i32
  }
  func.func @transform_6(%arg0: i32, %arg1: i32) -> (i32, i32, i32, i32) {
    %c0_i32 = arith.constant 0 : i32
    %c0_i32_0 = arith.constant 0 : i32
    %c0_i32_1 = arith.constant 0 : i32
    return %arg0, %arg1, %c0_i32, %c0_i32_0 : i32, i32, i32, i32
  }
}

module attributes {stable_mosaic.version = 11 : i64} {
  func.func @_conv3x3_relu_bn_kernel(%arg0: i32, %arg1: i32, %arg2: memref<1x1x32x128xbf16, #tpu.memory_space<vmem>>, %arg3: memref<1x16x32x128xbf16, #tpu.memory_space<vmem>>, %arg4: memref<1x1x32x128xbf16, #tpu.memory_space<vmem>>, %arg5: memref<3x3x128x128xbf16, #tpu.memory_space<vmem>>, %arg6: memref<1x128xf32, #tpu.memory_space<vmem>>, %arg7: memref<1x128xf32, #tpu.memory_space<vmem>>, %arg8: memref<1x16x32x128xf32, #tpu.memory_space<vmem>>, %arg9: memref<18x48x128xf32, #tpu.memory_space<vmem>>, %arg10: memref<512x128xf32, #tpu.memory_space<vmem>>) attributes {dimension_semantics = [#tpu.dimension_semantics<parallel>, #tpu.dimension_semantics<parallel>], iteration_bounds = array<i64: 2, 2>, scalar_prefetch = 0 : i64, scratch_operands = 2 : i64, tpu.core_type = #tpu.core_type<tc>, window_params = [{transform_indices = @transform_0, window_bounds = array<i64: 1, 1, 32, 128>}, {transform_indices = @transform_1, window_bounds = array<i64: 1, 16, 32, 128>}, {transform_indices = @transform_2, window_bounds = array<i64: 1, 1, 32, 128>}, {pipeline_mode = #tpu.pipeline_mode<synchronous>, transform_indices = @transform_3, window_bounds = array<i64: 3, 3, 128, 128>}, {pipeline_mode = #tpu.pipeline_mode<synchronous>, transform_indices = @transform_4, window_bounds = array<i64: 1, 128>}, {pipeline_mode = #tpu.pipeline_mode<synchronous>, transform_indices = @transform_5, window_bounds = array<i64: 1, 128>}, {transform_indices = @transform_6, window_bounds = array<i64: 1, 16, 32, 128>}]} {
    %c0 = arith.constant 0 : index
    %c0_0 = arith.constant 0 : index
    %c0_1 = arith.constant 0 : index
    %c0_2 = arith.constant 0 : index
    %0 = vector.load %arg3[%c0, %c0_0, %c0_1, %c0_2] : memref<1x16x32x128xbf16, #tpu.memory_space<vmem>>, vector<1x16x32x128xbf16>
    %1 = vector.shape_cast %0 : vector<1x16x32x128xbf16> to vector<16x32x128xbf16>
    %2 = arith.extf %1 : vector<16x32x128xbf16> to vector<16x32x128xf32>
    %c0_i32 = arith.constant 0 : i32
    %3 = arith.cmpi sgt, %arg1, %c0_i32 : i32
    %c0_3 = arith.constant 0 : index
    %c0_4 = arith.constant 0 : index
    %c0_5 = arith.constant 0 : index
    %c0_6 = arith.constant 0 : index
    %4 = vector.load %arg2[%c0_3, %c0_4, %c0_5, %c0_6] : memref<1x1x32x128xbf16, #tpu.memory_space<vmem>>, vector<1x1x32x128xbf16>
    %5 = vector.shape_cast %4 : vector<1x1x32x128xbf16> to vector<1x32x128xbf16>
    %6 = arith.extf %5 : vector<1x32x128xbf16> to vector<1x32x128xf32>
    %cst = arith.constant 0.000000e+00 : f32
    %7 = vector.broadcast %cst : f32 to vector<1x32x128xf32>
    %8 = arith.select %3, %6, %7 : vector<1x32x128xf32>
    %c1_i32 = arith.constant 1 : i32
    %9 = arith.cmpi slt, %arg1, %c1_i32 : i32
    %c0_7 = arith.constant 0 : index
    %c0_8 = arith.constant 0 : index
    %c0_9 = arith.constant 0 : index
    %c0_10 = arith.constant 0 : index
    %10 = vector.load %arg4[%c0_7, %c0_8, %c0_9, %c0_10] : memref<1x1x32x128xbf16, #tpu.memory_space<vmem>>, vector<1x1x32x128xbf16>
    %11 = vector.shape_cast %10 : vector<1x1x32x128xbf16> to vector<1x32x128xbf16>
    %12 = arith.extf %11 : vector<1x32x128xbf16> to vector<1x32x128xf32>
    %cst_11 = arith.constant 0.000000e+00 : f32
    %13 = vector.broadcast %cst_11 : f32 to vector<1x32x128xf32>
    %14 = arith.select %9, %12, %13 : vector<1x32x128xf32>
    %cst_12 = arith.constant 0.000000e+00 : f32
    %15 = vector.broadcast %cst_12 : f32 to vector<18x8x128xf32>
    %c0_13 = arith.constant 0 : index
    %c0_14 = arith.constant 0 : index
    %c0_15 = arith.constant 0 : index
    %16 = vector.load %arg9[%c0_13, %c0_14, %c0_15] : memref<18x48x128xf32, #tpu.memory_space<vmem>>, vector<18x8x128xf32>
    tpu.vector_store %arg9[%c0_13, %c0_14, %c0_15], %15 {strides = array<i32>} : memref<18x48x128xf32, #tpu.memory_space<vmem>>, vector<18x8x128xf32>,
    %c0_16 = arith.constant 0 : index
    %c40 = arith.constant 40 : index
    %c0_17 = arith.constant 0 : index
    %17 = vector.load %arg9[%c0_16, %c40, %c0_17] : memref<18x48x128xf32, #tpu.memory_space<vmem>>, vector<18x8x128xf32>
    tpu.vector_store %arg9[%c0_16, %c40, %c0_17], %15 {strides = array<i32>} : memref<18x48x128xf32, #tpu.memory_space<vmem>>, vector<18x8x128xf32>,
    %c0_18 = arith.constant 0 : index
    %c8 = arith.constant 8 : index
    %c0_19 = arith.constant 0 : index
    %18 = vector.load %arg9[%c0_18, %c8, %c0_19] : memref<18x48x128xf32, #tpu.memory_space<vmem>>, vector<1x32x128xf32>
    tpu.vector_store %arg9[%c0_18, %c8, %c0_19], %8 {strides = array<i32>} : memref<18x48x128xf32, #tpu.memory_space<vmem>>, vector<1x32x128xf32>,
    %c1 = arith.constant 1 : index
    %c8_20 = arith.constant 8 : index
    %c0_21 = arith.constant 0 : index
    %19 = vector.load %arg9[%c1, %c8_20, %c0_21] : memref<18x48x128xf32, #tpu.memory_space<vmem>>, vector<16x32x128xf32>
    tpu.vector_store %arg9[%c1, %c8_20, %c0_21], %2 {strides = array<i32>} : memref<18x48x128xf32, #tpu.memory_space<vmem>>, vector<16x32x128xf32>,
    %c17 = arith.constant 17 : index
    %c8_22 = arith.constant 8 : index
    %c0_23 = arith.constant 0 : index
    %20 = vector.load %arg9[%c17, %c8_22, %c0_23] : memref<18x48x128xf32, #tpu.memory_space<vmem>>, vector<1x32x128xf32>
    tpu.vector_store %arg9[%c17, %c8_22, %c0_23], %14 {strides = array<i32>} : memref<18x48x128xf32, #tpu.memory_space<vmem>>, vector<1x32x128xf32>,
    %c0_24 = arith.constant 0 : index
    %c7 = arith.constant 7 : index
    %c0_25 = arith.constant 0 : index
    %21 = vector.load %arg9[%c0_24, %c7, %c0_25] : memref<18x48x128xf32, #tpu.memory_space<vmem>>, vector<18x32x128xf32>
    %22 = arith.truncf %21 : vector<18x32x128xf32> to vector<18x32x128xbf16>
    %c0_26 = arith.constant 0 : index
    %c8_27 = arith.constant 8 : index
    %c0_28 = arith.constant 0 : index
    %23 = vector.load %arg9[%c0_26, %c8_27, %c0_28] : memref<18x48x128xf32, #tpu.memory_space<vmem>>, vector<18x32x128xf32>
    %24 = arith.truncf %23 : vector<18x32x128xf32> to vector<18x32x128xbf16>
    %c0_29 = arith.constant 0 : index
    %c9 = arith.constant 9 : index
    %c0_30 = arith.constant 0 : index
    %25 = vector.load %arg9[%c0_29, %c9, %c0_30] : memref<18x48x128xf32, #tpu.memory_space<vmem>>, vector<18x32x128xf32>
    %26 = arith.truncf %25 : vector<18x32x128xf32> to vector<18x32x128xbf16>
    %27 = vector.extract_strided_slice %22 {offsets = [0, 0, 0], sizes = [16, 32, 128], strides = [1, 1, 1]} : vector<18x32x128xbf16> to vector<16x32x128xbf16>
    %28 = vector.shape_cast %27 : vector<16x32x128xbf16> to vector<512x128xbf16>
    %c0_31 = arith.constant 0 : index
    %c0_32 = arith.constant 0 : index
    %c0_33 = arith.constant 0 : index
    %c0_34 = arith.constant 0 : index
    %29 = vector.load %arg5[%c0_31, %c0_32, %c0_33, %c0_34] : memref<3x3x128x128xbf16, #tpu.memory_space<vmem>>, vector<1x1x128x128xbf16>
    %30 = vector.shape_cast %29 : vector<1x1x128x128xbf16> to vector<128x128xbf16>
    %cst_35 = arith.constant dense<0.000000e+00> : vector<512x128xf32>
    %31 = tpu.matmul %28, %30, %cst_35 {dimension_numbers = #tpu.dot_dimension_numbers<[1], [0], [0], [1], [0, 0, 1, 1], [], []>} : vector<512x128xbf16>, vector<128x128xbf16>, vector<512x128xf32> -> vector<512x128xf32>
    %c0_36 = arith.constant 0 : index
    %c0_37 = arith.constant 0 : index
    %32 = vector.load %arg10[%c0_36, %c0_37] : memref<512x128xf32, #tpu.memory_space<vmem>>, vector<512x128xf32>
    tpu.vector_store %arg10[%c0_36, %c0_37], %31 {strides = array<i32>} : memref<512x128xf32, #tpu.memory_space<vmem>>, vector<512x128xf32>,
    %33 = vector.extract_strided_slice %24 {offsets = [0, 0, 0], sizes = [16, 32, 128], strides = [1, 1, 1]} : vector<18x32x128xbf16> to vector<16x32x128xbf16>
    %34 = vector.shape_cast %33 : vector<16x32x128xbf16> to vector<512x128xbf16>
    %c0_38 = arith.constant 0 : index
    %c1_39 = arith.constant 1 : index
    %c0_40 = arith.constant 0 : index
    %c0_41 = arith.constant 0 : index
    %35 = vector.load %arg5[%c0_38, %c1_39, %c0_40, %c0_41] : memref<3x3x128x128xbf16, #tpu.memory_space<vmem>>, vector<1x1x128x128xbf16>
    %36 = vector.shape_cast %35 : vector<1x1x128x128xbf16> to vector<128x128xbf16>
    %cst_42 = arith.constant dense<0.000000e+00> : vector<512x128xf32>
    %37 = tpu.matmul %34, %36, %cst_42 {dimension_numbers = #tpu.dot_dimension_numbers<[1], [0], [0], [1], [0, 0, 1, 1], [], []>} : vector<512x128xbf16>, vector<128x128xbf16>, vector<512x128xf32> -> vector<512x128xf32>
    %c0_43 = arith.constant 0 : index
    %c0_44 = arith.constant 0 : index
    %38 = vector.load %arg10[%c0_43, %c0_44] : memref<512x128xf32, #tpu.memory_space<vmem>>, vector<512x128xf32>
    %39 = arith.addf %38, %37 : vector<512x128xf32>
    %c0_45 = arith.constant 0 : index
    %c0_46 = arith.constant 0 : index
    %40 = vector.load %arg10[%c0_45, %c0_46] : memref<512x128xf32, #tpu.memory_space<vmem>>, vector<512x128xf32>
    tpu.vector_store %arg10[%c0_45, %c0_46], %39 {strides = array<i32>} : memref<512x128xf32, #tpu.memory_space<vmem>>, vector<512x128xf32>,
    %41 = vector.extract_strided_slice %26 {offsets = [0, 0, 0], sizes = [16, 32, 128], strides = [1, 1, 1]} : vector<18x32x128xbf16> to vector<16x32x128xbf16>
    %42 = vector.shape_cast %41 : vector<16x32x128xbf16> to vector<512x128xbf16>
    %c0_47 = arith.constant 0 : index
    %c2 = arith.constant 2 : index
    %c0_48 = arith.constant 0 : index
    %c0_49 = arith.constant 0 : index
    %43 = vector.load %arg5[%c0_47, %c2, %c0_48, %c0_49] : memref<3x3x128x128xbf16, #tpu.memory_space<vmem>>, vector<1x1x128x128xbf16>
    %44 = vector.shape_cast %43 : vector<1x1x128x128xbf16> to vector<128x128xbf16>
    %cst_50 = arith.constant dense<0.000000e+00> : vector<512x128xf32>
    %45 = tpu.matmul %42, %44, %cst_50 {dimension_numbers = #tpu.dot_dimension_numbers<[1], [0], [0], [1], [0, 0, 1, 1], [], []>} : vector<512x128xbf16>, vector<128x128xbf16>, vector<512x128xf32> -> vector<512x128xf32>
    %c0_51 = arith.constant 0 : index
    %c0_52 = arith.constant 0 : index
    %46 = vector.load %arg10[%c0_51, %c0_52] : memref<512x128xf32, #tpu.memory_space<vmem>>, vector<512x128xf32>
    %47 = arith.addf %46, %45 : vector<512x128xf32>
    %c0_53 = arith.constant 0 : index
    %c0_54 = arith.constant 0 : index
    %48 = vector.load %arg10[%c0_53, %c0_54] : memref<512x128xf32, #tpu.memory_space<vmem>>, vector<512x128xf32>
    tpu.vector_store %arg10[%c0_53, %c0_54], %47 {strides = array<i32>} : memref<512x128xf32, #tpu.memory_space<vmem>>, vector<512x128xf32>,
    %49 = vector.extract_strided_slice %22 {offsets = [1, 0, 0], sizes = [16, 32, 128], strides = [1, 1, 1]} : vector<18x32x128xbf16> to vector<16x32x128xbf16>
    %50 = vector.shape_cast %49 : vector<16x32x128xbf16> to vector<512x128xbf16>
    %c1_55 = arith.constant 1 : index
    %c0_56 = arith.constant 0 : index
    %c0_57 = arith.constant 0 : index
    %c0_58 = arith.constant 0 : index
    %51 = vector.load %arg5[%c1_55, %c0_56, %c0_57, %c0_58] : memref<3x3x128x128xbf16, #tpu.memory_space<vmem>>, vector<1x1x128x128xbf16>
    %52 = vector.shape_cast %51 : vector<1x1x128x128xbf16> to vector<128x128xbf16>
    %cst_59 = arith.constant dense<0.000000e+00> : vector<512x128xf32>
    %53 = tpu.matmul %50, %52, %cst_59 {dimension_numbers = #tpu.dot_dimension_numbers<[1], [0], [0], [1], [0, 0, 1, 1], [], []>} : vector<512x128xbf16>, vector<128x128xbf16>, vector<512x128xf32> -> vector<512x128xf32>
    %c0_60 = arith.constant 0 : index
    %c0_61 = arith.constant 0 : index
    %54 = vector.load %arg10[%c0_60, %c0_61] : memref<512x128xf32, #tpu.memory_space<vmem>>, vector<512x128xf32>
    %55 = arith.addf %54, %53 : vector<512x128xf32>
    %c0_62 = arith.constant 0 : index
    %c0_63 = arith.constant 0 : index
    %56 = vector.load %arg10[%c0_62, %c0_63] : memref<512x128xf32, #tpu.memory_space<vmem>>, vector<512x128xf32>
    tpu.vector_store %arg10[%c0_62, %c0_63], %55 {strides = array<i32>} : memref<512x128xf32, #tpu.memory_space<vmem>>, vector<512x128xf32>,
    %57 = vector.extract_strided_slice %24 {offsets = [1, 0, 0], sizes = [16, 32, 128], strides = [1, 1, 1]} : vector<18x32x128xbf16> to vector<16x32x128xbf16>
    %58 = vector.shape_cast %57 : vector<16x32x128xbf16> to vector<512x128xbf16>
    %c1_64 = arith.constant 1 : index
    %c1_65 = arith.constant 1 : index
    %c0_66 = arith.constant 0 : index
    %c0_67 = arith.constant 0 : index
    %59 = vector.load %arg5[%c1_64, %c1_65, %c0_66, %c0_67] : memref<3x3x128x128xbf16, #tpu.memory_space<vmem>>, vector<1x1x128x128xbf16>
    %60 = vector.shape_cast %59 : vector<1x1x128x128xbf16> to vector<128x128xbf16>
    %cst_68 = arith.constant dense<0.000000e+00> : vector<512x128xf32>
    %61 = tpu.matmul %58, %60, %cst_68 {dimension_numbers = #tpu.dot_dimension_numbers<[1], [0], [0], [1], [0, 0, 1, 1], [], []>} : vector<512x128xbf16>, vector<128x128xbf16>, vector<512x128xf32> -> vector<512x128xf32>
    %c0_69 = arith.constant 0 : index
    %c0_70 = arith.constant 0 : index
    %62 = vector.load %arg10[%c0_69, %c0_70] : memref<512x128xf32, #tpu.memory_space<vmem>>, vector<512x128xf32>
    %63 = arith.addf %62, %61 : vector<512x128xf32>
    %c0_71 = arith.constant 0 : index
    %c0_72 = arith.constant 0 : index
    %64 = vector.load %arg10[%c0_71, %c0_72] : memref<512x128xf32, #tpu.memory_space<vmem>>, vector<512x128xf32>
    tpu.vector_store %arg10[%c0_71, %c0_72], %63 {strides = array<i32>} : memref<512x128xf32, #tpu.memory_space<vmem>>, vector<512x128xf32>,
    %65 = vector.extract_strided_slice %26 {offsets = [1, 0, 0], sizes = [16, 32, 128], strides = [1, 1, 1]} : vector<18x32x128xbf16> to vector<16x32x128xbf16>
    %66 = vector.shape_cast %65 : vector<16x32x128xbf16> to vector<512x128xbf16>
    %c1_73 = arith.constant 1 : index
    %c2_74 = arith.constant 2 : index
    %c0_75 = arith.constant 0 : index
    %c0_76 = arith.constant 0 : index
    %67 = vector.load %arg5[%c1_73, %c2_74, %c0_75, %c0_76] : memref<3x3x128x128xbf16, #tpu.memory_space<vmem>>, vector<1x1x128x128xbf16>
    %68 = vector.shape_cast %67 : vector<1x1x128x128xbf16> to vector<128x128xbf16>
    %cst_77 = arith.constant dense<0.000000e+00> : vector<512x128xf32>
    %69 = tpu.matmul %66, %68, %cst_77 {dimension_numbers = #tpu.dot_dimension_numbers<[1], [0], [0], [1], [0, 0, 1, 1], [], []>} : vector<512x128xbf16>, vector<128x128xbf16>, vector<512x128xf32> -> vector<512x128xf32>
    %c0_78 = arith.constant 0 : index
    %c0_79 = arith.constant 0 : index
    %70 = vector.load %arg10[%c0_78, %c0_79] : memref<512x128xf32, #tpu.memory_space<vmem>>, vector<512x128xf32>
    %71 = arith.addf %70, %69 : vector<512x128xf32>
    %c0_80 = arith.constant 0 : index
    %c0_81 = arith.constant 0 : index
    %72 = vector.load %arg10[%c0_80, %c0_81] : memref<512x128xf32, #tpu.memory_space<vmem>>, vector<512x128xf32>
    tpu.vector_store %arg10[%c0_80, %c0_81], %71 {strides = array<i32>} : memref<512x128xf32, #tpu.memory_space<vmem>>, vector<512x128xf32>,
    %73 = vector.extract_strided_slice %22 {offsets = [2, 0, 0], sizes = [16, 32, 128], strides = [1, 1, 1]} : vector<18x32x128xbf16> to vector<16x32x128xbf16>
    %74 = vector.shape_cast %73 : vector<16x32x128xbf16> to vector<512x128xbf16>
    %c2_82 = arith.constant 2 : index
    %c0_83 = arith.constant 0 : index
    %c0_84 = arith.constant 0 : index
    %c0_85 = arith.constant 0 : index
    %75 = vector.load %arg5[%c2_82, %c0_83, %c0_84, %c0_85] : memref<3x3x128x128xbf16, #tpu.memory_space<vmem>>, vector<1x1x128x128xbf16>
    %76 = vector.shape_cast %75 : vector<1x1x128x128xbf16> to vector<128x128xbf16>
    %cst_86 = arith.constant dense<0.000000e+00> : vector<512x128xf32>
    %77 = tpu.matmul %74, %76, %cst_86 {dimension_numbers = #tpu.dot_dimension_numbers<[1], [0], [0], [1], [0, 0, 1, 1], [], []>} : vector<512x128xbf16>, vector<128x128xbf16>, vector<512x128xf32> -> vector<512x128xf32>
    %c0_87 = arith.constant 0 : index
    %c0_88 = arith.constant 0 : index
    %78 = vector.load %arg10[%c0_87, %c0_88] : memref<512x128xf32, #tpu.memory_space<vmem>>, vector<512x128xf32>
    %79 = arith.addf %78, %77 : vector<512x128xf32>
    %c0_89 = arith.constant 0 : index
    %c0_90 = arith.constant 0 : index
    %80 = vector.load %arg10[%c0_89, %c0_90] : memref<512x128xf32, #tpu.memory_space<vmem>>, vector<512x128xf32>
    tpu.vector_store %arg10[%c0_89, %c0_90], %79 {strides = array<i32>} : memref<512x128xf32, #tpu.memory_space<vmem>>, vector<512x128xf32>,
    %81 = vector.extract_strided_slice %24 {offsets = [2, 0, 0], sizes = [16, 32, 128], strides = [1, 1, 1]} : vector<18x32x128xbf16> to vector<16x32x128xbf16>
    %82 = vector.shape_cast %81 : vector<16x32x128xbf16> to vector<512x128xbf16>
    %c2_91 = arith.constant 2 : index
    %c1_92 = arith.constant 1 : index
    %c0_93 = arith.constant 0 : index
    %c0_94 = arith.constant 0 : index
    %83 = vector.load %arg5[%c2_91, %c1_92, %c0_93, %c0_94] : memref<3x3x128x128xbf16, #tpu.memory_space<vmem>>, vector<1x1x128x128xbf16>
    %84 = vector.shape_cast %83 : vector<1x1x128x128xbf16> to vector<128x128xbf16>
    %cst_95 = arith.constant dense<0.000000e+00> : vector<512x128xf32>
    %85 = tpu.matmul %82, %84, %cst_95 {dimension_numbers = #tpu.dot_dimension_numbers<[1], [0], [0], [1], [0, 0, 1, 1], [], []>} : vector<512x128xbf16>, vector<128x128xbf16>, vector<512x128xf32> -> vector<512x128xf32>
    %c0_96 = arith.constant 0 : index
    %c0_97 = arith.constant 0 : index
    %86 = vector.load %arg10[%c0_96, %c0_97] : memref<512x128xf32, #tpu.memory_space<vmem>>, vector<512x128xf32>
    %87 = arith.addf %86, %85 : vector<512x128xf32>
    %c0_98 = arith.constant 0 : index
    %c0_99 = arith.constant 0 : index
    %88 = vector.load %arg10[%c0_98, %c0_99] : memref<512x128xf32, #tpu.memory_space<vmem>>, vector<512x128xf32>
    tpu.vector_store %arg10[%c0_98, %c0_99], %87 {strides = array<i32>} : memref<512x128xf32, #tpu.memory_space<vmem>>, vector<512x128xf32>,
    %89 = vector.extract_strided_slice %26 {offsets = [2, 0, 0], sizes = [16, 32, 128], strides = [1, 1, 1]} : vector<18x32x128xbf16> to vector<16x32x128xbf16>
    %90 = vector.shape_cast %89 : vector<16x32x128xbf16> to vector<512x128xbf16>
    %c2_100 = arith.constant 2 : index
    %c2_101 = arith.constant 2 : index
    %c0_102 = arith.constant 0 : index
    %c0_103 = arith.constant 0 : index
    %91 = vector.load %arg5[%c2_100, %c2_101, %c0_102, %c0_103] : memref<3x3x128x128xbf16, #tpu.memory_space<vmem>>, vector<1x1x128x128xbf16>
    %92 = vector.shape_cast %91 : vector<1x1x128x128xbf16> to vector<128x128xbf16>
    %cst_104 = arith.constant dense<0.000000e+00> : vector<512x128xf32>
    %93 = tpu.matmul %90, %92, %cst_104 {dimension_numbers = #tpu.dot_dimension_numbers<[1], [0], [0], [1], [0, 0, 1, 1], [], []>} : vector<512x128xbf16>, vector<128x128xbf16>, vector<512x128xf32> -> vector<512x128xf32>
    %c0_105 = arith.constant 0 : index
    %c0_106 = arith.constant 0 : index
    %94 = vector.load %arg10[%c0_105, %c0_106] : memref<512x128xf32, #tpu.memory_space<vmem>>, vector<512x128xf32>
    %95 = arith.addf %94, %93 : vector<512x128xf32>
    %c0_107 = arith.constant 0 : index
    %c0_108 = arith.constant 0 : index
    %96 = vector.load %arg10[%c0_107, %c0_108] : memref<512x128xf32, #tpu.memory_space<vmem>>, vector<512x128xf32>
    tpu.vector_store %arg10[%c0_107, %c0_108], %95 {strides = array<i32>} : memref<512x128xf32, #tpu.memory_space<vmem>>, vector<512x128xf32>,
    %c0_109 = arith.constant 0 : index
    %c0_110 = arith.constant 0 : index
    %97 = vector.load %arg10[%c0_109, %c0_110] : memref<512x128xf32, #tpu.memory_space<vmem>>, vector<512x128xf32>
    %cst_111 = arith.constant 0.000000e+00 : f32
    %98 = vector.broadcast %cst_111 : f32 to vector<512x128xf32>
    %99 = arith.maximumf %97, %98 : vector<512x128xf32>
    %c0_112 = arith.constant 0 : index
    %c0_113 = arith.constant 0 : index
    %100 = vector.load %arg6[%c0_112, %c0_113] : memref<1x128xf32, #tpu.memory_space<vmem>>, vector<1x128xf32>
    %101 = vector.broadcast %100 : vector<1x128xf32> to vector<512x128xf32>
    %102 = arith.mulf %99, %101 : vector<512x128xf32>
    %c0_114 = arith.constant 0 : index
    %c0_115 = arith.constant 0 : index
    %103 = vector.load %arg7[%c0_114, %c0_115] : memref<1x128xf32, #tpu.memory_space<vmem>>, vector<1x128xf32>
    %104 = vector.broadcast %103 : vector<1x128xf32> to vector<512x128xf32>
    %105 = arith.addf %102, %104 : vector<512x128xf32>
    %106 = vector.shape_cast %105 : vector<512x128xf32> to vector<16x32x128xf32>
    %c0_116 = arith.constant 0 : index
    %c0_117 = arith.constant 0 : index
    %c0_118 = arith.constant 0 : index
    %c0_119 = arith.constant 0 : index
    %107 = vector.load %arg8[%c0_116, %c0_117, %c0_118, %c0_119] : memref<1x16x32x128xf32, #tpu.memory_space<vmem>>, vector<1x16x32x128xf32>
    %108 = vector.shape_cast %107 : vector<1x16x32x128xf32> to vector<16x32x128xf32>
    %109 = vector.shape_cast %106 : vector<16x32x128xf32> to vector<1x16x32x128xf32>
    tpu.vector_store %arg8[%c0_116, %c0_117, %c0_118, %c0_119], %109 {strides = array<i32>} : memref<1x16x32x128xf32, #tpu.memory_space<vmem>>, vector<1x16x32x128xf32>,
    return
  }
  func.func @transform_0(%arg0: i32, %arg1: i32) -> (i32, i32, i32, i32) {
    %c16_i32 = arith.constant 16 : i32
    %0 = arith.muli %arg1, %c16_i32 : i32
    %c1_i32 = arith.constant 1 : i32
    %1 = arith.subi %0, %c1_i32 : i32
    %c0_i32 = arith.constant 0 : i32
    %2 = arith.maxsi %1, %c0_i32 : i32
    %c0_i32_0 = arith.constant 0 : i32
    %c0_i32_1 = arith.constant 0 : i32
    %c0_i32_2 = arith.constant 0 : i32
    return %arg0, %2, %c0_i32_0, %c0_i32_1 : i32, i32, i32, i32
  }
  func.func @transform_1(%arg0: i32, %arg1: i32) -> (i32, i32, i32, i32) {
    %c0_i32 = arith.constant 0 : i32
    %c0_i32_0 = arith.constant 0 : i32
    %c0_i32_1 = arith.constant 0 : i32
    return %arg0, %arg1, %c0_i32, %c0_i32_0 : i32, i32, i32, i32
  }
  func.func @transform_2(%arg0: i32, %arg1: i32) -> (i32, i32, i32, i32) {
    %c1_i32 = arith.constant 1 : i32
    %0 = arith.addi %arg1, %c1_i32 : i32
    %c16_i32 = arith.constant 16 : i32
    %1 = arith.muli %0, %c16_i32 : i32
    %c31_i32 = arith.constant 31 : i32
    %2 = arith.minsi %1, %c31_i32 : i32
    %c0_i32 = arith.constant 0 : i32
    %c0_i32_0 = arith.constant 0 : i32
    %c0_i32_1 = arith.constant 0 : i32
    return %arg0, %2, %c0_i32, %c0_i32_0 : i32, i32, i32, i32
  }
  func.func @transform_3(%arg0: i32, %arg1: i32) -> (i32, i32, i32, i32) {
    %c0_i32 = arith.constant 0 : i32
    %c0_i32_0 = arith.constant 0 : i32
    %c0_i32_1 = arith.constant 0 : i32
    %c0_i32_2 = arith.constant 0 : i32
    %c0_i32_3 = arith.constant 0 : i32
    return %c0_i32, %c0_i32_0, %c0_i32_1, %c0_i32_2 : i32, i32, i32, i32
  }
  func.func @transform_4(%arg0: i32, %arg1: i32) -> (i32, i32) {
    %c0_i32 = arith.constant 0 : i32
    %c0_i32_0 = arith.constant 0 : i32
    %c0_i32_1 = arith.constant 0 : i32
    return %c0_i32, %c0_i32_0 : i32, i32
  }
  func.func @transform_5(%arg0: i32, %arg1: i32) -> (i32, i32) {
    %c0_i32 = arith.constant 0 : i32
    %c0_i32_0 = arith.constant 0 : i32
    %c0_i32_1 = arith.constant 0 : i32
    return %c0_i32, %c0_i32_0 : i32, i32
  }
  func.func @transform_6(%arg0: i32, %arg1: i32) -> (i32, i32, i32, i32) {
    %c0_i32 = arith.constant 0 : i32
    %c0_i32_0 = arith.constant 0 : i32
    %c0_i32_1 = arith.constant 0 : i32
    return %arg0, %arg1, %c0_i32, %c0_i32_0 : i32, i32, i32, i32
  }
}

</mosaic_0001>

<bundles_post_ra>
// kernel: up_block_forward.3
= control target key start
LH: loop header
LB: loop body
LE: loop exit
PB: predicated region body
PF: predicated region fallthrough
CT: control target
= control target key end

     0   :  { %s2413_s12 = smov 0   ;;  %s2415_s13 = smov 0   ;;  %s2885_s0 = inlined_call_operand.vmem [shape: bf16[2,16,16,256], index: 0, kind: input, shape index: {}]   ;;  %s2886_s1 = inlined_call_operand.vmem [shape: bf16[256,512], index: 1, kind: input, shape index: {}]   ;;  %s2887_s2 = inlined_call_operand.vmem [shape: f32[1,512], index: 2, kind: input, shape index: {}]   ;;  %s2888_s3 = inlined_call_operand.vmem [shape: bf16[2,32,16,256], index: 3, kind: output, shape index: {}]  }
   0x1   :  { %s2417_s14 = smov 0  }
   0x2 LB: > { %s25_s15 = sadd.s32 1, %s2387_s13  ;;  %p1906_p0 = scmp.ge.s32.totalorder %s2391_s14, 1  ;;  %s2391_s14 = sphi %s2417_s14, %s13_s14   ;;  %s2387_s13 = sphi %s2415_s13, %s2890_s13   ;;  %s2383_s12 = sphi %s2413_s12, %s2889_s12  }
   0x3   : > { %p27_p1 = scmp.ge.s32.totalorder %s25_s15, 2  ;;  %p159_p2 = scmp.lt.s32.totalorder %s2391_s14, 3 }
   0x5   : > { %s2892_s15 = smov (%p27_p1, %s25_s15), 0  ;;  %p160_p3 = pnand %p1906_p0, %p159_p2 }
   0x6   : > { %v2225_v0 = vld [vmem:[%s2886_s1 + $0x4] ss:$16 sps:$4 sm:$0xff] (!%p160_p3)   ;;  %v2227_v1 = vld [vmem:[%s2886_s1 + $0xc] ss:$16 sps:$4 sm:$0xff] (!%p160_p3)   ;;  %v2229_v2 = vld [vmem:[%s2886_s1] ss:$16 sps:$4 sm:$0xff] (!%p160_p3)  }
   0x7   : > { %163 = sbr.rel (%p160_p3) target bundleno = 413 (0x19d), region = 32  ;;  %813 = vmatprep.subr.bf16.mxu0 (!%p160_p3), %v2225_v0  ;;  %v2230_v3 = vld [vmem:[%s2886_s1 + $0x8] ss:$16 sps:$4 sm:$0xff] (!%p160_p3)   ;;  %1006 = vmatprep.subr.bf16.mxu1 (!%p160_p3), %v2227_v1  ;;  %v2231_v4 = vld [vmem:[%s2886_s1 + $0x24] ss:$16 sps:$4 sm:$0xff] (!%p160_p3)   ;;  %p194_p4 = scmp.lt.s32.totalorder (!%p160_p3), %s2383_s12, 1 }
   0x8   : > { %814 = vmatpush1.bf16.msra.mxu0 (!%p160_p3), %v2229_v2  ;;  %1007 = vmatpush1.bf16.msra.mxu1 (!%p160_p3), %v2230_v3  ;;  %v2233_v5 = vld [vmem:[%s2886_s1 + $0x2c] ss:$16 sps:$4 sm:$0xff] (!%p160_p3)   ;;  %v2235_v6 = vld [vmem:[%s2886_s1 + $0x20] ss:$16 sps:$4 sm:$0xff] (!%p160_p3)   ;;  %v2236_v7 = vld [vmem:[%s2886_s1 + $0x28] ss:$16 sps:$4 sm:$0xff] (!%p160_p3)  }
   0x9   : > { %815 = vmatprep.subr.bf16.mxu0 (!%p160_p3), %v2231_v4  ;;  %1008 = vmatprep.subr.bf16.mxu1 (!%p160_p3), %v2233_v5  ;;  %v2237_v8 = vld [vmem:[%s2886_s1 + $0x44] ss:$16 sps:$4 sm:$0xff] (!%p160_p3)   ;;  %v2239_v9 = vld [vmem:[%s2886_s1 + $0x4c] ss:$16 sps:$4 sm:$0xff] (!%p160_p3)   ;;  %v2241_v10 = vld [vmem:[%s2886_s1 + $0x40] ss:$16 sps:$4 sm:$0xff] (!%p160_p3)  }
   0xa   : > { %v2242_v11 = vld [vmem:[%s2886_s1 + $0x48] ss:$16 sps:$4 sm:$0xff] (!%p160_p3)   ;;  %v2243_v12 = vld [vmem:[%s2886_s1 + $0x64] ss:$16 sps:$4 sm:$0xff] (!%p160_p3)   ;;  %v2245_v13 = vld [vmem:[%s2886_s1 + $0x6c] ss:$16 sps:$4 sm:$0xff] (!%p160_p3)  }
   0xb   : > { %v2247_v14 = vld [vmem:[%s2886_s1 + $0x60] ss:$16 sps:$4 sm:$0xff] (!%p160_p3)   ;;  %v2248_v15 = vld [vmem:[%s2886_s1 + $0x68] ss:$16 sps:$4 sm:$0xff] (!%p160_p3)   ;;  %v2249_v16 = vld [vmem:[%s2886_s1 + $0x84] ss:$16 sps:$4 sm:$0xff] (!%p160_p3)  }
   0xc   : > { %816 = vmatpush1.bf16.msra.mxu0 (!%p160_p3), %v2235_v6  ;;  %1009 = vmatpush1.bf16.msra.mxu1 (!%p160_p3), %v2236_v7  ;;  %v2251_v17 = vld [vmem:[%s2886_s1 + $0x8c] ss:$16 sps:$4 sm:$0xff] (!%p160_p3)   ;;  %v2253_v18 = vld [vmem:[%s2886_s1 + $0x80] ss:$16 sps:$4 sm:$0xff] (!%p160_p3)   ;;  %v2254_v19 = vld [vmem:[%s2886_s1 + $0x88] ss:$16 sps:$4 sm:$0xff] (!%p160_p3)  }
   0xd   : > { %817 = vmatprep.subr.bf16.mxu0 (!%p160_p3), %v2237_v8  ;;  %1010 = vmatprep.subr.bf16.mxu1 (!%p160_p3), %v2239_v9  ;;  %v2255_v20 = vld [vmem:[%s2886_s1 + $0xa4] ss:$16 sps:$4 sm:$0xff] (!%p160_p3)   ;;  %v2257_v21 = vld [vmem:[%s2886_s1 + $0xac] ss:$16 sps:$4 sm:$0xff] (!%p160_p3)   ;;  %v2259_v22 = vld [vmem:[%s2886_s1 + $0xa0] ss:$16 sps:$4 sm:$0xff] (!%p160_p3)  }
   0xe   : > { %v2260_v23 = vld [vmem:[%s2886_s1 + $0xa8] ss:$16 sps:$4 sm:$0xff]   ;;  %v2261_v24 = vld [vmem:[%s2886_s1 + $0xc4] ss:$16 sps:$4 sm:$0xff]   ;;  %v2263_v25 = vld [vmem:[%s2886_s1 + $0xcc] ss:$16 sps:$4 sm:$0xff]  }
   0xf   : > { %v2265_v26 = vld [vmem:[%s2886_s1 + $0xc0] ss:$16 sps:$4 sm:$0xff]   ;;  %v2266_v27 = vld [vmem:[%s2886_s1 + $0xc8] ss:$16 sps:$4 sm:$0xff]   ;;  %v2267_v28 = vld [vmem:[%s2886_s1 + $0xe4] ss:$16 sps:$4 sm:$0xff]  }
  0x10   : > { %818 = vmatpush1.bf16.msra.mxu0 %v2241_v10  ;;  %1011 = vmatpush1.bf16.msra.mxu1 %v2242_v11  ;;  %v2269_v29 = vld [vmem:[%s2886_s1 + $0xec] ss:$16 sps:$4 sm:$0xff]   ;;  %v2271_v30 = vld [vmem:[%s2886_s1 + $0xe0] ss:$16 sps:$4 sm:$0xff]   ;;  %v2272_v31 = vld [vmem:[%s2886_s1 + $0xe8] ss:$16 sps:$4 sm:$0xff]  }
  0x11   : > { %819 = vmatprep.subr.bf16.mxu0 %v2243_v12  ;;  %1012 = vmatprep.subr.bf16.mxu1 %v2245_v13  ;;  %v2273_v32 = vld [vmem:[%s2886_s1 + $0x104] ss:$16 sps:$4 sm:$0xff]   ;;  %v2275_v33 = vld [vmem:[%s2886_s1 + $0x10c] ss:$16 sps:$4 sm:$0xff]   ;;  %v2277_v34 = vld [vmem:[%s2886_s1 + $0x100] ss:$16 sps:$4 sm:$0xff]  }
  0x12   : > { %v2278_v35 = vld [vmem:[%s2886_s1 + $0x108] ss:$16 sps:$4 sm:$0xff]   ;;  %v2279_v36 = vld [vmem:[%s2886_s1 + $0x124] ss:$16 sps:$4 sm:$0xff]   ;;  %v2281_v37 = vld [vmem:[%s2886_s1 + $0x12c] ss:$16 sps:$4 sm:$0xff]  }
  0x13   : > { %s2894_s12 = smov (!%p194_p4, %s2383_s12), 1  ;;  %v2283_v38 = vld [vmem:[%s2886_s1 + $0x120] ss:$16 sps:$4 sm:$0xff]   ;;  %v2284_v39 = vld [vmem:[%s2886_s1 + $0x128] ss:$16 sps:$4 sm:$0xff]  }
  0x14   : > { %820 = vmatpush1.bf16.msra.mxu0 %v2247_v14  ;;  %1013 = vmatpush1.bf16.msra.mxu1 %v2248_v15  ;;  %v2285_v40 = vld [vmem:[%s2886_s1 + $0x144] ss:$16 sps:$4 sm:$0xff]   ;;  %v2287_v41 = vld [vmem:[%s2886_s1 + $0x14c] ss:$16 sps:$4 sm:$0xff]   ;;  %s2135_s4 = sshll.u32 %s2894_s12, 8 }
  0x15   : > { %821 = vmatprep.subr.bf16.mxu0 %v2249_v16  ;;  %1014 = vmatprep.subr.bf16.mxu1 %v2251_v17  ;;  %v2289_v42 = vld [vmem:[%s2886_s1 + $0x140] ss:$16 sps:$4 sm:$0xff]   ;;  %v2290_v43 = vld [vmem:[%s2886_s1 + $0x148] ss:$16 sps:$4 sm:$0xff]   ;;  %v2291_v44 = vld [vmem:[%s2886_s1 + $0x164] ss:$16 sps:$4 sm:$0xff]   ;;  %s2576_s17 = scalar_lea.vmem %s2885_s0, %s2135_s4 }
  0x16   : > { %v2293_v45 = vld [vmem:[%s2886_s1 + $0x16c] ss:$16 sps:$4 sm:$0xff]   ;;  %v2295_v46 = vld [vmem:[%s2886_s1 + $0x160] ss:$16 sps:$4 sm:$0xff]   ;;  %v2296_v47 = vld [vmem:[%s2886_s1 + $0x168] ss:$16 sps:$4 sm:$0xff]  }
  0x17   : > { %v2323_v48 = vld [vmem:[%s2576_s17 + $0x4] ss:$8 sps:$4 sm:$0xff]   ;;  %v2301_v51 = vld [vmem:[%s2886_s1 + $0x180] ss:$16 sps:$4 sm:$0xff]   ;;  %v2302_v52 = vld [vmem:[%s2886_s1 + $0x188] ss:$16 sps:$4 sm:$0xff]  }
  0x18   : > { %822 = vmatpush1.bf16.msra.mxu0 %v2253_v18  ;;  %1015 = vmatpush1.bf16.msra.mxu1 %v2254_v19  ;;  %v2297_v49 = vld [vmem:[%s2886_s1 + $0x184] ss:$16 sps:$4 sm:$0xff]   ;;  %v2299_v50 = vld [vmem:[%s2886_s1 + $0x18c] ss:$16 sps:$4 sm:$0xff]   ;;  %v2307_v55 = vld [vmem:[%s2886_s1 + $0x1a0] ss:$16 sps:$4 sm:$0xff]  }
  0x19   : > { %823 = vmatprep.subr.bf16.mxu0 %v2255_v20  ;;  %1016 = vmatprep.subr.bf16.mxu1 %v2257_v21  ;;  %v2303_v53 = vld [vmem:[%s2886_s1 + $0x1a4] ss:$16 sps:$4 sm:$0xff]   ;;  %v2305_v54 = vld [vmem:[%s2886_s1 + $0x1ac] ss:$16 sps:$4 sm:$0xff]   ;;  %v2308_v56 = vld [vmem:[%s2886_s1 + $0x1a8] ss:$16 sps:$4 sm:$0xff]  }
  0x1a   : > { %845 = vmatprep.mubr.bf16.mxu0 %v2323_v48  ;;  %1038 = vmatprep.mubr.bf16.mxu1 %v2323_v48  ;;  %v2309_v57 = vld [vmem:[%s2886_s1 + $0x1c4] ss:$16 sps:$4 sm:$0xff]   ;;  %v2311_v58 = vld [vmem:[%s2886_s1 + $0x1cc] ss:$16 sps:$4 sm:$0xff]   ;;  %v2313_v59 = vld [vmem:[%s2886_s1 + $0x1c0] ss:$16 sps:$4 sm:$0xff]  }
  0x1b   : > { %v2314_v60 = vld [vmem:[%s2886_s1 + $0x1c8] ss:$16 sps:$4 sm:$0xff]   ;;  %v2315_v61 = vld [vmem:[%s2886_s1 + $0x1e4] ss:$16 sps:$4 sm:$0xff]   ;;  %v2317_v62 = vld [vmem:[%s2886_s1 + $0x1ec] ss:$16 sps:$4 sm:$0xff]  }
  0x1c   : > { %824 = vmatpush1.bf16.msra.mxu0 %v2259_v22  ;;  %1017 = vmatpush1.bf16.msra.mxu1 %v2260_v23  ;;  %v2319_v63 = vld [vmem:[%s2886_s1 + $0x1e0] ss:$16 sps:$4 sm:$0xff]   ;;  %v2320_v0 = vld [vmem:[%s2886_s1 + $0x1e8] ss:$16 sps:$4 sm:$0xff]   ;;  %v2324_v2 = vld [vmem:[%s2576_s17 + $0x14] ss:$8 sps:$4 sm:$0xff]  }
  0x1d   : > { %825 = vmatprep.subr.bf16.mxu0 %v2261_v24  ;;  %1018 = vmatprep.subr.bf16.mxu1 %v2263_v25  ;;  %v2321_v1 = vld [vmem:[%s2576_s17] ss:$8 sps:$4 sm:$0xff]   ;;  %v2326_v3 = vld [vmem:[%s2576_s17 + $0x10] ss:$8 sps:$4 sm:$0xff]   ;;  %v2327_v4 = vld [vmem:[%s2576_s17 + $0x24] ss:$8 sps:$4 sm:$0xff]  }
  0x1e   : > { %v2329_v5 = vld [vmem:[%s2576_s17 + $0x20] ss:$8 sps:$4 sm:$0xff]   ;;  %v2330_v6 = vld [vmem:[%s2576_s17 + $0x34] ss:$8 sps:$4 sm:$0xff]   ;;  %v2332_v7 = vld [vmem:[%s2576_s17 + $0x30] ss:$8 sps:$4 sm:$0xff]  }
  0x1f   : > { %v2333_v8 = vld [vmem:[%s2576_s17 + $0x44] ss:$8 sps:$4 sm:$0xff]   ;;  %v2335_v9 = vld [vmem:[%s2576_s17 + $0x40] ss:$8 sps:$4 sm:$0xff]   ;;  %v2336_v10 = vld [vmem:[%s2576_s17 + $0x54] ss:$8 sps:$4 sm:$0xff]  }
  0x20   : > { %826 = vmatpush1.bf16.msra.mxu0 %v2265_v26  ;;  %1019 = vmatpush1.bf16.msra.mxu1 %v2266_v27  ;;  %v2338_v11 = vld [vmem:[%s2576_s17 + $0x50] ss:$8 sps:$4 sm:$0xff]   ;;  %v2339_v12 = vld [vmem:[%s2576_s17 + $0x64] ss:$8 sps:$4 sm:$0xff]   ;;  %v2341_v13 = vld [vmem:[%s2576_s17 + $0x60] ss:$8 sps:$4 sm:$0xff]  }
  0x21   : > { %827 = vmatprep.subr.bf16.mxu0 %v2267_v28  ;;  %1020 = vmatprep.subr.bf16.mxu1 %v2269_v29  ;;  %v2342_v14 = vld [vmem:[%s2576_s17 + $0x74] ss:$8 sps:$4 sm:$0xff]   ;;  %v2344_v15 = vld [vmem:[%s2576_s17 + $0x70] ss:$8 sps:$4 sm:$0xff]   ;;  %v2345_v16 = vld [vmem:[%s2576_s17 + $0x84] ss:$8 sps:$4 sm:$0xff]  }
  0x22   : > { %v2347_v17 = vld [vmem:[%s2576_s17 + $0x80] ss:$8 sps:$4 sm:$0xff]   ;;  %v2348_v18 = vld [vmem:[%s2576_s17 + $0x94] ss:$8 sps:$4 sm:$0xff]   ;;  %v2350_v19 = vld [vmem:[%s2576_s17 + $0x90] ss:$8 sps:$4 sm:$0xff]  }
  0x23   : > { %v2351_v20 = vld [vmem:[%s2576_s17 + $0xa4] ss:$8 sps:$4 sm:$0xff]   ;;  %v2353_v21 = vld [vmem:[%s2576_s17 + $0xa0] ss:$8 sps:$4 sm:$0xff]   ;;  %v2354_v22 = vld [vmem:[%s2576_s17 + $0xb4] ss:$8 sps:$4 sm:$0xff]  }
  0x24   : > { %828 = vmatpush1.bf16.msra.mxu0 %v2271_v30  ;;  %1021 = vmatpush1.bf16.msra.mxu1 %v2272_v31  ;;  %v2356_v23 = vld [vmem:[%s2576_s17 + $0xb0] ss:$8 sps:$4 sm:$0xff]   ;;  %v2357_v24 = vld [vmem:[%s2576_s17 + $0xc4] ss:$8 sps:$4 sm:$0xff]   ;;  %v2359_v25 = vld [vmem:[%s2576_s17 + $0xc0] ss:$8 sps:$4 sm:$0xff]  }
  0x25   : > { %829 = vmatprep.subr.bf16.mxu0 %v2273_v32  ;;  %1022 = vmatprep.subr.bf16.mxu1 %v2275_v33  ;;  %v2360_v26 = vld [vmem:[%s2576_s17 + $0xd4] ss:$8 sps:$4 sm:$0xff]   ;;  %v2362_v27 = vld [vmem:[%s2576_s17 + $0xd0] ss:$8 sps:$4 sm:$0xff]   ;;  %v2363_v28 = vld [vmem:[%s2576_s17 + $0xe4] ss:$8 sps:$4 sm:$0xff]   ;;  %v313_v32 = vlaneseq }
  0x26   : > { %v2365_v29 = vld [vmem:[%s2576_s17 + $0xe0] ss:$8 sps:$4 sm:$0xff]   ;;  %v2366_v30 = vld [vmem:[%s2576_s17 + $0xf4] ss:$8 sps:$4 sm:$0xff]   ;;  %v2368_v31 = vld [vmem:[%s2576_s17 + $0xf0] ss:$8 sps:$4 sm:$0xff]  }
  0x27   : > { %v314_v33 = vshrl.u32 %v313_v32, 7  ;;  %s2136_s17 = sshll.u32 %s2894_s12, 9 }
  0x28   : > { %830 = vmatpush1.bf16.msra.mxu0 %v2277_v34  ;;  %1023 = vmatpush1.bf16.msra.mxu1 %v2278_v35  ;;  %s2690_s10 = scalar_lea.vmem %s2888_s3, %s2136_s17 }
  0x29   : > { %831 = vmatprep.subr.bf16.mxu0 %v2279_v36  ;;  %1024 = vmatprep.subr.bf16.mxu1 %v2281_v37  ;;  %v315_v34 = vsub.s32 0, %v314_v33  ;;  %v323_v35 = vsub.s32 2, %v314_v33  ;;  %v311_v36 = vld [vmem:[%s2887_s2] sm:$0xf]  ;;  %v319_v37 = vsub.s32 1, %v314_v33 }
  0x2c   : > { %832 = vmatpush1.bf16.msra.mxu0 %v2283_v38  ;;  %1025 = vmatpush1.bf16.msra.mxu1 %v2284_v39  ;;  %v327_v38 = vsub.s32 3, %v314_v33  ;;  %v2670_v39 = vrot.slane %v311_v36, %v315_v34 }
  0x2d   : > { %833 = vmatprep.subr.bf16.mxu0 %v2285_v40  ;;  %1026 = vmatprep.subr.bf16.mxu1 %v2287_v41  ;;  %v2672_v40 = vrot.slane %v311_v36, %v323_v35  ;;  %v2674_v41 = vrot.slane %v311_v36, %v319_v37 }
  0x30   : > { %834 = vmatpush1.bf16.msra.mxu0 %v2289_v42  ;;  %1027 = vmatpush1.bf16.msra.mxu1 %v2290_v43  ;;  %v2676_v42 = vrot.slane %v311_v36, %v327_v38 }
  0x31   : > { %835 = vmatprep.subr.bf16.mxu0 %v2291_v44  ;;  %1028 = vmatprep.subr.bf16.mxu1 %v2293_v45 }
  0x34   : > { %836 = vmatpush1.bf16.msra.mxu0 %v2295_v46  ;;  %1029 = vmatpush1.bf16.msra.mxu1 %v2296_v47 }
  0x35   : > { %837 = vmatprep.subr.bf16.mxu0 %v2297_v49  ;;  %1030 = vmatprep.subr.bf16.mxu1 %v2299_v50 }
  0x38   : > { %838 = vmatpush1.bf16.msra.mxu0 %v2301_v51  ;;  %1031 = vmatpush1.bf16.msra.mxu1 %v2302_v52 }
  0x39   : > { %839 = vmatprep.subr.bf16.mxu0 %v2303_v53  ;;  %1032 = vmatprep.subr.bf16.mxu1 %v2305_v54 }
  0x3c   : > { %840 = vmatpush1.bf16.msra.mxu0 %v2307_v55  ;;  %1033 = vmatpush1.bf16.msra.mxu1 %v2308_v56 }
  0x3d   : > { %841 = vmatprep.subr.bf16.mxu0 %v2309_v57  ;;  %1034 = vmatprep.subr.bf16.mxu1 %v2311_v58 }
  0x40   : > { %842 = vmatpush1.bf16.msra.mxu0 %v2313_v59  ;;  %1035 = vmatpush1.bf16.msra.mxu1 %v2314_v60 }
  0x41   : > { %843 = vmatprep.subr.bf16.mxu0 %v2315_v61  ;;  %1036 = vmatprep.subr.bf16.mxu1 %v2317_v62 }
  0x44   : > { %844 = vmatpush1.bf16.msra.mxu0 %v2319_v63  ;;  %1037 = vmatpush1.bf16.msra.mxu1 %v2320_v0 }
  0x47   : > { %846 = vmatmul.mubr.bf16.vlgmr.msra.gmra.mrb[0].mxu0 %v2321_v1  ;;  %1039 = vmatmul.mubr.bf16.vlgmr.msra.gmra.mrb[0].mxu1 %v2321_v1 }
  0x48   : > { %855 = vmatprep.mubr.bf16.mxu0 %v2324_v2  ;;  %1048 = vmatprep.mubr.bf16.mxu1 %v2324_v2 }
  0x4f   : > { %856 = vmatmul.mubr.bf16.gmra.mrb[4].mxu0 %v2326_v3  ;;  %1049 = vmatmul.mubr.bf16.gmra.mrb[4].mxu1 %v2326_v3 }
  0x50   : > { %865 = vmatprep.mubr.bf16.mxu0 %v2327_v4  ;;  %1058 = vmatprep.mubr.bf16.mxu1 %v2327_v4 }
  0x57   : > { %866 = vmatmul.mubr.bf16.gmra.mrb[8].mxu0 %v2329_v5  ;;  %1059 = vmatmul.mubr.bf16.gmra.mrb[8].mxu1 %v2329_v5 }
  0x58   : > { %875 = vmatprep.mubr.bf16.mxu0 %v2330_v6  ;;  %1068 = vmatprep.mubr.bf16.mxu1 %v2330_v6 }
  0x5f   : > { %876 = vmatmul.mubr.bf16.gmra.mrb[12].mxu0 %v2332_v7  ;;  %1069 = vmatmul.mubr.bf16.gmra.mrb[12].mxu1 %v2332_v7 }
  0x60   : > { %885 = vmatprep.mubr.bf16.mxu0 %v2333_v8  ;;  %1078 = vmatprep.mubr.bf16.mxu1 %v2333_v8 }
  0x67   : > { %886 = vmatmul.mubr.bf16.gmra.mrb[16].mxu0 %v2335_v9  ;;  %1079 = vmatmul.mubr.bf16.gmra.mrb[16].mxu1 %v2335_v9 }
  0x68   : > { %895 = vmatprep.mubr.bf16.mxu0 %v2336_v10  ;;  %1088 = vmatprep.mubr.bf16.mxu1 %v2336_v10 }
  0x6f   : > { %896 = vmatmul.mubr.bf16.gmra.mrb[20].mxu0 %v2338_v11  ;;  %1089 = vmatmul.mubr.bf16.gmra.mrb[20].mxu1 %v2338_v11 }
  0x70   : > { %905 = vmatprep.mubr.bf16.mxu0 %v2339_v12  ;;  %1098 = vmatprep.mubr.bf16.mxu1 %v2339_v12 }
  0x77   : > { %906 = vmatmul.mubr.bf16.gmra.mrb[24].mxu0 %v2341_v13  ;;  %1099 = vmatmul.mubr.bf16.gmra.mrb[24].mxu1 %v2341_v13 }
  0x78   : > { %915 = vmatprep.mubr.bf16.mxu0 %v2342_v14  ;;  %1108 = vmatprep.mubr.bf16.mxu1 %v2342_v14 }
  0x7f   : > { %916 = vmatmul.mubr.bf16.gmra.mrb[28].mxu0 %v2344_v15  ;;  %1109 = vmatmul.mubr.bf16.gmra.mrb[28].mxu1 %v2344_v15 }
  0x80   : > { %925 = vmatprep.mubr.bf16.mxu0 %v2345_v16  ;;  %1118 = vmatprep.mubr.bf16.mxu1 %v2345_v16 }
  0x87   : > { %926 = vmatmul.mubr.bf16.gmra.mrb[32].mxu0 %v2347_v17  ;;  %1119 = vmatmul.mubr.bf16.gmra.mrb[32].mxu1 %v2347_v17 }
  0x88   : > { %935 = vmatprep.mubr.bf16.mxu0 %v2348_v18  ;;  %1128 = vmatprep.mubr.bf16.mxu1 %v2348_v18 }
  0x8f   : > { %936 = vmatmul.mubr.bf16.gmra.mrb[36].mxu0 %v2350_v19  ;;  %1129 = vmatmul.mubr.bf16.gmra.mrb[36].mxu1 %v2350_v19 }
  0x90   : > { %945 = vmatprep.mubr.bf16.mxu0 %v2351_v20  ;;  %1138 = vmatprep.mubr.bf16.mxu1 %v2351_v20 }
  0x97   : > { %946 = vmatmul.mubr.bf16.gmra.mrb[40].mxu0 %v2353_v21  ;;  %1139 = vmatmul.mubr.bf16.gmra.mrb[40].mxu1 %v2353_v21 }
  0x98   : > { %955 = vmatprep.mubr.bf16.mxu0 %v2354_v22  ;;  %1148 = vmatprep.mubr.bf16.mxu1 %v2354_v22 }
  0x9f   : > { %956 = vmatmul.mubr.bf16.gmra.mrb[44].mxu0 %v2356_v23  ;;  %1149 = vmatmul.mubr.bf16.gmra.mrb[44].mxu1 %v2356_v23 }
  0xa0   : > { %965 = vmatprep.mubr.bf16.mxu0 %v2357_v24  ;;  %1158 = vmatprep.mubr.bf16.mxu1 %v2357_v24 }
  0xa7   : > { %966 = vmatmul.mubr.bf16.gmra.mrb[48].mxu0 %v2359_v25  ;;  %1159 = vmatmul.mubr.bf16.gmra.mrb[48].mxu1 %v2359_v25 }
  0xa8   : > { %975 = vmatprep.mubr.bf16.mxu0 %v2360_v26  ;;  %1168 = vmatprep.mubr.bf16.mxu1 %v2360_v26 }
  0xaf   : > { %976 = vmatmul.mubr.bf16.gmra.mrb[52].mxu0 %v2362_v27  ;;  %1169 = vmatmul.mubr.bf16.gmra.mrb[52].mxu1 %v2362_v27 }
  0xb0   : > { %985 = vmatprep.mubr.bf16.mxu0 %v2363_v28  ;;  %1178 = vmatprep.mubr.bf16.mxu1 %v2363_v28 }
  0xb7   : > { %986 = vmatmul.mubr.bf16.gmra.mrb[56].mxu0 %v2365_v29  ;;  %1179 = vmatmul.mubr.bf16.gmra.mrb[56].mxu1 %v2365_v29 }
  0xb8   : > { %995 = vmatprep.mubr.bf16.mxu0 %v2366_v30  ;;  %1188 = vmatprep.mubr.bf16.mxu1 %v2366_v30 }
  0xbf   : > { %996 = vmatmul.mubr.bf16.gmra.mrb[60].mxu0 %v2368_v31  ;;  %1189 = vmatmul.mubr.bf16.gmra.mrb[60].mxu1 %v2368_v31 }
 0x11a   : > { %v847_v43 = vpop.f32.mrb[0].mxu0  ;;  %v1040_v44 = vpop.f32.mrb[0].mxu1 }
 0x11b   : > { %v848_v45 = vadd.f32 %v847_v43, %v2670_v39  ;;  %v1041_v46 = vadd.f32 %v1040_v44, %v2672_v40  ;;  %v849_v47 = vpop.f32.mrb[1].mxu0  ;;  %v1042_v48 = vpop.f32.mrb[1].mxu1 }
 0x11c   : > { %v850_v49 = vadd.f32 %v849_v47, %v2674_v41  ;;  %v1043_v50 = vadd.f32 %v1042_v48, %v2676_v42  ;;  %v851_v51 = vpop.f32.mrb[2].mxu0  ;;  %v1044_v52 = vpop.f32.mrb[2].mxu1 }
 0x11d   : > { %v1199_v53 = vmax.f32 %v848_v45, 0.0  ;;  %v1201_v54 = vmax.f32 %v1041_v46, 0.0  ;;  %v852_v55 = vadd.f32 %v851_v51, %v2670_v39  ;;  %v1045_v56 = vadd.f32 %v1044_v52, %v2672_v40  ;;  %v853_v57 = vpop.f32.mrb[3].mxu0  ;;  %v1046_v58 = vpop.f32.mrb[3].mxu1 }
 0x11e   : > { %v1200_v59 = vmax.f32 %v850_v49, 0.0  ;;  %v1202_v60 = vmax.f32 %v1043_v50, 0.0  ;;  %v854_v61 = vadd.f32 %v853_v57, %v2674_v41  ;;  %v1047_v62 = vadd.f32 %v1046_v58, %v2676_v42 }
 0x11f   : > { %v1203_v63 = vmax.f32 %v852_v55, 0.0  ;;  %v1205_v0 = vmax.f32 %v1045_v56, 0.0 }
 0x120   : > { %v2137_v1 = vpack.c.bf16 %v1200_v59, %v1199_v53  ;;  %v2139_v2 = vpack.c.bf16 %v1202_v60, %v1201_v54  ;;  %v1204_v3 = vmax.f32 %v854_v61, 0.0  ;;  %v1206_v4 = vmax.f32 %v1047_v62, 0.0 }
 0x122   : > { %1401 = vst [vmem:[%s2690_s10] sm:$0xff] %v2137_v1  ;;  %2011 = vst [vmem:[%s2690_s10 + $0x10] sm:$0xff] %v2139_v2  ;;  %v2138_v5 = vpack.c.bf16 %v1204_v3, %v1203_v63  ;;  %v2140_v6 = vpack.c.bf16 %v1206_v4, %v1205_v0  ;;  %v857_v7 = vpop.f32.mrb[4].mxu0  ;;  %v1050_v8 = vpop.f32.mrb[4].mxu1 }
 0x123   : > { %v858_v9 = vadd.f32 %v857_v7, %v2670_v39  ;;  %v1051_v10 = vadd.f32 %v1050_v8, %v2672_v40  ;;  %v859_v11 = vpop.f32.mrb[5].mxu0  ;;  %v1052_v12 = vpop.f32.mrb[5].mxu1 }
 0x124   : > { %1402 = vst [vmem:[%s2690_s10 + $0x8] sm:$0xff] %v2138_v5  ;;  %2012 = vst [vmem:[%s2690_s10 + $0x18] sm:$0xff] %v2140_v6  ;;  %v860_v13 = vadd.f32 %v859_v11, %v2674_v41  ;;  %v1053_v14 = vadd.f32 %v1052_v12, %v2676_v42  ;;  %v861_v15 = vpop.f32.mrb[6].mxu0  ;;  %v1054_v16 = vpop.f32.mrb[6].mxu1 }
 0x125   : > { %v1207_v17 = vmax.f32 %v858_v9, 0.0  ;;  %v1209_v18 = vmax.f32 %v1051_v10, 0.0  ;;  %v862_v19 = vadd.f32 %v861_v15, %v2670_v39  ;;  %v1055_v20 = vadd.f32 %v1054_v16, %v2672_v40  ;;  %v863_v21 = vpop.f32.mrb[7].mxu0  ;;  %v1056_v22 = vpop.f32.mrb[7].mxu1 }
 0x126   : > { %v1208_v23 = vmax.f32 %v860_v13, 0.0  ;;  %v1210_v24 = vmax.f32 %v1053_v14, 0.0  ;;  %v864_v25 = vadd.f32 %v863_v21, %v2674_v41  ;;  %v1057_v26 = vadd.f32 %v1056_v22, %v2676_v42 }
 0x127   : > { %v1211_v27 = vmax.f32 %v862_v19, 0.0  ;;  %v1213_v28 = vmax.f32 %v1055_v20, 0.0 }
 0x128   : > { %v2141_v29 = vpack.c.bf16 %v1208_v23, %v1207_v17  ;;  %v2143_v30 = vpack.c.bf16 %v1210_v24, %v1209_v18  ;;  %v1212_v31 = vmax.f32 %v864_v25, 0.0  ;;  %v1214_v32 = vmax.f32 %v1057_v26, 0.0 }
 0x12a   : > { %2015 = vst [vmem:[%s2690_s10 + $0x20] sm:$0xff] %v2141_v29  ;;  %2019 = vst [vmem:[%s2690_s10 + $0x30] sm:$0xff] %v2143_v30  ;;  %v2142_v33 = vpack.c.bf16 %v1212_v31, %v1211_v27  ;;  %v2144_v34 = vpack.c.bf16 %v1214_v32, %v1213_v28  ;;  %v867_v35 = vpop.f32.mrb[8].mxu0  ;;  %v1060_v36 = vpop.f32.mrb[8].mxu1 }
 0x12b   : > { %v868_v37 = vadd.f32 %v867_v35, %v2670_v39  ;;  %v1061_v38 = vadd.f32 %v1060_v36, %v2672_v40  ;;  %v869_v43 = vpop.f32.mrb[9].mxu0  ;;  %v1062_v44 = vpop.f32.mrb[9].mxu1 }
 0x12c   : > { %2016 = vst [vmem:[%s2690_s10 + $0x28] sm:$0xff] %v2142_v33  ;;  %2020 = vst [vmem:[%s2690_s10 + $0x38] sm:$0xff] %v2144_v34  ;;  %v870_v45 = vadd.f32 %v869_v43, %v2674_v41  ;;  %v1063_v46 = vadd.f32 %v1062_v44, %v2676_v42  ;;  %v871_v47 = vpop.f32.mrb[10].mxu0  ;;  %v1064_v48 = vpop.f32.mrb[10].mxu1 }
 0x12d   : > { %v1215_v49 = vmax.f32 %v868_v37, 0.0  ;;  %v1217_v50 = vmax.f32 %v1061_v38, 0.0  ;;  %v872_v51 = vadd.f32 %v871_v47, %v2670_v39  ;;  %v1065_v52 = vadd.f32 %v1064_v48, %v2672_v40  ;;  %v873_v53 = vpop.f32.mrb[11].mxu0  ;;  %v1066_v54 = vpop.f32.mrb[11].mxu1 }
 0x12e   : > { %v1216_v55 = vmax.f32 %v870_v45, 0.0  ;;  %v1218_v56 = vmax.f32 %v1063_v46, 0.0  ;;  %v874_v57 = vadd.f32 %v873_v53, %v2674_v41  ;;  %v1067_v58 = vadd.f32 %v1066_v54, %v2676_v42 }
 0x12f   : > { %v1219_v59 = vmax.f32 %v872_v51, 0.0  ;;  %v1221_v60 = vmax.f32 %v1065_v52, 0.0 }
 0x130   : > { %v2145_v61 = vpack.c.bf16 %v1216_v55, %v1215_v49  ;;  %v2147_v62 = vpack.c.bf16 %v1218_v56, %v1217_v50  ;;  %v1220_v63 = vmax.f32 %v874_v57, 0.0  ;;  %v1222_v0 = vmax.f32 %v1067_v58, 0.0 }
 0x132   : > { %2023 = vst [vmem:[%s2690_s10 + $0x40] sm:$0xff] %v2145_v61  ;;  %2027 = vst [vmem:[%s2690_s10 + $0x50] sm:$0xff] %v2147_v62  ;;  %v2146_v1 = vpack.c.bf16 %v1220_v63, %v1219_v59  ;;  %v2148_v2 = vpack.c.bf16 %v1222_v0, %v1221_v60  ;;  %v877_v3 = vpop.f32.mrb[12].mxu0  ;;  %v1070_v4 = vpop.f32.mrb[12].mxu1 }
 0x133   : > { %v878_v5 = vadd.f32 %v877_v3, %v2670_v39  ;;  %v1071_v6 = vadd.f32 %v1070_v4, %v2672_v40  ;;  %v879_v7 = vpop.f32.mrb[13].mxu0  ;;  %v1072_v8 = vpop.f32.mrb[13].mxu1 }
 0x134   : > { %2024 = vst [vmem:[%s2690_s10 + $0x48] sm:$0xff] %v2146_v1  ;;  %2028 = vst [vmem:[%s2690_s10 + $0x58] sm:$0xff] %v2148_v2  ;;  %v880_v9 = vadd.f32 %v879_v7, %v2674_v41  ;;  %v1073_v10 = vadd.f32 %v1072_v8, %v2676_v42  ;;  %v881_v11 = vpop.f32.mrb[14].mxu0  ;;  %v1074_v12 = vpop.f32.mrb[14].mxu1 }
 0x135   : > { %v1223_v13 = vmax.f32 %v878_v5, 0.0  ;;  %v1225_v14 = vmax.f32 %v1071_v6, 0.0  ;;  %v882_v15 = vadd.f32 %v881_v11, %v2670_v39  ;;  %v1075_v16 = vadd.f32 %v1074_v12, %v2672_v40  ;;  %v883_v17 = vpop.f32.mrb[15].mxu0  ;;  %v1076_v18 = vpop.f32.mrb[15].mxu1 }
 0x136   : > { %v1224_v19 = vmax.f32 %v880_v9, 0.0  ;;  %v1226_v20 = vmax.f32 %v1073_v10, 0.0  ;;  %v884_v21 = vadd.f32 %v883_v17, %v2674_v41  ;;  %v1077_v22 = vadd.f32 %v1076_v18, %v2676_v42 }
 0x137   : > { %v1227_v23 = vmax.f32 %v882_v15, 0.0  ;;  %v1229_v24 = vmax.f32 %v1075_v16, 0.0 }
 0x138   : > { %v2149_v25 = vpack.c.bf16 %v1224_v19, %v1223_v13  ;;  %v2151_v26 = vpack.c.bf16 %v1226_v20, %v1225_v14  ;;  %v1228_v27 = vmax.f32 %v884_v21, 0.0  ;;  %v1230_v28 = vmax.f32 %v1077_v22, 0.0 }
 0x13a   : > { %2031 = vst [vmem:[%s2690_s10 + $0x60] sm:$0xff] %v2149_v25  ;;  %2035 = vst [vmem:[%s2690_s10 + $0x70] sm:$0xff] %v2151_v26  ;;  %v2150_v29 = vpack.c.bf16 %v1228_v27, %v1227_v23  ;;  %v2152_v30 = vpack.c.bf16 %v1230_v28, %v1229_v24  ;;  %v887_v31 = vpop.f32.mrb[16].mxu0  ;;  %v1080_v32 = vpop.f32.mrb[16].mxu1 }
 0x13b   : > { %v888_v33 = vadd.f32 %v887_v31, %v2670_v39  ;;  %v1081_v34 = vadd.f32 %v1080_v32, %v2672_v40  ;;  %v889_v35 = vpop.f32.mrb[17].mxu0  ;;  %v1082_v36 = vpop.f32.mrb[17].mxu1 }
 0x13c   : > { %2032 = vst [vmem:[%s2690_s10 + $0x68] sm:$0xff] %v2150_v29  ;;  %2036 = vst [vmem:[%s2690_s10 + $0x78] sm:$0xff] %v2152_v30  ;;  %v890_v37 = vadd.f32 %v889_v35, %v2674_v41  ;;  %v1083_v38 = vadd.f32 %v1082_v36, %v2676_v42  ;;  %v891_v43 = vpop.f32.mrb[18].mxu0  ;;  %v1084_v44 = vpop.f32.mrb[18].mxu1 }
 0x13d   : > { %v1231_v45 = vmax.f32 %v888_v33, 0.0  ;;  %v1233_v46 = vmax.f32 %v1081_v34, 0.0  ;;  %v892_v47 = vadd.f32 %v891_v43, %v2670_v39  ;;  %v1085_v48 = vadd.f32 %v1084_v44, %v2672_v40  ;;  %v893_v49 = vpop.f32.mrb[19].mxu0  ;;  %v1086_v50 = vpop.f32.mrb[19].mxu1 }
 0x13e   : > { %v1232_v51 = vmax.f32 %v890_v37, 0.0  ;;  %v1234_v52 = vmax.f32 %v1083_v38, 0.0  ;;  %v894_v53 = vadd.f32 %v893_v49, %v2674_v41  ;;  %v1087_v54 = vadd.f32 %v1086_v50, %v2676_v42 }
 0x13f   : > { %v1235_v55 = vmax.f32 %v892_v47, 0.0  ;;  %v1237_v56 = vmax.f32 %v1085_v48, 0.0 }
 0x140   : > { %v2153_v57 = vpack.c.bf16 %v1232_v51, %v1231_v45  ;;  %v2155_v58 = vpack.c.bf16 %v1234_v52, %v1233_v46  ;;  %v1236_v59 = vmax.f32 %v894_v53, 0.0  ;;  %v1238_v60 = vmax.f32 %v1087_v54, 0.0 }
 0x142   : > { %2039 = vst [vmem:[%s2690_s10 + $0x80] sm:$0xff] %v2153_v57  ;;  %2043 = vst [vmem:[%s2690_s10 + $0x90] sm:$0xff] %v2155_v58  ;;  %v2154_v61 = vpack.c.bf16 %v1236_v59, %v1235_v55  ;;  %v2156_v62 = vpack.c.bf16 %v1238_v60, %v1237_v56  ;;  %v897_v63 = vpop.f32.mrb[20].mxu0  ;;  %v1090_v0 = vpop.f32.mrb[20].mxu1 }
 0x143   : > { %v898_v1 = vadd.f32 %v897_v63, %v2670_v39  ;;  %v1091_v2 = vadd.f32 %v1090_v0, %v2672_v40  ;;  %v899_v3 = vpop.f32.mrb[21].mxu0  ;;  %v1092_v4 = vpop.f32.mrb[21].mxu1 }
 0x144   : > { %2040 = vst [vmem:[%s2690_s10 + $0x88] sm:$0xff] %v2154_v61  ;;  %2044 = vst [vmem:[%s2690_s10 + $0x98] sm:$0xff] %v2156_v62  ;;  %v900_v5 = vadd.f32 %v899_v3, %v2674_v41  ;;  %v1093_v6 = vadd.f32 %v1092_v4, %v2676_v42  ;;  %v901_v7 = vpop.f32.mrb[22].mxu0  ;;  %v1094_v8 = vpop.f32.mrb[22].mxu1 }
 0x145   : > { %v1239_v9 = vmax.f32 %v898_v1, 0.0  ;;  %v1241_v10 = vmax.f32 %v1091_v2, 0.0  ;;  %v902_v11 = vadd.f32 %v901_v7, %v2670_v39  ;;  %v1095_v12 = vadd.f32 %v1094_v8, %v2672_v40  ;;  %v903_v13 = vpop.f32.mrb[23].mxu0  ;;  %v1096_v14 = vpop.f32.mrb[23].mxu1 }
 0x146   : > { %v1240_v15 = vmax.f32 %v900_v5, 0.0  ;;  %v1242_v16 = vmax.f32 %v1093_v6, 0.0  ;;  %v904_v17 = vadd.f32 %v903_v13, %v2674_v41  ;;  %v1097_v18 = vadd.f32 %v1096_v14, %v2676_v42 }
 0x147   : > { %v1243_v19 = vmax.f32 %v902_v11, 0.0  ;;  %v1245_v20 = vmax.f32 %v1095_v12, 0.0 }
 0x148   : > { %v2157_v21 = vpack.c.bf16 %v1240_v15, %v1239_v9  ;;  %v2159_v22 = vpack.c.bf16 %v1242_v16, %v1241_v10  ;;  %v1244_v23 = vmax.f32 %v904_v17, 0.0  ;;  %v1246_v24 = vmax.f32 %v1097_v18, 0.0 }
 0x14a   : > { %2047 = vst [vmem:[%s2690_s10 + $0xa0] sm:$0xff] %v2157_v21  ;;  %2051 = vst [vmem:[%s2690_s10 + $0xb0] sm:$0xff] %v2159_v22  ;;  %v2158_v25 = vpack.c.bf16 %v1244_v23, %v1243_v19  ;;  %v2160_v26 = vpack.c.bf16 %v1246_v24, %v1245_v20  ;;  %v907_v27 = vpop.f32.mrb[24].mxu0  ;;  %v1100_v28 = vpop.f32.mrb[24].mxu1 }
 0x14b   : > { %v908_v29 = vadd.f32 %v907_v27, %v2670_v39  ;;  %v1101_v30 = vadd.f32 %v1100_v28, %v2672_v40  ;;  %v909_v31 = vpop.f32.mrb[25].mxu0  ;;  %v1102_v32 = vpop.f32.mrb[25].mxu1 }
 0x14c   : > { %2048 = vst [vmem:[%s2690_s10 + $0xa8] sm:$0xff] %v2158_v25  ;;  %2052 = vst [vmem:[%s2690_s10 + $0xb8] sm:$0xff] %v2160_v26  ;;  %v910_v33 = vadd.f32 %v909_v31, %v2674_v41  ;;  %v1103_v34 = vadd.f32 %v1102_v32, %v2676_v42  ;;  %v911_v35 = vpop.f32.mrb[26].mxu0  ;;  %v1104_v36 = vpop.f32.mrb[26].mxu1 }
 0x14d   : > { %v1247_v37 = vmax.f32 %v908_v29, 0.0  ;;  %v1249_v38 = vmax.f32 %v1101_v30, 0.0  ;;  %v912_v43 = vadd.f32 %v911_v35, %v2670_v39  ;;  %v1105_v44 = vadd.f32 %v1104_v36, %v2672_v40  ;;  %v913_v45 = vpop.f32.mrb[27].mxu0  ;;  %v1106_v46 = vpop.f32.mrb[27].mxu1 }
 0x14e   : > { %v1248_v47 = vmax.f32 %v910_v33, 0.0  ;;  %v1250_v48 = vmax.f32 %v1103_v34, 0.0  ;;  %v914_v49 = vadd.f32 %v913_v45, %v2674_v41  ;;  %v1107_v50 = vadd.f32 %v1106_v46, %v2676_v42 }
 0x14f   : > { %v1251_v51 = vmax.f32 %v912_v43, 0.0  ;;  %v1253_v52 = vmax.f32 %v1105_v44, 0.0 }
 0x150   : > { %v2161_v53 = vpack.c.bf16 %v1248_v47, %v1247_v37  ;;  %v2163_v54 = vpack.c.bf16 %v1250_v48, %v1249_v38  ;;  %v1252_v55 = vmax.f32 %v914_v49, 0.0  ;;  %v1254_v56 = vmax.f32 %v1107_v50, 0.0 }
 0x152   : > { %2055 = vst [vmem:[%s2690_s10 + $0xc0] sm:$0xff] %v2161_v53  ;;  %2059 = vst [vmem:[%s2690_s10 + $0xd0] sm:$0xff] %v2163_v54  ;;  %v2162_v57 = vpack.c.bf16 %v1252_v55, %v1251_v51  ;;  %v2164_v58 = vpack.c.bf16 %v1254_v56, %v1253_v52  ;;  %v917_v59 = vpop.f32.mrb[28].mxu0  ;;  %v1110_v60 = vpop.f32.mrb[28].mxu1 }
 0x153   : > { %v918_v61 = vadd.f32 %v917_v59, %v2670_v39  ;;  %v1111_v62 = vadd.f32 %v1110_v60, %v2672_v40  ;;  %v919_v63 = vpop.f32.mrb[29].mxu0  ;;  %v1112_v0 = vpop.f32.mrb[29].mxu1 }
 0x154   : > { %2056 = vst [vmem:[%s2690_s10 + $0xc8] sm:$0xff] %v2162_v57  ;;  %2060 = vst [vmem:[%s2690_s10 + $0xd8] sm:$0xff] %v2164_v58  ;;  %v920_v1 = vadd.f32 %v919_v63, %v2674_v41  ;;  %v1113_v2 = vadd.f32 %v1112_v0, %v2676_v42  ;;  %v921_v3 = vpop.f32.mrb[30].mxu0  ;;  %v1114_v4 = vpop.f32.mrb[30].mxu1 }
 0x155   : > { %v1255_v5 = vmax.f32 %v918_v61, 0.0  ;;  %v1257_v6 = vmax.f32 %v1111_v62, 0.0  ;;  %v922_v7 = vadd.f32 %v921_v3, %v2670_v39  ;;  %v1115_v8 = vadd.f32 %v1114_v4, %v2672_v40  ;;  %v923_v9 = vpop.f32.mrb[31].mxu0  ;;  %v1116_v10 = vpop.f32.mrb[31].mxu1 }
 0x156   : > { %v1256_v11 = vmax.f32 %v920_v1, 0.0  ;;  %v1258_v12 = vmax.f32 %v1113_v2, 0.0  ;;  %v924_v13 = vadd.f32 %v923_v9, %v2674_v41  ;;  %v1117_v14 = vadd.f32 %v1116_v10, %v2676_v42 }
 0x157   : > { %v1259_v15 = vmax.f32 %v922_v7, 0.0  ;;  %v1261_v16 = vmax.f32 %v1115_v8, 0.0 }
 0x158   : > { %v2165_v17 = vpack.c.bf16 %v1256_v11, %v1255_v5  ;;  %v2167_v18 = vpack.c.bf16 %v1258_v12, %v1257_v6  ;;  %v1260_v19 = vmax.f32 %v924_v13, 0.0  ;;  %v1262_v20 = vmax.f32 %v1117_v14, 0.0 }
 0x15a   : > { %2063 = vst [vmem:[%s2690_s10 + $0xe0] sm:$0xff] %v2165_v17  ;;  %2067 = vst [vmem:[%s2690_s10 + $0xf0] sm:$0xff] %v2167_v18  ;;  %v2166_v21 = vpack.c.bf16 %v1260_v19, %v1259_v15  ;;  %v2168_v22 = vpack.c.bf16 %v1262_v20, %v1261_v16  ;;  %v927_v23 = vpop.f32.mrb[32].mxu0  ;;  %v1120_v24 = vpop.f32.mrb[32].mxu1 }
 0x15b   : > { %v928_v25 = vadd.f32 %v927_v23, %v2670_v39  ;;  %v1121_v26 = vadd.f32 %v1120_v24, %v2672_v40  ;;  %v929_v27 = vpop.f32.mrb[33].mxu0  ;;  %v1122_v28 = vpop.f32.mrb[33].mxu1 }
 0x15c   : > { %2064 = vst [vmem:[%s2690_s10 + $0xe8] sm:$0xff] %v2166_v21  ;;  %2068 = vst [vmem:[%s2690_s10 + $0xf8] sm:$0xff] %v2168_v22  ;;  %v930_v29 = vadd.f32 %v929_v27, %v2674_v41  ;;  %v1123_v30 = vadd.f32 %v1122_v28, %v2676_v42  ;;  %v931_v31 = vpop.f32.mrb[34].mxu0  ;;  %v1124_v32 = vpop.f32.mrb[34].mxu1 }
 0x15d   : > { %v1263_v33 = vmax.f32 %v928_v25, 0.0  ;;  %v1265_v34 = vmax.f32 %v1121_v26, 0.0  ;;  %v932_v35 = vadd.f32 %v931_v31, %v2670_v39  ;;  %v1125_v36 = vadd.f32 %v1124_v32, %v2672_v40  ;;  %v933_v37 = vpop.f32.mrb[35].mxu0  ;;  %v1126_v38 = vpop.f32.mrb[35].mxu1 }
 0x15e   : > { %v1264_v43 = vmax.f32 %v930_v29, 0.0  ;;  %v1266_v44 = vmax.f32 %v1123_v30, 0.0  ;;  %v934_v45 = vadd.f32 %v933_v37, %v2674_v41  ;;  %v1127_v46 = vadd.f32 %v1126_v38, %v2676_v42 }
 0x15f   : > { %v1267_v47 = vmax.f32 %v932_v35, 0.0  ;;  %v1269_v48 = vmax.f32 %v1125_v36, 0.0 }
 0x160   : > { %v2169_v49 = vpack.c.bf16 %v1264_v43, %v1263_v33  ;;  %v2171_v50 = vpack.c.bf16 %v1266_v44, %v1265_v34  ;;  %v1268_v51 = vmax.f32 %v934_v45, 0.0  ;;  %v1270_v52 = vmax.f32 %v1127_v46, 0.0 }
 0x162   : > { %2071 = vst [vmem:[%s2690_s10 + $0x100] sm:$0xff] %v2169_v49  ;;  %2075 = vst [vmem:[%s2690_s10 + $0x110] sm:$0xff] %v2171_v50  ;;  %v2170_v53 = vpack.c.bf16 %v1268_v51, %v1267_v47  ;;  %v2172_v54 = vpack.c.bf16 %v1270_v52, %v1269_v48  ;;  %v937_v55 = vpop.f32.mrb[36].mxu0  ;;  %v1130_v56 = vpop.f32.mrb[36].mxu1 }
 0x163   : > { %v938_v57 = vadd.f32 %v937_v55, %v2670_v39  ;;  %v1131_v58 = vadd.f32 %v1130_v56, %v2672_v40  ;;  %v939_v59 = vpop.f32.mrb[37].mxu0  ;;  %v1132_v60 = vpop.f32.mrb[37].mxu1 }
 0x164   : > { %2072 = vst [vmem:[%s2690_s10 + $0x108] sm:$0xff] %v2170_v53  ;;  %2076 = vst [vmem:[%s2690_s10 + $0x118] sm:$0xff] %v2172_v54  ;;  %v940_v61 = vadd.f32 %v939_v59, %v2674_v41  ;;  %v1133_v62 = vadd.f32 %v1132_v60, %v2676_v42  ;;  %v941_v63 = vpop.f32.mrb[38].mxu0  ;;  %v1134_v0 = vpop.f32.mrb[38].mxu1 }
 0x165   : > { %v1271_v1 = vmax.f32 %v938_v57, 0.0  ;;  %v1273_v2 = vmax.f32 %v1131_v58, 0.0  ;;  %v942_v3 = vadd.f32 %v941_v63, %v2670_v39  ;;  %v1135_v4 = vadd.f32 %v1134_v0, %v2672_v40  ;;  %v943_v5 = vpop.f32.mrb[39].mxu0  ;;  %v1136_v6 = vpop.f32.mrb[39].mxu1 }
 0x166   : > { %v1272_v7 = vmax.f32 %v940_v61, 0.0  ;;  %v1274_v8 = vmax.f32 %v1133_v62, 0.0  ;;  %v944_v9 = vadd.f32 %v943_v5, %v2674_v41  ;;  %v1137_v10 = vadd.f32 %v1136_v6, %v2676_v42 }
 0x167   : > { %v1275_v11 = vmax.f32 %v942_v3, 0.0  ;;  %v1277_v12 = vmax.f32 %v1135_v4, 0.0 }
 0x168   : > { %v2173_v13 = vpack.c.bf16 %v1272_v7, %v1271_v1  ;;  %v2175_v14 = vpack.c.bf16 %v1274_v8, %v1273_v2  ;;  %v1276_v15 = vmax.f32 %v944_v9, 0.0  ;;  %v1278_v16 = vmax.f32 %v1137_v10, 0.0 }
 0x16a   : > { %2079 = vst [vmem:[%s2690_s10 + $0x120] sm:$0xff] %v2173_v13  ;;  %2083 = vst [vmem:[%s2690_s10 + $0x130] sm:$0xff] %v2175_v14  ;;  %v2174_v17 = vpack.c.bf16 %v1276_v15, %v1275_v11  ;;  %v2176_v18 = vpack.c.bf16 %v1278_v16, %v1277_v12  ;;  %v947_v19 = vpop.f32.mrb[40].mxu0  ;;  %v1140_v20 = vpop.f32.mrb[40].mxu1 }
 0x16b   : > { %v948_v21 = vadd.f32 %v947_v19, %v2670_v39  ;;  %v1141_v22 = vadd.f32 %v1140_v20, %v2672_v40  ;;  %v949_v23 = vpop.f32.mrb[41].mxu0  ;;  %v1142_v24 = vpop.f32.mrb[41].mxu1 }
 0x16c   : > { %2080 = vst [vmem:[%s2690_s10 + $0x128] sm:$0xff] %v2174_v17  ;;  %2084 = vst [vmem:[%s2690_s10 + $0x138] sm:$0xff] %v2176_v18  ;;  %v950_v25 = vadd.f32 %v949_v23, %v2674_v41  ;;  %v1143_v26 = vadd.f32 %v1142_v24, %v2676_v42  ;;  %v951_v27 = vpop.f32.mrb[42].mxu0  ;;  %v1144_v28 = vpop.f32.mrb[42].mxu1 }
 0x16d   : > { %v1279_v29 = vmax.f32 %v948_v21, 0.0  ;;  %v1281_v30 = vmax.f32 %v1141_v22, 0.0  ;;  %v952_v31 = vadd.f32 %v951_v27, %v2670_v39  ;;  %v1145_v32 = vadd.f32 %v1144_v28, %v2672_v40  ;;  %v953_v33 = vpop.f32.mrb[43].mxu0  ;;  %v1146_v34 = vpop.f32.mrb[43].mxu1 }
 0x16e   : > { %v1280_v35 = vmax.f32 %v950_v25, 0.0  ;;  %v1282_v36 = vmax.f32 %v1143_v26, 0.0  ;;  %v954_v37 = vadd.f32 %v953_v33, %v2674_v41  ;;  %v1147_v38 = vadd.f32 %v1146_v34, %v2676_v42 }
 0x16f   : > { %v1283_v43 = vmax.f32 %v952_v31, 0.0  ;;  %v1285_v44 = vmax.f32 %v1145_v32, 0.0 }
 0x170   : > { %v2177_v45 = vpack.c.bf16 %v1280_v35, %v1279_v29  ;;  %v2179_v46 = vpack.c.bf16 %v1282_v36, %v1281_v30  ;;  %v1284_v47 = vmax.f32 %v954_v37, 0.0  ;;  %v1286_v48 = vmax.f32 %v1147_v38, 0.0 }
 0x172   : > { %2087 = vst [vmem:[%s2690_s10 + $0x140] sm:$0xff] %v2177_v45  ;;  %2091 = vst [vmem:[%s2690_s10 + $0x150] sm:$0xff] %v2179_v46  ;;  %v2178_v49 = vpack.c.bf16 %v1284_v47, %v1283_v43  ;;  %v2180_v50 = vpack.c.bf16 %v1286_v48, %v1285_v44  ;;  %v957_v51 = vpop.f32.mrb[44].mxu0  ;;  %v1150_v52 = vpop.f32.mrb[44].mxu1 }
 0x173   : > { %v958_v53 = vadd.f32 %v957_v51, %v2670_v39  ;;  %v1151_v54 = vadd.f32 %v1150_v52, %v2672_v40  ;;  %v959_v55 = vpop.f32.mrb[45].mxu0  ;;  %v1152_v56 = vpop.f32.mrb[45].mxu1 }
 0x174   : > { %2088 = vst [vmem:[%s2690_s10 + $0x148] sm:$0xff] %v2178_v49  ;;  %2092 = vst [vmem:[%s2690_s10 + $0x158] sm:$0xff] %v2180_v50  ;;  %v960_v57 = vadd.f32 %v959_v55, %v2674_v41  ;;  %v1153_v58 = vadd.f32 %v1152_v56, %v2676_v42  ;;  %v961_v59 = vpop.f32.mrb[46].mxu0  ;;  %v1154_v60 = vpop.f32.mrb[46].mxu1 }
 0x175   : > { %v1287_v61 = vmax.f32 %v958_v53, 0.0  ;;  %v1289_v62 = vmax.f32 %v1151_v54, 0.0  ;;  %v962_v63 = vadd.f32 %v961_v59, %v2670_v39  ;;  %v1155_v0 = vadd.f32 %v1154_v60, %v2672_v40  ;;  %v963_v1 = vpop.f32.mrb[47].mxu0  ;;  %v1156_v2 = vpop.f32.mrb[47].mxu1 }
 0x176   : > { %v1288_v3 = vmax.f32 %v960_v57, 0.0  ;;  %v1290_v4 = vmax.f32 %v1153_v58, 0.0  ;;  %v964_v5 = vadd.f32 %v963_v1, %v2674_v41  ;;  %v1157_v6 = vadd.f32 %v1156_v2, %v2676_v42 }
 0x177   : > { %v1291_v7 = vmax.f32 %v962_v63, 0.0  ;;  %v1293_v8 = vmax.f32 %v1155_v0, 0.0 }
 0x178   : > { %v2181_v9 = vpack.c.bf16 %v1288_v3, %v1287_v61  ;;  %v2183_v10 = vpack.c.bf16 %v1290_v4, %v1289_v62  ;;  %v1292_v11 = vmax.f32 %v964_v5, 0.0  ;;  %v1294_v12 = vmax.f32 %v1157_v6, 0.0 }
 0x17a   : > { %2095 = vst [vmem:[%s2690_s10 + $0x160] sm:$0xff] %v2181_v9  ;;  %2099 = vst [vmem:[%s2690_s10 + $0x170] sm:$0xff] %v2183_v10  ;;  %v2182_v13 = vpack.c.bf16 %v1292_v11, %v1291_v7  ;;  %v2184_v14 = vpack.c.bf16 %v1294_v12, %v1293_v8  ;;  %v967_v15 = vpop.f32.mrb[48].mxu0  ;;  %v1160_v16 = vpop.f32.mrb[48].mxu1 }
 0x17b   : > { %v968_v17 = vadd.f32 %v967_v15, %v2670_v39  ;;  %v1161_v18 = vadd.f32 %v1160_v16, %v2672_v40  ;;  %v969_v19 = vpop.f32.mrb[49].mxu0  ;;  %v1162_v20 = vpop.f32.mrb[49].mxu1 }
 0x17c   : > { %2096 = vst [vmem:[%s2690_s10 + $0x168] sm:$0xff] %v2182_v13  ;;  %2100 = vst [vmem:[%s2690_s10 + $0x178] sm:$0xff] %v2184_v14  ;;  %v970_v21 = vadd.f32 %v969_v19, %v2674_v41  ;;  %v1163_v22 = vadd.f32 %v1162_v20, %v2676_v42  ;;  %v971_v23 = vpop.f32.mrb[50].mxu0  ;;  %v1164_v24 = vpop.f32.mrb[50].mxu1 }
 0x17d   : > { %v1295_v25 = vmax.f32 %v968_v17, 0.0  ;;  %v1297_v26 = vmax.f32 %v1161_v18, 0.0  ;;  %v972_v27 = vadd.f32 %v971_v23, %v2670_v39  ;;  %v1165_v28 = vadd.f32 %v1164_v24, %v2672_v40  ;;  %v973_v29 = vpop.f32.mrb[51].mxu0  ;;  %v1166_v30 = vpop.f32.mrb[51].mxu1 }
 0x17e   : > { %v1296_v31 = vmax.f32 %v970_v21, 0.0  ;;  %v1298_v32 = vmax.f32 %v1163_v22, 0.0  ;;  %v974_v33 = vadd.f32 %v973_v29, %v2674_v41  ;;  %v1167_v34 = vadd.f32 %v1166_v30, %v2676_v42 }
 0x17f   : > { %v1299_v35 = vmax.f32 %v972_v27, 0.0  ;;  %v1301_v36 = vmax.f32 %v1165_v28, 0.0 }
 0x180   : > { %v2185_v37 = vpack.c.bf16 %v1296_v31, %v1295_v25  ;;  %v2187_v38 = vpack.c.bf16 %v1298_v32, %v1297_v26  ;;  %v1300_v43 = vmax.f32 %v974_v33, 0.0  ;;  %v1302_v44 = vmax.f32 %v1167_v34, 0.0 }
 0x182   : > { %2103 = vst [vmem:[%s2690_s10 + $0x180] sm:$0xff] %v2185_v37  ;;  %2107 = vst [vmem:[%s2690_s10 + $0x190] sm:$0xff] %v2187_v38  ;;  %v2186_v45 = vpack.c.bf16 %v1300_v43, %v1299_v35  ;;  %v2188_v46 = vpack.c.bf16 %v1302_v44, %v1301_v36  ;;  %v977_v47 = vpop.f32.mrb[52].mxu0  ;;  %v1170_v48 = vpop.f32.mrb[52].mxu1 }
 0x183   : > { %v978_v49 = vadd.f32 %v977_v47, %v2670_v39  ;;  %v1171_v50 = vadd.f32 %v1170_v48, %v2672_v40  ;;  %v979_v51 = vpop.f32.mrb[53].mxu0  ;;  %v1172_v52 = vpop.f32.mrb[53].mxu1 }
 0x184   : > { %2104 = vst [vmem:[%s2690_s10 + $0x188] sm:$0xff] %v2186_v45  ;;  %2108 = vst [vmem:[%s2690_s10 + $0x198] sm:$0xff] %v2188_v46  ;;  %v980_v53 = vadd.f32 %v979_v51, %v2674_v41  ;;  %v1173_v54 = vadd.f32 %v1172_v52, %v2676_v42  ;;  %v981_v55 = vpop.f32.mrb[54].mxu0  ;;  %v1174_v56 = vpop.f32.mrb[54].mxu1 }
 0x185   : > { %v1303_v57 = vmax.f32 %v978_v49, 0.0  ;;  %v1305_v58 = vmax.f32 %v1171_v50, 0.0  ;;  %v982_v59 = vadd.f32 %v981_v55, %v2670_v39  ;;  %v1175_v60 = vadd.f32 %v1174_v56, %v2672_v40  ;;  %v983_v61 = vpop.f32.mrb[55].mxu0  ;;  %v1176_v62 = vpop.f32.mrb[55].mxu1 }
 0x186   : > { %v1304_v63 = vmax.f32 %v980_v53, 0.0  ;;  %v1306_v0 = vmax.f32 %v1173_v54, 0.0  ;;  %v984_v1 = vadd.f32 %v983_v61, %v2674_v41  ;;  %v1177_v2 = vadd.f32 %v1176_v62, %v2676_v42 }
 0x187   : > { %v1307_v3 = vmax.f32 %v982_v59, 0.0  ;;  %v1309_v4 = vmax.f32 %v1175_v60, 0.0 }
 0x188   : > { %v2189_v5 = vpack.c.bf16 %v1304_v63, %v1303_v57  ;;  %v2191_v6 = vpack.c.bf16 %v1306_v0, %v1305_v58  ;;  %v1308_v7 = vmax.f32 %v984_v1, 0.0  ;;  %v1310_v8 = vmax.f32 %v1177_v2, 0.0 }
 0x18a   : > { %2111 = vst [vmem:[%s2690_s10 + $0x1a0] sm:$0xff] %v2189_v5  ;;  %2115 = vst [vmem:[%s2690_s10 + $0x1b0] sm:$0xff] %v2191_v6  ;;  %v2190_v9 = vpack.c.bf16 %v1308_v7, %v1307_v3  ;;  %v2192_v10 = vpack.c.bf16 %v1310_v8, %v1309_v4  ;;  %v987_v11 = vpop.f32.mrb[56].mxu0  ;;  %v1180_v12 = vpop.f32.mrb[56].mxu1 }
 0x18b   : > { %v988_v13 = vadd.f32 %v987_v11, %v2670_v39  ;;  %v1181_v14 = vadd.f32 %v1180_v12, %v2672_v40  ;;  %v989_v15 = vpop.f32.mrb[57].mxu0  ;;  %v1182_v16 = vpop.f32.mrb[57].mxu1 }
 0x18c   : > { %2112 = vst [vmem:[%s2690_s10 + $0x1a8] sm:$0xff] %v2190_v9  ;;  %2116 = vst [vmem:[%s2690_s10 + $0x1b8] sm:$0xff] %v2192_v10  ;;  %v990_v17 = vadd.f32 %v989_v15, %v2674_v41  ;;  %v1183_v18 = vadd.f32 %v1182_v16, %v2676_v42  ;;  %v991_v19 = vpop.f32.mrb[58].mxu0  ;;  %v1184_v20 = vpop.f32.mrb[58].mxu1 }
 0x18d   : > { %v1311_v21 = vmax.f32 %v988_v13, 0.0  ;;  %v1313_v22 = vmax.f32 %v1181_v14, 0.0  ;;  %v992_v23 = vadd.f32 %v991_v19, %v2670_v39  ;;  %v1185_v24 = vadd.f32 %v1184_v20, %v2672_v40  ;;  %v993_v25 = vpop.f32.mrb[59].mxu0  ;;  %v1186_v26 = vpop.f32.mrb[59].mxu1 }
 0x18e   : > { %v1312_v27 = vmax.f32 %v990_v17, 0.0  ;;  %v1314_v28 = vmax.f32 %v1183_v18, 0.0  ;;  %v994_v29 = vadd.f32 %v993_v25, %v2674_v41  ;;  %v1187_v30 = vadd.f32 %v1186_v26, %v2676_v42 }
 0x18f   : > { %v1315_v31 = vmax.f32 %v992_v23, 0.0  ;;  %v1317_v32 = vmax.f32 %v1185_v24, 0.0 }
 0x190   : > { %v2193_v33 = vpack.c.bf16 %v1312_v27, %v1311_v21  ;;  %v2195_v34 = vpack.c.bf16 %v1314_v28, %v1313_v22  ;;  %v1316_v35 = vmax.f32 %v994_v29, 0.0  ;;  %v1318_v36 = vmax.f32 %v1187_v30, 0.0 }
 0x192   : > { %2119 = vst [vmem:[%s2690_s10 + $0x1c0] sm:$0xff] %v2193_v33  ;;  %2123 = vst [vmem:[%s2690_s10 + $0x1d0] sm:$0xff] %v2195_v34  ;;  %v2194_v37 = vpack.c.bf16 %v1316_v35, %v1315_v31  ;;  %v2196_v38 = vpack.c.bf16 %v1318_v36, %v1317_v32  ;;  %v997_v43 = vpop.f32.mrb[60].mxu0  ;;  %v1190_v44 = vpop.f32.mrb[60].mxu1 }
 0x193   : > { %v998_v45 = vadd.f32 %v997_v43, %v2670_v39  ;;  %v1191_v46 = vadd.f32 %v1190_v44, %v2672_v40  ;;  %v999_v47 = vpop.f32.mrb[61].mxu0  ;;  %v1192_v48 = vpop.f32.mrb[61].mxu1 }
 0x194   : > { %2120 = vst [vmem:[%s2690_s10 + $0x1c8] sm:$0xff] %v2194_v37  ;;  %2124 = vst [vmem:[%s2690_s10 + $0x1d8] sm:$0xff] %v2196_v38  ;;  %v1000_v49 = vadd.f32 %v999_v47, %v2674_v41  ;;  %v1193_v50 = vadd.f32 %v1192_v48, %v2676_v42  ;;  %v1001_v51 = vpop.f32.mrb[62].mxu0  ;;  %v1194_v52 = vpop.f32.mrb[62].mxu1 }
 0x195   : > { %v1319_v53 = vmax.f32 %v998_v45, 0.0  ;;  %v1321_v54 = vmax.f32 %v1191_v46, 0.0  ;;  %v1002_v55 = vadd.f32 %v1001_v51, %v2670_v39  ;;  %v1195_v56 = vadd.f32 %v1194_v52, %v2672_v40  ;;  %v1003_v57 = vpop.f32.mrb[63].mxu0  ;;  %v1196_v58 = vpop.f32.mrb[63].mxu1 }
 0x196   : > { %v1320_v59 = vmax.f32 %v1000_v49, 0.0  ;;  %v1322_v60 = vmax.f32 %v1193_v50, 0.0  ;;  %v1004_v61 = vadd.f32 %v1003_v57, %v2674_v41  ;;  %v1197_v62 = vadd.f32 %v1196_v58, %v2676_v42 }
 0x197   : > { %v1323_v63 = vmax.f32 %v1002_v55, 0.0  ;;  %v1325_v0 = vmax.f32 %v1195_v56, 0.0 }
 0x198   : > { %v2197_v1 = vpack.c.bf16 %v1320_v59, %v1319_v53  ;;  %v2199_v2 = vpack.c.bf16 %v1322_v60, %v1321_v54  ;;  %v1324_v3 = vmax.f32 %v1004_v61, 0.0  ;;  %v1326_v4 = vmax.f32 %v1197_v62, 0.0 }
 0x19a   : > { %2127 = vst [vmem:[%s2690_s10 + $0x1e0] sm:$0xff] %v2197_v1  ;;  %2131 = vst [vmem:[%s2690_s10 + $0x1f0] sm:$0xff] %v2199_v2  ;;  %v2198_v39 = vpack.c.bf16 %v1324_v3, %v1323_v63  ;;  %v2200_v40 = vpack.c.bf16 %v1326_v4, %v1325_v0 }
 0x19c   : > { %2128 = vst [vmem:[%s2690_s10 + $0x1e8] sm:$0xff] %v2198_v39  ;;  %2132 = vst [vmem:[%s2690_s10 + $0x1f8] sm:$0xff] %v2200_v40 }
 0x19d PF: > { %s13_s14 = sadd.s32 1, %s2391_s14   ;;  %s2889_s12 = smov %s2387_s13 }
 0x19e   : > { %p10_p5 = scmp.ge.s32.totalorder %s13_s14, 4   ;;  %s2890_s13 = smov %s2892_s15 }
 0x1a0   :  { %12 = sbr.rel (!%p10_p5) target bundleno = 2 (0x2), region = 93 }

// kernel: up_block_forward.4
= control target key start
LH: loop header
LB: loop body
LE: loop exit
PB: predicated region body
PF: predicated region fallthrough
CT: control target
= control target key end

     0   :  { %s9137_s21 = smov 0   ;;  %s9139_s22 = smov 0   ;;  %s10309_s0 = inlined_call_operand.vmem [shape: bf16[2,32,32,128], index: 0, kind: input, shape index: {}, may-alias: {0,1,2}]   ;;  %s10310_s1 = inlined_call_operand.vmem [shape: bf16[2,32,32,128], index: 1, kind: input, shape index: {}, may-alias: {0,1,2}]   ;;  %s10311_s2 = inlined_call_operand.vmem [shape: bf16[2,32,32,128], index: 2, kind: input, shape index: {}, may-alias: {0,1,2}]   ;;  %s10312_s3 = inlined_call_operand.vmem [shape: bf16[3,3,128,128], index: 3, kind: input, shape index: {}]   ;;  %s10313_s4 = inlined_call_operand.vmem [shape: f32[1,128], index: 4, kind: input, shape index: {}]   ;;  %s10314_s5 = inlined_call_operand.vmem [shape: f32[1,128], index: 5, kind: input, shape index: {}]   ;;  %s10315_s6 = inlined_call_operand.vmem [shape: bf16[2,32,32,128], index: 6, kind: output, shape index: {}]  }
   0x1   :  { %s9141_s23 = smov 0   ;;  %s9143_s24 = smov 0  }
   0x2   :  { %s9145_s25 = smov 0  }
   0x3 LB: > { %s25_s26 = sadd.s32 1, %s9091_s23  ;;  %s28_s27 = sadd.s32 1, %s9095_s24  ;;  %s9099_s25 = sphi %s9145_s25, %s16_s25   ;;  %s9095_s24 = sphi %s9143_s24, %s10448_s24   ;;  %s9091_s23 = sphi %s9141_s23, %s10447_s23   ;;  %s9087_s22 = sphi %s9139_s22, %s10446_s22   ;;  %s9083_s21 = sphi %s9137_s21, %s10445_s21  }
   0x4   : > { %p26_p0 = scmp.ge.s32.totalorder %s25_s26, 2  ;;  %p6541_p1 = scmp.ge.s32.totalorder %s9099_s25, 1 }
   0x5   : > { %p298_p2 = scmp.lt.s32.totalorder %s9099_s25, 5 }
   0x6   : > { %s10450_s26 = smov (%p26_p0, %s25_s26), 0  ;;  %s10452_s27 = smov (!%p26_p0, %s28_s27), %s9095_s24 }
   0x7   : > { %p299_p3 = pnand %p6541_p1, %p298_p2  ;;  %p30_p4 = scmp.ge.s32.totalorder %s10452_s27, 2 }
   0x9   : > { %s10454_s27 = smov (%p30_p4, %s10452_s27), 0  ;;  %302 = sbr.rel (%p299_p3) target bundleno = 844 (0x34c), region = 44 }
  0x10   : > { %v8924_v0 = vld [vmem:[%s10312_s3] sm:$0xff]   ;;  %s9175_s30 = sshll.u32 %s9083_s21, 4  ;;  %v8926_v2 = vld [vmem:[%s10312_s3 + $0x8] sm:$0xff]   ;;  %p368_p6 = scmp.lt.s32.totalorder %s9087_s22, 1  ;;  %v8928_v4 = vld [vmem:[%s10312_s3 + $0x10] sm:$0xff]   ;;  %v9101_v10 = vmov 0.0  }
  0x11   : > { %v8925_v1 = vld [vmem:[%s10312_s3 + $0x100] sm:$0xff]   ;;  %s6543_s9 = sadd.s32 4294967295, %s9175_s30  ;;  %7635 = vmatprep.subr.bf16.mxu1 %v8924_v0  ;;  %v8927_v3 = vld [vmem:[%s10312_s3 + $0x108] sm:$0xff]   ;;  %v8929_v5 = vld [vmem:[%s10312_s3 + $0x110] sm:$0xff]   ;;  %p384_p8 = scmp.lt.s32.totalorder %s9175_s30, 31  ;;  %581 = vst [vmem:[#allocation2] sm:$0xff] %v9101_v10 }
  0x12   : > { %p366_p5 = scmp.gt.s32.totalorder %s6543_s9, 0  ;;  %7955 = vmatprep.subr.bf16.mxu0 %v8925_v1  ;;  %7636 = vmatpush3.bf16.msra.mxu1 %v8924_v0  ;;  %s10456_s22 = smov (!%p368_p6, %s9087_s22), 1  ;;  %v8930_v6 = vld [vmem:[%s10312_s3 + $0x18] sm:$0xff]   ;;  %v8932_v8 = vld [vmem:[%s10312_s3 + $0x20] sm:$0xff]   ;;  %582 = vst [vmem:[#allocation2 + $0x30] sm:$0xff] %v9101_v10  ;;  %583 = vst [vmem:[#allocation2 + $0x60] sm:$0xff] %v9101_v10 }
  0x13   : > { %7956 = vmatpush3.bf16.msra.mxu0 %v8925_v1  ;;  %7637 = vmatprep.subr.bf16.mxu1 %v8926_v2  ;;  %p6544_p7 = scmp.lt.s32.totalorder %s6543_s9, 31  ;;  %s9195_s19 = sshll.u32 %s10456_s22, 7  ;;  %v8931_v7 = vld [vmem:[%s10312_s3 + $0x118] sm:$0xff]   ;;  %v8933_v9 = vld [vmem:[%s10312_s3 + $0x120] sm:$0xff]   ;;  %584 = vst [vmem:[#allocation2 + $0x90] sm:$0xff] %v9101_v10  ;;  %585 = vst [vmem:[#allocation2 + $0xc0] sm:$0xff] %v9101_v10 }
  0x14   : > { %s367_s16 = scalar_select %p366_p5, %s6543_s9, 0  ;;  %7957 = vmatprep.subr.bf16.mxu0 %v8927_v3  ;;  %586 = vst [vmem:[#allocation2 + $0xf0] sm:$0xff] %v9101_v10  ;;  %587 = vst [vmem:[#allocation2 + $0x120] sm:$0xff] %v9101_v10  ;;  %v8934_v11 = vld [vmem:[%s10312_s3 + $0x28] sm:$0xff]   ;;  %v8936_v15 = vld [vmem:[%s10312_s3 + $0x30] sm:$0xff]  }
  0x15   : > { %588 = vst [vmem:[#allocation2 + $0x150] sm:$0xff] %v9101_v10  ;;  %589 = vst [vmem:[#allocation2 + $0x180] sm:$0xff] %v9101_v10  ;;  %v8935_v12 = vld [vmem:[%s10312_s3 + $0x128] sm:$0xff]   ;;  %p549_p9 = scmp.gt.s32.totalorder %s9083_s21, 0  ;;  %v8937_v23 = vld [vmem:[%s10312_s3 + $0x130] sm:$0xff]   ;;  %s6842_s10 = sadd.s32 16, %s9175_s30 }
  0x16   : > { %7638 = vmatpush3.bf16.msra.mxu1 %v8926_v2  ;;  %s10458_s16 = smov (!%p6544_p7, %s367_s16), 31  ;;  %590 = vst [vmem:[#allocation2 + $0x1b0] sm:$0xff] %v9101_v10  ;;  %591 = vst [vmem:[#allocation2 + $0x1e0] sm:$0xff] %v9101_v10  ;;  %v8938_v38 = vld [vmem:[%s10312_s3 + $0x38] sm:$0xff]   ;;  %v8941_v54 = vld [vmem:[%s10312_s3 + $0x40] sm:$0xff]   ;;  %p394_p10 = scmp.lt.s32.totalorder %s6842_s10, 31 }
  0x17   : > { %7958 = vmatpush3.bf16.msra.mxu0 %v8927_v3  ;;  %7639 = vmatprep.subr.bf16.mxu1 %v8928_v4  ;;  %s6549_s8 = sshll.u32 %s10458_s16, 2  ;;  %592 = vst [vmem:[#allocation2 + $0x210] sm:$0xff] %v9101_v10  ;;  %593 = vst [vmem:[#allocation2 + $0x240] sm:$0xff] %v9101_v10  ;;  %v8939_v44 = vld [vmem:[%s10312_s3 + $0x138] sm:$0xff]   ;;  %v8943_v56 = vld [vmem:[%s10312_s3 + $0x140] sm:$0xff]   ;;  %p565_p11 = scmp.lt.s32.totalorder %s9083_s21, 1 }
  0x18   : > { %7959 = vmatprep.subr.bf16.mxu0 %v8929_v5  ;;  %s374_s9 = sadd.s32 %s9195_s19, %s6549_s8  ;;  %594 = vst [vmem:[#allocation2 + $0x270] sm:$0xff] %v9101_v10  ;;  %595 = vst [vmem:[#allocation2 + $0x2a0] sm:$0xff] %v9101_v10  ;;  %v8980_v34 = vld [vmem:[%s10312_s3 + $0x90] sm:$0xff]   ;;  %s10460_s10 = smov (!%p394_p10, %s6842_s10), 31 }
  0x19   : > { %s6551_s11 = sshll.u32 %s374_s9, 2  ;;  %596 = vst [vmem:[#allocation2 + $0x2d0] sm:$0xff] %v9101_v10  ;;  %597 = vst [vmem:[#allocation2 + $0x300] sm:$0xff] %v9101_v10  ;;  %s10462_s10 = smov (!%p394_p10, %s10460_s10), 31 }
  0x1a   : > { %7640 = vmatpush3.bf16.msra.mxu1 %v8928_v4  ;;  %s9214_s17 = scalar_lea.vmem %s10309_s0, %s6551_s11  ;;  %598 = vst [vmem:[#allocation2 + $0x330] sm:$0xff] %v9101_v10  ;;  %599 = vst [vmem:[#allocation2 + $0x28] sm:$0xff] %v9101_v10 }
  0x1b   : > { %7960 = vmatpush3.bf16.msra.mxu0 %v8929_v5  ;;  %7641 = vmatprep.subr.bf16.mxu1 %v8930_v6  ;;  %s9217_s16 = scalar_select %p384_p8, %s9175_s30, 31  ;;  %600 = vst [vmem:[#allocation2 + $0x58] sm:$0xff] %v9101_v10  ;;  %601 = vst [vmem:[#allocation2 + $0x88] sm:$0xff] %v9101_v10  ;;  %v7036_v13 = vld [vmem:[%s9214_s17] sm:$0xff]   ;;  %v9232_v14 = vld [vmem:[%s9214_s17 + $0x8] sm:$0xff]  }
  0x1c   : > { %7961 = vmatprep.subr.bf16.mxu0 %v8931_v7  ;;  %602 = vst [vmem:[#allocation2 + $0xb8] sm:$0xff] %v9101_v10  ;;  %603 = vst [vmem:[#allocation2 + $0xe8] sm:$0xff] %v9101_v10  ;;  %v7037_v16 = vunpack.c.l.bf16 %v7036_v13  ;;  %v7038_v17 = vunpack.c.h.bf16 %v7036_v13  ;;  %s558_s14 = scalar_select %p549_p9, 1, 0  ;;  %v7041_v20 = vunpack.c.l.bf16 %v9232_v14  ;;  %v7042_v21 = vunpack.c.h.bf16 %v9232_v14  ;;  %v8950_v13 = vld [vmem:[%s10312_s3 + $0x150] sm:$0xff]  }
  0x1d   : > { %604 = vst [vmem:[#allocation2 + $0x118] sm:$0xff] %v9101_v10  ;;  %605 = vst [vmem:[#allocation2 + $0x148] sm:$0xff] %v9101_v10  ;;  %s6553_s7 = sshll.u32 %s9217_s16, 2  ;;  %s6560_s30 = sshll.u32 %s10462_s10, 2 }
  0x1e   : > { %606 = vst [vmem:[#allocation2 + $0x178] sm:$0xff] %v9101_v10  ;;  %607 = vst [vmem:[#allocation2 + $0x1a8] sm:$0xff] %v9101_v10  ;;  %7642 = vmatpush3.bf16.msra.mxu1 %v8930_v6  ;;  %s9229_s8 = sadd.s32 %s6553_s7, %s9195_s19  ;;  %v559_v29 = vstv %s558_s14  ;;  %v8946_v6 = vld [vmem:[%s10312_s3 + $0x148] sm:$0xff]   ;;  %s402_s11 = sadd.s32 %s6560_s30, %s9195_s19 }
  0x1f   : > { %608 = vst [vmem:[#allocation2 + $0x1d8] sm:$0xff] %v9101_v10  ;;  %609 = vst [vmem:[#allocation2 + $0x208] sm:$0xff] %v9101_v10  ;;  %7962 = vmatpush3.bf16.msra.mxu0 %v8931_v7  ;;  %7643 = vmatprep.subr.bf16.mxu1 %v8932_v8  ;;  %s6555_s9 = sshll.u32 %s9229_s8, 2  ;;  %vm9256_vm0 = vcmp.eq.s32.totalorder %v559_v29, 1  ;;  %v8948_v7 = vld [vmem:[%s10312_s3 + $0x48] sm:$0xff]   ;;  %v8953_v29 = vld [vmem:[%s10312_s3 + $0x158] sm:$0xff]  }
  0x20   : > { %610 = vst [vmem:[#allocation2 + $0x238] sm:$0xff] %v9101_v10  ;;  %611 = vst [vmem:[#allocation2 + $0x268] sm:$0xff] %v9101_v10  ;;  %7963 = vmatprep.subr.bf16.mxu0 %v8933_v9  ;;  %s9243_s13 = scalar_lea.vmem %s10310_s1, %s6555_s9  ;;  %v561_v39 = vsel %vm9256_vm0, %v7037_v16, 0.0  ;;  %v562_v40 = vsel %vm9256_vm0, %v7038_v17, 0.0  ;;  %v563_v41 = vsel %vm9256_vm0, %v7041_v20, 0.0  ;;  %v564_v42 = vsel %vm9256_vm0, %v7042_v21, 0.0  ;;  %s10114_s16 = scalar_lea.vmem %s10315_s6, %s6555_s9 }
  0x21   : > { %612 = vst [vmem:[#allocation2 + $0x298] sm:$0xff] %v9101_v10  ;;  %613 = vst [vmem:[#allocation2 + $0x2c8] sm:$0xff] %v9101_v10  ;;  %v6908_v18 = vld [vmem:[%s9243_s13] sm:$0xff]   ;;  %v7211_v22 = vld [vmem:[%s9243_s13 + $0x8] sm:$0xff]   ;;  %s6562_s12 = sshll.u32 %s402_s11, 2 }
  0x22   : > { %614 = vst [vmem:[#allocation2 + $0x2f8] sm:$0xff] %v9101_v10  ;;  %615 = vst [vmem:[#allocation2 + $0x328] sm:$0xff] %v9101_v10  ;;  %7644 = vmatpush3.bf16.msra.mxu1 %v8932_v8  ;;  %v8940_v19 = vld [vmem:[%s9243_s13] sm:$0xff]  ;;  %v6909_v24 = vunpack.c.l.bf16 %v6908_v18  ;;  %v6910_v25 = vunpack.c.h.bf16 %v6908_v18  ;;  %v6913_v26 = vunpack.c.l.bf16 %v7211_v22  ;;  %v6914_v27 = vunpack.c.h.bf16 %v7211_v22  ;;  %v7212_v28 = vld [vmem:[%s9243_s13 + $0x10] sm:$0xff]   ;;  %s404_s17 = scalar_lea.vmem %s10311_s2, %s6562_s12 }
  0x23   : > { %616 = vst [vmem:[#allocation2 + $0x358] sm:$0xff] %v9101_v10  ;;  %7964 = vmatpush3.bf16.msra.mxu0 %v8933_v9  ;;  %7645 = vmatprep.subr.bf16.mxu1 %v8934_v11  ;;  %v6917_v30 = vunpack.c.l.bf16 %v7212_v28  ;;  %v6918_v31 = vunpack.c.h.bf16 %v7212_v28  ;;  %v7213_v32 = vld [vmem:[%s9243_s13 + $0x18] sm:$0xff]   ;;  %v7214_v33 = vld [vmem:[%s9243_s13 + $0x20] sm:$0xff]   ;;  %v7215_v43 = vld [vmem:[%s9243_s13 + $0x28] sm:$0xff]   ;;  %s574_s21 = scalar_select %p565_p11, 1, 0 }
  0x24   : > { %7965 = vmatprep.subr.bf16.mxu0 %v8935_v12  ;;  %7971 = vmatprep.mubr.bf16.mxu0 %v8940_v19  ;;  %622 = vst [vmem:[#allocation2 + $0x38] sm:$0xff] %v6909_v24  ;;  %623 = vst [vmem:[#allocation2 + $0x40] sm:$0xff] %v6910_v25  ;;  %v6921_v35 = vunpack.c.l.bf16 %v7213_v32  ;;  %v6922_v36 = vunpack.c.h.bf16 %v7213_v32  ;;  %v6925_v37 = vunpack.c.l.bf16 %v7214_v33  ;;  %v6926_v45 = vunpack.c.h.bf16 %v7214_v33  ;;  %v7216_v48 = vld [vmem:[%s9243_s13 + $0x30] sm:$0xff]   ;;  %v7217_v49 = vld [vmem:[%s9243_s13 + $0x38] sm:$0xff]  }
  0x25   : > { %624 = vst [vmem:[#allocation2 + $0x48] sm:$0xff] %v6913_v26  ;;  %625 = vst [vmem:[#allocation2 + $0x50] sm:$0xff] %v6914_v27  ;;  %v6929_v46 = vunpack.c.l.bf16 %v7215_v43  ;;  %v6930_v47 = vunpack.c.h.bf16 %v7215_v43  ;;  %v6933_v50 = vunpack.c.l.bf16 %v7216_v48  ;;  %v6934_v51 = vunpack.c.h.bf16 %v7216_v48  ;;  %v7218_v55 = vld [vmem:[%s9243_s13 + $0x40] sm:$0xff]   ;;  %v8942_v61 = vld [vmem:[%s9243_s13 + $0x8] sm:$0xff] }
  0x26   : > { %7646 = vmatpush3.bf16.msra.mxu1 %v8934_v11  ;;  %626 = vst [vmem:[#allocation2 + $0x68] sm:$0xff] %v6917_v30  ;;  %627 = vst [vmem:[#allocation2 + $0x70] sm:$0xff] %v6918_v31  ;;  %v6937_v52 = vunpack.c.l.bf16 %v7217_v49  ;;  %v6938_v53 = vunpack.c.h.bf16 %v7217_v49  ;;  %v6941_v57 = vunpack.c.l.bf16 %v7218_v55  ;;  %v6942_v58 = vunpack.c.h.bf16 %v7218_v55  ;;  %v8944_v5 = vld [vmem:[%s9243_s13 + $0x10] sm:$0xff]  ;;  %v7219_v8 = vld [vmem:[%s9243_s13 + $0x48] sm:$0xff]  }
  0x27   : > { %7966 = vmatpush3.bf16.msra.mxu0 %v8935_v12  ;;  %7647 = vmatprep.subr.bf16.mxu1 %v8936_v15  ;;  %617 = vst [vmem:[#allocation2 + $0x8] sm:$0xff] %v561_v39  ;;  %618 = vst [vmem:[#allocation2 + $0x10] sm:$0xff] %v562_v40  ;;  %v6945_v11 = vunpack.c.l.bf16 %v7219_v8  ;;  %v6946_v12 = vunpack.c.h.bf16 %v7219_v8  ;;  %v8955_v17 = vld [vmem:[%s10312_s3 + $0x50] sm:$0xff]   ;;  %v8945_v19 = vld [vmem:[%s9243_s13 + $0x18] sm:$0xff] }
  0x28   : > { %7967 = vmatprep.subr.bf16.mxu0 %v8937_v23  ;;  %619 = vst [vmem:[#allocation2 + $0x18] sm:$0xff] %v563_v41  ;;  %620 = vst [vmem:[#allocation2 + $0x20] sm:$0xff] %v564_v42  ;;  %v7220_v20 = vld [vmem:[%s9243_s13 + $0x50] sm:$0xff]   ;;  %v7221_v21 = vld [vmem:[%s9243_s13 + $0x58] sm:$0xff]  }
  0x29   : > { %628 = vst [vmem:[#allocation2 + $0x78] sm:$0xff] %v6921_v35  ;;  %629 = vst [vmem:[#allocation2 + $0x80] sm:$0xff] %v6922_v36  ;;  %v8947_v22 = vld [vmem:[%s9243_s13 + $0x20] sm:$0xff]  ;;  %v6950_v24 = vunpack.c.h.bf16 %v7220_v20  ;;  %v6953_v25 = vunpack.c.l.bf16 %v7221_v21  ;;  %v6954_v26 = vunpack.c.h.bf16 %v7221_v21  ;;  %v8962_v32 = vld [vmem:[%s10312_s3 + $0x58] sm:$0xff]  }
  0x2a   : > { %630 = vst [vmem:[#allocation2 + $0x98] sm:$0xff] %v6925_v37  ;;  %7648 = vmatpush3.bf16.msra.mxu1 %v8936_v15  ;;  %631 = vst [vmem:[#allocation2 + $0xa0] sm:$0xff] %v6926_v45  ;;  %v7222_v28 = vld [vmem:[%s9243_s13 + $0x60] sm:$0xff]   ;;  %v7223_v33 = vld [vmem:[%s9243_s13 + $0x68] sm:$0xff]  }
  0x2b   : > { %632 = vst [vmem:[#allocation2 + $0xa8] sm:$0xff] %v6929_v46  ;;  %633 = vst [vmem:[#allocation2 + $0xb0] sm:$0xff] %v6930_v47  ;;  %7968 = vmatpush3.bf16.msra.mxu0 %v8937_v23  ;;  %7649 = vmatprep.subr.bf16.mxu1 %v8938_v38  ;;  %v695_v59 = vld [vmem:[#allocation2 + $0x37] sm:$0xff]  ;;  %v696_v60 = vld [vmem:[#allocation2 + $0x3f] sm:$0xff]  ;;  %v6949_v23 = vunpack.c.l.bf16 %v7220_v20  ;;  %v6957_v30 = vunpack.c.l.bf16 %v7222_v28  ;;  %v6958_v31 = vunpack.c.h.bf16 %v7222_v28  ;;  %v6961_v36 = vunpack.c.l.bf16 %v7223_v33 }
  0x2c   : > { %7969 = vmatprep.subr.bf16.mxu0 %v8939_v44  ;;  %634 = vst [vmem:[#allocation2 + $0xc8] sm:$0xff] %v6933_v50  ;;  %635 = vst [vmem:[#allocation2 + $0xd0] sm:$0xff] %v6934_v51  ;;  %v9285_v3 = vpack.c.bf16 %v696_v60, %v695_v59  ;;  %v697_v9 = vld [vmem:[#allocation2 + $0x47] sm:$0xff]  ;;  %v698_v10 = vld [vmem:[#allocation2 + $0x4f] sm:$0xff]  ;;  %v6962_v37 = vunpack.c.h.bf16 %v7223_v33 }
  0x2d   : > { %636 = vst [vmem:[#allocation2 + $0xd8] sm:$0xff] %v6937_v52  ;;  %637 = vst [vmem:[#allocation2 + $0xe0] sm:$0xff] %v6938_v53  ;;  %v699_v15 = vld [vmem:[#allocation2 + $0x67] sm:$0xff]  ;;  %v700_v16 = vld [vmem:[#allocation2 + $0x6f] sm:$0xff]  ;;  %v9302_v18 = vpack.c.bf16 %v698_v10, %v697_v9 }
  0x2e   : > { %7650 = vmatpush3.bf16.msra.mxu1 %v8938_v38  ;;  %638 = vst [vmem:[#allocation2 + $0xf8] sm:$0xff] %v6941_v57  ;;  %639 = vst [vmem:[#allocation2 + $0x100] sm:$0xff] %v6942_v58  ;;  %v691_v62 = vld [vmem:[#allocation2 + $0x7] sm:$0xff]  ;;  %v692_v63 = vld [vmem:[#allocation2 + $0xf] sm:$0xff]  ;;  %v9308_v27 = vpack.c.bf16 %v700_v16, %v699_v15 }
  0x2f   : > { %7970 = vmatpush3.bf16.msra.mxu0 %v8939_v44  ;;  %v693_v0 = vld [vmem:[#allocation2 + $0x17] sm:$0xff]  ;;  %7715 = vmatprep.subr.bf16.mxu1 %v8941_v54  ;;  %v763_v1 = vpack.c.bf16 %v692_v63, %v691_v62  ;;  %v694_v2 = vld [vmem:[#allocation2 + $0x1f] sm:$0xff]  ;;  %10370 = vst [vmem:[#allocation4_spill] sm:$0xff] %v9285_v3  ;;  %640 = vst [vmem:[#allocation2 + $0x108] sm:$0xff] %v6945_v11 }
  0x30   : > { %8035 = vmatprep.subr.bf16.mxu0 %v8943_v56  ;;  %v764_v4 = vpack.c.bf16 %v694_v2, %v693_v0  ;;  %641 = vst [vmem:[#allocation2 + $0x110] sm:$0xff] %v6946_v12  ;;  %10371 = vst [vmem:[#allocation5_spill] sm:$0xff] %v9302_v18  ;;  %v701_v35 = vld [vmem:[#allocation2 + $0x77] sm:$0xff]  ;;  %v702_v39 = vld [vmem:[#allocation2 + $0x7f] sm:$0xff] }
  0x31   : > { %7651 = vmatprep.mubr.bf16.mxu1 %v763_v1  ;;  %642 = vst [vmem:[#allocation2 + $0x128] sm:$0xff] %v6949_v23  ;;  %643 = vst [vmem:[#allocation2 + $0x130] sm:$0xff] %v6950_v24  ;;  %v7224_v38 = vld [vmem:[%s9243_s13 + $0x70] sm:$0xff]   ;;  %v704_v41 = vld [vmem:[#allocation2 + $0x9f] sm:$0xff]  ;;  %v9328_v49 = vpack.c.bf16 %v702_v39, %v701_v35 }
  0x32   : > { %7972 = vmatmul.mubr.bf16.vlgmr.msra.gmra.mrb[0].mxu0 %v8942_v61  ;;  %7652 = vmatmul.mubr.bf16.vlgmr.msra.gmra.mrb[0].mxu1 %v764_v4  ;;  %644 = vst [vmem:[#allocation2 + $0x138] sm:$0xff] %v6953_v25  ;;  %645 = vst [vmem:[#allocation2 + $0x140] sm:$0xff] %v6954_v26  ;;  %v703_v40 = vld [vmem:[#allocation2 + $0x97] sm:$0xff]  ;;  %v6965_v42 = vunpack.c.l.bf16 %v7224_v38  ;;  %v6966_v43 = vunpack.c.h.bf16 %v7224_v38  ;;  %v8957_v44 = vld [vmem:[%s10312_s3 + $0x160] sm:$0xff]  }
  0x33   : > { %8036 = vmatpush3.bf16.msra.mxu0 %v8943_v56  ;;  %7716 = vmatpush3.bf16.msra.mxu1 %v8941_v54  ;;  %646 = vst [vmem:[#allocation2 + $0x158] sm:$0xff] %v6957_v30  ;;  %647 = vst [vmem:[#allocation2 + $0x160] sm:$0xff] %v6958_v31  ;;  %v7225_v45 = vld [vmem:[%s9243_s13 + $0x78] sm:$0xff]   ;;  %v9326_v46 = vld [vmem:[%s9243_s13 + $0x28] sm:$0xff]  ;;  %v9333_v51 = vpack.c.bf16 %v704_v41, %v703_v40 }
  0x34   : > { %7655 = vmatprep.mubr.bf16.mxu1 %v9285_v3  ;;  %7975 = vmatprep.mubr.bf16.mxu0 %v8944_v5  ;;  %648 = vst [vmem:[#allocation2 + $0x168] sm:$0xff] %v6961_v36  ;;  %649 = vst [vmem:[#allocation2 + $0x170] sm:$0xff] %v6962_v37  ;;  %v6969_v47 = vunpack.c.l.bf16 %v7225_v45  ;;  %v6970_v48 = vunpack.c.h.bf16 %v7225_v45  ;;  %v9331_v50 = vld [vmem:[%s9243_s13 + $0x30] sm:$0xff]  ;;  %v8960_v52 = vld [vmem:[%s10312_s3 + $0x168] sm:$0xff]  }
  0x35   : > { %8037 = vmatprep.subr.bf16.mxu0 %v8946_v6  ;;  %7717 = vmatprep.subr.bf16.mxu1 %v8948_v7  ;;  %650 = vst [vmem:[#allocation2 + $0x188] sm:$0xff] %v6965_v42  ;;  %651 = vst [vmem:[#allocation2 + $0x190] sm:$0xff] %v6966_v43  ;;  %v8968_v53 = vld [vmem:[%s10312_s3 + $0x60] sm:$0xff]   ;;  %v706_v55 = vld [vmem:[#allocation2 + $0xaf] sm:$0xff] }
  0x36   : > { %652 = vst [vmem:[#allocation2 + $0x198] sm:$0xff] %v6969_v47  ;;  %653 = vst [vmem:[#allocation2 + $0x1a0] sm:$0xff] %v6970_v48  ;;  %v705_v54 = vld [vmem:[#allocation2 + $0xa7] sm:$0xff]  ;;  %v708_v58 = vld [vmem:[#allocation2 + $0xcf] sm:$0xff] }
  0x37   : > { %8038 = vmatpush3.bf16.msra.mxu0 %v8946_v6  ;;  %7718 = vmatpush3.bf16.msra.mxu1 %v8948_v7  ;;  %v7226_v56 = vld [vmem:[%s9243_s13 + $0x80] sm:$0xff]   ;;  %v8964_v59 = vld [vmem:[%s10312_s3 + $0x170] sm:$0xff]   ;;  %v9350_v62 = vld [vmem:[%s9243_s13 + $0x38] sm:$0xff]  ;;  %v9353_v0 = vpack.c.bf16 %v706_v55, %v705_v54 }
  0x38   : > { %8039 = vmatprep.subr.bf16.mxu0 %v8950_v13  ;;  %7719 = vmatprep.subr.bf16.mxu1 %v8955_v17  ;;  %v707_v57 = vld [vmem:[#allocation2 + $0xc7] sm:$0xff]  ;;  %v6973_v60 = vunpack.c.l.bf16 %v7226_v56  ;;  %v6974_v61 = vunpack.c.h.bf16 %v7226_v56  ;;  %v8967_v6 = vld [vmem:[%s10312_s3 + $0x178] sm:$0xff]   ;;  %v7228_v7 = vld [vmem:[%s9243_s13 + $0x90] sm:$0xff]  }
  0x39   : > { %v7227_v63 = vld [vmem:[%s9243_s13 + $0x88] sm:$0xff]   ;;  %v9356_v1 = vld [vmem:[%s9243_s13 + $0x40] sm:$0xff]  ;;  %v9358_v5 = vpack.c.bf16 %v708_v58, %v707_v57  ;;  %v6981_v8 = vunpack.c.l.bf16 %v7228_v7  ;;  %v6982_v9 = vunpack.c.h.bf16 %v7228_v7  ;;  %v7229_v10 = vld [vmem:[%s9243_s13 + $0x98] sm:$0xff]  }
  0x3a   : > { %7976 = vmatmul.mubr.bf16.gmra.mrb[4].mxu0 %v8945_v19  ;;  %7656 = vmatmul.mubr.bf16.gmra.mrb[4].mxu1 %v9302_v18  ;;  %654 = vst [vmem:[#allocation2 + $0x1b8] sm:$0xff] %v6973_v60  ;;  %655 = vst [vmem:[#allocation2 + $0x1c0] sm:$0xff] %v6974_v61  ;;  %v6977_v2 = vunpack.c.l.bf16 %v7227_v63  ;;  %v6978_v4 = vunpack.c.h.bf16 %v7227_v63  ;;  %v6985_v11 = vunpack.c.l.bf16 %v7229_v10  ;;  %v6986_v12 = vunpack.c.h.bf16 %v7229_v10  ;;  %v709_v15 = vld [vmem:[#allocation2 + $0xd7] sm:$0xff]  ;;  %v710_v16 = vld [vmem:[#allocation2 + $0xdf] sm:$0xff] }
  0x3b   : > { %7979 = vmatprep.mubr.bf16.mxu0 %v8947_v22  ;;  %7659 = vmatprep.mubr.bf16.mxu1 %v9308_v27  ;;  %658 = vst [vmem:[#allocation2 + $0x1e8] sm:$0xff] %v6981_v8  ;;  %659 = vst [vmem:[#allocation2 + $0x1f0] sm:$0xff] %v6982_v9  ;;  %v7230_v19 = vld [vmem:[%s9243_s13 + $0xa0] sm:$0xff]   ;;  %v7231_v24 = vld [vmem:[%s9243_s13 + $0xa8] sm:$0xff]   ;;  %v9383_v30 = vpack.c.bf16 %v710_v16, %v709_v15 }
  0x3c   : > { %8040 = vmatpush3.bf16.msra.mxu0 %v8950_v13  ;;  %7720 = vmatpush3.bf16.msra.mxu1 %v8955_v17  ;;  %656 = vst [vmem:[#allocation2 + $0x1c8] sm:$0xff] %v6977_v2  ;;  %657 = vst [vmem:[#allocation2 + $0x1d0] sm:$0xff] %v6978_v4  ;;  %v8970_v13 = vld [vmem:[%s10312_s3 + $0x68] sm:$0xff]   ;;  %v711_v17 = vld [vmem:[#allocation2 + $0xf7] sm:$0xff]  ;;  %v6989_v22 = vunpack.c.l.bf16 %v7230_v19  ;;  %v6990_v23 = vunpack.c.h.bf16 %v7230_v19  ;;  %v6993_v26 = vunpack.c.l.bf16 %v7231_v24  ;;  %v6994_v28 = vunpack.c.h.bf16 %v7231_v24 }
  0x3d   : > { %8041 = vmatprep.subr.bf16.mxu0 %v8953_v29  ;;  %7721 = vmatprep.subr.bf16.mxu1 %v8962_v32  ;;  %660 = vst [vmem:[#allocation2 + $0x1f8] sm:$0xff] %v6985_v11  ;;  %661 = vst [vmem:[#allocation2 + $0x200] sm:$0xff] %v6986_v12  ;;  %v712_v20 = vld [vmem:[#allocation2 + $0xff] sm:$0xff]  ;;  %v9380_v25 = vld [vmem:[%s9243_s13 + $0x48] sm:$0xff] }
  0x3e   : > { %v9376_v21 = vld [vmem:[%s10312_s3 + $0x180] sm:$0xff]   ;;  %v9386_v31 = vld [vmem:[%s9243_s13 + $0x50] sm:$0xff]  ;;  %662 = vst [vmem:[#allocation2 + $0x218] sm:$0xff] %v6989_v22  ;;  %663 = vst [vmem:[#allocation2 + $0x220] sm:$0xff] %v6990_v23  ;;  %v9389_v36 = vpack.c.bf16 %v712_v20, %v711_v17 }
  0x3f   : > { %v7233_v35 = vld [vmem:[%s9243_s13 + $0xb8] sm:$0xff]   ;;  %664 = vst [vmem:[#allocation2 + $0x228] sm:$0xff] %v6993_v26  ;;  %665 = vst [vmem:[#allocation2 + $0x230] sm:$0xff] %v6994_v28  ;;  %v8972_v39 = vld [vmem:[%s10312_s3 + $0x70] sm:$0xff]  }
  0x40   : > { %8042 = vmatpush3.bf16.msra.mxu0 %v8953_v29  ;;  %7722 = vmatpush3.bf16.msra.mxu1 %v8962_v32  ;;  %v7232_v29 = vld [vmem:[%s9243_s13 + $0xb0] sm:$0xff]   ;;  %v7001_v37 = vunpack.c.l.bf16 %v7233_v35  ;;  %v7002_v38 = vunpack.c.h.bf16 %v7233_v35  ;;  %v713_v40 = vld [vmem:[#allocation2 + $0x107] sm:$0xff]  ;;  %v7237_v61 = vld [vmem:[%s9243_s13 + $0xd8] sm:$0xff]  }
  0x41   : > { %8043 = vmatprep.subr.bf16.mxu0 %v8957_v44  ;;  %7723 = vmatprep.subr.bf16.mxu1 %v8968_v53  ;;  %v6997_v32 = vunpack.c.l.bf16 %v7232_v29  ;;  %v6998_v33 = vunpack.c.h.bf16 %v7232_v29  ;;  %v714_v41 = vld [vmem:[#allocation2 + $0x10f] sm:$0xff]  ;;  %v7234_v42 = vld [vmem:[%s9243_s13 + $0xc0] sm:$0xff]   ;;  %v717_v63 = vld [vmem:[#allocation2 + $0x137] sm:$0xff]  ;;  %v7017_v2 = vunpack.c.l.bf16 %v7237_v61  ;;  %v7018_v4 = vunpack.c.h.bf16 %v7237_v61 }
  0x42   : > { %7980 = vmatmul.mubr.bf16.gmra.mrb[8].mxu0 %v9326_v46  ;;  %7660 = vmatmul.mubr.bf16.gmra.mrb[8].mxu1 %v9328_v49  ;;  %668 = vst [vmem:[#allocation2 + $0x258] sm:$0xff] %v7001_v37  ;;  %669 = vst [vmem:[#allocation2 + $0x260] sm:$0xff] %v7002_v38  ;;  %v715_v43 = vld [vmem:[#allocation2 + $0x127] sm:$0xff]  ;;  %v7005_v45 = vunpack.c.l.bf16 %v7234_v42  ;;  %v7006_v47 = vunpack.c.h.bf16 %v7234_v42  ;;  %v9404_v55 = vpack.c.bf16 %v714_v41, %v713_v40  ;;  %v7236_v58 = vld [vmem:[%s9243_s13 + $0xd0] sm:$0xff]  }
  0x43   : > { %7983 = vmatprep.mubr.bf16.mxu0 %v9331_v50  ;;  %7663 = vmatprep.mubr.bf16.mxu1 %v9333_v51  ;;  %666 = vst [vmem:[#allocation2 + $0x248] sm:$0xff] %v6997_v32  ;;  %667 = vst [vmem:[#allocation2 + $0x250] sm:$0xff] %v6998_v33  ;;  %v7235_v48 = vld [vmem:[%s9243_s13 + $0xc8] sm:$0xff]   ;;  %v9407_v56 = vld [vmem:[%s9243_s13 + $0x60] sm:$0xff]  ;;  %v7014_v60 = vunpack.c.h.bf16 %v7236_v58 }
  0x44   : > { %8044 = vmatpush3.bf16.msra.mxu0 %v8957_v44  ;;  %7724 = vmatpush3.bf16.msra.mxu1 %v8968_v53  ;;  %v716_v44 = vld [vmem:[#allocation2 + $0x12f] sm:$0xff]  ;;  %v7009_v53 = vunpack.c.l.bf16 %v7235_v48  ;;  %v7010_v54 = vunpack.c.h.bf16 %v7235_v48  ;;  %670 = vst [vmem:[#allocation2 + $0x278] sm:$0xff] %v7005_v45  ;;  %671 = vst [vmem:[#allocation2 + $0x280] sm:$0xff] %v7006_v47  ;;  %v718_v7 = vld [vmem:[#allocation2 + $0x13f] sm:$0xff] }
  0x45   : > { %8045 = vmatprep.subr.bf16.mxu0 %v8960_v52  ;;  %7725 = vmatprep.subr.bf16.mxu1 %v8970_v13  ;;  %v9409_v57 = vpack.c.bf16 %v716_v44, %v715_v43  ;;  %675 = vst [vmem:[#allocation2 + $0x2b0] sm:$0xff] %v7014_v60  ;;  %v719_v8 = vld [vmem:[#allocation2 + $0x157] sm:$0xff]  ;;  %v720_v9 = vld [vmem:[#allocation2 + $0x15f] sm:$0xff]  ;;  %676 = vst [vmem:[#allocation2 + $0x2b8] sm:$0xff] %v7017_v2  ;;  %v9424_v15 = vpack.c.bf16 %v718_v7, %v717_v63 }
  0x46   : > { %672 = vst [vmem:[#allocation2 + $0x288] sm:$0xff] %v7009_v53  ;;  %673 = vst [vmem:[#allocation2 + $0x290] sm:$0xff] %v7010_v54  ;;  %v7238_v10 = vld [vmem:[%s9243_s13 + $0xe0] sm:$0xff]   ;;  %v9422_v11 = vld [vmem:[%s9243_s13 + $0x68] sm:$0xff]  ;;  %v9430_v19 = vpack.c.bf16 %v720_v9, %v719_v8 }
  0x47   : > { %677 = vst [vmem:[#allocation2 + $0x2c0] sm:$0xff] %v7018_v4  ;;  %v7021_v12 = vunpack.c.l.bf16 %v7238_v10  ;;  %v9427_v16 = vld [vmem:[%s9243_s13 + $0x70] sm:$0xff]  ;;  %v7239_v17 = vld [vmem:[%s9243_s13 + $0xe8] sm:$0xff]   ;;  %v911_v23 = vld [vmem:[#allocation2 + $0x39] sm:$0xff] }
  0x48   : > { %8046 = vmatpush3.bf16.msra.mxu0 %v8960_v52  ;;  %7726 = vmatpush3.bf16.msra.mxu1 %v8970_v13  ;;  %v9402_v52 = vld [vmem:[%s9243_s13 + $0x58] sm:$0xff]  ;;  %v7022_v13 = vunpack.c.h.bf16 %v7238_v10  ;;  %v7025_v20 = vunpack.c.l.bf16 %v7239_v17  ;;  %v7026_v22 = vunpack.c.h.bf16 %v7239_v17  ;;  %v912_v24 = vld [vmem:[#allocation2 + $0x41] sm:$0xff]  ;;  %v722_v29 = vld [vmem:[#allocation2 + $0x16f] sm:$0xff] }
  0x49   : > { %8047 = vmatprep.subr.bf16.mxu0 %v8964_v59  ;;  %7727 = vmatprep.subr.bf16.mxu1 %v8972_v39  ;;  %678 = vst [vmem:[#allocation2 + $0x2d8] sm:$0xff] %v7021_v12  ;;  %v9438_v26 = vld [vmem:[%s10312_s3 + $0x80] sm:$0xff]   ;;  %v724_v33 = vld [vmem:[#allocation2 + $0x18f] sm:$0xff]  ;;  %v9443_v35 = vld [vmem:[%s9243_s13 + $0x78] sm:$0xff]  ;;  %v9447_v38 = vpack.c.bf16 %v912_v24, %v911_v23 }
  0x4a   : > { %7984 = vmatmul.mubr.bf16.gmra.mrb[12].mxu0 %v9350_v62  ;;  %7664 = vmatmul.mubr.bf16.gmra.mrb[12].mxu1 %v9353_v0  ;;  %679 = vst [vmem:[#allocation2 + $0x2e0] sm:$0xff] %v7022_v13  ;;  %680 = vst [vmem:[#allocation2 + $0x2e8] sm:$0xff] %v7025_v20  ;;  %v721_v28 = vld [vmem:[#allocation2 + $0x167] sm:$0xff]  ;;  %v914_v41 = vld [vmem:[#allocation2 + $0x51] sm:$0xff] }
  0x4b   : > { %7987 = vmatprep.mubr.bf16.mxu0 %v9356_v1  ;;  %7667 = vmatprep.mubr.bf16.mxu1 %v9358_v5  ;;  %681 = vst [vmem:[#allocation2 + $0x2f0] sm:$0xff] %v7026_v22  ;;  %v723_v32 = vld [vmem:[#allocation2 + $0x187] sm:$0xff]  ;;  %v9445_v37 = vpack.c.bf16 %v722_v29, %v721_v28  ;;  %v725_v42 = vld [vmem:[#allocation2 + $0x197] sm:$0xff]  ;;  %v726_v43 = vld [vmem:[#allocation2 + $0x19f] sm:$0xff] }
  0x4c   : > { %8048 = vmatpush3.bf16.msra.mxu0 %v8964_v59  ;;  %7728 = vmatpush3.bf16.msra.mxu1 %v8972_v39  ;;  %v7013_v59 = vunpack.c.l.bf16 %v7236_v58  ;;  %v9449_v39 = vpack.c.bf16 %v724_v33, %v723_v32  ;;  %v913_v40 = vld [vmem:[#allocation2 + $0x49] sm:$0xff]  ;;  %v727_v45 = vld [vmem:[#allocation2 + $0x1b7] sm:$0xff]  ;;  %v728_v47 = vld [vmem:[#allocation2 + $0x1bf] sm:$0xff]  ;;  %v9457_v54 = vpack.c.bf16 %v726_v43, %v725_v42 }
  0x4d   : > { %8049 = vmatprep.subr.bf16.mxu0 %v8967_v6  ;;  %v915_v44 = vld [vmem:[#allocation2 + $0x69] sm:$0xff]  ;;  %v916_v48 = vld [vmem:[#allocation2 + $0x71] sm:$0xff]  ;;  %v9455_v53 = vpack.c.bf16 %v914_v41, %v913_v40  ;;  %v9459_v58 = vpack.c.bf16 %v728_v47, %v727_v45  ;;  %v917_v60 = vld [vmem:[#allocation2 + $0x79] sm:$0xff] }
  0x4e   : > { %674 = vst [vmem:[#allocation2 + $0x2a8] sm:$0xff] %v7013_v59  ;;  %10372 = vst [vmem:[#allocation6_spill] sm:$0xff] %v9449_v39  ;;  %v9461_v59 = vpack.c.bf16 %v916_v48, %v915_v44  ;;  %v918_v61 = vld [vmem:[#allocation2 + $0x81] sm:$0xff]  ;;  %v919_v4 = vld [vmem:[#allocation2 + $0x99] sm:$0xff] }
  0x4f   : > { %10373 = vst [vmem:[#allocation7_spill] sm:$0xff] %v9457_v54  ;;  %10374 = vst [vmem:[#allocation8_spill] sm:$0xff] %v9459_v58  ;;  %v8971_v63 = vld [vmem:[%s10312_s3 + $0x188] sm:$0xff]   ;;  %v8973_v9 = vld [vmem:[%s10312_s3 + $0x190] sm:$0xff]   ;;  %v9474_v10 = vpack.c.bf16 %v918_v61, %v917_v60 }
  0x50   : > { %8050 = vmatpush3.bf16.msra.mxu0 %v8967_v6  ;;  %v8974_v6 = vld [vmem:[%s10312_s3 + $0x78] sm:$0xff]   ;;  %v729_v2 = vld [vmem:[#allocation2 + $0x1c7] sm:$0xff]  ;;  %v730_v7 = vld [vmem:[#allocation2 + $0x1cf] sm:$0xff] }
  0x51   : > { %8115 = vmatprep.subr.bf16.mxu0 %v9376_v21  ;;  %7729 = vmatprep.subr.bf16.mxu1 %v8974_v6  ;;  %v731_v8 = vld [vmem:[#allocation2 + $0x1e7] sm:$0xff]  ;;  %v732_v12 = vld [vmem:[#allocation2 + $0x1ef] sm:$0xff]  ;;  %v7241_v17 = vld [vmem:[%s9243_s13 + $0xf8] sm:$0xff]   ;;  %v9478_v24 = vpack.c.bf16 %v730_v7, %v729_v2 }
  0x52   : > { %7988 = vmatmul.mubr.bf16.gmra.mrb[16].mxu0 %v9380_v25  ;;  %7668 = vmatmul.mubr.bf16.gmra.mrb[16].mxu1 %v9383_v30  ;;  %v7240_v13 = vld [vmem:[%s9243_s13 + $0xf0] sm:$0xff]   ;;  %v7033_v23 = vunpack.c.l.bf16 %v7241_v17  ;;  %v9482_v29 = vpack.c.bf16 %v732_v12, %v731_v8  ;;  %v8975_v32 = vld [vmem:[%s10312_s3 + $0x198] sm:$0xff]   ;;  %v8977_v48 = vld [vmem:[%s10312_s3 + $0x1a0] sm:$0xff]  }
  0x53   : > { %7991 = vmatprep.mubr.bf16.mxu0 %v9386_v31  ;;  %7671 = vmatprep.mubr.bf16.mxu1 %v9389_v36  ;;  %v7029_v20 = vunpack.c.l.bf16 %v7240_v13  ;;  %v7030_v22 = vunpack.c.h.bf16 %v7240_v13  ;;  %v921_v33 = vld [vmem:[#allocation2 + $0xa9] sm:$0xff]  ;;  %v922_v40 = vld [vmem:[#allocation2 + $0xb1] sm:$0xff]  ;;  %v734_v42 = vld [vmem:[#allocation2 + $0x1ff] sm:$0xff] }
  0x54   : > { %7730 = vmatpush3.bf16.msra.mxu1 %v8974_v6  ;;  %v920_v6 = vld [vmem:[#allocation2 + $0xa1] sm:$0xff]  ;;  %684 = vst [vmem:[#allocation2 + $0x318] sm:$0xff] %v7033_v23  ;;  %v733_v41 = vld [vmem:[#allocation2 + $0x1f7] sm:$0xff]  ;;  %v923_v43 = vld [vmem:[#allocation2 + $0xc9] sm:$0xff]  ;;  %v9494_v60 = vpack.c.bf16 %v922_v40, %v921_v33 }
  0x55   : > { %7795 = vmatprep.subr.bf16.mxu1 %v9438_v26  ;;  %v9480_v28 = vpack.c.bf16 %v920_v6, %v919_v4  ;;  %682 = vst [vmem:[#allocation2 + $0x308] sm:$0xff] %v7029_v20  ;;  %683 = vst [vmem:[#allocation2 + $0x310] sm:$0xff] %v7030_v22  ;;  %v924_v44 = vld [vmem:[#allocation2 + $0xd1] sm:$0xff]  ;;  %v736_v47 = vld [vmem:[#allocation2 + $0x21f] sm:$0xff]  ;;  %v9496_v61 = vpack.c.bf16 %v734_v42, %v733_v41 }
  0x56   : > { %v735_v45 = vld [vmem:[#allocation2 + $0x217] sm:$0xff]  ;;  %v8979_v4 = vld [vmem:[%s10312_s3 + $0x1a8] sm:$0xff]   ;;  %vm9052_vm1 = vmpackc.low %vm9256_vm0, %vm9256_vm0 }
  0x57   : > { %v9500_v2 = vpack.c.bf16 %v736_v47, %v735_v45  ;;  %v925_v6 = vld [vmem:[#allocation2 + $0xd9] sm:$0xff]  ;;  %v926_v7 = vld [vmem:[#allocation2 + $0xe1] sm:$0xff]  ;;  %v738_v13 = vld [vmem:[#allocation2 + $0x22f] sm:$0xff] }
  0x58   : > { %v737_v8 = vld [vmem:[#allocation2 + $0x227] sm:$0xff]  ;;  %v740_v20 = vld [vmem:[#allocation2 + $0x24f] sm:$0xff]  ;;  %v9512_v23 = vpack.c.bf16 %v926_v7, %v925_v6  ;;  %v8983_v33 = vld [vmem:[%s10312_s3 + $0x1b8] sm:$0xff]  }
  0x59   : > { %v928_v12 = vld [vmem:[#allocation2 + $0x101] sm:$0xff]  ;;  %v8981_v22 = vld [vmem:[%s10312_s3 + $0x1b0] sm:$0xff]  }
  0x5a   : > { %7992 = vmatmul.mubr.bf16.gmra.mrb[20].mxu0 %v9402_v52  ;;  %7672 = vmatmul.mubr.bf16.gmra.mrb[20].mxu1 %v9404_v55  ;;  %10375 = vst [vmem:[#allocation9_spill] sm:$0xff] %v9512_v23  ;;  %v929_v41 = vld [vmem:[#allocation2 + $0x109] sm:$0xff]  ;;  %v930_v42 = vld [vmem:[#allocation2 + $0x111] sm:$0xff]  ;;  %v744_v6 = vld [vmem:[#allocation2 + $0x27f] sm:$0xff] }
  0x5b   : > { %7995 = vmatprep.mubr.bf16.mxu0 %v9407_v56  ;;  %7675 = vmatprep.mubr.bf16.mxu1 %v9409_v57  ;;  %v931_v45 = vld [vmem:[#allocation2 + $0x129] sm:$0xff]  ;;  %v932_v47 = vld [vmem:[#allocation2 + $0x131] sm:$0xff]  ;;  %v9532_v7 = vpack.c.bf16 %v930_v42, %v929_v41  ;;  %v936_v42 = vld [vmem:[#allocation2 + $0x161] sm:$0xff] }
  0x5c   : > { %v746_v41 = vld [vmem:[#allocation2 + $0x28f] sm:$0xff] }
  0x5d   : > { %10378 = vst [vmem:[#allocation12_spill] sm:$0xff] %v9532_v7  ;;  %v938_v18 = vld [vmem:[#allocation2 + $0x171] sm:$0xff]  ;;  %v939_v3 = vld [vmem:[#allocation2 + $0x189] sm:$0xff] }
  0x62   : > { %7996 = vmatmul.mubr.bf16.gmra.mrb[24].mxu0 %v9422_v11  ;;  %7676 = vmatmul.mubr.bf16.gmra.mrb[24].mxu1 %v9424_v15 }
  0x63   : > { %7999 = vmatprep.mubr.bf16.mxu0 %v9427_v16  ;;  %7679 = vmatprep.mubr.bf16.mxu1 %v9430_v19 }
  0x6a   : > { %8000 = vmatmul.mubr.bf16.gmra.mrb[28].mxu0 %v9443_v35  ;;  %7680 = vmatmul.mubr.bf16.gmra.mrb[28].mxu1 %v9445_v37 }
  0x6b   : > { %8051 = vmatprep.mubr.bf16.mxu0 %v9447_v38  ;;  %7683 = vmatprep.mubr.bf16.mxu1 %v9449_v39 }
  0x72   : > { %8052 = vmatmul.mubr.bf16.vlgmr.msra.gmra.mrb[0].mxu0 %v9455_v53  ;;  %7684 = vmatmul.mubr.bf16.gmra.mrb[32].mxu1 %v9457_v54 }
  0x73   : > { %8116 = vmatpush3.bf16.msra.mxu0 %v9376_v21  ;;  %7687 = vmatprep.mubr.bf16.mxu1 %v9459_v58  ;;  %v7034_v21 = vunpack.c.h.bf16 %v7241_v17  ;;  %v739_v17 = vld [vmem:[#allocation2 + $0x247] sm:$0xff] }
  0x74   : > { %8055 = vmatprep.mubr.bf16.mxu0 %v9461_v59  ;;  %8117 = vmatprep.subr.bf16.mxu0 %v8971_v63  ;;  %v9521_v40 = vpack.c.bf16 %v740_v20, %v739_v17  ;;  %v934_v17 = vld [vmem:[#allocation2 + $0x141] sm:$0xff]  ;;  %v935_v20 = vld [vmem:[#allocation2 + $0x159] sm:$0xff] }
  0x75   : > { %685 = vst [vmem:[#allocation2 + $0x320] sm:$0xff] %v7034_v21  ;;  %v9514_v21 = vpack.c.bf16 %v738_v13, %v737_v8  ;;  %v933_v13 = vld [vmem:[#allocation2 + $0x139] sm:$0xff] }
  0x76   : > { %10377 = vst [vmem:[#allocation11_spill] sm:$0xff] %v9521_v40 }
  0x77   : > { %8118 = vmatpush3.bf16.msra.mxu0 %v8971_v63  ;;  %v9498_v63 = vpack.c.bf16 %v924_v44, %v923_v43  ;;  %v741_v43 = vld [vmem:[#allocation2 + $0x257] sm:$0xff]  ;;  %v742_v44 = vld [vmem:[#allocation2 + $0x25f] sm:$0xff] }
  0x78   : > { %8119 = vmatprep.subr.bf16.mxu0 %v8973_v9  ;;  %v9534_v8 = vpack.c.bf16 %v742_v44, %v741_v43  ;;  %v747_v43 = vld [vmem:[#allocation2 + $0x2a7] sm:$0xff]  ;;  %v748_v44 = vld [vmem:[#allocation2 + $0x2af] sm:$0xff] }
  0x7a   : > { %8056 = vmatmul.mubr.bf16.gmra.mrb[4].mxu0 %v9474_v10  ;;  %7688 = vmatmul.mubr.bf16.gmra.mrb[36].mxu1 %v9478_v24  ;;  %10379 = vst [vmem:[#allocation13_spill] sm:$0xff] %v9534_v8 }
  0x7b   : > { %8059 = vmatprep.mubr.bf16.mxu0 %v9480_v28  ;;  %7691 = vmatprep.mubr.bf16.mxu1 %v9482_v29 }
  0x7c   : > { %8120 = vmatpush3.bf16.msra.mxu0 %v8973_v9  ;;  %v927_v9 = vld [vmem:[#allocation2 + $0xf9] sm:$0xff] }
  0x7d   : > { %8121 = vmatprep.subr.bf16.mxu0 %v8975_v32 }
  0x80   : > { %8122 = vmatpush3.bf16.msra.mxu0 %v8975_v32  ;;  %v9516_v32 = vpack.c.bf16 %v928_v12, %v927_v9  ;;  %v9536_v9 = vpack.c.bf16 %v932_v47, %v931_v45  ;;  %v9545_v45 = vpack.c.bf16 %v934_v17, %v933_v13  ;;  %v9549_v47 = vpack.c.bf16 %v936_v42, %v935_v20  ;;  %v750_v13 = vld [vmem:[#allocation2 + $0x2bf] sm:$0xff]  ;;  %v940_v17 = vld [vmem:[#allocation2 + $0x191] sm:$0xff] }
  0x81   : > { %8123 = vmatprep.subr.bf16.mxu0 %v8977_v48 }
  0x82   : > { %8060 = vmatmul.mubr.bf16.gmra.mrb[8].mxu0 %v9494_v60  ;;  %7692 = vmatmul.mubr.bf16.gmra.mrb[40].mxu1 %v9496_v61  ;;  %10376 = vst [vmem:[#allocation10_spill] sm:$0xff] %v9516_v32  ;;  %10380 = vst [vmem:[#allocation14_spill] sm:$0xff] %v9536_v9 }
  0x83   : > { %8063 = vmatprep.mubr.bf16.mxu0 %v9498_v63  ;;  %7695 = vmatprep.mubr.bf16.mxu1 %v9500_v2  ;;  %10382 = vst [vmem:[#allocation16_spill] sm:$0xff] %v9545_v45  ;;  %10384 = vst [vmem:[#allocation18_spill] sm:$0xff] %v9549_v47 }
  0x84   : > { %8124 = vmatpush3.bf16.msra.mxu0 %v8977_v48  ;;  %v743_v48 = vld [vmem:[#allocation2 + $0x277] sm:$0xff] }
  0x85   : > { %8125 = vmatprep.subr.bf16.mxu0 %v8979_v4  ;;  %v9538_v12 = vpack.c.bf16 %v744_v6, %v743_v48  ;;  %v9551_v48 = vpack.c.bf16 %v748_v44, %v747_v43  ;;  %v937_v6 = vld [vmem:[#allocation2 + $0x169] sm:$0xff]  ;;  %v9561_v43 = vpack.c.bf16 %v940_v17, %v939_v3 }
  0x86   : > { %v9557_v20 = vpack.c.bf16 %v938_v18, %v937_v6  ;;  %v754_v18 = vld [vmem:[#allocation2 + $0x2ef] sm:$0xff]  ;;  %v944_v6 = vld [vmem:[#allocation2 + $0x1c1] sm:$0xff] }
  0x87   : > { %10381 = vst [vmem:[#allocation15_spill] sm:$0xff] %v9538_v12  ;;  %10385 = vst [vmem:[#allocation19_spill] sm:$0xff] %v9551_v48 }
  0x88   : > { %8126 = vmatpush3.bf16.msra.mxu0 %v8979_v4  ;;  %v9530_v4 = vld [vmem:[%s10312_s3 + $0x1c0] sm:$0xff]   ;;  %10386 = vst [vmem:[#allocation20_spill] sm:$0xff] %v9557_v20  ;;  %10388 = vst [vmem:[#allocation22_spill] sm:$0xff] %v9561_v43 }
  0x89   : > { %8127 = vmatprep.subr.bf16.mxu0 %v8981_v22 }
  0x8a   : > { %8064 = vmatmul.mubr.bf16.gmra.mrb[12].mxu0 %v9512_v23  ;;  %7696 = vmatmul.mubr.bf16.gmra.mrb[44].mxu1 %v9514_v21  ;;  %v948_v23 = vld [vmem:[#allocation2 + $0x1f1] sm:$0xff] }
  0x8b   : > { %8067 = vmatprep.mubr.bf16.mxu0 %v9516_v32  ;;  %7699 = vmatprep.mubr.bf16.mxu1 %v9521_v40  ;;  %v753_v32 = vld [vmem:[#allocation2 + $0x2e7] sm:$0xff] }
  0x8c   : > { %8128 = vmatpush3.bf16.msra.mxu0 %v8981_v22  ;;  %v745_v22 = vld [vmem:[#allocation2 + $0x287] sm:$0xff]  ;;  %v9571_v17 = vpack.c.bf16 %v754_v18, %v753_v32 }
  0x8d   : > { %8129 = vmatprep.subr.bf16.mxu0 %v8983_v33  ;;  %v8978_v32 = vld [vmem:[%s10312_s3 + $0x88] sm:$0xff]  }
  0x8e   : > { %10390 = vst [vmem:[#allocation24_spill] sm:$0xff] %v9571_v17  ;;  %v9029_v18 = vld [vmem:[%s9243_s13 + $0x8] sm:$0xff] }
  0x90   : > { %8130 = vmatpush3.bf16.msra.mxu0 %v8983_v33  ;;  %v9547_v33 = vpack.c.bf16 %v746_v41, %v745_v22  ;;  %v751_v22 = vld [vmem:[#allocation2 + $0x2d7] sm:$0xff]  ;;  %v752_v41 = vld [vmem:[#allocation2 + $0x2df] sm:$0xff] }
  0x91   : > { %8195 = vmatprep.subr.bf16.mxu0 %v9530_v4  ;;  %v9563_v44 = vpack.c.bf16 %v752_v41, %v751_v22 }
  0x92   : > { %8068 = vmatmul.mubr.bf16.gmra.mrb[16].mxu0 %v9532_v7  ;;  %7700 = vmatmul.mubr.bf16.gmra.mrb[48].mxu1 %v9534_v8  ;;  %10383 = vst [vmem:[#allocation17_spill] sm:$0xff] %v9547_v33  ;;  %v943_v7 = vld [vmem:[#allocation2 + $0x1b9] sm:$0xff] }
  0x93   : > { %8071 = vmatprep.mubr.bf16.mxu0 %v9536_v9  ;;  %7703 = vmatprep.mubr.bf16.mxu1 %v9538_v12  ;;  %v749_v9 = vld [vmem:[#allocation2 + $0x2b7] sm:$0xff]  ;;  %10389 = vst [vmem:[#allocation23_spill] sm:$0xff] %v9563_v44  ;;  %v9573_v22 = vpack.c.bf16 %v944_v6, %v943_v7  ;;  %v953_v6 = vld [vmem:[#allocation2 + $0x229] sm:$0xff] }
  0x94   : > { %v9559_v42 = vpack.c.bf16 %v750_v13, %v749_v9  ;;  %v799_v9 = vld [vmem:[#allocation2 + $0x8] sm:$0xff]  ;;  %v800_v13 = vld [vmem:[#allocation2 + $0x10] sm:$0xff]  ;;  %v949_v7 = vld [vmem:[#allocation2 + $0x1f9] sm:$0xff] }
  0x95   : > { %v871_v41 = vpack.c.bf16 %v800_v13, %v799_v9  ;;  %v954_v9 = vld [vmem:[#allocation2 + $0x231] sm:$0xff] }
  0x96   : > { %10387 = vst [vmem:[#allocation21_spill] sm:$0xff] %v9559_v42  ;;  %v9607_v13 = vld [vmem:[%s9243_s13 + $0x10] sm:$0xff] }
  0x9a   : > { %8072 = vmatmul.mubr.bf16.gmra.mrb[20].mxu0 %v9545_v45  ;;  %7704 = vmatmul.mubr.bf16.gmra.mrb[52].mxu1 %v9547_v33  ;;  %v942_v45 = vld [vmem:[#allocation2 + $0x1a1] sm:$0xff] }
  0x9b   : > { %8075 = vmatprep.mubr.bf16.mxu0 %v9549_v47  ;;  %7707 = vmatprep.mubr.bf16.mxu1 %v9551_v48  ;;  %v941_v47 = vld [vmem:[#allocation2 + $0x199] sm:$0xff] }
  0x9c   : > { %v9569_v3 = vpack.c.bf16 %v942_v45, %v941_v47  ;;  %v950_v47 = vld [vmem:[#allocation2 + $0x201] sm:$0xff] }
  0xa2   : > { %8076 = vmatmul.mubr.bf16.gmra.mrb[24].mxu0 %v9557_v20  ;;  %7708 = vmatmul.mubr.bf16.gmra.mrb[56].mxu1 %v9559_v42  ;;  %v946_v20 = vld [vmem:[#allocation2 + $0x1d1] sm:$0xff] }
  0xa3   : > { %8079 = vmatprep.mubr.bf16.mxu0 %v9561_v43  ;;  %7711 = vmatprep.mubr.bf16.mxu1 %v9563_v44  ;;  %v945_v43 = vld [vmem:[#allocation2 + $0x1c9] sm:$0xff] }
  0xa4   : > { %v947_v44 = vld [vmem:[#allocation2 + $0x1e9] sm:$0xff]  ;;  %v9578_v42 = vpack.c.bf16 %v946_v20, %v945_v43  ;;  %v951_v20 = vld [vmem:[#allocation2 + $0x219] sm:$0xff]  ;;  %v952_v43 = vld [vmem:[#allocation2 + $0x221] sm:$0xff] }
  0xa5   : > { %v9580_v45 = vpack.c.bf16 %v948_v23, %v947_v44  ;;  %v9028_v23 = vld [vmem:[%s9243_s13] sm:$0xff]  ;;  %v9596_v44 = vpack.c.bf16 %v950_v47, %v949_v7  ;;  %v9613_v47 = vpack.c.bf16 %v954_v9, %v953_v6 }
  0xa6   : > { %v8984_v7 = vld [vmem:[%s10312_s3 + $0xa0] sm:$0xff]  }
  0xa7   : > { %10392 = vst [vmem:[#allocation26_spill] sm:$0xff] %v9613_v47  ;;  %v9627_v6 = vld [vmem:[%s9243_s13 + $0x20] sm:$0xff] }
  0xa8   : > { %v960_v9 = vld [vmem:[#allocation2 + $0x281] sm:$0xff] }
  0xaa   : > { %8080 = vmatmul.mubr.bf16.gmra.mrb[28].mxu0 %v9569_v3  ;;  %7712 = vmatmul.mubr.bf16.gmra.mrb[60].mxu1 %v9571_v17 }
  0xab   : > { %8083 = vmatprep.mubr.bf16.mxu0 %v9573_v22  ;;  %7731 = vmatprep.mubr.bf16.mxu1 %v871_v41  ;;  %v955_v41 = vld [vmem:[#allocation2 + $0x249] sm:$0xff] }
  0xb2   : > { %8084 = vmatmul.mubr.bf16.gmra.mrb[32].mxu0 %v9578_v42  ;;  %9054 = vmatmul.mubr.msk.bf16.vlgmr.msra.gmra.mrb[0].mxu1 %vm9052_vm1, %v9232_v14  ;;  %v9598_v14 = vpack.c.bf16 %v952_v43, %v951_v20  ;;  %v8990_v20 = vld [vmem:[%s10312_s3 + $0xa8] sm:$0xff]   ;;  %v9622_v43 = vld [vmem:[%s9243_s13 + $0x18] sm:$0xff] }
  0xb3   : > { %8087 = vmatprep.mubr.bf16.mxu0 %v9580_v45  ;;  %7796 = vmatpush3.bf16.msra.mxu1 %v9438_v26  ;;  %v8982_v26 = vld [vmem:[%s10312_s3 + $0x98] sm:$0xff]  }
  0xb4   : > { %7735 = vmatprep.mubr.bf16.mxu1 %v9028_v23  ;;  %7797 = vmatprep.subr.bf16.mxu1 %v8978_v32  ;;  %10391 = vst [vmem:[#allocation25_spill] sm:$0xff] %v9598_v14 }
  0xb7   : > { %7798 = vmatpush3.bf16.msra.mxu1 %v8978_v32  ;;  %v956_v32 = vld [vmem:[#allocation2 + $0x251] sm:$0xff] }
  0xb8   : > { %7799 = vmatprep.subr.bf16.mxu1 %v8980_v34  ;;  %v9615_v23 = vpack.c.bf16 %v956_v32, %v955_v41  ;;  %v8996_v41 = vld [vmem:[%s10312_s3 + $0xb0] sm:$0xff]  }
  0xba   : > { %8088 = vmatmul.mubr.bf16.gmra.mrb[36].mxu0 %v9596_v44  ;;  %7736 = vmatmul.mubr.bf16.gmra.mrb[4].mxu1 %v9029_v18  ;;  %10393 = vst [vmem:[#allocation27_spill] sm:$0xff] %v9615_v23  ;;  %v958_v18 = vld [vmem:[#allocation2 + $0x261] sm:$0xff] }
  0xbb   : > { %8091 = vmatprep.mubr.bf16.mxu0 %v9598_v14  ;;  %7739 = vmatprep.mubr.bf16.mxu1 %v9607_v13  ;;  %v962_v14 = vld [vmem:[#allocation2 + $0x291] sm:$0xff] }
  0xbc   : > { %7800 = vmatpush3.bf16.msra.mxu1 %v8980_v34  ;;  %v957_v34 = vld [vmem:[#allocation2 + $0x259] sm:$0xff] }
  0xbd   : > { %7801 = vmatprep.subr.bf16.mxu1 %v8982_v26  ;;  %v9633_v32 = vpack.c.bf16 %v958_v18, %v957_v34  ;;  %v963_v34 = vld [vmem:[#allocation2 + $0x2a9] sm:$0xff]  ;;  %v964_v18 = vld [vmem:[#allocation2 + $0x2b1] sm:$0xff] }
  0xc0   : > { %7802 = vmatpush3.bf16.msra.mxu1 %v8982_v26  ;;  %v959_v26 = vld [vmem:[#allocation2 + $0x279] sm:$0xff] }
  0xc1   : > { %7803 = vmatprep.subr.bf16.mxu1 %v8984_v7 }
  0xc2   : > { %8092 = vmatmul.mubr.bf16.gmra.mrb[40].mxu0 %v9613_v47  ;;  %7740 = vmatmul.mubr.bf16.gmra.mrb[8].mxu1 %v9622_v43  ;;  %v9635_v47 = vpack.c.bf16 %v960_v9, %v959_v26  ;;  %v9651_v9 = vpack.c.bf16 %v964_v18, %v963_v34  ;;  %v971_v34 = vld [vmem:[#allocation2 + $0x309] sm:$0xff]  ;;  %v972_v18 = vld [vmem:[#allocation2 + $0x311] sm:$0xff] }
  0xc3   : > { %8095 = vmatprep.mubr.bf16.mxu0 %v9615_v23  ;;  %7743 = vmatprep.mubr.bf16.mxu1 %v9627_v6  ;;  %v9002_v23 = vld [vmem:[%s10312_s3 + $0xb8] sm:$0xff]  }
  0xc4   : > { %7804 = vmatpush3.bf16.msra.mxu1 %v8984_v7  ;;  %10394 = vst [vmem:[#allocation28_spill] sm:$0xff] %v9635_v47  ;;  %v961_v7 = vld [vmem:[#allocation2 + $0x289] sm:$0xff]  ;;  %10396 = vst [vmem:[#allocation30_spill] sm:$0xff] %v9651_v9 }
  0xc5   : > { %7805 = vmatprep.subr.bf16.mxu1 %v8990_v20  ;;  %v9649_v26 = vpack.c.bf16 %v962_v14, %v961_v7  ;;  %v967_v14 = vld [vmem:[#allocation2 + $0x2d9] sm:$0xff] }
  0xc7   : > { %10395 = vst [vmem:[#allocation29_spill] sm:$0xff] %v9649_v26 }
  0xc8   : > { %7806 = vmatpush3.bf16.msra.mxu1 %v8990_v20  ;;  %v9647_v20 = vld [vmem:[%s10312_s3 + $0xc0] sm:$0xff]  }
  0xc9   : > { %7807 = vmatprep.subr.bf16.mxu1 %v8996_v41 }
  0xca   : > { %8096 = vmatmul.mubr.bf16.gmra.mrb[44].mxu0 %v9633_v32  ;;  %7744 = vmatmul.mubr.bf16.gmra.mrb[12].mxu1 %v9326_v46  ;;  %v965_v46 = vld [vmem:[#allocation2 + $0x2b9] sm:$0xff] }
  0xcb   : > { %8099 = vmatprep.mubr.bf16.mxu0 %v9635_v47  ;;  %7747 = vmatprep.mubr.bf16.mxu1 %v9331_v50  ;;  %v966_v50 = vld [vmem:[#allocation2 + $0x2c1] sm:$0xff] }
  0xcc   : > { %7808 = vmatpush3.bf16.msra.mxu1 %v8996_v41  ;;  %v968_v41 = vld [vmem:[#allocation2 + $0x2e1] sm:$0xff] }
  0xcd   : > { %7809 = vmatprep.subr.bf16.mxu1 %v9002_v23  ;;  %v9661_v7 = vpack.c.bf16 %v968_v41, %v967_v14 }
  0xcf   : > { %10398 = vst [vmem:[#allocation32_spill] sm:$0xff] %v9661_v7 }
  0xd0   : > { %7810 = vmatpush3.bf16.msra.mxu1 %v9002_v23  ;;  %v9659_v23 = vpack.c.bf16 %v966_v50, %v965_v46  ;;  %v9672_v46 = vld [vmem:[%s404_s17] sm:$0xff]  }
  0xd1   : > { %7875 = vmatprep.subr.bf16.mxu1 %v9647_v20  ;;  %10399 = vst [vmem:[#allocation33_spill] sm:$0xff] %v9672_v46  ;;  %v7045_v50 = vunpack.c.l.bf16 %v9672_v46  ;;  %v7046_v14 = vunpack.c.h.bf16 %v9672_v46 }
  0xd2   : > { %8100 = vmatmul.mubr.bf16.gmra.mrb[48].mxu0 %v9649_v26  ;;  %7748 = vmatmul.mubr.bf16.gmra.mrb[16].mxu1 %v9350_v62  ;;  %10397 = vst [vmem:[#allocation31_spill] sm:$0xff] %v9659_v23  ;;  %v969_v62 = vld [vmem:[#allocation2 + $0x2e9] sm:$0xff]  ;;  %v9682_v26 = vpack.c.bf16 %v972_v18, %v971_v34  ;;  %v974_v34 = vld [vmem:[#allocation2 + $0x321] sm:$0xff] }
  0xd3   : > { %8103 = vmatprep.mubr.bf16.mxu0 %v9651_v9  ;;  %7751 = vmatprep.mubr.bf16.mxu1 %v9356_v1  ;;  %v970_v1 = vld [vmem:[#allocation2 + $0x2f1] sm:$0xff]  ;;  %v9740_v18 = vld [vmem:[%s9243_s13 + $0xa0] sm:$0xff] }
  0xd4   : > { %v9678_v41 = vpack.c.bf16 %v970_v1, %v969_v62  ;;  %10401 = vst [vmem:[#allocation35_spill] sm:$0xff] %v9682_v26 }
  0xda   : > { %8104 = vmatmul.mubr.bf16.gmra.mrb[52].mxu0 %v9659_v23  ;;  %7752 = vmatmul.mubr.bf16.gmra.mrb[20].mxu1 %v9380_v25  ;;  %v9676_v25 = vld [vmem:[%s404_s17 + $0x8] sm:$0xff]  }
  0xdb   : > { %8107 = vmatprep.mubr.bf16.mxu0 %v9661_v7  ;;  %7755 = vmatprep.mubr.bf16.mxu1 %v9386_v31  ;;  %10400 = vst [vmem:[#allocation34_spill] sm:$0xff] %v9676_v25  ;;  %v575_v7 = vstv %s574_s21  ;;  %v7049_v23 = vunpack.c.l.bf16 %v9676_v25  ;;  %v7050_v9 = vunpack.c.h.bf16 %v9676_v25  ;;  %v909_v25 = vld [vmem:[#allocation2 + $0x19] sm:$0xff] }
  0xdc   : > { %vm9684_vm2 = vcmp.eq.s32.totalorder %v575_v7, 1  ;;  %v973_v7 = vld [vmem:[#allocation2 + $0x319] sm:$0xff] }
  0xdd   : > { %v577_v47 = vsel %vm9684_vm2, %v7045_v50, 0.0  ;;  %v578_v46 = vsel %vm9684_vm2, %v7046_v14, 0.0  ;;  %v579_v62 = vsel %vm9684_vm2, %v7049_v23, 0.0  ;;  %v580_v1 = vsel %vm9684_vm2, %v7050_v9, 0.0  ;;  %v9737_v9 = vld [vmem:[%s9243_s13 + $0x98] sm:$0xff]  ;;  %v9011_v50 = vld [vmem:[%s10312_s3 + $0x1f0] sm:$0xff]   ;;  %vm9055_vm3 = vmpackc.low %vm9684_vm2, %vm9684_vm2 }
  0xde   : > { %687 = vst [vmem:[#allocation2 + $0x338] sm:$0xff] %v577_v47  ;;  %688 = vst [vmem:[#allocation2 + $0x340] sm:$0xff] %v578_v46  ;;  %v9700_v23 = vpack.c.bf16 %v974_v34, %v973_v7  ;;  %v9707_v47 = vld [vmem:[%s9243_s13 + $0x80] sm:$0xff]  ;;  %v9009_v46 = vld [vmem:[%s10312_s3 + $0x1e8] sm:$0xff]  }
  0xdf   : > { %689 = vst [vmem:[#allocation2 + $0x348] sm:$0xff] %v579_v62  ;;  %690 = vst [vmem:[#allocation2 + $0x350] sm:$0xff] %v580_v1  ;;  %v9753_v14 = vld [vmem:[%s9243_s13 + $0xa8] sm:$0xff]  ;;  %v9756_v62 = vld [vmem:[%s9243_s13 + $0xb0] sm:$0xff] }
  0xe0   : > { %10404 = vst [vmem:[#allocation36_spill] sm:$0xff] %v9700_v23  ;;  %v9013_v1 = vld [vmem:[%s10312_s3 + $0x1f8] sm:$0xff]   ;;  %v9768_v7 = vld [vmem:[%s10312_s3 + $0x200] sm:$0xff]  }
  0xe1   : > { %v9771_v34 = vld [vmem:[%s9243_s13 + $0xb8] sm:$0xff] }
  0xe2   : > { %8108 = vmatmul.mubr.bf16.gmra.mrb[56].mxu0 %v9678_v41  ;;  %7756 = vmatmul.mubr.bf16.gmra.mrb[24].mxu1 %v9402_v52  ;;  %v8991_v52 = vld [vmem:[%s10312_s3 + $0x1c8] sm:$0xff]  }
  0xe3   : > { %8111 = vmatprep.mubr.bf16.mxu0 %v9682_v26  ;;  %7759 = vmatprep.mubr.bf16.mxu1 %v9407_v56  ;;  %v8997_v56 = vld [vmem:[%s10312_s3 + $0x1d0] sm:$0xff]  }
  0xea   : > { %8112 = vmatmul.mubr.bf16.gmra.mrb[60].mxu0 %v9700_v23  ;;  %7760 = vmatmul.mubr.bf16.gmra.mrb[28].mxu1 %v9422_v11  ;;  %v9721_v11 = vld [vmem:[%s9243_s13 + $0x88] sm:$0xff] }
  0xeb   : > { %8131 = vmatprep.mubr.bf16.mxu0 %v9308_v27  ;;  %7763 = vmatprep.mubr.bf16.mxu1 %v9427_v16  ;;  %v9724_v16 = vld [vmem:[%s9243_s13 + $0x90] sm:$0xff]  ;;  %v9802_v23 = vld [vmem:[%s9243_s13 + $0xe8] sm:$0xff] }
  0xf2   : > { %8132 = vmatmul.mubr.bf16.vlgmr.msra.gmra.mrb[0].mxu0 %v9328_v49  ;;  %7764 = vmatmul.mubr.bf16.gmra.mrb[32].mxu1 %v9443_v35  ;;  %v9003_v35 = vld [vmem:[%s10312_s3 + $0x1d8] sm:$0xff]  }
  0xf3   : > { %8196 = vmatpush3.bf16.msra.mxu0 %v9530_v4  ;;  %7767 = vmatprep.mubr.bf16.mxu1 %v9707_v47  ;;  %v9007_v4 = vld [vmem:[%s10312_s3 + $0x1e0] sm:$0xff]  }
  0xf4   : > { %8135 = vmatprep.mubr.bf16.mxu0 %v9333_v51  ;;  %8197 = vmatprep.subr.bf16.mxu0 %v8991_v52 }
  0xf7   : > { %8198 = vmatpush3.bf16.msra.mxu0 %v8991_v52  ;;  %v9774_v52 = vld [vmem:[%s9243_s13 + $0xc0] sm:$0xff] }
  0xf8   : > { %8199 = vmatprep.subr.bf16.mxu0 %v8997_v56 }
  0xfa   : > { %8136 = vmatmul.mubr.bf16.gmra.mrb[4].mxu0 %v9353_v0  ;;  %7768 = vmatmul.mubr.bf16.gmra.mrb[36].mxu1 %v9721_v11 }
  0xfb   : > { %8139 = vmatprep.mubr.bf16.mxu0 %v9358_v5  ;;  %7771 = vmatprep.mubr.bf16.mxu1 %v9724_v16 }
  0xfc   : > { %8200 = vmatpush3.bf16.msra.mxu0 %v8997_v56  ;;  %v9782_v56 = vld [vmem:[%s9243_s13 + $0xc8] sm:$0xff] }
  0xfd   : > { %8201 = vmatprep.subr.bf16.mxu0 %v9003_v35 }
 0x100   : > { %8202 = vmatpush3.bf16.msra.mxu0 %v9003_v35  ;;  %v9785_v35 = vld [vmem:[%s9243_s13 + $0xd0] sm:$0xff] }
 0x101   : > { %8203 = vmatprep.subr.bf16.mxu0 %v9007_v4 }
 0x102   : > { %8140 = vmatmul.mubr.bf16.gmra.mrb[8].mxu0 %v9383_v30  ;;  %7772 = vmatmul.mubr.bf16.gmra.mrb[40].mxu1 %v9737_v9 }
 0x103   : > { %8143 = vmatprep.mubr.bf16.mxu0 %v9389_v36  ;;  %7775 = vmatprep.mubr.bf16.mxu1 %v9740_v18 }
 0x104   : > { %8204 = vmatpush3.bf16.msra.mxu0 %v9007_v4  ;;  %v9792_v4 = vld [vmem:[%s9243_s13 + $0xd8] sm:$0xff] }
 0x105   : > { %8205 = vmatprep.subr.bf16.mxu0 %v9009_v46 }
 0x108   : > { %8206 = vmatpush3.bf16.msra.mxu0 %v9009_v46  ;;  %v9795_v46 = vld [vmem:[%s9243_s13 + $0xe0] sm:$0xff] }
 0x109   : > { %8207 = vmatprep.subr.bf16.mxu0 %v9011_v50 }
 0x10a   : > { %8144 = vmatmul.mubr.bf16.gmra.mrb[12].mxu0 %v9404_v55  ;;  %7776 = vmatmul.mubr.bf16.gmra.mrb[44].mxu1 %v9753_v14 }
 0x10b   : > { %8147 = vmatprep.mubr.bf16.mxu0 %v9409_v57  ;;  %7779 = vmatprep.mubr.bf16.mxu1 %v9756_v62 }
 0x10c   : > { %8208 = vmatpush3.bf16.msra.mxu0 %v9011_v50  ;;  %v907_v50 = vld [vmem:[#allocation2 + $0x9] sm:$0xff] }
 0x10d   : > { %8209 = vmatprep.subr.bf16.mxu0 %v9013_v1 }
 0x110   : > { %8210 = vmatpush3.bf16.msra.mxu0 %v9013_v1  ;;  %v908_v1 = vld [vmem:[#allocation2 + $0x11] sm:$0xff] }
 0x111   : > { %8275 = vmatprep.subr.bf16.mxu0 %v9768_v7  ;;  %v979_v26 = vpack.c.bf16 %v908_v1, %v907_v50  ;;  %v10406_v50 = vld [vmem:[#allocation9_spill] sm:$0xff]  ;;  %v10407_v1 = vld [vmem:[#allocation23_spill] sm:$0xff] }
 0x112   : > { %8148 = vmatmul.mubr.bf16.gmra.mrb[16].mxu0 %v9424_v15  ;;  %7780 = vmatmul.mubr.bf16.gmra.mrb[48].mxu1 %v9771_v34 }
 0x113   : > { %8151 = vmatprep.mubr.bf16.mxu0 %v9430_v19  ;;  %7783 = vmatprep.mubr.bf16.mxu1 %v9774_v52 }
 0x11a   : > { %8152 = vmatmul.mubr.bf16.gmra.mrb[20].mxu0 %v9445_v37  ;;  %7784 = vmatmul.mubr.bf16.gmra.mrb[52].mxu1 %v9782_v56 }
 0x11b   : > { %8155 = vmatprep.mubr.bf16.mxu0 %v9449_v39  ;;  %7787 = vmatprep.mubr.bf16.mxu1 %v9785_v35 }
 0x122   : > { %8156 = vmatmul.mubr.bf16.gmra.mrb[24].mxu0 %v9457_v54  ;;  %7788 = vmatmul.mubr.bf16.gmra.mrb[56].mxu1 %v9792_v4  ;;  %v910_v54 = vld [vmem:[#allocation2 + $0x21] sm:$0xff] }
 0x123   : > { %8159 = vmatprep.mubr.bf16.mxu0 %v9459_v58  ;;  %7791 = vmatprep.mubr.bf16.mxu1 %v9795_v46  ;;  %v980_v39 = vpack.c.bf16 %v910_v54, %v909_v25  ;;  %v9008_v58 = vld [vmem:[%s10312_s3 + $0xc8] sm:$0xff]   ;;  %v9012_v54 = vld [vmem:[%s10312_s3 + $0xd8] sm:$0xff]  }
 0x124   : > { %v10405_v25 = vld [vmem:[#allocation21_spill] sm:$0xff] }
 0x12a   : > { %8160 = vmatmul.mubr.bf16.gmra.mrb[28].mxu0 %v9478_v24  ;;  %7792 = vmatmul.mubr.bf16.gmra.mrb[60].mxu1 %v9802_v23 }
 0x12b   : > { %8163 = vmatprep.mubr.bf16.mxu0 %v9482_v29  ;;  %7811 = vmatprep.mubr.bf16.mxu1 %v979_v26  ;;  %v9010_v26 = vld [vmem:[%s10312_s3 + $0xd0] sm:$0xff]  }
 0x132   : > { %8164 = vmatmul.mubr.bf16.gmra.mrb[32].mxu0 %v9496_v61  ;;  %7812 = vmatmul.mubr.bf16.vlgmr.msra.gmra.mrb[0].mxu1 %v980_v39  ;;  %v9016_v39 = vld [vmem:[%s10312_s3 + $0xe8] sm:$0xff]  }
 0x133   : > { %8167 = vmatprep.mubr.bf16.mxu0 %v9500_v2  ;;  %7876 = vmatpush3.bf16.msra.mxu1 %v9647_v20  ;;  %v9847_v20 = vld [vmem:[%s10312_s3 + $0x100] sm:$0xff]  }
 0x134   : > { %7815 = vmatprep.mubr.bf16.mxu1 %v9447_v38  ;;  %7877 = vmatprep.subr.bf16.mxu1 %v9008_v58  ;;  %v9014_v38 = vld [vmem:[%s10312_s3 + $0xe0] sm:$0xff]  }
 0x137   : > { %7878 = vmatpush3.bf16.msra.mxu1 %v9008_v58  ;;  %v9020_v58 = vld [vmem:[%s10312_s3 + $0xf8] sm:$0xff]  }
 0x138   : > { %7879 = vmatprep.subr.bf16.mxu1 %v9010_v26 }
 0x13a   : > { %8168 = vmatmul.mubr.bf16.gmra.mrb[36].mxu0 %v9514_v21  ;;  %7816 = vmatmul.mubr.bf16.gmra.mrb[4].mxu1 %v9455_v53  ;;  %v9018_v53 = vld [vmem:[%s10312_s3 + $0xf0] sm:$0xff]  }
 0x13b   : > { %8171 = vmatprep.mubr.bf16.mxu0 %v9521_v40  ;;  %7819 = vmatprep.mubr.bf16.mxu1 %v9461_v59  ;;  %v10412_v40 = vld [vmem:[#allocation16_spill] sm:$0xff] }
 0x13c   : > { %7880 = vmatpush3.bf16.msra.mxu1 %v9010_v26  ;;  %v10408_v26 = vld [vmem:[#allocation10_spill] sm:$0xff] }
 0x13d   : > { %7881 = vmatprep.subr.bf16.mxu1 %v9012_v54 }
 0x140   : > { %7882 = vmatpush3.bf16.msra.mxu1 %v9012_v54  ;;  %v755_v54 = vld [vmem:[#allocation2 + $0x307] sm:$0xff] }
 0x141   : > { %7883 = vmatprep.subr.bf16.mxu1 %v9014_v38 }
 0x142   : > { %8172 = vmatmul.mubr.bf16.gmra.mrb[40].mxu0 %v9534_v8  ;;  %7820 = vmatmul.mubr.bf16.gmra.mrb[8].mxu1 %v9474_v10 }
 0x143   : > { %8175 = vmatprep.mubr.bf16.mxu0 %v9538_v12  ;;  %7823 = vmatprep.mubr.bf16.mxu1 %v9480_v28  ;;  %v760_v12 = vld [vmem:[#allocation2 + $0x33f] sm:$0xff] }
 0x144   : > { %7884 = vmatpush3.bf16.msra.mxu1 %v9014_v38  ;;  %v756_v38 = vld [vmem:[#allocation2 + $0x30f] sm:$0xff] }
 0x145   : > { %7885 = vmatprep.subr.bf16.mxu1 %v9016_v39 }
 0x148   : > { %7886 = vmatpush3.bf16.msra.mxu1 %v9016_v39  ;;  %v9854_v39 = vpack.c.bf16 %v756_v38, %v755_v54  ;;  %v761_v54 = vld [vmem:[#allocation2 + $0x347] sm:$0xff]  ;;  %v762_v38 = vld [vmem:[#allocation2 + $0x34f] sm:$0xff] }
 0x149   : > { %7887 = vmatprep.subr.bf16.mxu1 %v9018_v53 }
 0x14a   : > { %8176 = vmatmul.mubr.bf16.gmra.mrb[44].mxu0 %v9547_v33  ;;  %7824 = vmatmul.mubr.bf16.gmra.mrb[12].mxu1 %v9494_v60  ;;  %10409 = vst [vmem:[#allocation9_spill] sm:$0xff] %v9854_v39  ;;  %v10411_v33 = vld [vmem:[#allocation14_spill] sm:$0xff] }
 0x14b   : > { %8179 = vmatprep.mubr.bf16.mxu0 %v9551_v48  ;;  %7827 = vmatprep.mubr.bf16.mxu1 %v9498_v63  ;;  %v758_v48 = vld [vmem:[#allocation2 + $0x31f] sm:$0xff] }
 0x14c   : > { %7888 = vmatpush3.bf16.msra.mxu1 %v9018_v53  ;;  %v10410_v53 = vld [vmem:[#allocation12_spill] sm:$0xff] }
 0x14d   : > { %7889 = vmatprep.subr.bf16.mxu1 %v9020_v58 }
 0x150   : > { %7890 = vmatpush3.bf16.msra.mxu1 %v9020_v58  ;;  %v757_v58 = vld [vmem:[#allocation2 + $0x317] sm:$0xff] }
 0x151   : > { %8355 = vmatprep.subr.bf16.mxu1 %v9847_v20  ;;  %v9860_v8 = vpack.c.bf16 %v758_v48, %v757_v58  ;;  %v9019_v48 = vld [vmem:[%s10312_s3 + $0x210] sm:$0xff]   ;;  %v10416_v58 = vld [vmem:[#allocation25_spill] sm:$0xff] }
 0x152   : > { %8180 = vmatmul.mubr.bf16.gmra.mrb[48].mxu0 %v10405_v25  ;;  %7828 = vmatmul.mubr.bf16.gmra.mrb[16].mxu1 %v10406_v50  ;;  %v759_v25 = vld [vmem:[#allocation2 + $0x337] sm:$0xff] }
 0x153   : > { %8183 = vmatprep.mubr.bf16.mxu0 %v10407_v1  ;;  %7831 = vmatprep.mubr.bf16.mxu1 %v10408_v26  ;;  %v797_v1 = vpack.c.bf16 %v760_v12, %v759_v25  ;;  %v9017_v12 = vld [vmem:[%s10312_s3 + $0x208] sm:$0xff]  }
 0x154   : > { %v9023_v25 = vld [vmem:[%s10312_s3 + $0x228] sm:$0xff]  }
 0x15a   : > { %8184 = vmatmul.mubr.bf16.gmra.mrb[52].mxu0 %v9571_v17  ;;  %7832 = vmatmul.mubr.bf16.gmra.mrb[20].mxu1 %v10410_v53  ;;  %v10413_v17 = vld [vmem:[#allocation18_spill] sm:$0xff]  ;;  %v798_v53 = vpack.c.bf16 %v762_v38, %v761_v54  ;;  %v9027_v38 = vld [vmem:[%s10312_s3 + $0x238] sm:$0xff]  }
 0x15b   : > { %8187 = vmatprep.mubr.bf16.mxu0 %v9854_v39  ;;  %7835 = vmatprep.mubr.bf16.mxu1 %v10411_v33  ;;  %v10414_v39 = vld [vmem:[#allocation20_spill] sm:$0xff]  ;;  %v10415_v33 = vld [vmem:[#allocation22_spill] sm:$0xff] }
 0x15c   : > { %v9024_v54 = vld [vmem:[%s10312_s3 + $0x230] sm:$0xff]  }
 0x162   : > { %8188 = vmatmul.mubr.bf16.gmra.mrb[56].mxu0 %v9860_v8  ;;  %7836 = vmatmul.mubr.bf16.gmra.mrb[24].mxu1 %v10412_v40 }
 0x163   : > { %8191 = vmatprep.mubr.bf16.mxu0 %v797_v1  ;;  %7839 = vmatprep.mubr.bf16.mxu1 %v10413_v17  ;;  %v9036_v1 = vld [vmem:[%s9243_s13 + $0x38] sm:$0xff] }
 0x16a   : > { %8192 = vmatmul.mubr.bf16.gmra.mrb[60].mxu0 %v798_v53  ;;  %7840 = vmatmul.mubr.bf16.gmra.mrb[28].mxu1 %v10414_v39  ;;  %v9037_v53 = vld [vmem:[%s9243_s13 + $0x40] sm:$0xff] }
 0x16b   : > { %8211 = vmatprep.mubr.bf16.mxu0 %v9607_v13  ;;  %7843 = vmatprep.mubr.bf16.mxu1 %v10415_v33  ;;  %v9021_v13 = vld [vmem:[%s10312_s3 + $0x218] sm:$0xff]  }
 0x172   : > { %8212 = vmatmul.mubr.bf16.vlgmr.msra.gmra.mrb[0].mxu0 %v9622_v43  ;;  %7844 = vmatmul.mubr.bf16.gmra.mrb[32].mxu1 %v9569_v3  ;;  %v9034_v43 = vld [vmem:[%s9243_s13 + $0x28] sm:$0xff] }
 0x173   : > { %8276 = vmatpush3.bf16.msra.mxu0 %v9768_v7  ;;  %7847 = vmatprep.mubr.bf16.mxu1 %v9573_v22  ;;  %v9035_v7 = vld [vmem:[%s9243_s13 + $0x30] sm:$0xff] }
 0x174   : > { %8215 = vmatprep.mubr.bf16.mxu0 %v9627_v6  ;;  %8277 = vmatprep.subr.bf16.mxu0 %v9017_v12  ;;  %v9022_v6 = vld [vmem:[%s10312_s3 + $0x220] sm:$0xff]  }
 0x177   : > { %8278 = vmatpush3.bf16.msra.mxu0 %v9017_v12  ;;  %v9038_v12 = vld [vmem:[%s9243_s13 + $0x48] sm:$0xff] }
 0x178   : > { %8279 = vmatprep.subr.bf16.mxu0 %v9019_v48 }
 0x17a   : > { %8216 = vmatmul.mubr.bf16.gmra.mrb[4].mxu0 %v9034_v43  ;;  %7848 = vmatmul.mubr.bf16.gmra.mrb[36].mxu1 %v9578_v42  ;;  %v10418_v43 = vld [vmem:[#allocation27_spill] sm:$0xff] }
 0x17b   : > { %8219 = vmatprep.mubr.bf16.mxu0 %v9035_v7  ;;  %7851 = vmatprep.mubr.bf16.mxu1 %v9580_v45  ;;  %v9040_v7 = vld [vmem:[%s9243_s13 + $0x58] sm:$0xff] }
 0x17c   : > { %8280 = vmatpush3.bf16.msra.mxu0 %v9019_v48  ;;  %v10417_v48 = vld [vmem:[#allocation26_spill] sm:$0xff] }
 0x17d   : > { %8281 = vmatprep.subr.bf16.mxu0 %v9021_v13 }
 0x180   : > { %8282 = vmatpush3.bf16.msra.mxu0 %v9021_v13  ;;  %v9039_v13 = vld [vmem:[%s9243_s13 + $0x50] sm:$0xff] }
 0x181   : > { %8283 = vmatprep.subr.bf16.mxu0 %v9022_v6 }
 0x182   : > { %8220 = vmatmul.mubr.bf16.gmra.mrb[8].mxu0 %v9036_v1  ;;  %7852 = vmatmul.mubr.bf16.gmra.mrb[40].mxu1 %v9596_v44  ;;  %v9042_v1 = vld [vmem:[%s9243_s13 + $0x68] sm:$0xff] }
 0x183   : > { %8223 = vmatprep.mubr.bf16.mxu0 %v9037_v53  ;;  %7855 = vmatprep.mubr.bf16.mxu1 %v10416_v58  ;;  %v10420_v53 = vld [vmem:[#allocation29_spill] sm:$0xff] }
 0x184   : > { %8284 = vmatpush3.bf16.msra.mxu0 %v9022_v6  ;;  %v9041_v6 = vld [vmem:[%s9243_s13 + $0x60] sm:$0xff] }
 0x185   : > { %8285 = vmatprep.subr.bf16.mxu0 %v9023_v25 }
 0x188   : > { %8286 = vmatpush3.bf16.msra.mxu0 %v9023_v25  ;;  %v10419_v25 = vld [vmem:[#allocation28_spill] sm:$0xff] }
 0x189   : > { %8287 = vmatprep.subr.bf16.mxu0 %v9024_v54 }
 0x18a   : > { %8224 = vmatmul.mubr.bf16.gmra.mrb[12].mxu0 %v9038_v12  ;;  %7856 = vmatmul.mubr.bf16.gmra.mrb[44].mxu1 %v10417_v48  ;;  %v9043_v12 = vld [vmem:[%s9243_s13 + $0x70] sm:$0xff] }
 0x18b   : > { %8227 = vmatprep.mubr.bf16.mxu0 %v9039_v13  ;;  %7859 = vmatprep.mubr.bf16.mxu1 %v10418_v43  ;;  %v10421_v13 = vld [vmem:[#allocation30_spill] sm:$0xff]  ;;  %v9044_v43 = vld [vmem:[%s9243_s13 + $0x78] sm:$0xff] }
 0x18c   : > { %8288 = vmatpush3.bf16.msra.mxu0 %v9024_v54  ;;  %v10422_v54 = vld [vmem:[#allocation31_spill] sm:$0xff] }
 0x18d   : > { %8289 = vmatprep.subr.bf16.mxu0 %v9027_v38 }
 0x190   : > { %8290 = vmatpush3.bf16.msra.mxu0 %v9027_v38  ;;  %v10423_v38 = vld [vmem:[#allocation32_spill] sm:$0xff] }
 0x192   : > { %8228 = vmatmul.mubr.bf16.gmra.mrb[16].mxu0 %v9040_v7  ;;  %7860 = vmatmul.mubr.bf16.gmra.mrb[48].mxu1 %v9633_v32  ;;  %v10424_v7 = vld [vmem:[#allocation4_spill] sm:$0xff] }
 0x193   : > { %8231 = vmatprep.mubr.bf16.mxu0 %v9041_v6  ;;  %7863 = vmatprep.mubr.bf16.mxu1 %v10419_v25  ;;  %v10425_v6 = vld [vmem:[#allocation5_spill] sm:$0xff] }
 0x19a   : > { %8232 = vmatmul.mubr.bf16.gmra.mrb[20].mxu0 %v9042_v1  ;;  %7864 = vmatmul.mubr.bf16.gmra.mrb[52].mxu1 %v10420_v53  ;;  %v9046_v1 = vld [vmem:[%s10312_s3 + $0x110] sm:$0xff]  }
 0x19b   : > { %8235 = vmatprep.mubr.bf16.mxu0 %v9043_v12  ;;  %7867 = vmatprep.mubr.bf16.mxu1 %v10421_v13 }
 0x1a2   : > { %8236 = vmatmul.mubr.bf16.gmra.mrb[24].mxu0 %v9044_v43  ;;  %7868 = vmatmul.mubr.bf16.gmra.mrb[56].mxu1 %v10422_v54  ;;  %v9045_v43 = vld [vmem:[%s10312_s3 + $0x108] sm:$0xff]  }
 0x1a3   : > { %8239 = vmatprep.mubr.bf16.mxu0 %v9707_v47  ;;  %7871 = vmatprep.mubr.bf16.mxu1 %v10423_v38 }
 0x1aa   : > { %8240 = vmatmul.mubr.bf16.gmra.mrb[28].mxu0 %v9721_v11  ;;  %7872 = vmatmul.mubr.bf16.gmra.mrb[60].mxu1 %v9678_v41 }
 0x1ab   : > { %8243 = vmatprep.mubr.bf16.mxu0 %v9724_v16  ;;  %7891 = vmatprep.mubr.bf16.mxu1 %v10424_v7 }
 0x1b2   : > { %8244 = vmatmul.mubr.bf16.gmra.mrb[32].mxu0 %v9737_v9  ;;  %7892 = vmatmul.mubr.bf16.vlgmr.msra.gmra.mrb[0].mxu1 %v10425_v6 }
 0x1b3   : > { %8247 = vmatprep.mubr.bf16.mxu0 %v9740_v18  ;;  %8363 = vmatpush3.bf16.msra.mxu1 %v9847_v20  ;;  %v9048_v20 = vld [vmem:[%s10312_s3 + $0x120] sm:$0xff]  }
 0x1b4   : > { %7895 = vmatprep.mubr.bf16.mxu1 %v9308_v27  ;;  %8356 = vmatprep.subr.bf16.mxu1 %v9045_v43  ;;  %v9047_v27 = vld [vmem:[%s10312_s3 + $0x118] sm:$0xff]  }
 0x1b7   : > { %8364 = vmatpush3.bf16.msra.mxu1 %v9045_v43 }
 0x1b8   : > { %8357 = vmatprep.subr.bf16.mxu1 %v9046_v1 }
 0x1ba   : > { %8248 = vmatmul.mubr.bf16.gmra.mrb[36].mxu0 %v9753_v14  ;;  %7896 = vmatmul.mubr.bf16.gmra.mrb[4].mxu1 %v9328_v49  ;;  %v9049_v49 = vld [vmem:[%s10312_s3 + $0x128] sm:$0xff]  }
 0x1bb   : > { %8251 = vmatprep.mubr.bf16.mxu0 %v9756_v62  ;;  %7899 = vmatprep.mubr.bf16.mxu1 %v9333_v51  ;;  %v9050_v51 = vld [vmem:[%s10312_s3 + $0x130] sm:$0xff]  }
 0x1bc   : > { %8365 = vmatpush3.bf16.msra.mxu1 %v9046_v1 }
 0x1bd   : > { %8358 = vmatprep.subr.bf16.mxu1 %v9047_v27 }
 0x1c0   : > { %8366 = vmatpush3.bf16.msra.mxu1 %v9047_v27 }
 0x1c1   : > { %8359 = vmatprep.subr.bf16.mxu1 %v9048_v20 }
 0x1c2   : > { %8252 = vmatmul.mubr.bf16.gmra.mrb[40].mxu0 %v9771_v34  ;;  %7900 = vmatmul.mubr.bf16.gmra.mrb[8].mxu1 %v9353_v0  ;;  %v9051_v0 = vld [vmem:[%s10312_s3 + $0x138] sm:$0xff]  }
 0x1c3   : > { %8255 = vmatprep.mubr.bf16.mxu0 %v9774_v52  ;;  %7903 = vmatprep.mubr.bf16.mxu1 %v9358_v5  ;;  %v9965_v5 = vld [vmem:[%s9243_s13 + $0xf0] sm:$0xff] }
 0x1c4   : > { %8367 = vmatpush3.bf16.msra.mxu1 %v9048_v20 }
 0x1c5   : > { %8360 = vmatprep.subr.bf16.mxu1 %v9049_v49 }
 0x1c8   : > { %8368 = vmatpush3.bf16.msra.mxu1 %v9049_v49 }
 0x1c9   : > { %8361 = vmatprep.subr.bf16.mxu1 %v9050_v51 }
 0x1ca   : > { %8256 = vmatmul.mubr.bf16.gmra.mrb[44].mxu0 %v9782_v56  ;;  %7904 = vmatmul.mubr.bf16.gmra.mrb[12].mxu1 %v9383_v30  ;;  %v9972_v30 = vld [vmem:[%s9243_s13 + $0xf8] sm:$0xff] }
 0x1cb   : > { %8259 = vmatprep.mubr.bf16.mxu0 %v9785_v35  ;;  %7907 = vmatprep.mubr.bf16.mxu1 %v9389_v36  ;;  %v10426_v36 = vld [vmem:[#allocation33_spill] sm:$0xff] }
 0x1cc   : > { %8369 = vmatpush3.bf16.msra.mxu1 %v9050_v51  ;;  %v10096_v51 = vld [vmem:[%s10313_s4] ss:$0 sm:$0xff] }
 0x1cd   : > { %8362 = vmatprep.subr.bf16.mxu1 %v9051_v0 }
 0x1d0   : > { %8370 = vmatpush3.bf16.msra.mxu1 %v9051_v0 }
 0x1d2   : > { %8260 = vmatmul.mubr.bf16.gmra.mrb[48].mxu0 %v9792_v4  ;;  %7908 = vmatmul.mubr.bf16.gmra.mrb[16].mxu1 %v9404_v55  ;;  %v10427_v55 = vld [vmem:[#allocation6_spill] sm:$0xff] }
 0x1d3   : > { %8263 = vmatprep.mubr.bf16.mxu0 %v9795_v46  ;;  %7911 = vmatprep.mubr.bf16.mxu1 %v9409_v57  ;;  %v10428_v57 = vld [vmem:[#allocation34_spill] sm:$0xff] }
 0x1da   : > { %8264 = vmatmul.mubr.bf16.gmra.mrb[52].mxu0 %v9802_v23  ;;  %7912 = vmatmul.mubr.bf16.gmra.mrb[20].mxu1 %v9424_v15  ;;  %v10429_v15 = vld [vmem:[#allocation7_spill] sm:$0xff] }
 0x1db   : > { %8267 = vmatprep.mubr.bf16.mxu0 %v9965_v5  ;;  %7915 = vmatprep.mubr.bf16.mxu1 %v9430_v19  ;;  %v10430_v19 = vld [vmem:[#allocation8_spill] sm:$0xff] }
 0x1e2   : > { %8268 = vmatmul.mubr.bf16.gmra.mrb[56].mxu0 %v9972_v30  ;;  %7916 = vmatmul.mubr.bf16.gmra.mrb[24].mxu1 %v9445_v37  ;;  %v10431_v37 = vld [vmem:[#allocation11_spill] sm:$0xff] }
 0x1e3   : > { %9057 = vmatprep.mubr.msk.bf16.mxu0 %vm9055_vm3, %v10426_v36  ;;  %7919 = vmatprep.mubr.bf16.mxu1 %v10427_v55 }
 0x1ea   : > { %9060 = vmatmul.mubr.msk.bf16.gmra.mrb[60].mxu0 %vm9055_vm3, %v10428_v57  ;;  %7920 = vmatmul.mubr.bf16.gmra.mrb[28].mxu1 %v10429_v15 }
 0x1eb   : > { %8291 = vmatprep.mubr.bf16.mxu0 %v9461_v59  ;;  %7923 = vmatprep.mubr.bf16.mxu1 %v10430_v19  ;;  %v10432_v59 = vld [vmem:[#allocation12_spill] sm:$0xff] }
 0x1f2   : > { %8292 = vmatmul.mubr.bf16.vlgmr.msra.gmra.mrb[0].mxu0 %v9474_v10  ;;  %7924 = vmatmul.mubr.bf16.gmra.mrb[32].mxu1 %v9478_v24  ;;  %v10433_v10 = vld [vmem:[#allocation13_spill] sm:$0xff]  ;;  %v10434_v24 = vld [vmem:[#allocation14_spill] sm:$0xff] }
 0x1f3   : > { %8295 = vmatprep.mubr.bf16.mxu0 %v9480_v28  ;;  %7927 = vmatprep.mubr.bf16.mxu1 %v9482_v29  ;;  %v10435_v28 = vld [vmem:[#allocation15_spill] sm:$0xff]  ;;  %v10436_v29 = vld [vmem:[#allocation17_spill] sm:$0xff] }
 0x1fa   : > { %8296 = vmatmul.mubr.bf16.gmra.mrb[4].mxu0 %v9494_v60  ;;  %7928 = vmatmul.mubr.bf16.gmra.mrb[36].mxu1 %v9496_v61  ;;  %v10437_v60 = vld [vmem:[#allocation19_spill] sm:$0xff]  ;;  %v10438_v61 = vld [vmem:[#allocation21_spill] sm:$0xff] }
 0x1fb   : > { %8299 = vmatprep.mubr.bf16.mxu0 %v9498_v63  ;;  %7931 = vmatprep.mubr.bf16.mxu1 %v9500_v2  ;;  %v10439_v63 = vld [vmem:[#allocation23_spill] sm:$0xff]  ;;  %v10440_v2 = vld [vmem:[#allocation24_spill] sm:$0xff] }
 0x202   : > { %8300 = vmatmul.mubr.bf16.gmra.mrb[8].mxu0 %v10406_v50  ;;  %7932 = vmatmul.mubr.bf16.gmra.mrb[40].mxu1 %v9514_v21  ;;  %v10441_v21 = vld [vmem:[#allocation9_spill] sm:$0xff] }
 0x203   : > { %8303 = vmatprep.mubr.bf16.mxu0 %v10408_v26  ;;  %7935 = vmatprep.mubr.bf16.mxu1 %v10431_v37 }
 0x20a   : > { %8304 = vmatmul.mubr.bf16.gmra.mrb[12].mxu0 %v10432_v59  ;;  %7936 = vmatmul.mubr.bf16.gmra.mrb[44].mxu1 %v10433_v10  ;;  %v10102_v59 = vld [vmem:[%s10314_s5] ss:$0 sm:$0xff] }
 0x20b   : > { %8307 = vmatprep.mubr.bf16.mxu0 %v10434_v24  ;;  %7939 = vmatprep.mubr.bf16.mxu1 %v10435_v28 }
 0x212   : > { %8308 = vmatmul.mubr.bf16.gmra.mrb[16].mxu0 %v10412_v40  ;;  %7940 = vmatmul.mubr.bf16.gmra.mrb[48].mxu1 %v10436_v29  ;;  %v10442_v40 = vld [vmem:[#allocation27_spill] sm:$0xff] }
 0x213   : > { %8311 = vmatprep.mubr.bf16.mxu0 %v10413_v17  ;;  %7943 = vmatprep.mubr.bf16.mxu1 %v10437_v60  ;;  %v10444_v17 = vld [vmem:[#allocation36_spill] sm:$0xff] }
 0x21a   : > { %8312 = vmatmul.mubr.bf16.gmra.mrb[20].mxu0 %v10414_v39  ;;  %7944 = vmatmul.mubr.bf16.gmra.mrb[52].mxu1 %v10438_v61 }
 0x21b   : > { %8315 = vmatprep.mubr.bf16.mxu0 %v10415_v33  ;;  %7947 = vmatprep.mubr.bf16.mxu1 %v10439_v63  ;;  %v975_v33 = vld [vmem:[#allocation2 + $0x339] sm:$0xff] }
 0x222   : > { %8316 = vmatmul.mubr.bf16.gmra.mrb[24].mxu0 %v9569_v3  ;;  %7948 = vmatmul.mubr.bf16.gmra.mrb[56].mxu1 %v10440_v2 }
 0x223   : > { %8319 = vmatprep.mubr.bf16.mxu0 %v9573_v22  ;;  %7951 = vmatprep.mubr.bf16.mxu1 %v10441_v21  ;;  %v977_v22 = vld [vmem:[#allocation2 + $0x349] sm:$0xff] }
 0x22a   : > { %8320 = vmatmul.mubr.bf16.gmra.mrb[28].mxu0 %v9578_v42  ;;  %7952 = vmatmul.mubr.bf16.gmra.mrb[60].mxu1 %v9860_v8  ;;  %v10443_v8 = vld [vmem:[#allocation35_spill] sm:$0xff]  ;;  %v976_v42 = vld [vmem:[#allocation2 + $0x341] sm:$0xff] }
 0x22b   : > { %8323 = vmatprep.mubr.bf16.mxu0 %v9580_v45  ;;  %8003 = vmatprep.mubr.bf16.mxu1 %v9707_v47  ;;  %v1013_v3 = vpack.c.bf16 %v976_v42, %v975_v33  ;;  %v978_v45 = vld [vmem:[#allocation2 + $0x351] sm:$0xff] }
 0x232   : > { %8324 = vmatmul.mubr.bf16.gmra.mrb[32].mxu0 %v9596_v44  ;;  %8004 = vmatmul.mubr.bf16.vlgmr.msra.gmra.mrb[32].mxu1 %v9721_v11  ;;  %v1014_v44 = vpack.c.bf16 %v978_v45, %v977_v22 }
 0x233   : > { %8327 = vmatprep.mubr.bf16.mxu0 %v10416_v58  ;;  %8007 = vmatprep.mubr.bf16.mxu1 %v9724_v16 }
 0x23a   : > { %8328 = vmatmul.mubr.bf16.gmra.mrb[36].mxu0 %v10417_v48  ;;  %8008 = vmatmul.mubr.bf16.gmra.mrb[36].mxu1 %v9737_v9 }
 0x23b   : > { %8331 = vmatprep.mubr.bf16.mxu0 %v10442_v40  ;;  %8011 = vmatprep.mubr.bf16.mxu1 %v9740_v18 }
 0x242   : > { %8332 = vmatmul.mubr.bf16.gmra.mrb[40].mxu0 %v9633_v32  ;;  %8012 = vmatmul.mubr.bf16.gmra.mrb[40].mxu1 %v9753_v14 }
 0x243   : > { %8335 = vmatprep.mubr.bf16.mxu0 %v10419_v25  ;;  %8015 = vmatprep.mubr.bf16.mxu1 %v9756_v62 }
 0x24a   : > { %8336 = vmatmul.mubr.bf16.gmra.mrb[44].mxu0 %v10420_v53  ;;  %8016 = vmatmul.mubr.bf16.gmra.mrb[44].mxu1 %v9771_v34 }
 0x24b   : > { %8339 = vmatprep.mubr.bf16.mxu0 %v10421_v13  ;;  %8019 = vmatprep.mubr.bf16.mxu1 %v9774_v52 }
 0x252   : > { %8340 = vmatmul.mubr.bf16.gmra.mrb[48].mxu0 %v10422_v54  ;;  %8020 = vmatmul.mubr.bf16.gmra.mrb[48].mxu1 %v9782_v56 }
 0x253   : > { %8343 = vmatprep.mubr.bf16.mxu0 %v10423_v38  ;;  %8023 = vmatprep.mubr.bf16.mxu1 %v9785_v35 }
 0x25a   : > { %8344 = vmatmul.mubr.bf16.gmra.mrb[52].mxu0 %v9678_v41  ;;  %8024 = vmatmul.mubr.bf16.gmra.mrb[52].mxu1 %v9792_v4 }
 0x25b   : > { %8347 = vmatprep.mubr.bf16.mxu0 %v10443_v8  ;;  %8027 = vmatprep.mubr.bf16.mxu1 %v9795_v46 }
 0x262   : > { %8348 = vmatmul.mubr.bf16.gmra.mrb[56].mxu0 %v10444_v17  ;;  %8028 = vmatmul.mubr.bf16.gmra.mrb[56].mxu1 %v9802_v23 }
 0x263   : > { %8351 = vmatprep.mubr.bf16.mxu0 %v1013_v3  ;;  %8031 = vmatprep.mubr.bf16.mxu1 %v9965_v5 }
 0x26a   : > { %8352 = vmatmul.mubr.bf16.gmra.mrb[60].mxu0 %v1014_v44  ;;  %8032 = vmatmul.mubr.bf16.gmra.mrb[60].mxu1 %v9972_v30 }
 0x285   : > { %v7893_v32 = vpop.f32.mrb[0].mxu1 }
 0x286   : > { %v2623_v41 = vpop.f32.mrb[1].mxu1 }
 0x287   : > { %v7894_v31 = vpop.f32.mrb[2].mxu1 }
 0x288   : > { %v2626_v47 = vpop.f32.mrb[3].mxu1 }
 0x28d   : > { %v7897_v11 = vpop.f32.mrb[4].mxu1 }
 0x28e   : > { %v2639_v16 = vpop.f32.mrb[5].mxu1 }
 0x28f   : > { %v7898_v9 = vpop.f32.mrb[6].mxu1 }
 0x290   : > { %v2642_v18 = vpop.f32.mrb[7].mxu1 }
 0x295   : > { %v10045_v14 = vpop.f32.mrb[8].mxu1 }
 0x296   : > { %v10047_v23 = vpop.f32.mrb[9].mxu1 }
 0x297   : > { %v10049_v62 = vpop.f32.mrb[10].mxu1 }
 0x298   : > { %v10051_v34 = vpop.f32.mrb[11].mxu1 }
 0x29d   : > { %v10053_v52 = vpop.f32.mrb[12].mxu1 }
 0x29e   : > { %v10055_v56 = vpop.f32.mrb[13].mxu1 }
 0x29f   : > { %v10057_v35 = vpop.f32.mrb[14].mxu1 }
 0x2a0   : > { %v10059_v4 = vpop.f32.mrb[15].mxu1 }
 0x2a5   : > { %v10061_v46 = vpop.f32.mrb[16].mxu1 }
 0x2a6   : > { %v10063_v50 = vpop.f32.mrb[17].mxu1 }
 0x2a7   : > { %v10065_v26 = vpop.f32.mrb[18].mxu1 }
 0x2a8   : > { %v10067_v39 = vpop.f32.mrb[19].mxu1 }
 0x2ad   : > { %v10069_v58 = vpop.f32.mrb[20].mxu1 }
 0x2ae   : > { %v10071_v48 = vpop.f32.mrb[21].mxu1 }
 0x2af   : > { %v10073_v25 = vpop.f32.mrb[22].mxu1 }
 0x2b0   : > { %v10075_v53 = vpop.f32.mrb[23].mxu1 }
 0x2b5   : > { %v10077_v12 = vpop.f32.mrb[24].mxu1 }
 0x2b6   : > { %v10079_v13 = vpop.f32.mrb[25].mxu1 }
 0x2b7   : > { %v10081_v54 = vpop.f32.mrb[26].mxu1 }
 0x2b8   : > { %v10083_v38 = vpop.f32.mrb[27].mxu1 }
 0x2bd   : > { %v10085_v7 = vpop.f32.mrb[28].mxu1 }
 0x2be   : > { %v10087_v6 = vpop.f32.mrb[29].mxu1 }
 0x2bf   : > { %v10089_v43 = vpop.f32.mrb[30].mxu1 }
 0x2c0   : > { %v10091_v1 = vpop.f32.mrb[31].mxu1 }
 0x2c5   : > { %v8293_v27 = vpop.f32.mrb[0].mxu0 }
 0x2c6   : > { %v8371_v20 = vadd.f32 %v8293_v27, %v7893_v32  ;;  %v5353_v49 = vpop.f32.mrb[1].mxu0 }
 0x2c7   : > { %v8372_v0 = vadd.f32 %v5353_v49, %v2623_v41  ;;  %v8294_v5 = vpop.f32.mrb[2].mxu0 }
 0x2c8   : > { %v5866_v30 = vmax.f32 %v8371_v20, 0.0  ;;  %v8373_v36 = vadd.f32 %v8294_v5, %v7894_v31  ;;  %v5356_v55 = vpop.f32.mrb[3].mxu0 }
 0x2c9   : > { %v5864_v57 = vmax.f32 %v8372_v0, 0.0  ;;  %v8374_v15 = vadd.f32 %v5356_v55, %v2626_v47 }
 0x2ca   : > { %v5937_v19 = vmul.f32 %v10096_v51, %v5866_v30  ;;  %v5867_v37 = vmax.f32 %v8373_v36, 0.0 }
 0x2cb   : > { %v5935_v10 = vmul.f32 %v10096_v51, %v5864_v57  ;;  %v5865_v24 = vmax.f32 %v8374_v15, 0.0 }
 0x2cc   : > { %v5938_v28 = vmul.f32 %v10096_v51, %v5867_v37  ;;  %v6008_v61 = vadd.f32 %v10102_v59, %v5937_v19 }
 0x2cd   : > { %v5936_v29 = vmul.f32 %v10096_v51, %v5865_v24  ;;  %v8297_v60 = vpop.f32.mrb[4].mxu0  ;;  %v6006_v40 = vadd.f32 %v10102_v59, %v5935_v10 }
 0x2ce   : > { %v6009_v63 = vadd.f32 %v10102_v59, %v5938_v28  ;;  %v8375_v2 = vadd.f32 %v8297_v60, %v7897_v11  ;;  %v5369_v21 = vpop.f32.mrb[5].mxu0 }
 0x2cf   : > { %v6007_v8 = vadd.f32 %v10102_v59, %v5936_v29  ;;  %v8376_v33 = vadd.f32 %v5369_v21, %v2639_v16  ;;  %v8298_v42 = vpop.f32.mrb[6].mxu0 }
 0x2d0   : > { %v7059_v3 = vpack.c.bf16 %v6009_v63, %v6008_v61  ;;  %v5870_v17 = vmax.f32 %v8375_v2, 0.0  ;;  %v8377_v22 = vadd.f32 %v8298_v42, %v7898_v9  ;;  %v5372_v45 = vpop.f32.mrb[7].mxu0 }
 0x2d1   : > { %v7054_v44 = vpack.c.bf16 %v6007_v8, %v6006_v40  ;;  %v5868_v32 = vmax.f32 %v8376_v33, 0.0  ;;  %v8378_v41 = vadd.f32 %v5372_v45, %v2642_v18 }
 0x2d2   : > { %7244 = vst [vmem:[%s10114_s16 + $0x8] sm:$0xff] %v7059_v3   ;;  %v5941_v31 = vmul.f32 %v10096_v51, %v5870_v17  ;;  %v5871_v47 = vmax.f32 %v8377_v22, 0.0 }
 0x2d3   : > { %7055 = vst [vmem:[%s10114_s16] sm:$0xff] %v7054_v44   ;;  %v5939_v11 = vmul.f32 %v10096_v51, %v5868_v32  ;;  %v5869_v27 = vmax.f32 %v8378_v41, 0.0 }
 0x2d4   : > { %v5942_v20 = vmul.f32 %v10096_v51, %v5871_v47  ;;  %v6012_v9 = vadd.f32 %v10102_v59, %v5941_v31 }
 0x2d5   : > { %v5940_v16 = vmul.f32 %v10096_v51, %v5869_v27  ;;  %v8301_v49 = vpop.f32.mrb[8].mxu0  ;;  %v6010_v30 = vadd.f32 %v10102_v59, %v5939_v11 }
 0x2d6   : > { %v6013_v0 = vadd.f32 %v10102_v59, %v5942_v20  ;;  %v8379_v18 = vadd.f32 %v8301_v49, %v10045_v14  ;;  %v5385_v5 = vpop.f32.mrb[9].mxu0 }
 0x2d7   : > { %v6011_v36 = vadd.f32 %v10102_v59, %v5940_v16  ;;  %v8380_v55 = vadd.f32 %v5385_v5, %v10047_v23  ;;  %v8302_v57 = vpop.f32.mrb[10].mxu0 }
 0x2d8   : > { %v7069_v15 = vpack.c.bf16 %v6013_v0, %v6012_v9  ;;  %v5874_v19 = vmax.f32 %v8379_v18, 0.0  ;;  %v8381_v37 = vadd.f32 %v8302_v57, %v10049_v62  ;;  %v5388_v10 = vpop.f32.mrb[11].mxu0 }
 0x2d9   : > { %v7064_v24 = vpack.c.bf16 %v6011_v36, %v6010_v30  ;;  %v5872_v28 = vmax.f32 %v8380_v55, 0.0  ;;  %v8382_v29 = vadd.f32 %v5388_v10, %v10051_v34 }
 0x2da   : > { %7246 = vst [vmem:[%s10114_s16 + $0x18] sm:$0xff] %v7069_v15   ;;  %v5945_v14 = vmul.f32 %v10096_v51, %v5874_v19  ;;  %v5875_v60 = vmax.f32 %v8381_v37, 0.0 }
 0x2db   : > { %7245 = vst [vmem:[%s10114_s16 + $0x10] sm:$0xff] %v7064_v24   ;;  %v5943_v61 = vmul.f32 %v10096_v51, %v5872_v28  ;;  %v5873_v63 = vmax.f32 %v8382_v29, 0.0 }
 0x2dc   : > { %v5946_v23 = vmul.f32 %v10096_v51, %v5875_v60  ;;  %v6016_v62 = vadd.f32 %v10102_v59, %v5945_v14 }
 0x2dd   : > { %v5944_v2 = vmul.f32 %v10096_v51, %v5873_v63  ;;  %v8305_v21 = vpop.f32.mrb[12].mxu0  ;;  %v6014_v33 = vadd.f32 %v10102_v59, %v5943_v61 }
 0x2de   : > { %v6017_v40 = vadd.f32 %v10102_v59, %v5946_v23  ;;  %v8383_v34 = vadd.f32 %v8305_v21, %v10053_v52  ;;  %v5401_v8 = vpop.f32.mrb[13].mxu0 }
 0x2df   : > { %v6015_v42 = vadd.f32 %v10102_v59, %v5944_v2  ;;  %v8384_v3 = vadd.f32 %v5401_v8, %v10055_v56  ;;  %v8306_v17 = vpop.f32.mrb[14].mxu0 }
 0x2e0   : > { %v7079_v22 = vpack.c.bf16 %v6017_v40, %v6016_v62  ;;  %v5878_v45 = vmax.f32 %v8383_v34, 0.0  ;;  %v8385_v44 = vadd.f32 %v8306_v17, %v10057_v35  ;;  %v5404_v32 = vpop.f32.mrb[15].mxu0 }
 0x2e1   : > { %v7074_v41 = vpack.c.bf16 %v6015_v42, %v6014_v33  ;;  %v5876_v31 = vmax.f32 %v8384_v3, 0.0  ;;  %v8386_v47 = vadd.f32 %v5404_v32, %v10059_v4 }
 0x2e2   : > { %7248 = vst [vmem:[%s10114_s16 + $0x28] sm:$0xff] %v7079_v22   ;;  %v5949_v52 = vmul.f32 %v10096_v51, %v5878_v45  ;;  %v5879_v11 = vmax.f32 %v8385_v44, 0.0 }
 0x2e3   : > { %7247 = vst [vmem:[%s10114_s16 + $0x20] sm:$0xff] %v7074_v41   ;;  %v5947_v27 = vmul.f32 %v10096_v51, %v5876_v31  ;;  %v5877_v20 = vmax.f32 %v8386_v47, 0.0 }
 0x2e4   : > { %v5950_v56 = vmul.f32 %v10096_v51, %v5879_v11  ;;  %v6020_v35 = vadd.f32 %v10102_v59, %v5949_v52 }
 0x2e5   : > { %v5948_v16 = vmul.f32 %v10096_v51, %v5877_v20  ;;  %v8309_v49 = vpop.f32.mrb[16].mxu0  ;;  %v6018_v18 = vadd.f32 %v10102_v59, %v5947_v27 }
 0x2e6   : > { %v6021_v9 = vadd.f32 %v10102_v59, %v5950_v56  ;;  %v8387_v4 = vadd.f32 %v8309_v49, %v10061_v46  ;;  %v5417_v0 = vpop.f32.mrb[17].mxu0 }
 0x2e7   : > { %v6019_v5 = vadd.f32 %v10102_v59, %v5948_v16  ;;  %v8388_v30 = vadd.f32 %v5417_v0, %v10063_v50  ;;  %v8310_v36 = vpop.f32.mrb[18].mxu0 }
 0x2e8   : > { %v7089_v55 = vpack.c.bf16 %v6021_v9, %v6020_v35  ;;  %v5882_v57 = vmax.f32 %v8387_v4, 0.0  ;;  %v8389_v15 = vadd.f32 %v8310_v36, %v10065_v26  ;;  %v5420_v19 = vpop.f32.mrb[19].mxu0 }
 0x2e9   : > { %v7084_v37 = vpack.c.bf16 %v6019_v5, %v6018_v18  ;;  %v5880_v10 = vmax.f32 %v8388_v30, 0.0  ;;  %v8390_v24 = vadd.f32 %v5420_v19, %v10067_v39 }
 0x2ea   : > { %7250 = vst [vmem:[%s10114_s16 + $0x38] sm:$0xff] %v7089_v55   ;;  %v5953_v46 = vmul.f32 %v10096_v51, %v5882_v57  ;;  %v5883_v28 = vmax.f32 %v8389_v15, 0.0 }
 0x2eb   : > { %7249 = vst [vmem:[%s10114_s16 + $0x30] sm:$0xff] %v7084_v37   ;;  %v5951_v29 = vmul.f32 %v10096_v51, %v5880_v10  ;;  %v5881_v14 = vmax.f32 %v8390_v24, 0.0 }
 0x2ec   : > { %v5954_v50 = vmul.f32 %v10096_v51, %v5883_v28  ;;  %v6024_v26 = vadd.f32 %v10102_v59, %v5953_v46 }
 0x2ed   : > { %v5952_v60 = vmul.f32 %v10096_v51, %v5881_v14  ;;  %v8313_v61 = vpop.f32.mrb[20].mxu0  ;;  %v6022_v2 = vadd.f32 %v10102_v59, %v5951_v29 }
 0x2ee   : > { %v6025_v63 = vadd.f32 %v10102_v59, %v5954_v50  ;;  %v8391_v39 = vadd.f32 %v8313_v61, %v10069_v58  ;;  %v5433_v23 = vpop.f32.mrb[21].mxu0 }
 0x2ef   : > { %v6023_v21 = vadd.f32 %v10102_v59, %v5952_v60  ;;  %v8392_v62 = vadd.f32 %v5433_v23, %v10071_v48  ;;  %v8314_v40 = vpop.f32.mrb[22].mxu0 }
 0x2f0   : > { %v7099_v34 = vpack.c.bf16 %v6025_v63, %v6024_v26  ;;  %v5886_v8 = vmax.f32 %v8391_v39, 0.0  ;;  %v8393_v33 = vadd.f32 %v8314_v40, %v10073_v25  ;;  %v5436_v42 = vpop.f32.mrb[23].mxu0 }
 0x2f1   : > { %v7094_v3 = vpack.c.bf16 %v6023_v21, %v6022_v2  ;;  %v5884_v17 = vmax.f32 %v8392_v62, 0.0  ;;  %v8394_v22 = vadd.f32 %v5436_v42, %v10075_v53 }
 0x2f2   : > { %7252 = vst [vmem:[%s10114_s16 + $0x48] sm:$0xff] %v7099_v34   ;;  %v5957_v58 = vmul.f32 %v10096_v51, %v5886_v8  ;;  %v5887_v45 = vmax.f32 %v8393_v33, 0.0 }
 0x2f3   : > { %7251 = vst [vmem:[%s10114_s16 + $0x40] sm:$0xff] %v7094_v3   ;;  %v5955_v44 = vmul.f32 %v10096_v51, %v5884_v17  ;;  %v5885_v32 = vmax.f32 %v8394_v22, 0.0 }
 0x2f4   : > { %v5958_v48 = vmul.f32 %v10096_v51, %v5887_v45  ;;  %v6028_v25 = vadd.f32 %v10102_v59, %v5957_v58 }
 0x2f5   : > { %v5956_v41 = vmul.f32 %v10096_v51, %v5885_v32  ;;  %v8317_v31 = vpop.f32.mrb[24].mxu0  ;;  %v6026_v11 = vadd.f32 %v10102_v59, %v5955_v44 }
 0x2f6   : > { %v6029_v47 = vadd.f32 %v10102_v59, %v5958_v48  ;;  %v8395_v53 = vadd.f32 %v8317_v31, %v10077_v12  ;;  %v5449_v52 = vpop.f32.mrb[25].mxu0 }
 0x2f7   : > { %v6027_v27 = vadd.f32 %v10102_v59, %v5956_v41  ;;  %v8396_v20 = vadd.f32 %v5449_v52, %v10079_v13  ;;  %v8318_v56 = vpop.f32.mrb[26].mxu0 }
 0x2f8   : > { %v7109_v16 = vpack.c.bf16 %v6029_v47, %v6028_v25  ;;  %v5890_v49 = vmax.f32 %v8395_v53, 0.0  ;;  %v8397_v35 = vadd.f32 %v8318_v56, %v10081_v54  ;;  %v5452_v9 = vpop.f32.mrb[27].mxu0 }
 0x2f9   : > { %v7104_v4 = vpack.c.bf16 %v6027_v27, %v6026_v11  ;;  %v5888_v0 = vmax.f32 %v8396_v20, 0.0  ;;  %v8398_v18 = vadd.f32 %v5452_v9, %v10083_v38 }
 0x2fa   : > { %7254 = vst [vmem:[%s10114_s16 + $0x58] sm:$0xff] %v7109_v16   ;;  %v5961_v12 = vmul.f32 %v10096_v51, %v5890_v49  ;;  %v5891_v5 = vmax.f32 %v8397_v35, 0.0 }
 0x2fb   : > { %7253 = vst [vmem:[%s10114_s16 + $0x50] sm:$0xff] %v7104_v4   ;;  %v5959_v30 = vmul.f32 %v10096_v51, %v5888_v0  ;;  %v5889_v36 = vmax.f32 %v8398_v18, 0.0 }
 0x2fc   : > { %v5962_v13 = vmul.f32 %v10096_v51, %v5891_v5  ;;  %v6032_v54 = vadd.f32 %v10102_v59, %v5961_v12 }
 0x2fd   : > { %v5960_v55 = vmul.f32 %v10096_v51, %v5889_v36  ;;  %v8321_v57 = vpop.f32.mrb[28].mxu0  ;;  %v6030_v37 = vadd.f32 %v10102_v59, %v5959_v30 }
 0x2fe   : > { %v6033_v15 = vadd.f32 %v10102_v59, %v5962_v13  ;;  %v8399_v38 = vadd.f32 %v8321_v57, %v10085_v7  ;;  %v5465_v19 = vpop.f32.mrb[29].mxu0 }
 0x2ff   : > { %v6031_v10 = vadd.f32 %v10102_v59, %v5960_v55  ;;  %v8400_v24 = vadd.f32 %v5465_v19, %v10087_v6  ;;  %v8322_v46 = vpop.f32.mrb[30].mxu0 }
 0x300   : > { %v7119_v28 = vpack.c.bf16 %v6033_v15, %v6032_v54  ;;  %v5894_v29 = vmax.f32 %v8399_v38, 0.0  ;;  %v8401_v14 = vadd.f32 %v8322_v46, %v10089_v43  ;;  %v5468_v50 = vpop.f32.mrb[31].mxu0 }
 0x301   : > { %v7114_v60 = vpack.c.bf16 %v6031_v10, %v6030_v37  ;;  %v5892_v61 = vmax.f32 %v8400_v24, 0.0  ;;  %v8402_v26 = vadd.f32 %v5468_v50, %v10091_v1 }
 0x302   : > { %7256 = vst [vmem:[%s10114_s16 + $0x68] sm:$0xff] %v7119_v28   ;;  %v5965_v7 = vmul.f32 %v10096_v51, %v5894_v29  ;;  %v5895_v63 = vmax.f32 %v8401_v14, 0.0 }
 0x303   : > { %7255 = vst [vmem:[%s10114_s16 + $0x60] sm:$0xff] %v7114_v60   ;;  %v5963_v39 = vmul.f32 %v10096_v51, %v5892_v61  ;;  %v5893_v23 = vmax.f32 %v8402_v26, 0.0 }
 0x304   : > { %v5966_v6 = vmul.f32 %v10096_v51, %v5895_v63  ;;  %v6036_v43 = vadd.f32 %v10102_v59, %v5965_v7 }
 0x305   : > { %v5964_v2 = vmul.f32 %v10096_v51, %v5893_v23  ;;  %v8325_v21 = vpop.f32.mrb[32].mxu0  ;;  %v8005_v40 = vpop.f32.mrb[32].mxu1  ;;  %v6034_v34 = vadd.f32 %v10102_v59, %v5963_v39 }
 0x306   : > { %v6037_v62 = vadd.f32 %v10102_v59, %v5966_v6  ;;  %v5481_v1 = vpop.f32.mrb[33].mxu0  ;;  %v8403_v33 = vadd.f32 %v8325_v21, %v8005_v40  ;;  %v3297_v42 = vpop.f32.mrb[33].mxu1 }
 0x307   : > { %v6035_v8 = vadd.f32 %v10102_v59, %v5964_v2  ;;  %v8326_v3 = vpop.f32.mrb[34].mxu0  ;;  %v8404_v22 = vadd.f32 %v5481_v1, %v3297_v42  ;;  %v8006_v58 = vpop.f32.mrb[34].mxu1 }
 0x308   : > { %v7129_v17 = vpack.c.bf16 %v6037_v62, %v6036_v43  ;;  %v5484_v45 = vpop.f32.mrb[35].mxu0  ;;  %v5898_v32 = vmax.f32 %v8403_v33, 0.0  ;;  %v8405_v48 = vadd.f32 %v8326_v3, %v8006_v58  ;;  %v3300_v41 = vpop.f32.mrb[35].mxu1 }
 0x309   : > { %v7124_v44 = vpack.c.bf16 %v6035_v8, %v6034_v34  ;;  %v5896_v31 = vmax.f32 %v8404_v22, 0.0  ;;  %v8406_v25 = vadd.f32 %v5484_v45, %v3300_v41 }
 0x30a   : > { %7258 = vst [vmem:[%s10114_s16 + $0x78] sm:$0xff] %v7129_v17   ;;  %v5969_v47 = vmul.f32 %v10096_v51, %v5898_v32  ;;  %v5899_v53 = vmax.f32 %v8405_v48, 0.0 }
 0x30b   : > { %7257 = vst [vmem:[%s10114_s16 + $0x70] sm:$0xff] %v7124_v44   ;;  %v5967_v52 = vmul.f32 %v10096_v51, %v5896_v31  ;;  %v5897_v11 = vmax.f32 %v8406_v25, 0.0 }
 0x30c   : > { %v5970_v27 = vmul.f32 %v10096_v51, %v5899_v53  ;;  %v6040_v35 = vadd.f32 %v10102_v59, %v5969_v47 }
 0x30d   : > { %v8329_v20 = vpop.f32.mrb[36].mxu0  ;;  %v5968_v56 = vmul.f32 %v10096_v51, %v5897_v11  ;;  %v8009_v16 = vpop.f32.mrb[36].mxu1  ;;  %v6038_v12 = vadd.f32 %v10102_v59, %v5967_v52 }
 0x30e   : > { %v5497_v49 = vpop.f32.mrb[37].mxu0  ;;  %v6041_v9 = vadd.f32 %v10102_v59, %v5970_v27  ;;  %v8407_v4 = vadd.f32 %v8329_v20, %v8009_v16  ;;  %v3313_v0 = vpop.f32.mrb[37].mxu1 }
 0x30f   : > { %v8330_v18 = vpop.f32.mrb[38].mxu0  ;;  %v6039_v5 = vadd.f32 %v10102_v59, %v5968_v56  ;;  %v8408_v30 = vadd.f32 %v5497_v49, %v3313_v0  ;;  %v8010_v36 = vpop.f32.mrb[38].mxu1 }
 0x310   : > { %v5500_v13 = vpop.f32.mrb[39].mxu0  ;;  %v7139_v55 = vpack.c.bf16 %v6041_v9, %v6040_v35  ;;  %v5902_v57 = vmax.f32 %v8407_v4, 0.0  ;;  %v8409_v54 = vadd.f32 %v8330_v18, %v8010_v36  ;;  %v3316_v15 = vpop.f32.mrb[39].mxu1 }
 0x311   : > { %v7134_v38 = vpack.c.bf16 %v6039_v5, %v6038_v12  ;;  %v5900_v19 = vmax.f32 %v8408_v30, 0.0  ;;  %v8410_v37 = vadd.f32 %v5500_v13, %v3316_v15 }
 0x312   : > { %7260 = vst [vmem:[%s10114_s16 + $0x88] sm:$0xff] %v7139_v55   ;;  %v5973_v10 = vmul.f32 %v10096_v51, %v5902_v57  ;;  %v5903_v24 = vmax.f32 %v8409_v54, 0.0 }
 0x313   : > { %7259 = vst [vmem:[%s10114_s16 + $0x80] sm:$0xff] %v7134_v38   ;;  %v5971_v46 = vmul.f32 %v10096_v51, %v5900_v19  ;;  %v5901_v28 = vmax.f32 %v8410_v37, 0.0 }
 0x314   : > { %v5974_v29 = vmul.f32 %v10096_v51, %v5903_v24  ;;  %v6044_v26 = vadd.f32 %v10102_v59, %v5973_v10 }
 0x315   : > { %v8333_v14 = vpop.f32.mrb[40].mxu0  ;;  %v5972_v50 = vmul.f32 %v10096_v51, %v5901_v28  ;;  %v8013_v60 = vpop.f32.mrb[40].mxu1  ;;  %v6042_v6 = vadd.f32 %v10102_v59, %v5971_v46 }
 0x316   : > { %v5513_v61 = vpop.f32.mrb[41].mxu0  ;;  %v6045_v7 = vadd.f32 %v10102_v59, %v5974_v29  ;;  %v8411_v63 = vadd.f32 %v8333_v14, %v8013_v60  ;;  %v3329_v39 = vpop.f32.mrb[41].mxu1 }
 0x317   : > { %v8334_v23 = vpop.f32.mrb[42].mxu0  ;;  %v6043_v2 = vadd.f32 %v10102_v59, %v5972_v50  ;;  %v8412_v21 = vadd.f32 %v5513_v61, %v3329_v39  ;;  %v8014_v43 = vpop.f32.mrb[42].mxu1 }
 0x318   : > { %v5516_v62 = vpop.f32.mrb[43].mxu0  ;;  %v7149_v40 = vpack.c.bf16 %v6045_v7, %v6044_v26  ;;  %v5906_v1 = vmax.f32 %v8411_v63, 0.0  ;;  %v8413_v34 = vadd.f32 %v8334_v23, %v8014_v43  ;;  %v3332_v8 = vpop.f32.mrb[43].mxu1 }
 0x319   : > { %v7144_v33 = vpack.c.bf16 %v6043_v2, %v6042_v6  ;;  %v5904_v42 = vmax.f32 %v8412_v21, 0.0  ;;  %v8414_v3 = vadd.f32 %v5516_v62, %v3332_v8 }
 0x31a   : > { %7262 = vst [vmem:[%s10114_s16 + $0x98] sm:$0xff] %v7149_v40   ;;  %v5977_v17 = vmul.f32 %v10096_v51, %v5906_v1  ;;  %v5907_v22 = vmax.f32 %v8413_v34, 0.0 }
 0x31b   : > { %7261 = vst [vmem:[%s10114_s16 + $0x90] sm:$0xff] %v7144_v33   ;;  %v5975_v58 = vmul.f32 %v10096_v51, %v5904_v42  ;;  %v5905_v45 = vmax.f32 %v8414_v3, 0.0 }
 0x31c   : > { %v5978_v44 = vmul.f32 %v10096_v51, %v5907_v22  ;;  %v6048_v25 = vadd.f32 %v10102_v59, %v5977_v17 }
 0x31d   : > { %v8337_v32 = vpop.f32.mrb[44].mxu0  ;;  %v5976_v48 = vmul.f32 %v10096_v51, %v5905_v45  ;;  %v8017_v41 = vpop.f32.mrb[44].mxu1  ;;  %v6046_v27 = vadd.f32 %v10102_v59, %v5975_v58 }
 0x31e   : > { %v5529_v31 = vpop.f32.mrb[45].mxu0  ;;  %v6049_v47 = vadd.f32 %v10102_v59, %v5978_v44  ;;  %v8415_v53 = vadd.f32 %v8337_v32, %v8017_v41  ;;  %v3345_v52 = vpop.f32.mrb[45].mxu1 }
 0x31f   : > { %v8338_v11 = vpop.f32.mrb[46].mxu0  ;;  %v6047_v20 = vadd.f32 %v10102_v59, %v5976_v48  ;;  %v8416_v56 = vadd.f32 %v5529_v31, %v3345_v52  ;;  %v8018_v16 = vpop.f32.mrb[46].mxu1 }
 0x320   : > { %v5532_v49 = vpop.f32.mrb[47].mxu0  ;;  %v7159_v35 = vpack.c.bf16 %v6049_v47, %v6048_v25  ;;  %v5910_v9 = vmax.f32 %v8415_v53, 0.0  ;;  %v8417_v4 = vadd.f32 %v8338_v11, %v8018_v16  ;;  %v3348_v0 = vpop.f32.mrb[47].mxu1 }
 0x321   : > { %v7154_v18 = vpack.c.bf16 %v6047_v20, %v6046_v27  ;;  %v5908_v12 = vmax.f32 %v8416_v56, 0.0  ;;  %v8418_v5 = vadd.f32 %v5532_v49, %v3348_v0 }
 0x322   : > { %7264 = vst [vmem:[%s10114_s16 + $0xa8] sm:$0xff] %v7159_v35   ;;  %v5981_v30 = vmul.f32 %v10096_v51, %v5910_v9  ;;  %v5911_v36 = vmax.f32 %v8417_v4, 0.0 }
 0x323   : > { %7263 = vst [vmem:[%s10114_s16 + $0xa0] sm:$0xff] %v7154_v18   ;;  %v5979_v13 = vmul.f32 %v10096_v51, %v5908_v12  ;;  %v5909_v55 = vmax.f32 %v8418_v5, 0.0 }
 0x324   : > { %v5982_v57 = vmul.f32 %v10096_v51, %v5911_v36  ;;  %v6052_v37 = vadd.f32 %v10102_v59, %v5981_v30 }
 0x325   : > { %v8341_v54 = vpop.f32.mrb[48].mxu0  ;;  %v5980_v15 = vmul.f32 %v10096_v51, %v5909_v55  ;;  %v8021_v38 = vpop.f32.mrb[48].mxu1  ;;  %v6050_v29 = vadd.f32 %v10102_v59, %v5979_v13 }
 0x326   : > { %v5545_v19 = vpop.f32.mrb[49].mxu0  ;;  %v6053_v10 = vadd.f32 %v10102_v59, %v5982_v57  ;;  %v8419_v24 = vadd.f32 %v8341_v54, %v8021_v38  ;;  %v3361_v46 = vpop.f32.mrb[49].mxu1 }
 0x327   : > { %v8342_v28 = vpop.f32.mrb[50].mxu0  ;;  %v6051_v14 = vadd.f32 %v10102_v59, %v5980_v15  ;;  %v8420_v50 = vadd.f32 %v5545_v19, %v3361_v46  ;;  %v8022_v60 = vpop.f32.mrb[50].mxu1 }
 0x328   : > { %v5548_v61 = vpop.f32.mrb[51].mxu0  ;;  %v7169_v26 = vpack.c.bf16 %v6053_v10, %v6052_v37  ;;  %v5914_v7 = vmax.f32 %v8419_v24, 0.0  ;;  %v8421_v63 = vadd.f32 %v8342_v28, %v8022_v60  ;;  %v3364_v39 = vpop.f32.mrb[51].mxu1 }
 0x329   : > { %v7164_v23 = vpack.c.bf16 %v6051_v14, %v6050_v29  ;;  %v5912_v6 = vmax.f32 %v8420_v50, 0.0  ;;  %v8422_v2 = vadd.f32 %v5548_v61, %v3364_v39 }
 0x32a   : > { %7266 = vst [vmem:[%s10114_s16 + $0xb8] sm:$0xff] %v7169_v26   ;;  %v5985_v21 = vmul.f32 %v10096_v51, %v5914_v7  ;;  %v5915_v43 = vmax.f32 %v8421_v63, 0.0 }
 0x32b   : > { %7265 = vst [vmem:[%s10114_s16 + $0xb0] sm:$0xff] %v7164_v23   ;;  %v5983_v62 = vmul.f32 %v10096_v51, %v5912_v6  ;;  %v5913_v40 = vmax.f32 %v8422_v2, 0.0 }
 0x32c   : > { %v5986_v1 = vmul.f32 %v10096_v51, %v5915_v43  ;;  %v6056_v3 = vadd.f32 %v10102_v59, %v5985_v21 }
 0x32d   : > { %v8345_v34 = vpop.f32.mrb[52].mxu0  ;;  %v5984_v8 = vmul.f32 %v10096_v51, %v5913_v40  ;;  %v8025_v33 = vpop.f32.mrb[52].mxu1  ;;  %v6054_v44 = vadd.f32 %v10102_v59, %v5983_v62 }
 0x32e   : > { %v5561_v42 = vpop.f32.mrb[53].mxu0  ;;  %v6057_v17 = vadd.f32 %v10102_v59, %v5986_v1  ;;  %v8423_v22 = vadd.f32 %v8345_v34, %v8025_v33  ;;  %v3377_v58 = vpop.f32.mrb[53].mxu1 }
 0x32f   : > { %v8346_v45 = vpop.f32.mrb[54].mxu0  ;;  %v6055_v32 = vadd.f32 %v10102_v59, %v5984_v8  ;;  %v8424_v48 = vadd.f32 %v5561_v42, %v3377_v58  ;;  %v8026_v41 = vpop.f32.mrb[54].mxu1 }
 0x330   : > { %v5564_v31 = vpop.f32.mrb[55].mxu0  ;;  %v7179_v25 = vpack.c.bf16 %v6057_v17, %v6056_v3  ;;  %v5918_v47 = vmax.f32 %v8423_v22, 0.0  ;;  %v8425_v53 = vadd.f32 %v8346_v45, %v8026_v41  ;;  %v3380_v52 = vpop.f32.mrb[55].mxu1 }
 0x331   : > { %v7174_v11 = vpack.c.bf16 %v6055_v32, %v6054_v44  ;;  %v5916_v27 = vmax.f32 %v8424_v48, 0.0  ;;  %v8426_v20 = vadd.f32 %v5564_v31, %v3380_v52 }
 0x332   : > { %7268 = vst [vmem:[%s10114_s16 + $0xc8] sm:$0xff] %v7179_v25   ;;  %v5989_v56 = vmul.f32 %v10096_v51, %v5918_v47  ;;  %v5919_v16 = vmax.f32 %v8425_v53, 0.0 }
 0x333   : > { %7267 = vst [vmem:[%s10114_s16 + $0xc0] sm:$0xff] %v7174_v11   ;;  %v5987_v49 = vmul.f32 %v10096_v51, %v5916_v27  ;;  %v5917_v35 = vmax.f32 %v8426_v20, 0.0 }
 0x334   : > { %v5990_v9 = vmul.f32 %v10096_v51, %v5919_v16  ;;  %v6060_v5 = vadd.f32 %v10102_v59, %v5989_v56 }
 0x335   : > { %v8349_v4 = vpop.f32.mrb[56].mxu0  ;;  %v5988_v0 = vmul.f32 %v10096_v51, %v5917_v35  ;;  %v8029_v18 = vpop.f32.mrb[56].mxu1  ;;  %v6058_v57 = vadd.f32 %v10102_v59, %v5987_v49 }
 0x336   : > { %v5577_v12 = vpop.f32.mrb[57].mxu0  ;;  %v6061_v30 = vadd.f32 %v10102_v59, %v5990_v9  ;;  %v8427_v36 = vadd.f32 %v8349_v4, %v8029_v18  ;;  %v3393_v13 = vpop.f32.mrb[57].mxu1 }
 0x337   : > { %v8350_v55 = vpop.f32.mrb[58].mxu0  ;;  %v6059_v54 = vadd.f32 %v10102_v59, %v5988_v0  ;;  %v8428_v15 = vadd.f32 %v5577_v12, %v3393_v13  ;;  %v8030_v38 = vpop.f32.mrb[58].mxu1 }
 0x338   : > { %v5580_v19 = vpop.f32.mrb[59].mxu0  ;;  %v7189_v37 = vpack.c.bf16 %v6061_v30, %v6060_v5  ;;  %v5922_v10 = vmax.f32 %v8427_v36, 0.0  ;;  %v8429_v24 = vadd.f32 %v8350_v55, %v8030_v38  ;;  %v3396_v46 = vpop.f32.mrb[59].mxu1 }
 0x339   : > { %v7184_v28 = vpack.c.bf16 %v6059_v54, %v6058_v57  ;;  %v5920_v29 = vmax.f32 %v8428_v15, 0.0  ;;  %v8430_v14 = vadd.f32 %v5580_v19, %v3396_v46 }
 0x33a   : > { %7270 = vst [vmem:[%s10114_s16 + $0xd8] sm:$0xff] %v7189_v37   ;;  %v5993_v50 = vmul.f32 %v10096_v51, %v5922_v10  ;;  %v5923_v60 = vmax.f32 %v8429_v24, 0.0 }
 0x33b   : > { %7269 = vst [vmem:[%s10114_s16 + $0xd0] sm:$0xff] %v7184_v28   ;;  %v5991_v61 = vmul.f32 %v10096_v51, %v5920_v29  ;;  %v5921_v26 = vmax.f32 %v8430_v14, 0.0 }
 0x33c   : > { %v5994_v7 = vmul.f32 %v10096_v51, %v5923_v60  ;;  %v6064_v2 = vadd.f32 %v10102_v59, %v5993_v50 }
 0x33d   : > { %v8353_v63 = vpop.f32.mrb[60].mxu0  ;;  %v5992_v39 = vmul.f32 %v10096_v51, %v5921_v26  ;;  %v8033_v23 = vpop.f32.mrb[60].mxu1  ;;  %v6062_v1 = vadd.f32 %v10102_v59, %v5991_v61 }
 0x33e   : > { %v5593_v6 = vpop.f32.mrb[61].mxu0  ;;  %v6065_v21 = vadd.f32 %v10102_v59, %v5994_v7  ;;  %v8431_v43 = vadd.f32 %v8353_v63, %v8033_v23  ;;  %v3409_v62 = vpop.f32.mrb[61].mxu1 }
 0x33f   : > { %v8354_v40 = vpop.f32.mrb[62].mxu0  ;;  %v6063_v34 = vadd.f32 %v10102_v59, %v5992_v39  ;;  %v8432_v8 = vadd.f32 %v5593_v6, %v3409_v62  ;;  %v8034_v33 = vpop.f32.mrb[62].mxu1 }
 0x340   : > { %v5596_v42 = vpop.f32.mrb[63].mxu0  ;;  %v7199_v3 = vpack.c.bf16 %v6065_v21, %v6064_v2  ;;  %v5926_v17 = vmax.f32 %v8431_v43, 0.0  ;;  %v8433_v22 = vadd.f32 %v8354_v40, %v8034_v33  ;;  %v3412_v58 = vpop.f32.mrb[63].mxu1 }
 0x341   : > { %v7194_v45 = vpack.c.bf16 %v6063_v34, %v6062_v1  ;;  %v5924_v44 = vmax.f32 %v8432_v8, 0.0  ;;  %v8434_v32 = vadd.f32 %v5596_v42, %v3412_v58 }
 0x342   : > { %7272 = vst [vmem:[%s10114_s16 + $0xe8] sm:$0xff] %v7199_v3   ;;  %v5997_v48 = vmul.f32 %v10096_v51, %v5926_v17  ;;  %v5927_v41 = vmax.f32 %v8433_v22, 0.0 }
 0x343   : > { %7271 = vst [vmem:[%s10114_s16 + $0xe0] sm:$0xff] %v7194_v45   ;;  %v5995_v31 = vmul.f32 %v10096_v51, %v5924_v44  ;;  %v5925_v25 = vmax.f32 %v8434_v32, 0.0 }
 0x344   : > { %v5998_v47 = vmul.f32 %v10096_v51, %v5927_v41  ;;  %v6068_v52 = vadd.f32 %v10102_v59, %v5997_v48 }
 0x345   : > { %v5996_v53 = vmul.f32 %v10096_v51, %v5925_v25  ;;  %v6066_v27 = vadd.f32 %v10102_v59, %v5995_v31 }
 0x346   : > { %v6069_v11 = vadd.f32 %v10102_v59, %v5998_v47 }
 0x347   : > { %v6067_v20 = vadd.f32 %v10102_v59, %v5996_v53 }
 0x348   : > { %v7209_v56 = vpack.c.bf16 %v6069_v11, %v6068_v52 }
 0x349   : > { %v7204_v16 = vpack.c.bf16 %v6067_v20, %v6066_v27 }
 0x34a   : > { %7274 = vst [vmem:[%s10114_s16 + $0xf8] sm:$0xff] %v7209_v56  }
 0x34b   : > { %7273 = vst [vmem:[%s10114_s16 + $0xf0] sm:$0xff] %v7204_v16  }
 0x34c PF: > { %s16_s25 = sadd.s32 1, %s9099_s25   ;;  %s10445_s21 = smov %s9091_s23 }
 0x34d   : > { %p13_p12 = scmp.ge.s32.totalorder %s16_s25, 6   ;;  %s10446_s22 = smov %s9095_s24 }
 0x34e   : > { %s10447_s23 = smov %s10450_s26  ;;  %s10448_s24 = smov %s10454_s27 }
 0x34f   :  { %15 = sbr.rel (!%p13_p12) target bundleno = 3 (0x3), region = 90 }

// kernel: up_block_forward.5
= control target key start
LH: loop header
LB: loop body
LE: loop exit
PB: predicated region body
PF: predicated region fallthrough
CT: control target
= control target key end

     0   :  { %11 = vsyncpa [#allocation5], 0  ;;  %s9934_s0 = inlined_call_operand.vmem [shape: bf16[2,32,32,128], index: 0, kind: input, shape index: {}, may-alias: {0,1,2}]   ;;  %s9935_s1 = inlined_call_operand.vmem [shape: bf16[2,32,32,128], index: 1, kind: input, shape index: {}, may-alias: {0,1,2}]   ;;  %s9936_s2 = inlined_call_operand.vmem [shape: bf16[2,32,32,128], index: 2, kind: input, shape index: {}, may-alias: {0,1,2}]   ;;  %s9937_s3 = inlined_call_operand.vmem [shape: bf16[3,3,128,128], index: 3, kind: input, shape index: {}]   ;;  %s9938_s4 = inlined_call_operand.vmem [shape: f32[1,128], index: 4, kind: input, shape index: {}]   ;;  %s9939_s5 = inlined_call_operand.vmem [shape: f32[1,128], index: 5, kind: input, shape index: {}]   ;;  %s9940_s6 = inlined_call_operand.hbm [shape: f32[2,32,32,128], index: 6, kind: output, shape index: {}]  }
   0x1   :  { %13 = vsyncpa [#allocation5 + $0x1], 0  ;;  %s8648_s21 = smov 0   ;;  %s8650_s22 = smov 0  }
   0x2   :  { %s8652_s23 = smov 0   ;;  %s8654_s24 = smov 0  }
   0x3   :  { %s8656_s25 = smov 0   ;;  %s8658_s26 = smov 0  }
   0x4   :  { %s8660_s27 = smov 0   ;;  %s8662_s28 = smov 0  }
   0x5 LB: > { %9996 = sst [smem:[#allocation7_spill]] %s8603_s27  ;;  %s6266_s29 = sadd.s32 4294967295, %s8607_s28   ;;  %s8607_s28 = sphi %s8662_s28, %s19_s28   ;;  %s8603_s27 = sphi %s8660_s27, %s10080_s27   ;;  %s8599_s26 = sphi %s8658_s26, %s10085_s26   ;;  %s8595_s25 = sphi %s8656_s25, %s10078_s25   ;;  %s8591_s24 = sphi %s8654_s24, %s10084_s24   ;;  %s8587_s23 = sphi %s8652_s23, %s10083_s23   ;;  %s8583_s22 = sphi %s8650_s22, %s10082_s22   ;;  %s8579_s21 = sphi %s8648_s21, %s10081_s21  }
   0x6   : > { %s6267_s30 = sadd.s32 4294967294, %s8607_s28   ;;  %s28_s7 = sadd.s32 1, %s8599_s26 }
   0x7   : > { %p29_p0 = scmp.ge.s32.totalorder %s28_s7, 2  ;;  %s31_s8 = sadd.s32 1, %s8603_s27 }
   0x8   : > { %p213_p1 = scmp.ne.s32.totalorder %s8587_s23, %s8583_s22  ;;  %p214_p2 = scmp.eq.s32.totalorder %s6266_s29, 3 }
   0x9   : > { %s10087_s7 = smov (%p29_p0, %s28_s7), 0  ;;  %s10089_s8 = smov (!%p29_p0, %s31_s8), %s8603_s27 }
   0xa   : > { %9997 = sst [smem:[#allocation8_spill]] %s10087_s7  ;;  %s199_s9 = ssub.s32 %s8599_s26, %s10087_s7 }
   0xb   : > { %p8699_p3 = por %p214_p2, %p213_p1  ;;  %p33_p4 = scmp.ge.s32.totalorder %s10089_s8, 2 }
   0xc   : > { %p219_p5 = scmp.ne.s32.totalorder %s8583_s22, %s8579_s21  ;;  %p220_p6 = scmp.eq.s32.totalorder %s6267_s30, 3 }
   0xd   : > { %p6276_p7 = scmp.ge.s32.totalorder %s8607_s28, 1  ;;  %s10091_s8 = smov (%p33_p4, %s10089_s8), 0 }
   0xe   : > { %9999 = sst [smem:[#allocation9_spill]] %s10091_s8  ;;  %p8708_p8 = por %p220_p6, %p219_p5 }
   0xf   : > { %p301_p9 = scmp.lt.s32.totalorder %s8607_s28, 5  ;;  %s198_s12 = ssub.s32 %s8603_s27, %s10091_s8 }
  0x10   : > { %s203_s13 = sadd.s32 1, %s8587_s23  ;;  %s200_s14 = sor.u32 %s199_s9, %s198_s12 }
  0x11   : > { %p302_p10 = pnand %p6276_p7, %p301_p9  ;;  %p201_p11 = scmp.eq.s32.totalorder %s200_s14, 0 }
  0x13   : > { %s8717_s15 = scalar_select %p201_p11, %s8587_s23, %s203_s13  }
  0x14   : > { %305 = sbr.rel (%p302_p10) target bundleno = 867 (0x363), region = 44 }
  0x1b   : > { %v8376_v0 = vld [vmem:[%s9937_s3] sm:$0xff]   ;;  %s8723_s18 = sshll.u32 %s8591_s24, 4  ;;  %v8378_v2 = vld [vmem:[%s9937_s3 + $0x8] sm:$0xff]   ;;  %p366_p13 = scmp.lt.s32.totalorder %s8595_s25, 1  ;;  %v8380_v4 = vld [vmem:[%s9937_s3 + $0x10] sm:$0xff]   ;;  %v8609_v10 = vmov 0.0  }
  0x1c   : > { %v8377_v1 = vld [vmem:[%s9937_s3 + $0x100] sm:$0xff]   ;;  %s6279_s29 = sadd.s32 4294967295, %s8723_s18  ;;  %7054 = vmatprep.subr.bf16.mxu1 %v8376_v0  ;;  %v8379_v3 = vld [vmem:[%s9937_s3 + $0x108] sm:$0xff]   ;;  %v8381_v5 = vld [vmem:[%s9937_s3 + $0x110] sm:$0xff]   ;;  %p382_p1 = scmp.lt.s32.totalorder %s8723_s18, 31  ;;  %569 = vst [vmem:[#allocation2] sm:$0xff] %v8609_v10 }
  0x1d   : > { %p364_p12 = scmp.gt.s32.totalorder %s6279_s29, 0  ;;  %7374 = vmatprep.subr.bf16.mxu0 %v8377_v1  ;;  %7055 = vmatpush3.bf16.msra.mxu1 %v8376_v0  ;;  %p6280_p0 = scmp.lt.s32.totalorder %s6279_s29, 31  ;;  %v8382_v6 = vld [vmem:[%s9937_s3 + $0x18] sm:$0xff]   ;;  %v8384_v8 = vld [vmem:[%s9937_s3 + $0x20] sm:$0xff]   ;;  %570 = vst [vmem:[#allocation2 + $0x30] sm:$0xff] %v8609_v10  ;;  %571 = vst [vmem:[#allocation2 + $0x60] sm:$0xff] %v8609_v10 }
  0x1e   : > { %7375 = vmatpush3.bf16.msra.mxu0 %v8377_v1  ;;  %7056 = vmatprep.subr.bf16.mxu1 %v8378_v2  ;;  %s367_s30 = scalar_select %p366_p13, %s8595_s25, 1  ;;  %v8383_v7 = vld [vmem:[%s9937_s3 + $0x118] sm:$0xff]   ;;  %v8385_v9 = vld [vmem:[%s9937_s3 + $0x120] sm:$0xff]   ;;  %572 = vst [vmem:[#allocation2 + $0x90] sm:$0xff] %v8609_v10  ;;  %573 = vst [vmem:[#allocation2 + $0xc0] sm:$0xff] %v8609_v10 }
  0x1f   : > { %s365_s17 = scalar_select %p364_p12, %s6279_s29, 0  ;;  %7376 = vmatprep.subr.bf16.mxu0 %v8379_v3  ;;  %574 = vst [vmem:[#allocation2 + $0xf0] sm:$0xff] %v8609_v10  ;;  %575 = vst [vmem:[#allocation2 + $0x120] sm:$0xff] %v8609_v10  ;;  %v8386_v11 = vld [vmem:[%s9937_s3 + $0x28] sm:$0xff]   ;;  %v8388_v15 = vld [vmem:[%s9937_s3 + $0x30] sm:$0xff]  }
  0x20   : > { %s8743_s9 = sshll.u32 %s367_s30, 7  ;;  %576 = vst [vmem:[#allocation2 + $0x150] sm:$0xff] %v8609_v10  ;;  %577 = vst [vmem:[#allocation2 + $0x180] sm:$0xff] %v8609_v10  ;;  %v8387_v12 = vld [vmem:[%s9937_s3 + $0x128] sm:$0xff]   ;;  %p537_p2 = scmp.gt.s32.totalorder %s8591_s24, 0  ;;  %v8389_v23 = vld [vmem:[%s9937_s3 + $0x130] sm:$0xff]  }
  0x21   : > { %7057 = vmatpush3.bf16.msra.mxu1 %v8378_v2  ;;  %s10093_s17 = smov (!%p6280_p0, %s365_s17), 31  ;;  %578 = vst [vmem:[#allocation2 + $0x1b0] sm:$0xff] %v8609_v10  ;;  %579 = vst [vmem:[#allocation2 + $0x1e0] sm:$0xff] %v8609_v10  ;;  %v8390_v38 = vld [vmem:[%s9937_s3 + $0x38] sm:$0xff]   ;;  %v8393_v54 = vld [vmem:[%s9937_s3 + $0x40] sm:$0xff]   ;;  %s6515_s13 = sadd.s32 16, %s8723_s18 }
  0x22   : > { %7377 = vmatpush3.bf16.msra.mxu0 %v8379_v3  ;;  %7058 = vmatprep.subr.bf16.mxu1 %v8380_v4  ;;  %s6285_s19 = sshll.u32 %s10093_s17, 2  ;;  %580 = vst [vmem:[#allocation2 + $0x210] sm:$0xff] %v8609_v10  ;;  %581 = vst [vmem:[#allocation2 + $0x240] sm:$0xff] %v8609_v10  ;;  %v8391_v44 = vld [vmem:[%s9937_s3 + $0x138] sm:$0xff]   ;;  %v8395_v56 = vld [vmem:[%s9937_s3 + $0x140] sm:$0xff]   ;;  %p392_p4 = scmp.lt.s32.totalorder %s6515_s13, 31 }
  0x23   : > { %7378 = vmatprep.subr.bf16.mxu0 %v8381_v5  ;;  %s372_s29 = sadd.s32 %s8743_s9, %s6285_s19  ;;  %582 = vst [vmem:[#allocation2 + $0x270] sm:$0xff] %v8609_v10  ;;  %583 = vst [vmem:[#allocation2 + $0x2a0] sm:$0xff] %v8609_v10  ;;  %v8432_v34 = vld [vmem:[%s9937_s3 + $0x90] sm:$0xff]   ;;  %p553_p5 = scmp.lt.s32.totalorder %s8591_s24, 1 }
  0x24   : > { %s6287_s8 = sshll.u32 %s372_s29, 2  ;;  %584 = vst [vmem:[#allocation2 + $0x2d0] sm:$0xff] %v8609_v10  ;;  %585 = vst [vmem:[#allocation2 + $0x300] sm:$0xff] %v8609_v10  ;;  %s10095_s13 = smov (!%p392_p4, %s6515_s13), 31 }
  0x25   : > { %7059 = vmatpush3.bf16.msra.mxu1 %v8380_v4  ;;  %s8762_s14 = scalar_lea.vmem %s9934_s0, %s6287_s8  ;;  %586 = vst [vmem:[#allocation2 + $0x330] sm:$0xff] %v8609_v10  ;;  %587 = vst [vmem:[#allocation2 + $0x28] sm:$0xff] %v8609_v10  ;;  %s10097_s13 = smov (!%p392_p4, %s10095_s13), 31 }
  0x26   : > { %7379 = vmatpush3.bf16.msra.mxu0 %v8381_v5  ;;  %7060 = vmatprep.subr.bf16.mxu1 %v8382_v6  ;;  %s8765_s17 = scalar_select %p382_p1, %s8723_s18, 31  ;;  %588 = vst [vmem:[#allocation2 + $0x58] sm:$0xff] %v8609_v10  ;;  %589 = vst [vmem:[#allocation2 + $0x88] sm:$0xff] %v8609_v10  ;;  %v6646_v13 = vld [vmem:[%s8762_s14] sm:$0xff]   ;;  %v8778_v14 = vld [vmem:[%s8762_s14 + $0x8] sm:$0xff]  }
  0x27   : > { %7380 = vmatprep.subr.bf16.mxu0 %v8383_v7  ;;  %590 = vst [vmem:[#allocation2 + $0xb8] sm:$0xff] %v8609_v10  ;;  %591 = vst [vmem:[#allocation2 + $0xe8] sm:$0xff] %v8609_v10  ;;  %v6647_v16 = vunpack.c.l.bf16 %v6646_v13  ;;  %v6648_v17 = vunpack.c.h.bf16 %v6646_v13  ;;  %s546_s14 = scalar_select %p537_p2, 1, 0  ;;  %v6651_v20 = vunpack.c.l.bf16 %v8778_v14  ;;  %v6652_v21 = vunpack.c.h.bf16 %v8778_v14  ;;  %v8402_v13 = vld [vmem:[%s9937_s3 + $0x150] sm:$0xff]  }
  0x28   : > { %592 = vst [vmem:[#allocation2 + $0x118] sm:$0xff] %v8609_v10  ;;  %593 = vst [vmem:[#allocation2 + $0x148] sm:$0xff] %v8609_v10  ;;  %s6289_s19 = sshll.u32 %s8765_s17, 2  ;;  %s6296_s18 = sshll.u32 %s10097_s13, 2 }
  0x29   : > { %594 = vst [vmem:[#allocation2 + $0x178] sm:$0xff] %v8609_v10  ;;  %595 = vst [vmem:[#allocation2 + $0x1a8] sm:$0xff] %v8609_v10  ;;  %7061 = vmatpush3.bf16.msra.mxu1 %v8382_v6  ;;  %s386_s29 = sadd.s32 %s6289_s19, %s8743_s9  ;;  %v547_v29 = vstv %s546_s14  ;;  %v8398_v6 = vld [vmem:[%s9937_s3 + $0x148] sm:$0xff]   ;;  %s400_s27 = sadd.s32 %s6296_s18, %s8743_s9 }
  0x2a   : > { %596 = vst [vmem:[#allocation2 + $0x1d8] sm:$0xff] %v8609_v10  ;;  %597 = vst [vmem:[#allocation2 + $0x208] sm:$0xff] %v8609_v10  ;;  %7381 = vmatpush3.bf16.msra.mxu0 %v8383_v7  ;;  %7062 = vmatprep.subr.bf16.mxu1 %v8384_v8  ;;  %s6291_s20 = sshll.u32 %s386_s29, 2  ;;  %vm8799_vm0 = vcmp.eq.s32.totalorder %v547_v29, 1  ;;  %v8400_v7 = vld [vmem:[%s9937_s3 + $0x48] sm:$0xff]   ;;  %v8405_v29 = vld [vmem:[%s9937_s3 + $0x158] sm:$0xff]  }
  0x2b   : > { %598 = vst [vmem:[#allocation2 + $0x238] sm:$0xff] %v8609_v10  ;;  %599 = vst [vmem:[#allocation2 + $0x268] sm:$0xff] %v8609_v10  ;;  %7382 = vmatprep.subr.bf16.mxu0 %v8385_v9  ;;  %s8786_s7 = scalar_lea.vmem %s9935_s1, %s6291_s20  ;;  %v549_v39 = vsel %vm8799_vm0, %v6647_v16, 0.0  ;;  %v550_v40 = vsel %vm8799_vm0, %v6648_v17, 0.0  ;;  %v551_v41 = vsel %vm8799_vm0, %v6651_v20, 0.0  ;;  %v552_v42 = vsel %vm8799_vm0, %v6652_v21, 0.0 }
  0x2c   : > { %600 = vst [vmem:[#allocation2 + $0x298] sm:$0xff] %v8609_v10  ;;  %601 = vst [vmem:[#allocation2 + $0x2c8] sm:$0xff] %v8609_v10  ;;  %v6518_v18 = vld [vmem:[%s8786_s7] sm:$0xff]   ;;  %v6661_v22 = vld [vmem:[%s8786_s7 + $0x8] sm:$0xff]   ;;  %s6298_s14 = sshll.u32 %s400_s27, 2  ;;  %s6516_s29 = sshll.u32 %s8591_s24, 6 }
  0x2d   : > { %602 = vst [vmem:[#allocation2 + $0x2f8] sm:$0xff] %v8609_v10  ;;  %603 = vst [vmem:[#allocation2 + $0x328] sm:$0xff] %v8609_v10  ;;  %7063 = vmatpush3.bf16.msra.mxu1 %v8384_v8  ;;  %v8392_v19 = vld [vmem:[%s8786_s7] sm:$0xff]  ;;  %v6519_v24 = vunpack.c.l.bf16 %v6518_v18  ;;  %v6520_v25 = vunpack.c.h.bf16 %v6518_v18  ;;  %v6523_v26 = vunpack.c.l.bf16 %v6661_v22  ;;  %v6524_v27 = vunpack.c.h.bf16 %v6661_v22  ;;  %v6662_v28 = vld [vmem:[%s8786_s7 + $0x10] sm:$0xff]   ;;  %s402_s16 = scalar_lea.vmem %s9936_s2, %s6298_s14  ;;  %s6504_s20 = sshll.u32 %s8595_s25, 7 }
  0x2e   : > { %604 = vst [vmem:[#allocation2 + $0x358] sm:$0xff] %v8609_v10  ;;  %7383 = vmatpush3.bf16.msra.mxu0 %v8385_v9  ;;  %7064 = vmatprep.subr.bf16.mxu1 %v8386_v11  ;;  %v6527_v30 = vunpack.c.l.bf16 %v6662_v28  ;;  %v6528_v31 = vunpack.c.h.bf16 %v6662_v28  ;;  %v6663_v32 = vld [vmem:[%s8786_s7 + $0x18] sm:$0xff]   ;;  %v6664_v33 = vld [vmem:[%s8786_s7 + $0x20] sm:$0xff]   ;;  %v6665_v43 = vld [vmem:[%s8786_s7 + $0x28] sm:$0xff]   ;;  %s562_s9 = scalar_select %p553_p5, 1, 0 }
  0x2f   : > { %7384 = vmatprep.subr.bf16.mxu0 %v8387_v12  ;;  %7390 = vmatprep.mubr.bf16.mxu0 %v8392_v19  ;;  %610 = vst [vmem:[#allocation2 + $0x38] sm:$0xff] %v6519_v24  ;;  %611 = vst [vmem:[#allocation2 + $0x40] sm:$0xff] %v6520_v25  ;;  %v6531_v35 = vunpack.c.l.bf16 %v6663_v32  ;;  %v6532_v36 = vunpack.c.h.bf16 %v6663_v32  ;;  %v6535_v37 = vunpack.c.l.bf16 %v6664_v33  ;;  %v6536_v45 = vunpack.c.h.bf16 %v6664_v33  ;;  %v6666_v48 = vld [vmem:[%s8786_s7 + $0x30] sm:$0xff]   ;;  %v6667_v49 = vld [vmem:[%s8786_s7 + $0x38] sm:$0xff]   ;;  %s6136_s24 = sadd.s32 %s6516_s29, %s6504_s20  ;;  %s8610_s17 = smov [#allocation4]  }
  0x30   : > { %612 = vst [vmem:[#allocation2 + $0x48] sm:$0xff] %v6523_v26  ;;  %613 = vst [vmem:[#allocation2 + $0x50] sm:$0xff] %v6524_v27  ;;  %v6539_v46 = vunpack.c.l.bf16 %v6665_v43  ;;  %v6540_v47 = vunpack.c.h.bf16 %v6665_v43  ;;  %v6543_v50 = vunpack.c.l.bf16 %v6666_v48  ;;  %v6544_v51 = vunpack.c.h.bf16 %v6666_v48  ;;  %v6668_v55 = vld [vmem:[%s8786_s7 + $0x40] sm:$0xff]   ;;  %v8394_v61 = vld [vmem:[%s8786_s7 + $0x8] sm:$0xff]  ;;  %s6505_s25 = sshll.u32 %s6136_s24, 7 }
  0x31   : > { %7065 = vmatpush3.bf16.msra.mxu1 %v8386_v11  ;;  %614 = vst [vmem:[#allocation2 + $0x68] sm:$0xff] %v6527_v30  ;;  %615 = vst [vmem:[#allocation2 + $0x70] sm:$0xff] %v6528_v31  ;;  %v6547_v52 = vunpack.c.l.bf16 %v6667_v49  ;;  %v6548_v53 = vunpack.c.h.bf16 %v6667_v49  ;;  %v6551_v57 = vunpack.c.l.bf16 %v6668_v55  ;;  %v6552_v58 = vunpack.c.h.bf16 %v6668_v55  ;;  %v8396_v5 = vld [vmem:[%s8786_s7 + $0x10] sm:$0xff]  ;;  %v6669_v8 = vld [vmem:[%s8786_s7 + $0x48] sm:$0xff]   ;;  %s9872_s18 = scalar_lea.hbm %s9940_s6, %s6505_s25 }
  0x32   : > { %7385 = vmatpush3.bf16.msra.mxu0 %v8387_v12  ;;  %7066 = vmatprep.subr.bf16.mxu1 %v8388_v15  ;;  %605 = vst [vmem:[#allocation2 + $0x8] sm:$0xff] %v549_v39  ;;  %606 = vst [vmem:[#allocation2 + $0x10] sm:$0xff] %v550_v40  ;;  %v6555_v11 = vunpack.c.l.bf16 %v6669_v8  ;;  %v6556_v12 = vunpack.c.h.bf16 %v6669_v8  ;;  %v8407_v17 = vld [vmem:[%s9937_s3 + $0x50] sm:$0xff]   ;;  %v8397_v19 = vld [vmem:[%s8786_s7 + $0x18] sm:$0xff] }
  0x33   : > { %7386 = vmatprep.subr.bf16.mxu0 %v8389_v23  ;;  %607 = vst [vmem:[#allocation2 + $0x18] sm:$0xff] %v551_v41  ;;  %608 = vst [vmem:[#allocation2 + $0x20] sm:$0xff] %v552_v42  ;;  %v6670_v20 = vld [vmem:[%s8786_s7 + $0x50] sm:$0xff]   ;;  %v6671_v21 = vld [vmem:[%s8786_s7 + $0x58] sm:$0xff]  }
  0x34   : > { %616 = vst [vmem:[#allocation2 + $0x78] sm:$0xff] %v6531_v35  ;;  %617 = vst [vmem:[#allocation2 + $0x80] sm:$0xff] %v6532_v36  ;;  %v8399_v22 = vld [vmem:[%s8786_s7 + $0x20] sm:$0xff]  ;;  %v6560_v24 = vunpack.c.h.bf16 %v6670_v20  ;;  %v6563_v25 = vunpack.c.l.bf16 %v6671_v21  ;;  %v6564_v26 = vunpack.c.h.bf16 %v6671_v21  ;;  %v8414_v32 = vld [vmem:[%s9937_s3 + $0x58] sm:$0xff]  }
  0x35   : > { %618 = vst [vmem:[#allocation2 + $0x98] sm:$0xff] %v6535_v37  ;;  %7067 = vmatpush3.bf16.msra.mxu1 %v8388_v15  ;;  %619 = vst [vmem:[#allocation2 + $0xa0] sm:$0xff] %v6536_v45  ;;  %v6672_v28 = vld [vmem:[%s8786_s7 + $0x60] sm:$0xff]   ;;  %v6673_v33 = vld [vmem:[%s8786_s7 + $0x68] sm:$0xff]  }
  0x36   : > { %620 = vst [vmem:[#allocation2 + $0xa8] sm:$0xff] %v6539_v46  ;;  %621 = vst [vmem:[#allocation2 + $0xb0] sm:$0xff] %v6540_v47  ;;  %7387 = vmatpush3.bf16.msra.mxu0 %v8389_v23  ;;  %7068 = vmatprep.subr.bf16.mxu1 %v8390_v38  ;;  %v683_v59 = vld [vmem:[#allocation2 + $0x37] sm:$0xff]  ;;  %v684_v60 = vld [vmem:[#allocation2 + $0x3f] sm:$0xff]  ;;  %v6559_v23 = vunpack.c.l.bf16 %v6670_v20  ;;  %v6567_v30 = vunpack.c.l.bf16 %v6672_v28  ;;  %v6568_v31 = vunpack.c.h.bf16 %v6672_v28  ;;  %v6571_v36 = vunpack.c.l.bf16 %v6673_v33 }
  0x37   : > { %7388 = vmatprep.subr.bf16.mxu0 %v8391_v44  ;;  %622 = vst [vmem:[#allocation2 + $0xc8] sm:$0xff] %v6543_v50  ;;  %623 = vst [vmem:[#allocation2 + $0xd0] sm:$0xff] %v6544_v51  ;;  %v8828_v3 = vpack.c.bf16 %v684_v60, %v683_v59  ;;  %v685_v9 = vld [vmem:[#allocation2 + $0x47] sm:$0xff]  ;;  %v686_v10 = vld [vmem:[#allocation2 + $0x4f] sm:$0xff]  ;;  %v6572_v37 = vunpack.c.h.bf16 %v6673_v33 }
  0x38   : > { %624 = vst [vmem:[#allocation2 + $0xd8] sm:$0xff] %v6547_v52  ;;  %625 = vst [vmem:[#allocation2 + $0xe0] sm:$0xff] %v6548_v53  ;;  %v687_v15 = vld [vmem:[#allocation2 + $0x67] sm:$0xff]  ;;  %v688_v16 = vld [vmem:[#allocation2 + $0x6f] sm:$0xff]  ;;  %v8845_v18 = vpack.c.bf16 %v686_v10, %v685_v9 }
  0x39   : > { %7069 = vmatpush3.bf16.msra.mxu1 %v8390_v38  ;;  %626 = vst [vmem:[#allocation2 + $0xf8] sm:$0xff] %v6551_v57  ;;  %627 = vst [vmem:[#allocation2 + $0x100] sm:$0xff] %v6552_v58  ;;  %v679_v62 = vld [vmem:[#allocation2 + $0x7] sm:$0xff]  ;;  %v680_v63 = vld [vmem:[#allocation2 + $0xf] sm:$0xff]  ;;  %v8851_v27 = vpack.c.bf16 %v688_v16, %v687_v15 }
  0x3a   : > { %7389 = vmatpush3.bf16.msra.mxu0 %v8391_v44  ;;  %v681_v0 = vld [vmem:[#allocation2 + $0x17] sm:$0xff]  ;;  %7134 = vmatprep.subr.bf16.mxu1 %v8393_v54  ;;  %v751_v1 = vpack.c.bf16 %v680_v63, %v679_v62  ;;  %v682_v2 = vld [vmem:[#allocation2 + $0x1f] sm:$0xff]  ;;  %10003 = vst [vmem:[#allocation10_spill] sm:$0xff] %v8828_v3  ;;  %628 = vst [vmem:[#allocation2 + $0x108] sm:$0xff] %v6555_v11 }
  0x3b   : > { %7454 = vmatprep.subr.bf16.mxu0 %v8395_v56  ;;  %v752_v4 = vpack.c.bf16 %v682_v2, %v681_v0  ;;  %629 = vst [vmem:[#allocation2 + $0x110] sm:$0xff] %v6556_v12  ;;  %10004 = vst [vmem:[#allocation11_spill] sm:$0xff] %v8845_v18  ;;  %v689_v35 = vld [vmem:[#allocation2 + $0x77] sm:$0xff]  ;;  %v690_v39 = vld [vmem:[#allocation2 + $0x7f] sm:$0xff] }
  0x3c   : > { %7070 = vmatprep.mubr.bf16.mxu1 %v751_v1  ;;  %630 = vst [vmem:[#allocation2 + $0x128] sm:$0xff] %v6559_v23  ;;  %631 = vst [vmem:[#allocation2 + $0x130] sm:$0xff] %v6560_v24  ;;  %v6674_v38 = vld [vmem:[%s8786_s7 + $0x70] sm:$0xff]   ;;  %v692_v41 = vld [vmem:[#allocation2 + $0x9f] sm:$0xff]  ;;  %v8871_v49 = vpack.c.bf16 %v690_v39, %v689_v35 }
  0x3d   : > { %7391 = vmatmul.mubr.bf16.vlgmr.msra.gmra.mrb[0].mxu0 %v8394_v61  ;;  %7071 = vmatmul.mubr.bf16.vlgmr.msra.gmra.mrb[0].mxu1 %v752_v4  ;;  %632 = vst [vmem:[#allocation2 + $0x138] sm:$0xff] %v6563_v25  ;;  %633 = vst [vmem:[#allocation2 + $0x140] sm:$0xff] %v6564_v26  ;;  %v691_v40 = vld [vmem:[#allocation2 + $0x97] sm:$0xff]  ;;  %v6575_v42 = vunpack.c.l.bf16 %v6674_v38  ;;  %v6576_v43 = vunpack.c.h.bf16 %v6674_v38  ;;  %v8409_v44 = vld [vmem:[%s9937_s3 + $0x160] sm:$0xff]  }
  0x3e   : > { %7455 = vmatpush3.bf16.msra.mxu0 %v8395_v56  ;;  %7135 = vmatpush3.bf16.msra.mxu1 %v8393_v54  ;;  %634 = vst [vmem:[#allocation2 + $0x158] sm:$0xff] %v6567_v30  ;;  %635 = vst [vmem:[#allocation2 + $0x160] sm:$0xff] %v6568_v31  ;;  %v6675_v45 = vld [vmem:[%s8786_s7 + $0x78] sm:$0xff]   ;;  %v8869_v46 = vld [vmem:[%s8786_s7 + $0x28] sm:$0xff]  ;;  %v8876_v51 = vpack.c.bf16 %v692_v41, %v691_v40 }
  0x3f   : > { %7074 = vmatprep.mubr.bf16.mxu1 %v8828_v3  ;;  %7394 = vmatprep.mubr.bf16.mxu0 %v8396_v5  ;;  %636 = vst [vmem:[#allocation2 + $0x168] sm:$0xff] %v6571_v36  ;;  %637 = vst [vmem:[#allocation2 + $0x170] sm:$0xff] %v6572_v37  ;;  %v6579_v47 = vunpack.c.l.bf16 %v6675_v45  ;;  %v6580_v48 = vunpack.c.h.bf16 %v6675_v45  ;;  %v8874_v50 = vld [vmem:[%s8786_s7 + $0x30] sm:$0xff]  ;;  %v8412_v52 = vld [vmem:[%s9937_s3 + $0x168] sm:$0xff]  }
  0x40   : > { %7456 = vmatprep.subr.bf16.mxu0 %v8398_v6  ;;  %7136 = vmatprep.subr.bf16.mxu1 %v8400_v7  ;;  %638 = vst [vmem:[#allocation2 + $0x188] sm:$0xff] %v6575_v42  ;;  %639 = vst [vmem:[#allocation2 + $0x190] sm:$0xff] %v6576_v43  ;;  %v8420_v53 = vld [vmem:[%s9937_s3 + $0x60] sm:$0xff]   ;;  %v694_v55 = vld [vmem:[#allocation2 + $0xaf] sm:$0xff] }
  0x41   : > { %640 = vst [vmem:[#allocation2 + $0x198] sm:$0xff] %v6579_v47  ;;  %641 = vst [vmem:[#allocation2 + $0x1a0] sm:$0xff] %v6580_v48  ;;  %v693_v54 = vld [vmem:[#allocation2 + $0xa7] sm:$0xff]  ;;  %v696_v58 = vld [vmem:[#allocation2 + $0xcf] sm:$0xff] }
  0x42   : > { %7457 = vmatpush3.bf16.msra.mxu0 %v8398_v6  ;;  %7137 = vmatpush3.bf16.msra.mxu1 %v8400_v7  ;;  %v6676_v56 = vld [vmem:[%s8786_s7 + $0x80] sm:$0xff]   ;;  %v8416_v59 = vld [vmem:[%s9937_s3 + $0x170] sm:$0xff]   ;;  %v8893_v62 = vld [vmem:[%s8786_s7 + $0x38] sm:$0xff]  ;;  %v8896_v0 = vpack.c.bf16 %v694_v55, %v693_v54 }
  0x43   : > { %7458 = vmatprep.subr.bf16.mxu0 %v8402_v13  ;;  %7138 = vmatprep.subr.bf16.mxu1 %v8407_v17  ;;  %v695_v57 = vld [vmem:[#allocation2 + $0xc7] sm:$0xff]  ;;  %v6583_v60 = vunpack.c.l.bf16 %v6676_v56  ;;  %v6584_v61 = vunpack.c.h.bf16 %v6676_v56  ;;  %v8419_v6 = vld [vmem:[%s9937_s3 + $0x178] sm:$0xff]   ;;  %v6678_v7 = vld [vmem:[%s8786_s7 + $0x90] sm:$0xff]  }
  0x44   : > { %v6677_v63 = vld [vmem:[%s8786_s7 + $0x88] sm:$0xff]   ;;  %v8899_v1 = vld [vmem:[%s8786_s7 + $0x40] sm:$0xff]  ;;  %v8901_v5 = vpack.c.bf16 %v696_v58, %v695_v57  ;;  %v6591_v8 = vunpack.c.l.bf16 %v6678_v7  ;;  %v6592_v9 = vunpack.c.h.bf16 %v6678_v7  ;;  %v6679_v10 = vld [vmem:[%s8786_s7 + $0x98] sm:$0xff]  }
  0x45   : > { %7395 = vmatmul.mubr.bf16.gmra.mrb[4].mxu0 %v8397_v19  ;;  %7075 = vmatmul.mubr.bf16.gmra.mrb[4].mxu1 %v8845_v18  ;;  %642 = vst [vmem:[#allocation2 + $0x1b8] sm:$0xff] %v6583_v60  ;;  %643 = vst [vmem:[#allocation2 + $0x1c0] sm:$0xff] %v6584_v61  ;;  %v6587_v2 = vunpack.c.l.bf16 %v6677_v63  ;;  %v6588_v4 = vunpack.c.h.bf16 %v6677_v63  ;;  %v6595_v11 = vunpack.c.l.bf16 %v6679_v10  ;;  %v6596_v12 = vunpack.c.h.bf16 %v6679_v10  ;;  %v697_v15 = vld [vmem:[#allocation2 + $0xd7] sm:$0xff]  ;;  %v698_v16 = vld [vmem:[#allocation2 + $0xdf] sm:$0xff] }
  0x46   : > { %7398 = vmatprep.mubr.bf16.mxu0 %v8399_v22  ;;  %7078 = vmatprep.mubr.bf16.mxu1 %v8851_v27  ;;  %646 = vst [vmem:[#allocation2 + $0x1e8] sm:$0xff] %v6591_v8  ;;  %647 = vst [vmem:[#allocation2 + $0x1f0] sm:$0xff] %v6592_v9  ;;  %v6680_v19 = vld [vmem:[%s8786_s7 + $0xa0] sm:$0xff]   ;;  %v6681_v24 = vld [vmem:[%s8786_s7 + $0xa8] sm:$0xff]   ;;  %v8926_v30 = vpack.c.bf16 %v698_v16, %v697_v15 }
  0x47   : > { %7459 = vmatpush3.bf16.msra.mxu0 %v8402_v13  ;;  %7139 = vmatpush3.bf16.msra.mxu1 %v8407_v17  ;;  %644 = vst [vmem:[#allocation2 + $0x1c8] sm:$0xff] %v6587_v2  ;;  %645 = vst [vmem:[#allocation2 + $0x1d0] sm:$0xff] %v6588_v4  ;;  %v8422_v13 = vld [vmem:[%s9937_s3 + $0x68] sm:$0xff]   ;;  %v699_v17 = vld [vmem:[#allocation2 + $0xf7] sm:$0xff]  ;;  %v6599_v22 = vunpack.c.l.bf16 %v6680_v19  ;;  %v6600_v23 = vunpack.c.h.bf16 %v6680_v19  ;;  %v6603_v26 = vunpack.c.l.bf16 %v6681_v24  ;;  %v6604_v28 = vunpack.c.h.bf16 %v6681_v24 }
  0x48   : > { %7460 = vmatprep.subr.bf16.mxu0 %v8405_v29  ;;  %7140 = vmatprep.subr.bf16.mxu1 %v8414_v32  ;;  %648 = vst [vmem:[#allocation2 + $0x1f8] sm:$0xff] %v6595_v11  ;;  %649 = vst [vmem:[#allocation2 + $0x200] sm:$0xff] %v6596_v12  ;;  %v700_v20 = vld [vmem:[#allocation2 + $0xff] sm:$0xff]  ;;  %v8923_v25 = vld [vmem:[%s8786_s7 + $0x48] sm:$0xff] }
  0x49   : > { %v8919_v21 = vld [vmem:[%s9937_s3 + $0x180] sm:$0xff]   ;;  %v8929_v31 = vld [vmem:[%s8786_s7 + $0x50] sm:$0xff]  ;;  %650 = vst [vmem:[#allocation2 + $0x218] sm:$0xff] %v6599_v22  ;;  %651 = vst [vmem:[#allocation2 + $0x220] sm:$0xff] %v6600_v23  ;;  %v8932_v36 = vpack.c.bf16 %v700_v20, %v699_v17 }
  0x4a   : > { %v6683_v35 = vld [vmem:[%s8786_s7 + $0xb8] sm:$0xff]   ;;  %652 = vst [vmem:[#allocation2 + $0x228] sm:$0xff] %v6603_v26  ;;  %653 = vst [vmem:[#allocation2 + $0x230] sm:$0xff] %v6604_v28  ;;  %v8424_v39 = vld [vmem:[%s9937_s3 + $0x70] sm:$0xff]  }
  0x4b   : > { %7461 = vmatpush3.bf16.msra.mxu0 %v8405_v29  ;;  %7141 = vmatpush3.bf16.msra.mxu1 %v8414_v32  ;;  %v6682_v29 = vld [vmem:[%s8786_s7 + $0xb0] sm:$0xff]   ;;  %v6611_v37 = vunpack.c.l.bf16 %v6683_v35  ;;  %v6612_v38 = vunpack.c.h.bf16 %v6683_v35  ;;  %v701_v40 = vld [vmem:[#allocation2 + $0x107] sm:$0xff]  ;;  %v6687_v61 = vld [vmem:[%s8786_s7 + $0xd8] sm:$0xff]  }
  0x4c   : > { %7462 = vmatprep.subr.bf16.mxu0 %v8409_v44  ;;  %7142 = vmatprep.subr.bf16.mxu1 %v8420_v53  ;;  %v6607_v32 = vunpack.c.l.bf16 %v6682_v29  ;;  %v6608_v33 = vunpack.c.h.bf16 %v6682_v29  ;;  %v702_v41 = vld [vmem:[#allocation2 + $0x10f] sm:$0xff]  ;;  %v6684_v42 = vld [vmem:[%s8786_s7 + $0xc0] sm:$0xff]   ;;  %v705_v63 = vld [vmem:[#allocation2 + $0x137] sm:$0xff]  ;;  %v6627_v2 = vunpack.c.l.bf16 %v6687_v61  ;;  %v6628_v4 = vunpack.c.h.bf16 %v6687_v61 }
  0x4d   : > { %7399 = vmatmul.mubr.bf16.gmra.mrb[8].mxu0 %v8869_v46  ;;  %7079 = vmatmul.mubr.bf16.gmra.mrb[8].mxu1 %v8871_v49  ;;  %656 = vst [vmem:[#allocation2 + $0x258] sm:$0xff] %v6611_v37  ;;  %657 = vst [vmem:[#allocation2 + $0x260] sm:$0xff] %v6612_v38  ;;  %v703_v43 = vld [vmem:[#allocation2 + $0x127] sm:$0xff]  ;;  %v6615_v45 = vunpack.c.l.bf16 %v6684_v42  ;;  %v6616_v47 = vunpack.c.h.bf16 %v6684_v42  ;;  %v8947_v55 = vpack.c.bf16 %v702_v41, %v701_v40  ;;  %v6686_v58 = vld [vmem:[%s8786_s7 + $0xd0] sm:$0xff]  }
  0x4e   : > { %7402 = vmatprep.mubr.bf16.mxu0 %v8874_v50  ;;  %7082 = vmatprep.mubr.bf16.mxu1 %v8876_v51  ;;  %654 = vst [vmem:[#allocation2 + $0x248] sm:$0xff] %v6607_v32  ;;  %655 = vst [vmem:[#allocation2 + $0x250] sm:$0xff] %v6608_v33  ;;  %v6685_v48 = vld [vmem:[%s8786_s7 + $0xc8] sm:$0xff]   ;;  %v8950_v56 = vld [vmem:[%s8786_s7 + $0x60] sm:$0xff]  ;;  %v6624_v60 = vunpack.c.h.bf16 %v6686_v58 }
  0x4f   : > { %7463 = vmatpush3.bf16.msra.mxu0 %v8409_v44  ;;  %7143 = vmatpush3.bf16.msra.mxu1 %v8420_v53  ;;  %v704_v44 = vld [vmem:[#allocation2 + $0x12f] sm:$0xff]  ;;  %v6619_v53 = vunpack.c.l.bf16 %v6685_v48  ;;  %v6620_v54 = vunpack.c.h.bf16 %v6685_v48  ;;  %658 = vst [vmem:[#allocation2 + $0x278] sm:$0xff] %v6615_v45  ;;  %659 = vst [vmem:[#allocation2 + $0x280] sm:$0xff] %v6616_v47  ;;  %v706_v7 = vld [vmem:[#allocation2 + $0x13f] sm:$0xff] }
  0x50   : > { %7464 = vmatprep.subr.bf16.mxu0 %v8412_v52  ;;  %7144 = vmatprep.subr.bf16.mxu1 %v8422_v13  ;;  %v8952_v57 = vpack.c.bf16 %v704_v44, %v703_v43  ;;  %663 = vst [vmem:[#allocation2 + $0x2b0] sm:$0xff] %v6624_v60  ;;  %v707_v8 = vld [vmem:[#allocation2 + $0x157] sm:$0xff]  ;;  %v708_v9 = vld [vmem:[#allocation2 + $0x15f] sm:$0xff]  ;;  %664 = vst [vmem:[#allocation2 + $0x2b8] sm:$0xff] %v6627_v2  ;;  %v8967_v15 = vpack.c.bf16 %v706_v7, %v705_v63 }
  0x51   : > { %660 = vst [vmem:[#allocation2 + $0x288] sm:$0xff] %v6619_v53  ;;  %661 = vst [vmem:[#allocation2 + $0x290] sm:$0xff] %v6620_v54  ;;  %v6688_v10 = vld [vmem:[%s8786_s7 + $0xe0] sm:$0xff]   ;;  %v8965_v11 = vld [vmem:[%s8786_s7 + $0x68] sm:$0xff]  ;;  %v8973_v19 = vpack.c.bf16 %v708_v9, %v707_v8 }
  0x52   : > { %665 = vst [vmem:[#allocation2 + $0x2c0] sm:$0xff] %v6628_v4  ;;  %v6631_v12 = vunpack.c.l.bf16 %v6688_v10  ;;  %v8970_v16 = vld [vmem:[%s8786_s7 + $0x70] sm:$0xff]  ;;  %v6689_v17 = vld [vmem:[%s8786_s7 + $0xe8] sm:$0xff]   ;;  %v899_v23 = vld [vmem:[#allocation2 + $0x39] sm:$0xff] }
  0x53   : > { %7465 = vmatpush3.bf16.msra.mxu0 %v8412_v52  ;;  %7145 = vmatpush3.bf16.msra.mxu1 %v8422_v13  ;;  %v8945_v52 = vld [vmem:[%s8786_s7 + $0x58] sm:$0xff]  ;;  %v6632_v13 = vunpack.c.h.bf16 %v6688_v10  ;;  %v6635_v20 = vunpack.c.l.bf16 %v6689_v17  ;;  %v6636_v22 = vunpack.c.h.bf16 %v6689_v17  ;;  %v900_v24 = vld [vmem:[#allocation2 + $0x41] sm:$0xff]  ;;  %v710_v29 = vld [vmem:[#allocation2 + $0x16f] sm:$0xff] }
  0x54   : > { %7466 = vmatprep.subr.bf16.mxu0 %v8416_v59  ;;  %7146 = vmatprep.subr.bf16.mxu1 %v8424_v39  ;;  %666 = vst [vmem:[#allocation2 + $0x2d8] sm:$0xff] %v6631_v12  ;;  %v8981_v26 = vld [vmem:[%s9937_s3 + $0x80] sm:$0xff]   ;;  %v712_v33 = vld [vmem:[#allocation2 + $0x18f] sm:$0xff]  ;;  %v8986_v35 = vld [vmem:[%s8786_s7 + $0x78] sm:$0xff]  ;;  %v8990_v38 = vpack.c.bf16 %v900_v24, %v899_v23 }
  0x55   : > { %7403 = vmatmul.mubr.bf16.gmra.mrb[12].mxu0 %v8893_v62  ;;  %7083 = vmatmul.mubr.bf16.gmra.mrb[12].mxu1 %v8896_v0  ;;  %667 = vst [vmem:[#allocation2 + $0x2e0] sm:$0xff] %v6632_v13  ;;  %668 = vst [vmem:[#allocation2 + $0x2e8] sm:$0xff] %v6635_v20  ;;  %v709_v28 = vld [vmem:[#allocation2 + $0x167] sm:$0xff]  ;;  %v902_v41 = vld [vmem:[#allocation2 + $0x51] sm:$0xff] }
  0x56   : > { %7406 = vmatprep.mubr.bf16.mxu0 %v8899_v1  ;;  %7086 = vmatprep.mubr.bf16.mxu1 %v8901_v5  ;;  %669 = vst [vmem:[#allocation2 + $0x2f0] sm:$0xff] %v6636_v22  ;;  %v711_v32 = vld [vmem:[#allocation2 + $0x187] sm:$0xff]  ;;  %v8988_v37 = vpack.c.bf16 %v710_v29, %v709_v28  ;;  %v713_v42 = vld [vmem:[#allocation2 + $0x197] sm:$0xff]  ;;  %v714_v43 = vld [vmem:[#allocation2 + $0x19f] sm:$0xff] }
  0x57   : > { %7467 = vmatpush3.bf16.msra.mxu0 %v8416_v59  ;;  %7147 = vmatpush3.bf16.msra.mxu1 %v8424_v39  ;;  %v6623_v59 = vunpack.c.l.bf16 %v6686_v58  ;;  %v8992_v39 = vpack.c.bf16 %v712_v33, %v711_v32  ;;  %v901_v40 = vld [vmem:[#allocation2 + $0x49] sm:$0xff]  ;;  %v715_v45 = vld [vmem:[#allocation2 + $0x1b7] sm:$0xff]  ;;  %v716_v47 = vld [vmem:[#allocation2 + $0x1bf] sm:$0xff]  ;;  %v9000_v54 = vpack.c.bf16 %v714_v43, %v713_v42 }
  0x58   : > { %7468 = vmatprep.subr.bf16.mxu0 %v8419_v6  ;;  %v903_v44 = vld [vmem:[#allocation2 + $0x69] sm:$0xff]  ;;  %v904_v48 = vld [vmem:[#allocation2 + $0x71] sm:$0xff]  ;;  %v8998_v53 = vpack.c.bf16 %v902_v41, %v901_v40  ;;  %v9002_v58 = vpack.c.bf16 %v716_v47, %v715_v45  ;;  %v905_v60 = vld [vmem:[#allocation2 + $0x79] sm:$0xff] }
  0x59   : > { %662 = vst [vmem:[#allocation2 + $0x2a8] sm:$0xff] %v6623_v59  ;;  %10005 = vst [vmem:[#allocation12_spill] sm:$0xff] %v8992_v39  ;;  %v9004_v59 = vpack.c.bf16 %v904_v48, %v903_v44  ;;  %v906_v61 = vld [vmem:[#allocation2 + $0x81] sm:$0xff]  ;;  %v907_v4 = vld [vmem:[#allocation2 + $0x99] sm:$0xff] }
  0x5a   : > { %10006 = vst [vmem:[#allocation13_spill] sm:$0xff] %v9000_v54  ;;  %10007 = vst [vmem:[#allocation14_spill] sm:$0xff] %v9002_v58  ;;  %v8423_v63 = vld [vmem:[%s9937_s3 + $0x188] sm:$0xff]   ;;  %v8425_v9 = vld [vmem:[%s9937_s3 + $0x190] sm:$0xff]   ;;  %v9017_v10 = vpack.c.bf16 %v906_v61, %v905_v60 }
  0x5b   : > { %7469 = vmatpush3.bf16.msra.mxu0 %v8419_v6  ;;  %v8426_v6 = vld [vmem:[%s9937_s3 + $0x78] sm:$0xff]   ;;  %v717_v2 = vld [vmem:[#allocation2 + $0x1c7] sm:$0xff]  ;;  %v718_v7 = vld [vmem:[#allocation2 + $0x1cf] sm:$0xff] }
  0x5c   : > { %7534 = vmatprep.subr.bf16.mxu0 %v8919_v21  ;;  %7148 = vmatprep.subr.bf16.mxu1 %v8426_v6  ;;  %v719_v8 = vld [vmem:[#allocation2 + $0x1e7] sm:$0xff]  ;;  %v720_v12 = vld [vmem:[#allocation2 + $0x1ef] sm:$0xff]  ;;  %v6691_v17 = vld [vmem:[%s8786_s7 + $0xf8] sm:$0xff]   ;;  %v9021_v24 = vpack.c.bf16 %v718_v7, %v717_v2 }
  0x5d   : > { %7407 = vmatmul.mubr.bf16.gmra.mrb[16].mxu0 %v8923_v25  ;;  %7087 = vmatmul.mubr.bf16.gmra.mrb[16].mxu1 %v8926_v30  ;;  %v6690_v13 = vld [vmem:[%s8786_s7 + $0xf0] sm:$0xff]   ;;  %v6643_v23 = vunpack.c.l.bf16 %v6691_v17  ;;  %v9025_v29 = vpack.c.bf16 %v720_v12, %v719_v8  ;;  %v8427_v32 = vld [vmem:[%s9937_s3 + $0x198] sm:$0xff]   ;;  %v8429_v48 = vld [vmem:[%s9937_s3 + $0x1a0] sm:$0xff]  }
  0x5e   : > { %7410 = vmatprep.mubr.bf16.mxu0 %v8929_v31  ;;  %7090 = vmatprep.mubr.bf16.mxu1 %v8932_v36  ;;  %v6639_v20 = vunpack.c.l.bf16 %v6690_v13  ;;  %v6640_v22 = vunpack.c.h.bf16 %v6690_v13  ;;  %v909_v33 = vld [vmem:[#allocation2 + $0xa9] sm:$0xff]  ;;  %v910_v40 = vld [vmem:[#allocation2 + $0xb1] sm:$0xff]  ;;  %v722_v42 = vld [vmem:[#allocation2 + $0x1ff] sm:$0xff] }
  0x5f   : > { %7149 = vmatpush3.bf16.msra.mxu1 %v8426_v6  ;;  %v908_v6 = vld [vmem:[#allocation2 + $0xa1] sm:$0xff]  ;;  %672 = vst [vmem:[#allocation2 + $0x318] sm:$0xff] %v6643_v23  ;;  %v721_v41 = vld [vmem:[#allocation2 + $0x1f7] sm:$0xff]  ;;  %v911_v43 = vld [vmem:[#allocation2 + $0xc9] sm:$0xff]  ;;  %v9037_v60 = vpack.c.bf16 %v910_v40, %v909_v33 }
  0x60   : > { %7214 = vmatprep.subr.bf16.mxu1 %v8981_v26  ;;  %v9023_v28 = vpack.c.bf16 %v908_v6, %v907_v4  ;;  %670 = vst [vmem:[#allocation2 + $0x308] sm:$0xff] %v6639_v20  ;;  %671 = vst [vmem:[#allocation2 + $0x310] sm:$0xff] %v6640_v22  ;;  %v912_v44 = vld [vmem:[#allocation2 + $0xd1] sm:$0xff]  ;;  %v724_v47 = vld [vmem:[#allocation2 + $0x21f] sm:$0xff]  ;;  %v9039_v61 = vpack.c.bf16 %v722_v42, %v721_v41 }
  0x61   : > { %v723_v45 = vld [vmem:[#allocation2 + $0x217] sm:$0xff]  ;;  %v8431_v4 = vld [vmem:[%s9937_s3 + $0x1a8] sm:$0xff]   ;;  %vm8504_vm1 = vmpackc.low %vm8799_vm0, %vm8799_vm0 }
  0x62   : > { %v9043_v2 = vpack.c.bf16 %v724_v47, %v723_v45  ;;  %v913_v6 = vld [vmem:[#allocation2 + $0xd9] sm:$0xff]  ;;  %v914_v7 = vld [vmem:[#allocation2 + $0xe1] sm:$0xff]  ;;  %v726_v13 = vld [vmem:[#allocation2 + $0x22f] sm:$0xff] }
  0x63   : > { %v725_v8 = vld [vmem:[#allocation2 + $0x227] sm:$0xff]  ;;  %v728_v20 = vld [vmem:[#allocation2 + $0x24f] sm:$0xff]  ;;  %v9055_v23 = vpack.c.bf16 %v914_v7, %v913_v6  ;;  %v8435_v33 = vld [vmem:[%s9937_s3 + $0x1b8] sm:$0xff]  }
  0x64   : > { %v916_v12 = vld [vmem:[#allocation2 + $0x101] sm:$0xff]  ;;  %v8433_v22 = vld [vmem:[%s9937_s3 + $0x1b0] sm:$0xff]  }
  0x65   : > { %7411 = vmatmul.mubr.bf16.gmra.mrb[20].mxu0 %v8945_v52  ;;  %7091 = vmatmul.mubr.bf16.gmra.mrb[20].mxu1 %v8947_v55  ;;  %10008 = vst [vmem:[#allocation15_spill] sm:$0xff] %v9055_v23  ;;  %v917_v41 = vld [vmem:[#allocation2 + $0x109] sm:$0xff]  ;;  %v918_v42 = vld [vmem:[#allocation2 + $0x111] sm:$0xff]  ;;  %v732_v6 = vld [vmem:[#allocation2 + $0x27f] sm:$0xff] }
  0x66   : > { %7414 = vmatprep.mubr.bf16.mxu0 %v8950_v56  ;;  %7094 = vmatprep.mubr.bf16.mxu1 %v8952_v57  ;;  %v919_v45 = vld [vmem:[#allocation2 + $0x129] sm:$0xff]  ;;  %v920_v47 = vld [vmem:[#allocation2 + $0x131] sm:$0xff]  ;;  %v9075_v7 = vpack.c.bf16 %v918_v42, %v917_v41  ;;  %v924_v42 = vld [vmem:[#allocation2 + $0x161] sm:$0xff] }
  0x67   : > { %v734_v41 = vld [vmem:[#allocation2 + $0x28f] sm:$0xff] }
  0x68   : > { %10011 = vst [vmem:[#allocation18_spill] sm:$0xff] %v9075_v7  ;;  %v926_v18 = vld [vmem:[#allocation2 + $0x171] sm:$0xff]  ;;  %v927_v3 = vld [vmem:[#allocation2 + $0x189] sm:$0xff] }
  0x6d   : > { %7415 = vmatmul.mubr.bf16.gmra.mrb[24].mxu0 %v8965_v11  ;;  %7095 = vmatmul.mubr.bf16.gmra.mrb[24].mxu1 %v8967_v15 }
  0x6e   : > { %7418 = vmatprep.mubr.bf16.mxu0 %v8970_v16  ;;  %7098 = vmatprep.mubr.bf16.mxu1 %v8973_v19 }
  0x75   : > { %7419 = vmatmul.mubr.bf16.gmra.mrb[28].mxu0 %v8986_v35  ;;  %7099 = vmatmul.mubr.bf16.gmra.mrb[28].mxu1 %v8988_v37 }
  0x76   : > { %7470 = vmatprep.mubr.bf16.mxu0 %v8990_v38  ;;  %7102 = vmatprep.mubr.bf16.mxu1 %v8992_v39 }
  0x7d   : > { %7471 = vmatmul.mubr.bf16.vlgmr.msra.gmra.mrb[0].mxu0 %v8998_v53  ;;  %7103 = vmatmul.mubr.bf16.gmra.mrb[32].mxu1 %v9000_v54 }
  0x7e   : > { %7535 = vmatpush3.bf16.msra.mxu0 %v8919_v21  ;;  %7106 = vmatprep.mubr.bf16.mxu1 %v9002_v58  ;;  %v6644_v21 = vunpack.c.h.bf16 %v6691_v17  ;;  %v727_v17 = vld [vmem:[#allocation2 + $0x247] sm:$0xff] }
  0x7f   : > { %7474 = vmatprep.mubr.bf16.mxu0 %v9004_v59  ;;  %7536 = vmatprep.subr.bf16.mxu0 %v8423_v63  ;;  %v9064_v40 = vpack.c.bf16 %v728_v20, %v727_v17  ;;  %v922_v17 = vld [vmem:[#allocation2 + $0x141] sm:$0xff]  ;;  %v923_v20 = vld [vmem:[#allocation2 + $0x159] sm:$0xff] }
  0x80   : > { %673 = vst [vmem:[#allocation2 + $0x320] sm:$0xff] %v6644_v21  ;;  %v9057_v21 = vpack.c.bf16 %v726_v13, %v725_v8  ;;  %v921_v13 = vld [vmem:[#allocation2 + $0x139] sm:$0xff] }
  0x81   : > { %10010 = vst [vmem:[#allocation17_spill] sm:$0xff] %v9064_v40 }
  0x82   : > { %7537 = vmatpush3.bf16.msra.mxu0 %v8423_v63  ;;  %v9041_v63 = vpack.c.bf16 %v912_v44, %v911_v43  ;;  %v729_v43 = vld [vmem:[#allocation2 + $0x257] sm:$0xff]  ;;  %v730_v44 = vld [vmem:[#allocation2 + $0x25f] sm:$0xff] }
  0x83   : > { %7538 = vmatprep.subr.bf16.mxu0 %v8425_v9  ;;  %v9077_v8 = vpack.c.bf16 %v730_v44, %v729_v43  ;;  %v735_v43 = vld [vmem:[#allocation2 + $0x2a7] sm:$0xff]  ;;  %v736_v44 = vld [vmem:[#allocation2 + $0x2af] sm:$0xff] }
  0x85   : > { %7475 = vmatmul.mubr.bf16.gmra.mrb[4].mxu0 %v9017_v10  ;;  %7107 = vmatmul.mubr.bf16.gmra.mrb[36].mxu1 %v9021_v24  ;;  %10012 = vst [vmem:[#allocation19_spill] sm:$0xff] %v9077_v8 }
  0x86   : > { %7478 = vmatprep.mubr.bf16.mxu0 %v9023_v28  ;;  %7110 = vmatprep.mubr.bf16.mxu1 %v9025_v29 }
  0x87   : > { %7539 = vmatpush3.bf16.msra.mxu0 %v8425_v9  ;;  %v915_v9 = vld [vmem:[#allocation2 + $0xf9] sm:$0xff] }
  0x88   : > { %7540 = vmatprep.subr.bf16.mxu0 %v8427_v32 }
  0x8b   : > { %7541 = vmatpush3.bf16.msra.mxu0 %v8427_v32  ;;  %v9059_v32 = vpack.c.bf16 %v916_v12, %v915_v9  ;;  %v9079_v9 = vpack.c.bf16 %v920_v47, %v919_v45  ;;  %v9088_v45 = vpack.c.bf16 %v922_v17, %v921_v13  ;;  %v9092_v47 = vpack.c.bf16 %v924_v42, %v923_v20  ;;  %v738_v13 = vld [vmem:[#allocation2 + $0x2bf] sm:$0xff]  ;;  %v928_v17 = vld [vmem:[#allocation2 + $0x191] sm:$0xff] }
  0x8c   : > { %7542 = vmatprep.subr.bf16.mxu0 %v8429_v48 }
  0x8d   : > { %7479 = vmatmul.mubr.bf16.gmra.mrb[8].mxu0 %v9037_v60  ;;  %7111 = vmatmul.mubr.bf16.gmra.mrb[40].mxu1 %v9039_v61  ;;  %10009 = vst [vmem:[#allocation16_spill] sm:$0xff] %v9059_v32  ;;  %10013 = vst [vmem:[#allocation20_spill] sm:$0xff] %v9079_v9 }
  0x8e   : > { %7482 = vmatprep.mubr.bf16.mxu0 %v9041_v63  ;;  %7114 = vmatprep.mubr.bf16.mxu1 %v9043_v2  ;;  %10015 = vst [vmem:[#allocation22_spill] sm:$0xff] %v9088_v45  ;;  %10017 = vst [vmem:[#allocation24_spill] sm:$0xff] %v9092_v47 }
  0x8f   : > { %7543 = vmatpush3.bf16.msra.mxu0 %v8429_v48  ;;  %v731_v48 = vld [vmem:[#allocation2 + $0x277] sm:$0xff] }
  0x90   : > { %7544 = vmatprep.subr.bf16.mxu0 %v8431_v4  ;;  %v9081_v12 = vpack.c.bf16 %v732_v6, %v731_v48  ;;  %v9094_v48 = vpack.c.bf16 %v736_v44, %v735_v43  ;;  %v925_v6 = vld [vmem:[#allocation2 + $0x169] sm:$0xff]  ;;  %v9104_v43 = vpack.c.bf16 %v928_v17, %v927_v3 }
  0x91   : > { %v9100_v20 = vpack.c.bf16 %v926_v18, %v925_v6  ;;  %v742_v18 = vld [vmem:[#allocation2 + $0x2ef] sm:$0xff]  ;;  %v932_v6 = vld [vmem:[#allocation2 + $0x1c1] sm:$0xff] }
  0x92   : > { %10014 = vst [vmem:[#allocation21_spill] sm:$0xff] %v9081_v12  ;;  %10018 = vst [vmem:[#allocation25_spill] sm:$0xff] %v9094_v48 }
  0x93   : > { %7545 = vmatpush3.bf16.msra.mxu0 %v8431_v4  ;;  %v9073_v4 = vld [vmem:[%s9937_s3 + $0x1c0] sm:$0xff]   ;;  %10019 = vst [vmem:[#allocation26_spill] sm:$0xff] %v9100_v20  ;;  %10021 = vst [vmem:[#allocation28_spill] sm:$0xff] %v9104_v43 }
  0x94   : > { %7546 = vmatprep.subr.bf16.mxu0 %v8433_v22 }
  0x95   : > { %7483 = vmatmul.mubr.bf16.gmra.mrb[12].mxu0 %v9055_v23  ;;  %7115 = vmatmul.mubr.bf16.gmra.mrb[44].mxu1 %v9057_v21  ;;  %v936_v23 = vld [vmem:[#allocation2 + $0x1f1] sm:$0xff] }
  0x96   : > { %7486 = vmatprep.mubr.bf16.mxu0 %v9059_v32  ;;  %7118 = vmatprep.mubr.bf16.mxu1 %v9064_v40  ;;  %v741_v32 = vld [vmem:[#allocation2 + $0x2e7] sm:$0xff] }
  0x97   : > { %7547 = vmatpush3.bf16.msra.mxu0 %v8433_v22  ;;  %v733_v22 = vld [vmem:[#allocation2 + $0x287] sm:$0xff]  ;;  %v9114_v17 = vpack.c.bf16 %v742_v18, %v741_v32 }
  0x98   : > { %7548 = vmatprep.subr.bf16.mxu0 %v8435_v33  ;;  %v8430_v32 = vld [vmem:[%s9937_s3 + $0x88] sm:$0xff]  }
  0x99   : > { %10023 = vst [vmem:[#allocation30_spill] sm:$0xff] %v9114_v17  ;;  %v8481_v18 = vld [vmem:[%s8786_s7 + $0x8] sm:$0xff] }
  0x9b   : > { %7549 = vmatpush3.bf16.msra.mxu0 %v8435_v33  ;;  %v9090_v33 = vpack.c.bf16 %v734_v41, %v733_v22  ;;  %v739_v22 = vld [vmem:[#allocation2 + $0x2d7] sm:$0xff]  ;;  %v740_v41 = vld [vmem:[#allocation2 + $0x2df] sm:$0xff] }
  0x9c   : > { %7614 = vmatprep.subr.bf16.mxu0 %v9073_v4  ;;  %v9106_v44 = vpack.c.bf16 %v740_v41, %v739_v22 }
  0x9d   : > { %7487 = vmatmul.mubr.bf16.gmra.mrb[16].mxu0 %v9075_v7  ;;  %7119 = vmatmul.mubr.bf16.gmra.mrb[48].mxu1 %v9077_v8  ;;  %10016 = vst [vmem:[#allocation23_spill] sm:$0xff] %v9090_v33  ;;  %v931_v7 = vld [vmem:[#allocation2 + $0x1b9] sm:$0xff] }
  0x9e   : > { %7490 = vmatprep.mubr.bf16.mxu0 %v9079_v9  ;;  %7122 = vmatprep.mubr.bf16.mxu1 %v9081_v12  ;;  %v737_v9 = vld [vmem:[#allocation2 + $0x2b7] sm:$0xff]  ;;  %10022 = vst [vmem:[#allocation29_spill] sm:$0xff] %v9106_v44  ;;  %v9116_v22 = vpack.c.bf16 %v932_v6, %v931_v7  ;;  %v941_v6 = vld [vmem:[#allocation2 + $0x229] sm:$0xff] }
  0x9f   : > { %v9102_v42 = vpack.c.bf16 %v738_v13, %v737_v9  ;;  %v787_v9 = vld [vmem:[#allocation2 + $0x8] sm:$0xff]  ;;  %v788_v13 = vld [vmem:[#allocation2 + $0x10] sm:$0xff]  ;;  %v937_v7 = vld [vmem:[#allocation2 + $0x1f9] sm:$0xff] }
  0xa0   : > { %v859_v41 = vpack.c.bf16 %v788_v13, %v787_v9  ;;  %v942_v9 = vld [vmem:[#allocation2 + $0x231] sm:$0xff] }
  0xa1   : > { %10020 = vst [vmem:[#allocation27_spill] sm:$0xff] %v9102_v42  ;;  %v9150_v13 = vld [vmem:[%s8786_s7 + $0x10] sm:$0xff] }
  0xa5   : > { %7491 = vmatmul.mubr.bf16.gmra.mrb[20].mxu0 %v9088_v45  ;;  %7123 = vmatmul.mubr.bf16.gmra.mrb[52].mxu1 %v9090_v33  ;;  %v930_v45 = vld [vmem:[#allocation2 + $0x1a1] sm:$0xff] }
  0xa6   : > { %7494 = vmatprep.mubr.bf16.mxu0 %v9092_v47  ;;  %7126 = vmatprep.mubr.bf16.mxu1 %v9094_v48  ;;  %v929_v47 = vld [vmem:[#allocation2 + $0x199] sm:$0xff] }
  0xa7   : > { %v9112_v3 = vpack.c.bf16 %v930_v45, %v929_v47  ;;  %v938_v47 = vld [vmem:[#allocation2 + $0x201] sm:$0xff] }
  0xad   : > { %7495 = vmatmul.mubr.bf16.gmra.mrb[24].mxu0 %v9100_v20  ;;  %7127 = vmatmul.mubr.bf16.gmra.mrb[56].mxu1 %v9102_v42  ;;  %v934_v20 = vld [vmem:[#allocation2 + $0x1d1] sm:$0xff] }
  0xae   : > { %7498 = vmatprep.mubr.bf16.mxu0 %v9104_v43  ;;  %7130 = vmatprep.mubr.bf16.mxu1 %v9106_v44  ;;  %v933_v43 = vld [vmem:[#allocation2 + $0x1c9] sm:$0xff] }
  0xaf   : > { %v935_v44 = vld [vmem:[#allocation2 + $0x1e9] sm:$0xff]  ;;  %v9121_v42 = vpack.c.bf16 %v934_v20, %v933_v43  ;;  %v939_v20 = vld [vmem:[#allocation2 + $0x219] sm:$0xff]  ;;  %v940_v43 = vld [vmem:[#allocation2 + $0x221] sm:$0xff] }
  0xb0   : > { %v9123_v45 = vpack.c.bf16 %v936_v23, %v935_v44  ;;  %v8480_v23 = vld [vmem:[%s8786_s7] sm:$0xff]  ;;  %v9139_v44 = vpack.c.bf16 %v938_v47, %v937_v7  ;;  %v9156_v47 = vpack.c.bf16 %v942_v9, %v941_v6 }
  0xb1   : > { %v8436_v7 = vld [vmem:[%s9937_s3 + $0xa0] sm:$0xff]  }
  0xb2   : > { %10025 = vst [vmem:[#allocation32_spill] sm:$0xff] %v9156_v47  ;;  %v9170_v6 = vld [vmem:[%s8786_s7 + $0x20] sm:$0xff] }
  0xb3   : > { %v948_v9 = vld [vmem:[#allocation2 + $0x281] sm:$0xff] }
  0xb5   : > { %7499 = vmatmul.mubr.bf16.gmra.mrb[28].mxu0 %v9112_v3  ;;  %7131 = vmatmul.mubr.bf16.gmra.mrb[60].mxu1 %v9114_v17 }
  0xb6   : > { %7502 = vmatprep.mubr.bf16.mxu0 %v9116_v22  ;;  %7150 = vmatprep.mubr.bf16.mxu1 %v859_v41  ;;  %v943_v41 = vld [vmem:[#allocation2 + $0x249] sm:$0xff] }
  0xbd   : > { %7503 = vmatmul.mubr.bf16.gmra.mrb[32].mxu0 %v9121_v42  ;;  %8506 = vmatmul.mubr.msk.bf16.vlgmr.msra.gmra.mrb[0].mxu1 %vm8504_vm1, %v8778_v14  ;;  %v9141_v14 = vpack.c.bf16 %v940_v43, %v939_v20  ;;  %v8442_v20 = vld [vmem:[%s9937_s3 + $0xa8] sm:$0xff]   ;;  %v9165_v43 = vld [vmem:[%s8786_s7 + $0x18] sm:$0xff] }
  0xbe   : > { %7506 = vmatprep.mubr.bf16.mxu0 %v9123_v45  ;;  %7215 = vmatpush3.bf16.msra.mxu1 %v8981_v26  ;;  %v8434_v26 = vld [vmem:[%s9937_s3 + $0x98] sm:$0xff]  }
  0xbf   : > { %7154 = vmatprep.mubr.bf16.mxu1 %v8480_v23  ;;  %7216 = vmatprep.subr.bf16.mxu1 %v8430_v32  ;;  %10024 = vst [vmem:[#allocation31_spill] sm:$0xff] %v9141_v14 }
  0xc2   : > { %7217 = vmatpush3.bf16.msra.mxu1 %v8430_v32  ;;  %v944_v32 = vld [vmem:[#allocation2 + $0x251] sm:$0xff] }
  0xc3   : > { %7218 = vmatprep.subr.bf16.mxu1 %v8432_v34  ;;  %v9158_v23 = vpack.c.bf16 %v944_v32, %v943_v41  ;;  %v8448_v41 = vld [vmem:[%s9937_s3 + $0xb0] sm:$0xff]  }
  0xc5   : > { %7507 = vmatmul.mubr.bf16.gmra.mrb[36].mxu0 %v9139_v44  ;;  %7155 = vmatmul.mubr.bf16.gmra.mrb[4].mxu1 %v8481_v18  ;;  %10026 = vst [vmem:[#allocation33_spill] sm:$0xff] %v9158_v23  ;;  %v946_v18 = vld [vmem:[#allocation2 + $0x261] sm:$0xff] }
  0xc6   : > { %7510 = vmatprep.mubr.bf16.mxu0 %v9141_v14  ;;  %7158 = vmatprep.mubr.bf16.mxu1 %v9150_v13  ;;  %v950_v14 = vld [vmem:[#allocation2 + $0x291] sm:$0xff] }
  0xc7   : > { %7219 = vmatpush3.bf16.msra.mxu1 %v8432_v34  ;;  %v945_v34 = vld [vmem:[#allocation2 + $0x259] sm:$0xff] }
  0xc8   : > { %7220 = vmatprep.subr.bf16.mxu1 %v8434_v26  ;;  %v9176_v32 = vpack.c.bf16 %v946_v18, %v945_v34  ;;  %v951_v34 = vld [vmem:[#allocation2 + $0x2a9] sm:$0xff]  ;;  %v952_v18 = vld [vmem:[#allocation2 + $0x2b1] sm:$0xff] }
  0xcb   : > { %7221 = vmatpush3.bf16.msra.mxu1 %v8434_v26  ;;  %v947_v26 = vld [vmem:[#allocation2 + $0x279] sm:$0xff] }
  0xcc   : > { %7222 = vmatprep.subr.bf16.mxu1 %v8436_v7 }
  0xcd   : > { %7511 = vmatmul.mubr.bf16.gmra.mrb[40].mxu0 %v9156_v47  ;;  %7159 = vmatmul.mubr.bf16.gmra.mrb[8].mxu1 %v9165_v43  ;;  %v9178_v47 = vpack.c.bf16 %v948_v9, %v947_v26  ;;  %v9194_v9 = vpack.c.bf16 %v952_v18, %v951_v34  ;;  %v959_v34 = vld [vmem:[#allocation2 + $0x309] sm:$0xff]  ;;  %v960_v18 = vld [vmem:[#allocation2 + $0x311] sm:$0xff] }
  0xce   : > { %7514 = vmatprep.mubr.bf16.mxu0 %v9158_v23  ;;  %7162 = vmatprep.mubr.bf16.mxu1 %v9170_v6  ;;  %v8454_v23 = vld [vmem:[%s9937_s3 + $0xb8] sm:$0xff]  }
  0xcf   : > { %7223 = vmatpush3.bf16.msra.mxu1 %v8436_v7  ;;  %10027 = vst [vmem:[#allocation34_spill] sm:$0xff] %v9178_v47  ;;  %v949_v7 = vld [vmem:[#allocation2 + $0x289] sm:$0xff]  ;;  %10029 = vst [vmem:[#allocation36_spill] sm:$0xff] %v9194_v9 }
  0xd0   : > { %7224 = vmatprep.subr.bf16.mxu1 %v8442_v20  ;;  %v9192_v26 = vpack.c.bf16 %v950_v14, %v949_v7  ;;  %v955_v14 = vld [vmem:[#allocation2 + $0x2d9] sm:$0xff] }
  0xd2   : > { %10028 = vst [vmem:[#allocation35_spill] sm:$0xff] %v9192_v26 }
  0xd3   : > { %7225 = vmatpush3.bf16.msra.mxu1 %v8442_v20  ;;  %v9190_v20 = vld [vmem:[%s9937_s3 + $0xc0] sm:$0xff]  }
  0xd4   : > { %7226 = vmatprep.subr.bf16.mxu1 %v8448_v41 }
  0xd5   : > { %7515 = vmatmul.mubr.bf16.gmra.mrb[44].mxu0 %v9176_v32  ;;  %7163 = vmatmul.mubr.bf16.gmra.mrb[12].mxu1 %v8869_v46  ;;  %v953_v46 = vld [vmem:[#allocation2 + $0x2b9] sm:$0xff] }
  0xd6   : > { %7518 = vmatprep.mubr.bf16.mxu0 %v9178_v47  ;;  %7166 = vmatprep.mubr.bf16.mxu1 %v8874_v50  ;;  %v954_v50 = vld [vmem:[#allocation2 + $0x2c1] sm:$0xff] }
  0xd7   : > { %7227 = vmatpush3.bf16.msra.mxu1 %v8448_v41  ;;  %v956_v41 = vld [vmem:[#allocation2 + $0x2e1] sm:$0xff] }
  0xd8   : > { %7228 = vmatprep.subr.bf16.mxu1 %v8454_v23  ;;  %v9204_v7 = vpack.c.bf16 %v956_v41, %v955_v14 }
  0xda   : > { %10031 = vst [vmem:[#allocation38_spill] sm:$0xff] %v9204_v7 }
  0xdb   : > { %7229 = vmatpush3.bf16.msra.mxu1 %v8454_v23  ;;  %v9202_v23 = vpack.c.bf16 %v954_v50, %v953_v46  ;;  %v9215_v46 = vld [vmem:[%s402_s16] sm:$0xff]  }
  0xdc   : > { %7294 = vmatprep.subr.bf16.mxu1 %v9190_v20  ;;  %10032 = vst [vmem:[#allocation39_spill] sm:$0xff] %v9215_v46  ;;  %v6655_v50 = vunpack.c.l.bf16 %v9215_v46  ;;  %v6656_v14 = vunpack.c.h.bf16 %v9215_v46 }
  0xdd   : > { %7519 = vmatmul.mubr.bf16.gmra.mrb[48].mxu0 %v9192_v26  ;;  %7167 = vmatmul.mubr.bf16.gmra.mrb[16].mxu1 %v8893_v62  ;;  %10030 = vst [vmem:[#allocation37_spill] sm:$0xff] %v9202_v23  ;;  %v957_v62 = vld [vmem:[#allocation2 + $0x2e9] sm:$0xff]  ;;  %v9225_v26 = vpack.c.bf16 %v960_v18, %v959_v34  ;;  %v962_v34 = vld [vmem:[#allocation2 + $0x321] sm:$0xff] }
  0xde   : > { %7522 = vmatprep.mubr.bf16.mxu0 %v9194_v9  ;;  %7170 = vmatprep.mubr.bf16.mxu1 %v8899_v1  ;;  %v958_v1 = vld [vmem:[#allocation2 + $0x2f1] sm:$0xff]  ;;  %v9283_v18 = vld [vmem:[%s8786_s7 + $0xa0] sm:$0xff] }
  0xdf   : > { %v9221_v41 = vpack.c.bf16 %v958_v1, %v957_v62  ;;  %10034 = vst [vmem:[#allocation41_spill] sm:$0xff] %v9225_v26 }
  0xe5   : > { %7523 = vmatmul.mubr.bf16.gmra.mrb[52].mxu0 %v9202_v23  ;;  %7171 = vmatmul.mubr.bf16.gmra.mrb[20].mxu1 %v8923_v25  ;;  %v9219_v25 = vld [vmem:[%s402_s16 + $0x8] sm:$0xff]  }
  0xe6   : > { %7526 = vmatprep.mubr.bf16.mxu0 %v9204_v7  ;;  %7174 = vmatprep.mubr.bf16.mxu1 %v8929_v31  ;;  %10033 = vst [vmem:[#allocation40_spill] sm:$0xff] %v9219_v25  ;;  %v563_v7 = vstv %s562_s9  ;;  %v6659_v23 = vunpack.c.l.bf16 %v9219_v25  ;;  %v6660_v9 = vunpack.c.h.bf16 %v9219_v25  ;;  %v897_v25 = vld [vmem:[#allocation2 + $0x19] sm:$0xff] }
  0xe7   : > { %vm9227_vm2 = vcmp.eq.s32.totalorder %v563_v7, 1  ;;  %v961_v7 = vld [vmem:[#allocation2 + $0x319] sm:$0xff] }
  0xe8   : > { %v565_v47 = vsel %vm9227_vm2, %v6655_v50, 0.0  ;;  %v566_v46 = vsel %vm9227_vm2, %v6656_v14, 0.0  ;;  %v567_v62 = vsel %vm9227_vm2, %v6659_v23, 0.0  ;;  %v568_v1 = vsel %vm9227_vm2, %v6660_v9, 0.0  ;;  %v9280_v9 = vld [vmem:[%s8786_s7 + $0x98] sm:$0xff]  ;;  %v8463_v50 = vld [vmem:[%s9937_s3 + $0x1f0] sm:$0xff]   ;;  %vm8507_vm3 = vmpackc.low %vm9227_vm2, %vm9227_vm2 }
  0xe9   : > { %675 = vst [vmem:[#allocation2 + $0x338] sm:$0xff] %v565_v47  ;;  %676 = vst [vmem:[#allocation2 + $0x340] sm:$0xff] %v566_v46  ;;  %v9243_v23 = vpack.c.bf16 %v962_v34, %v961_v7  ;;  %v9250_v47 = vld [vmem:[%s8786_s7 + $0x80] sm:$0xff]  ;;  %v8461_v46 = vld [vmem:[%s9937_s3 + $0x1e8] sm:$0xff]  }
  0xea   : > { %677 = vst [vmem:[#allocation2 + $0x348] sm:$0xff] %v567_v62  ;;  %678 = vst [vmem:[#allocation2 + $0x350] sm:$0xff] %v568_v1  ;;  %v9296_v14 = vld [vmem:[%s8786_s7 + $0xa8] sm:$0xff]  ;;  %v9299_v62 = vld [vmem:[%s8786_s7 + $0xb0] sm:$0xff] }
  0xeb   : > { %10037 = vst [vmem:[#allocation42_spill] sm:$0xff] %v9243_v23  ;;  %v8465_v1 = vld [vmem:[%s9937_s3 + $0x1f8] sm:$0xff]   ;;  %v9311_v7 = vld [vmem:[%s9937_s3 + $0x200] sm:$0xff]  }
  0xec   : > { %v9314_v34 = vld [vmem:[%s8786_s7 + $0xb8] sm:$0xff] }
  0xed   : > { %7527 = vmatmul.mubr.bf16.gmra.mrb[56].mxu0 %v9221_v41  ;;  %7175 = vmatmul.mubr.bf16.gmra.mrb[24].mxu1 %v8945_v52  ;;  %v8443_v52 = vld [vmem:[%s9937_s3 + $0x1c8] sm:$0xff]  }
  0xee   : > { %7530 = vmatprep.mubr.bf16.mxu0 %v9225_v26  ;;  %7178 = vmatprep.mubr.bf16.mxu1 %v8950_v56  ;;  %v8449_v56 = vld [vmem:[%s9937_s3 + $0x1d0] sm:$0xff]  }
  0xf5   : > { %7531 = vmatmul.mubr.bf16.gmra.mrb[60].mxu0 %v9243_v23  ;;  %7179 = vmatmul.mubr.bf16.gmra.mrb[28].mxu1 %v8965_v11  ;;  %v9264_v11 = vld [vmem:[%s8786_s7 + $0x88] sm:$0xff] }
  0xf6   : > { %7550 = vmatprep.mubr.bf16.mxu0 %v8851_v27  ;;  %7182 = vmatprep.mubr.bf16.mxu1 %v8970_v16  ;;  %v9267_v16 = vld [vmem:[%s8786_s7 + $0x90] sm:$0xff]  ;;  %v9345_v23 = vld [vmem:[%s8786_s7 + $0xe8] sm:$0xff] }
  0xfd   : > { %7551 = vmatmul.mubr.bf16.vlgmr.msra.gmra.mrb[0].mxu0 %v8871_v49  ;;  %7183 = vmatmul.mubr.bf16.gmra.mrb[32].mxu1 %v8986_v35  ;;  %v8455_v35 = vld [vmem:[%s9937_s3 + $0x1d8] sm:$0xff]  }
  0xfe   : > { %7615 = vmatpush3.bf16.msra.mxu0 %v9073_v4  ;;  %7186 = vmatprep.mubr.bf16.mxu1 %v9250_v47  ;;  %v8459_v4 = vld [vmem:[%s9937_s3 + $0x1e0] sm:$0xff]  }
  0xff   : > { %7554 = vmatprep.mubr.bf16.mxu0 %v8876_v51  ;;  %7616 = vmatprep.subr.bf16.mxu0 %v8443_v52 }
 0x102   : > { %7617 = vmatpush3.bf16.msra.mxu0 %v8443_v52  ;;  %v9317_v52 = vld [vmem:[%s8786_s7 + $0xc0] sm:$0xff] }
 0x103   : > { %7618 = vmatprep.subr.bf16.mxu0 %v8449_v56 }
 0x105   : > { %7555 = vmatmul.mubr.bf16.gmra.mrb[4].mxu0 %v8896_v0  ;;  %7187 = vmatmul.mubr.bf16.gmra.mrb[36].mxu1 %v9264_v11 }
 0x106   : > { %7558 = vmatprep.mubr.bf16.mxu0 %v8901_v5  ;;  %7190 = vmatprep.mubr.bf16.mxu1 %v9267_v16 }
 0x107   : > { %7619 = vmatpush3.bf16.msra.mxu0 %v8449_v56  ;;  %v9325_v56 = vld [vmem:[%s8786_s7 + $0xc8] sm:$0xff] }
 0x108   : > { %7620 = vmatprep.subr.bf16.mxu0 %v8455_v35 }
 0x10b   : > { %7621 = vmatpush3.bf16.msra.mxu0 %v8455_v35  ;;  %v9328_v35 = vld [vmem:[%s8786_s7 + $0xd0] sm:$0xff] }
 0x10c   : > { %7622 = vmatprep.subr.bf16.mxu0 %v8459_v4 }
 0x10d   : > { %7559 = vmatmul.mubr.bf16.gmra.mrb[8].mxu0 %v8926_v30  ;;  %7191 = vmatmul.mubr.bf16.gmra.mrb[40].mxu1 %v9280_v9 }
 0x10e   : > { %7562 = vmatprep.mubr.bf16.mxu0 %v8932_v36  ;;  %7194 = vmatprep.mubr.bf16.mxu1 %v9283_v18 }
 0x10f   : > { %7623 = vmatpush3.bf16.msra.mxu0 %v8459_v4  ;;  %v9335_v4 = vld [vmem:[%s8786_s7 + $0xd8] sm:$0xff] }
 0x110   : > { %7624 = vmatprep.subr.bf16.mxu0 %v8461_v46 }
 0x113   : > { %7625 = vmatpush3.bf16.msra.mxu0 %v8461_v46  ;;  %v9338_v46 = vld [vmem:[%s8786_s7 + $0xe0] sm:$0xff] }
 0x114   : > { %7626 = vmatprep.subr.bf16.mxu0 %v8463_v50 }
 0x115   : > { %7563 = vmatmul.mubr.bf16.gmra.mrb[12].mxu0 %v8947_v55  ;;  %7195 = vmatmul.mubr.bf16.gmra.mrb[44].mxu1 %v9296_v14 }
 0x116   : > { %7566 = vmatprep.mubr.bf16.mxu0 %v8952_v57  ;;  %7198 = vmatprep.mubr.bf16.mxu1 %v9299_v62 }
 0x117   : > { %7627 = vmatpush3.bf16.msra.mxu0 %v8463_v50  ;;  %v895_v50 = vld [vmem:[#allocation2 + $0x9] sm:$0xff] }
 0x118   : > { %7628 = vmatprep.subr.bf16.mxu0 %v8465_v1 }
 0x11b   : > { %7629 = vmatpush3.bf16.msra.mxu0 %v8465_v1  ;;  %v896_v1 = vld [vmem:[#allocation2 + $0x11] sm:$0xff] }
 0x11c   : > { %7694 = vmatprep.subr.bf16.mxu0 %v9311_v7  ;;  %v967_v26 = vpack.c.bf16 %v896_v1, %v895_v50  ;;  %v10039_v50 = vld [vmem:[#allocation15_spill] sm:$0xff]  ;;  %v10040_v1 = vld [vmem:[#allocation29_spill] sm:$0xff] }
 0x11d   : > { %7567 = vmatmul.mubr.bf16.gmra.mrb[16].mxu0 %v8967_v15  ;;  %7199 = vmatmul.mubr.bf16.gmra.mrb[48].mxu1 %v9314_v34 }
 0x11e   : > { %7570 = vmatprep.mubr.bf16.mxu0 %v8973_v19  ;;  %7202 = vmatprep.mubr.bf16.mxu1 %v9317_v52 }
 0x125   : > { %7571 = vmatmul.mubr.bf16.gmra.mrb[20].mxu0 %v8988_v37  ;;  %7203 = vmatmul.mubr.bf16.gmra.mrb[52].mxu1 %v9325_v56 }
 0x126   : > { %7574 = vmatprep.mubr.bf16.mxu0 %v8992_v39  ;;  %7206 = vmatprep.mubr.bf16.mxu1 %v9328_v35 }
 0x12d   : > { %7575 = vmatmul.mubr.bf16.gmra.mrb[24].mxu0 %v9000_v54  ;;  %7207 = vmatmul.mubr.bf16.gmra.mrb[56].mxu1 %v9335_v4  ;;  %v898_v54 = vld [vmem:[#allocation2 + $0x21] sm:$0xff] }
 0x12e   : > { %7578 = vmatprep.mubr.bf16.mxu0 %v9002_v58  ;;  %7210 = vmatprep.mubr.bf16.mxu1 %v9338_v46  ;;  %v968_v39 = vpack.c.bf16 %v898_v54, %v897_v25  ;;  %v8460_v58 = vld [vmem:[%s9937_s3 + $0xc8] sm:$0xff]   ;;  %v8464_v54 = vld [vmem:[%s9937_s3 + $0xd8] sm:$0xff]  }
 0x12f   : > { %v10038_v25 = vld [vmem:[#allocation27_spill] sm:$0xff] }
 0x135   : > { %7579 = vmatmul.mubr.bf16.gmra.mrb[28].mxu0 %v9021_v24  ;;  %7211 = vmatmul.mubr.bf16.gmra.mrb[60].mxu1 %v9345_v23 }
 0x136   : > { %7582 = vmatprep.mubr.bf16.mxu0 %v9025_v29  ;;  %7230 = vmatprep.mubr.bf16.mxu1 %v967_v26  ;;  %v8462_v26 = vld [vmem:[%s9937_s3 + $0xd0] sm:$0xff]  }
 0x13d   : > { %7583 = vmatmul.mubr.bf16.gmra.mrb[32].mxu0 %v9039_v61  ;;  %7231 = vmatmul.mubr.bf16.vlgmr.msra.gmra.mrb[0].mxu1 %v968_v39  ;;  %v8468_v39 = vld [vmem:[%s9937_s3 + $0xe8] sm:$0xff]  }
 0x13e   : > { %7586 = vmatprep.mubr.bf16.mxu0 %v9043_v2  ;;  %7295 = vmatpush3.bf16.msra.mxu1 %v9190_v20  ;;  %v9390_v20 = vld [vmem:[%s9937_s3 + $0x100] sm:$0xff]  }
 0x13f   : > { %7234 = vmatprep.mubr.bf16.mxu1 %v8990_v38  ;;  %7296 = vmatprep.subr.bf16.mxu1 %v8460_v58  ;;  %v8466_v38 = vld [vmem:[%s9937_s3 + $0xe0] sm:$0xff]  }
 0x142   : > { %7297 = vmatpush3.bf16.msra.mxu1 %v8460_v58  ;;  %v8472_v58 = vld [vmem:[%s9937_s3 + $0xf8] sm:$0xff]  }
 0x143   : > { %7298 = vmatprep.subr.bf16.mxu1 %v8462_v26 }
 0x145   : > { %7587 = vmatmul.mubr.bf16.gmra.mrb[36].mxu0 %v9057_v21  ;;  %7235 = vmatmul.mubr.bf16.gmra.mrb[4].mxu1 %v8998_v53  ;;  %v8470_v53 = vld [vmem:[%s9937_s3 + $0xf0] sm:$0xff]  }
 0x146   : > { %7590 = vmatprep.mubr.bf16.mxu0 %v9064_v40  ;;  %7238 = vmatprep.mubr.bf16.mxu1 %v9004_v59  ;;  %v10045_v40 = vld [vmem:[#allocation22_spill] sm:$0xff] }
 0x147   : > { %7299 = vmatpush3.bf16.msra.mxu1 %v8462_v26  ;;  %v10041_v26 = vld [vmem:[#allocation16_spill] sm:$0xff] }
 0x148   : > { %7300 = vmatprep.subr.bf16.mxu1 %v8464_v54 }
 0x14b   : > { %7301 = vmatpush3.bf16.msra.mxu1 %v8464_v54  ;;  %v743_v54 = vld [vmem:[#allocation2 + $0x307] sm:$0xff] }
 0x14c   : > { %7302 = vmatprep.subr.bf16.mxu1 %v8466_v38 }
 0x14d   : > { %7591 = vmatmul.mubr.bf16.gmra.mrb[40].mxu0 %v9077_v8  ;;  %7239 = vmatmul.mubr.bf16.gmra.mrb[8].mxu1 %v9017_v10 }
 0x14e   : > { %7594 = vmatprep.mubr.bf16.mxu0 %v9081_v12  ;;  %7242 = vmatprep.mubr.bf16.mxu1 %v9023_v28  ;;  %v748_v12 = vld [vmem:[#allocation2 + $0x33f] sm:$0xff] }
 0x14f   : > { %7303 = vmatpush3.bf16.msra.mxu1 %v8466_v38  ;;  %v744_v38 = vld [vmem:[#allocation2 + $0x30f] sm:$0xff] }
 0x150   : > { %7304 = vmatprep.subr.bf16.mxu1 %v8468_v39 }
 0x153   : > { %7305 = vmatpush3.bf16.msra.mxu1 %v8468_v39  ;;  %v9397_v39 = vpack.c.bf16 %v744_v38, %v743_v54  ;;  %v749_v54 = vld [vmem:[#allocation2 + $0x347] sm:$0xff]  ;;  %v750_v38 = vld [vmem:[#allocation2 + $0x34f] sm:$0xff] }
 0x154   : > { %7306 = vmatprep.subr.bf16.mxu1 %v8470_v53 }
 0x155   : > { %7595 = vmatmul.mubr.bf16.gmra.mrb[44].mxu0 %v9090_v33  ;;  %7243 = vmatmul.mubr.bf16.gmra.mrb[12].mxu1 %v9037_v60  ;;  %10042 = vst [vmem:[#allocation15_spill] sm:$0xff] %v9397_v39  ;;  %v10044_v33 = vld [vmem:[#allocation20_spill] sm:$0xff] }
 0x156   : > { %7598 = vmatprep.mubr.bf16.mxu0 %v9094_v48  ;;  %7246 = vmatprep.mubr.bf16.mxu1 %v9041_v63  ;;  %v746_v48 = vld [vmem:[#allocation2 + $0x31f] sm:$0xff] }
 0x157   : > { %7307 = vmatpush3.bf16.msra.mxu1 %v8470_v53  ;;  %v10043_v53 = vld [vmem:[#allocation18_spill] sm:$0xff] }
 0x158   : > { %7308 = vmatprep.subr.bf16.mxu1 %v8472_v58 }
 0x15b   : > { %7309 = vmatpush3.bf16.msra.mxu1 %v8472_v58  ;;  %v745_v58 = vld [vmem:[#allocation2 + $0x317] sm:$0xff] }
 0x15c   : > { %7774 = vmatprep.subr.bf16.mxu1 %v9390_v20  ;;  %v9403_v8 = vpack.c.bf16 %v746_v48, %v745_v58  ;;  %v8471_v48 = vld [vmem:[%s9937_s3 + $0x210] sm:$0xff]   ;;  %v10049_v58 = vld [vmem:[#allocation31_spill] sm:$0xff] }
 0x15d   : > { %7599 = vmatmul.mubr.bf16.gmra.mrb[48].mxu0 %v10038_v25  ;;  %7247 = vmatmul.mubr.bf16.gmra.mrb[16].mxu1 %v10039_v50  ;;  %v747_v25 = vld [vmem:[#allocation2 + $0x337] sm:$0xff] }
 0x15e   : > { %7602 = vmatprep.mubr.bf16.mxu0 %v10040_v1  ;;  %7250 = vmatprep.mubr.bf16.mxu1 %v10041_v26  ;;  %v785_v1 = vpack.c.bf16 %v748_v12, %v747_v25  ;;  %v8469_v12 = vld [vmem:[%s9937_s3 + $0x208] sm:$0xff]  }
 0x15f   : > { %v8475_v25 = vld [vmem:[%s9937_s3 + $0x228] sm:$0xff]  }
 0x165   : > { %7603 = vmatmul.mubr.bf16.gmra.mrb[52].mxu0 %v9114_v17  ;;  %7251 = vmatmul.mubr.bf16.gmra.mrb[20].mxu1 %v10043_v53  ;;  %v10046_v17 = vld [vmem:[#allocation24_spill] sm:$0xff]  ;;  %v786_v53 = vpack.c.bf16 %v750_v38, %v749_v54  ;;  %v8479_v38 = vld [vmem:[%s9937_s3 + $0x238] sm:$0xff]  }
 0x166   : > { %7606 = vmatprep.mubr.bf16.mxu0 %v9397_v39  ;;  %7254 = vmatprep.mubr.bf16.mxu1 %v10044_v33  ;;  %v10047_v39 = vld [vmem:[#allocation26_spill] sm:$0xff]  ;;  %v10048_v33 = vld [vmem:[#allocation28_spill] sm:$0xff] }
 0x167   : > { %v8476_v54 = vld [vmem:[%s9937_s3 + $0x230] sm:$0xff]  }
 0x16d   : > { %7607 = vmatmul.mubr.bf16.gmra.mrb[56].mxu0 %v9403_v8  ;;  %7255 = vmatmul.mubr.bf16.gmra.mrb[24].mxu1 %v10045_v40 }
 0x16e   : > { %7610 = vmatprep.mubr.bf16.mxu0 %v785_v1  ;;  %7258 = vmatprep.mubr.bf16.mxu1 %v10046_v17  ;;  %v8488_v1 = vld [vmem:[%s8786_s7 + $0x38] sm:$0xff] }
 0x175   : > { %7611 = vmatmul.mubr.bf16.gmra.mrb[60].mxu0 %v786_v53  ;;  %7259 = vmatmul.mubr.bf16.gmra.mrb[28].mxu1 %v10047_v39  ;;  %v8489_v53 = vld [vmem:[%s8786_s7 + $0x40] sm:$0xff] }
 0x176   : > { %7630 = vmatprep.mubr.bf16.mxu0 %v9150_v13  ;;  %7262 = vmatprep.mubr.bf16.mxu1 %v10048_v33  ;;  %v8473_v13 = vld [vmem:[%s9937_s3 + $0x218] sm:$0xff]  }
 0x17d   : > { %7631 = vmatmul.mubr.bf16.vlgmr.msra.gmra.mrb[0].mxu0 %v9165_v43  ;;  %7263 = vmatmul.mubr.bf16.gmra.mrb[32].mxu1 %v9112_v3  ;;  %v8486_v43 = vld [vmem:[%s8786_s7 + $0x28] sm:$0xff] }
 0x17e   : > { %7695 = vmatpush3.bf16.msra.mxu0 %v9311_v7  ;;  %7266 = vmatprep.mubr.bf16.mxu1 %v9116_v22  ;;  %v8487_v7 = vld [vmem:[%s8786_s7 + $0x30] sm:$0xff] }
 0x17f   : > { %7634 = vmatprep.mubr.bf16.mxu0 %v9170_v6  ;;  %7696 = vmatprep.subr.bf16.mxu0 %v8469_v12  ;;  %v8474_v6 = vld [vmem:[%s9937_s3 + $0x220] sm:$0xff]  }
 0x182   : > { %7697 = vmatpush3.bf16.msra.mxu0 %v8469_v12  ;;  %v8490_v12 = vld [vmem:[%s8786_s7 + $0x48] sm:$0xff] }
 0x183   : > { %7698 = vmatprep.subr.bf16.mxu0 %v8471_v48 }
 0x185   : > { %7635 = vmatmul.mubr.bf16.gmra.mrb[4].mxu0 %v8486_v43  ;;  %7267 = vmatmul.mubr.bf16.gmra.mrb[36].mxu1 %v9121_v42  ;;  %v10051_v43 = vld [vmem:[#allocation33_spill] sm:$0xff] }
 0x186   : > { %7638 = vmatprep.mubr.bf16.mxu0 %v8487_v7  ;;  %7270 = vmatprep.mubr.bf16.mxu1 %v9123_v45  ;;  %v8492_v7 = vld [vmem:[%s8786_s7 + $0x58] sm:$0xff] }
 0x187   : > { %7699 = vmatpush3.bf16.msra.mxu0 %v8471_v48  ;;  %v10050_v48 = vld [vmem:[#allocation32_spill] sm:$0xff] }
 0x188   : > { %7700 = vmatprep.subr.bf16.mxu0 %v8473_v13 }
 0x18b   : > { %7701 = vmatpush3.bf16.msra.mxu0 %v8473_v13  ;;  %v8491_v13 = vld [vmem:[%s8786_s7 + $0x50] sm:$0xff] }
 0x18c   : > { %7702 = vmatprep.subr.bf16.mxu0 %v8474_v6 }
 0x18d   : > { %7639 = vmatmul.mubr.bf16.gmra.mrb[8].mxu0 %v8488_v1  ;;  %7271 = vmatmul.mubr.bf16.gmra.mrb[40].mxu1 %v9139_v44  ;;  %v8494_v1 = vld [vmem:[%s8786_s7 + $0x68] sm:$0xff] }
 0x18e   : > { %7642 = vmatprep.mubr.bf16.mxu0 %v8489_v53  ;;  %7274 = vmatprep.mubr.bf16.mxu1 %v10049_v58  ;;  %v10053_v53 = vld [vmem:[#allocation35_spill] sm:$0xff] }
 0x18f   : > { %7703 = vmatpush3.bf16.msra.mxu0 %v8474_v6  ;;  %v8493_v6 = vld [vmem:[%s8786_s7 + $0x60] sm:$0xff] }
 0x190   : > { %7704 = vmatprep.subr.bf16.mxu0 %v8475_v25 }
 0x193   : > { %7705 = vmatpush3.bf16.msra.mxu0 %v8475_v25  ;;  %v10052_v25 = vld [vmem:[#allocation34_spill] sm:$0xff] }
 0x194   : > { %7706 = vmatprep.subr.bf16.mxu0 %v8476_v54 }
 0x195   : > { %7643 = vmatmul.mubr.bf16.gmra.mrb[12].mxu0 %v8490_v12  ;;  %7275 = vmatmul.mubr.bf16.gmra.mrb[44].mxu1 %v10050_v48  ;;  %v8495_v12 = vld [vmem:[%s8786_s7 + $0x70] sm:$0xff] }
 0x196   : > { %7646 = vmatprep.mubr.bf16.mxu0 %v8491_v13  ;;  %7278 = vmatprep.mubr.bf16.mxu1 %v10051_v43  ;;  %v10054_v13 = vld [vmem:[#allocation36_spill] sm:$0xff]  ;;  %v8496_v43 = vld [vmem:[%s8786_s7 + $0x78] sm:$0xff] }
 0x197   : > { %7707 = vmatpush3.bf16.msra.mxu0 %v8476_v54  ;;  %v10055_v54 = vld [vmem:[#allocation37_spill] sm:$0xff] }
 0x198   : > { %7708 = vmatprep.subr.bf16.mxu0 %v8479_v38 }
 0x19b   : > { %7709 = vmatpush3.bf16.msra.mxu0 %v8479_v38  ;;  %v10056_v38 = vld [vmem:[#allocation38_spill] sm:$0xff] }
 0x19d   : > { %7647 = vmatmul.mubr.bf16.gmra.mrb[16].mxu0 %v8492_v7  ;;  %7279 = vmatmul.mubr.bf16.gmra.mrb[48].mxu1 %v9176_v32  ;;  %v10057_v7 = vld [vmem:[#allocation10_spill] sm:$0xff] }
 0x19e   : > { %7650 = vmatprep.mubr.bf16.mxu0 %v8493_v6  ;;  %7282 = vmatprep.mubr.bf16.mxu1 %v10052_v25  ;;  %v10058_v6 = vld [vmem:[#allocation11_spill] sm:$0xff] }
 0x1a5   : > { %7651 = vmatmul.mubr.bf16.gmra.mrb[20].mxu0 %v8494_v1  ;;  %7283 = vmatmul.mubr.bf16.gmra.mrb[52].mxu1 %v10053_v53  ;;  %v8498_v1 = vld [vmem:[%s9937_s3 + $0x110] sm:$0xff]  }
 0x1a6   : > { %7654 = vmatprep.mubr.bf16.mxu0 %v8495_v12  ;;  %7286 = vmatprep.mubr.bf16.mxu1 %v10054_v13 }
 0x1ad   : > { %7655 = vmatmul.mubr.bf16.gmra.mrb[24].mxu0 %v8496_v43  ;;  %7287 = vmatmul.mubr.bf16.gmra.mrb[56].mxu1 %v10055_v54  ;;  %v8497_v43 = vld [vmem:[%s9937_s3 + $0x108] sm:$0xff]  }
 0x1ae   : > { %7658 = vmatprep.mubr.bf16.mxu0 %v9250_v47  ;;  %7290 = vmatprep.mubr.bf16.mxu1 %v10056_v38 }
 0x1b5   : > { %7659 = vmatmul.mubr.bf16.gmra.mrb[28].mxu0 %v9264_v11  ;;  %7291 = vmatmul.mubr.bf16.gmra.mrb[60].mxu1 %v9221_v41 }
 0x1b6   : > { %7662 = vmatprep.mubr.bf16.mxu0 %v9267_v16  ;;  %7310 = vmatprep.mubr.bf16.mxu1 %v10057_v7 }
 0x1bd   : > { %7663 = vmatmul.mubr.bf16.gmra.mrb[32].mxu0 %v9280_v9  ;;  %7311 = vmatmul.mubr.bf16.vlgmr.msra.gmra.mrb[0].mxu1 %v10058_v6 }
 0x1be   : > { %7666 = vmatprep.mubr.bf16.mxu0 %v9283_v18  ;;  %7782 = vmatpush3.bf16.msra.mxu1 %v9390_v20  ;;  %v8500_v20 = vld [vmem:[%s9937_s3 + $0x120] sm:$0xff]  }
 0x1bf   : > { %7314 = vmatprep.mubr.bf16.mxu1 %v8851_v27  ;;  %7775 = vmatprep.subr.bf16.mxu1 %v8497_v43  ;;  %v8499_v27 = vld [vmem:[%s9937_s3 + $0x118] sm:$0xff]  }
 0x1c2   : > { %7783 = vmatpush3.bf16.msra.mxu1 %v8497_v43 }
 0x1c3   : > { %7776 = vmatprep.subr.bf16.mxu1 %v8498_v1 }
 0x1c5   : > { %7667 = vmatmul.mubr.bf16.gmra.mrb[36].mxu0 %v9296_v14  ;;  %7315 = vmatmul.mubr.bf16.gmra.mrb[4].mxu1 %v8871_v49  ;;  %v8501_v49 = vld [vmem:[%s9937_s3 + $0x128] sm:$0xff]  }
 0x1c6   : > { %7670 = vmatprep.mubr.bf16.mxu0 %v9299_v62  ;;  %7318 = vmatprep.mubr.bf16.mxu1 %v8876_v51  ;;  %v8502_v51 = vld [vmem:[%s9937_s3 + $0x130] sm:$0xff]  }
 0x1c7   : > { %7784 = vmatpush3.bf16.msra.mxu1 %v8498_v1 }
 0x1c8   : > { %7777 = vmatprep.subr.bf16.mxu1 %v8499_v27 }
 0x1cb   : > { %7785 = vmatpush3.bf16.msra.mxu1 %v8499_v27 }
 0x1cc   : > { %7778 = vmatprep.subr.bf16.mxu1 %v8500_v20 }
 0x1cd   : > { %7671 = vmatmul.mubr.bf16.gmra.mrb[40].mxu0 %v9314_v34  ;;  %7319 = vmatmul.mubr.bf16.gmra.mrb[8].mxu1 %v8896_v0  ;;  %v8503_v0 = vld [vmem:[%s9937_s3 + $0x138] sm:$0xff]  }
 0x1ce   : > { %7674 = vmatprep.mubr.bf16.mxu0 %v9317_v52  ;;  %7322 = vmatprep.mubr.bf16.mxu1 %v8901_v5  ;;  %v9508_v5 = vld [vmem:[%s8786_s7 + $0xf0] sm:$0xff] }
 0x1cf   : > { %7786 = vmatpush3.bf16.msra.mxu1 %v8500_v20 }
 0x1d0   : > { %7779 = vmatprep.subr.bf16.mxu1 %v8501_v49 }
 0x1d3   : > { %7787 = vmatpush3.bf16.msra.mxu1 %v8501_v49 }
 0x1d4   : > { %7780 = vmatprep.subr.bf16.mxu1 %v8502_v51 }
 0x1d5   : > { %7675 = vmatmul.mubr.bf16.gmra.mrb[44].mxu0 %v9325_v56  ;;  %7323 = vmatmul.mubr.bf16.gmra.mrb[12].mxu1 %v8926_v30  ;;  %v9515_v30 = vld [vmem:[%s8786_s7 + $0xf8] sm:$0xff]  ;;  %s359_s7 = sand.u32 1, %s8583_s22  }
 0x1d6   : > { %7678 = vmatprep.mubr.bf16.mxu0 %v9328_v35  ;;  %7326 = vmatprep.mubr.bf16.mxu1 %v8932_v36  ;;  %v10059_v36 = vld [vmem:[#allocation39_spill] sm:$0xff]  ;;  %s6277_s8 = sshll.u32 %s359_s7, 9  ;;  %s9882_s27 = scalar_lea.sflag [#allocation5], %s359_s7 }
 0x1d7   : > { %7788 = vmatpush3.bf16.msra.mxu1 %v8502_v51  ;;  %v9642_v51 = vld [vmem:[%s9938_s4] ss:$0 sm:$0xff]  ;;  %s9657_s19 = scalar_lea.vmem [#allocation4], %s6277_s8  ;;  %s8517_s8 = sshll.u32 %s8610_s17, 4  ;;  %s8518_s8 = int_to_ptr.vmem [resolvable:$false] %s8517_s8 }
 0x1d8   : > { %7781 = vmatprep.subr.bf16.mxu1 %v8503_v0  ;;  %s6139_s30 = sshll.u32 %s9657_s19, 4  ;;  %s8519_s16 = scalar_lea.vmem %s8518_s8, 16384  ;;  %s9874_s30 = int_to_ptr.vmem [resolvable:$true] %s6139_s30 }
 0x1d9   : > { %s8513_s14 = scalar_lea.vmem %s9874_s30, 8192  ;;  %p8520_p10 = scmp.lt.s32.totalorder %s9874_s30, %s8518_s8 }
 0x1da   : > { %p8514_p6 = scmp.ne.s32.totalorder %s9874_s30, %s8513_s14  ;;  %p8521_p11 = scmp.lt.s32.totalorder %s8519_s16, %s8513_s14 }
 0x1db   : > { %7789 = vmatpush3.bf16.msra.mxu1 %v8503_v0 }
 0x1dc   : > { %p8515_p7 = pnand %p8514_p6, %p8699_p3  ;;  %p8522_p12 = por %p8521_p11, %p8520_p10 }
 0x1dd   : > { %7679 = vmatmul.mubr.bf16.gmra.mrb[48].mxu0 %v9335_v4  ;;  %7327 = vmatmul.mubr.bf16.gmra.mrb[16].mxu1 %v8947_v55  ;;  %v10060_v55 = vld [vmem:[#allocation12_spill] sm:$0xff] }
 0x1de   : > { %7682 = vmatprep.mubr.bf16.mxu0 %v9338_v46  ;;  %7330 = vmatprep.mubr.bf16.mxu1 %v8952_v57  ;;  %v10061_v57 = vld [vmem:[#allocation40_spill] sm:$0xff]  ;;  %p8516_p9 = pneg %p8515_p7 }
 0x1e0   : > { %p8523_p13 = pnand %p8522_p12, %p8516_p9 }
 0x1e5   : > { %7683 = vmatmul.mubr.bf16.gmra.mrb[52].mxu0 %v9345_v23  ;;  %7331 = vmatmul.mubr.bf16.gmra.mrb[20].mxu1 %v8967_v15  ;;  %v10062_v15 = vld [vmem:[#allocation13_spill] sm:$0xff] }
 0x1e6   : > { %7686 = vmatprep.mubr.bf16.mxu0 %v9508_v5  ;;  %7334 = vmatprep.mubr.bf16.mxu1 %v8973_v19  ;;  %v10063_v19 = vld [vmem:[#allocation14_spill] sm:$0xff] }
 0x1ed   : > { %7687 = vmatmul.mubr.bf16.gmra.mrb[56].mxu0 %v9515_v30  ;;  %7335 = vmatmul.mubr.bf16.gmra.mrb[24].mxu1 %v8988_v37  ;;  %v10064_v37 = vld [vmem:[#allocation17_spill] sm:$0xff] }
 0x1ee   : > { %8509 = vmatprep.mubr.msk.bf16.mxu0 %vm8507_vm3, %v10059_v36  ;;  %7338 = vmatprep.mubr.bf16.mxu1 %v10060_v55 }
 0x1f5   : > { %8512 = vmatmul.mubr.msk.bf16.gmra.mrb[60].mxu0 %vm8507_vm3, %v10061_v57  ;;  %7339 = vmatmul.mubr.bf16.gmra.mrb[28].mxu1 %v10062_v15  ;;  %v9649_v57 = vld [vmem:[%s9939_s5] ss:$0 sm:$0xff] }
 0x1f6   : > { %7710 = vmatprep.mubr.bf16.mxu0 %v9004_v59  ;;  %7342 = vmatprep.mubr.bf16.mxu1 %v10063_v19  ;;  %v10065_v59 = vld [vmem:[#allocation18_spill] sm:$0xff] }
 0x1fd   : > { %7711 = vmatmul.mubr.bf16.vlgmr.msra.gmra.mrb[0].mxu0 %v9017_v10  ;;  %7343 = vmatmul.mubr.bf16.gmra.mrb[32].mxu1 %v9021_v24  ;;  %v10066_v10 = vld [vmem:[#allocation19_spill] sm:$0xff]  ;;  %v10067_v24 = vld [vmem:[#allocation20_spill] sm:$0xff] }
 0x1fe   : > { %7714 = vmatprep.mubr.bf16.mxu0 %v9023_v28  ;;  %7346 = vmatprep.mubr.bf16.mxu1 %v9025_v29  ;;  %v10068_v28 = vld [vmem:[#allocation21_spill] sm:$0xff]  ;;  %v10069_v29 = vld [vmem:[#allocation23_spill] sm:$0xff] }
 0x205   : > { %7715 = vmatmul.mubr.bf16.gmra.mrb[4].mxu0 %v9037_v60  ;;  %7347 = vmatmul.mubr.bf16.gmra.mrb[36].mxu1 %v9039_v61  ;;  %v10070_v60 = vld [vmem:[#allocation25_spill] sm:$0xff]  ;;  %v10071_v61 = vld [vmem:[#allocation27_spill] sm:$0xff] }
 0x206   : > { %7718 = vmatprep.mubr.bf16.mxu0 %v9041_v63  ;;  %7350 = vmatprep.mubr.bf16.mxu1 %v9043_v2  ;;  %v10072_v63 = vld [vmem:[#allocation29_spill] sm:$0xff]  ;;  %v10073_v2 = vld [vmem:[#allocation30_spill] sm:$0xff] }
 0x20d   : > { %7719 = vmatmul.mubr.bf16.gmra.mrb[8].mxu0 %v10039_v50  ;;  %7351 = vmatmul.mubr.bf16.gmra.mrb[40].mxu1 %v9057_v21  ;;  %v10074_v21 = vld [vmem:[#allocation15_spill] sm:$0xff] }
 0x20e   : > { %7722 = vmatprep.mubr.bf16.mxu0 %v10041_v26  ;;  %7354 = vmatprep.mubr.bf16.mxu1 %v10064_v37 }
 0x215   : > { %7723 = vmatmul.mubr.bf16.gmra.mrb[12].mxu0 %v10065_v59  ;;  %7355 = vmatmul.mubr.bf16.gmra.mrb[44].mxu1 %v10066_v10 }
 0x216   : > { %7726 = vmatprep.mubr.bf16.mxu0 %v10067_v24  ;;  %7358 = vmatprep.mubr.bf16.mxu1 %v10068_v28 }
 0x21d   : > { %7727 = vmatmul.mubr.bf16.gmra.mrb[16].mxu0 %v10045_v40  ;;  %7359 = vmatmul.mubr.bf16.gmra.mrb[48].mxu1 %v10069_v29  ;;  %v10075_v40 = vld [vmem:[#allocation33_spill] sm:$0xff] }
 0x21e   : > { %7730 = vmatprep.mubr.bf16.mxu0 %v10046_v17  ;;  %7362 = vmatprep.mubr.bf16.mxu1 %v10070_v60  ;;  %v10077_v17 = vld [vmem:[#allocation42_spill] sm:$0xff] }
 0x225   : > { %7731 = vmatmul.mubr.bf16.gmra.mrb[20].mxu0 %v10047_v39  ;;  %7363 = vmatmul.mubr.bf16.gmra.mrb[52].mxu1 %v10071_v61 }
 0x226   : > { %7734 = vmatprep.mubr.bf16.mxu0 %v10048_v33  ;;  %7366 = vmatprep.mubr.bf16.mxu1 %v10072_v63  ;;  %v963_v33 = vld [vmem:[#allocation2 + $0x339] sm:$0xff] }
 0x22d   : > { %7735 = vmatmul.mubr.bf16.gmra.mrb[24].mxu0 %v9112_v3  ;;  %7367 = vmatmul.mubr.bf16.gmra.mrb[56].mxu1 %v10073_v2 }
 0x22e   : > { %7738 = vmatprep.mubr.bf16.mxu0 %v9116_v22  ;;  %7370 = vmatprep.mubr.bf16.mxu1 %v10074_v21  ;;  %v965_v22 = vld [vmem:[#allocation2 + $0x349] sm:$0xff] }
 0x235   : > { %7739 = vmatmul.mubr.bf16.gmra.mrb[28].mxu0 %v9121_v42  ;;  %7371 = vmatmul.mubr.bf16.gmra.mrb[60].mxu1 %v9403_v8  ;;  %v10076_v8 = vld [vmem:[#allocation41_spill] sm:$0xff]  ;;  %v964_v42 = vld [vmem:[#allocation2 + $0x341] sm:$0xff] }
 0x236   : > { %7742 = vmatprep.mubr.bf16.mxu0 %v9123_v45  ;;  %7422 = vmatprep.mubr.bf16.mxu1 %v9250_v47  ;;  %v1001_v3 = vpack.c.bf16 %v964_v42, %v963_v33  ;;  %v966_v45 = vld [vmem:[#allocation2 + $0x351] sm:$0xff] }
 0x23d   : > { %7743 = vmatmul.mubr.bf16.gmra.mrb[32].mxu0 %v9139_v44  ;;  %7423 = vmatmul.mubr.bf16.vlgmr.msra.gmra.mrb[32].mxu1 %v9264_v11  ;;  %v1002_v44 = vpack.c.bf16 %v966_v45, %v965_v22 }
 0x23e   : > { %7746 = vmatprep.mubr.bf16.mxu0 %v10049_v58  ;;  %7426 = vmatprep.mubr.bf16.mxu1 %v9267_v16 }
 0x245   : > { %7747 = vmatmul.mubr.bf16.gmra.mrb[36].mxu0 %v10050_v48  ;;  %7427 = vmatmul.mubr.bf16.gmra.mrb[36].mxu1 %v9280_v9 }
 0x246   : > { %7750 = vmatprep.mubr.bf16.mxu0 %v10075_v40  ;;  %7430 = vmatprep.mubr.bf16.mxu1 %v9283_v18 }
 0x24d   : > { %7751 = vmatmul.mubr.bf16.gmra.mrb[40].mxu0 %v9176_v32  ;;  %7431 = vmatmul.mubr.bf16.gmra.mrb[40].mxu1 %v9296_v14 }
 0x24e   : > { %7754 = vmatprep.mubr.bf16.mxu0 %v10052_v25  ;;  %7434 = vmatprep.mubr.bf16.mxu1 %v9299_v62 }
 0x255   : > { %7755 = vmatmul.mubr.bf16.gmra.mrb[44].mxu0 %v10053_v53  ;;  %7435 = vmatmul.mubr.bf16.gmra.mrb[44].mxu1 %v9314_v34 }
 0x256   : > { %7758 = vmatprep.mubr.bf16.mxu0 %v10054_v13  ;;  %7438 = vmatprep.mubr.bf16.mxu1 %v9317_v52 }
 0x25d   : > { %7759 = vmatmul.mubr.bf16.gmra.mrb[48].mxu0 %v10055_v54  ;;  %7439 = vmatmul.mubr.bf16.gmra.mrb[48].mxu1 %v9325_v56 }
 0x25e   : > { %7762 = vmatprep.mubr.bf16.mxu0 %v10056_v38  ;;  %7442 = vmatprep.mubr.bf16.mxu1 %v9328_v35 }
 0x265   : > { %7763 = vmatmul.mubr.bf16.gmra.mrb[52].mxu0 %v9221_v41  ;;  %7443 = vmatmul.mubr.bf16.gmra.mrb[52].mxu1 %v9335_v4 }
 0x266   : > { %7766 = vmatprep.mubr.bf16.mxu0 %v10076_v8  ;;  %7446 = vmatprep.mubr.bf16.mxu1 %v9338_v46 }
 0x26d   : > { %7767 = vmatmul.mubr.bf16.gmra.mrb[56].mxu0 %v10077_v17  ;;  %7447 = vmatmul.mubr.bf16.gmra.mrb[56].mxu1 %v9345_v23 }
 0x26e   : > { %7770 = vmatprep.mubr.bf16.mxu0 %v1001_v3  ;;  %7450 = vmatprep.mubr.bf16.mxu1 %v9508_v5 }
 0x275   : > { %7771 = vmatmul.mubr.bf16.gmra.mrb[60].mxu0 %v1002_v44  ;;  %7451 = vmatmul.mubr.bf16.gmra.mrb[60].mxu1 %v9515_v30 }
 0x290   : > { %v7312_v32 = vpop.f32.mrb[0].mxu1 }
 0x291   : > { %v2611_v41 = vpop.f32.mrb[1].mxu1 }
 0x292   : > { %v7313_v31 = vpop.f32.mrb[2].mxu1 }
 0x293   : > { %v2614_v47 = vpop.f32.mrb[3].mxu1 }
 0x298   : > { %v7316_v11 = vpop.f32.mrb[4].mxu1 }
 0x299   : > { %v2627_v16 = vpop.f32.mrb[5].mxu1 }
 0x29a   : > { %v7317_v9 = vpop.f32.mrb[6].mxu1 }
 0x29b   : > { %v9588_v18 = vpop.f32.mrb[7].mxu1 }
 0x2a0   : > { %v9590_v14 = vpop.f32.mrb[8].mxu1 }
 0x2a1   : > { %v9592_v23 = vpop.f32.mrb[9].mxu1 }
 0x2a2   : > { %v9594_v62 = vpop.f32.mrb[10].mxu1 }
 0x2a3   : > { %v9596_v34 = vpop.f32.mrb[11].mxu1 }
 0x2a8   : > { %v9598_v52 = vpop.f32.mrb[12].mxu1 }
 0x2a9   : > { %v9600_v56 = vpop.f32.mrb[13].mxu1 }
 0x2aa   : > { %v9602_v35 = vpop.f32.mrb[14].mxu1 }
 0x2ab   : > { %v9604_v4 = vpop.f32.mrb[15].mxu1 }
 0x2b0   : > { %v9606_v46 = vpop.f32.mrb[16].mxu1 }
 0x2b1   : > { %v9608_v50 = vpop.f32.mrb[17].mxu1 }
 0x2b2   : > { %v9610_v26 = vpop.f32.mrb[18].mxu1 }
 0x2b3   : > { %v9612_v39 = vpop.f32.mrb[19].mxu1 }
 0x2b8   : > { %v9614_v58 = vpop.f32.mrb[20].mxu1 }
 0x2b9   : > { %v9616_v48 = vpop.f32.mrb[21].mxu1 }
 0x2ba   : > { %v9618_v25 = vpop.f32.mrb[22].mxu1 }
 0x2bb   : > { %v9620_v53 = vpop.f32.mrb[23].mxu1 }
 0x2c0   : > { %v9622_v12 = vpop.f32.mrb[24].mxu1 }
 0x2c1   : > { %v9624_v13 = vpop.f32.mrb[25].mxu1 }
 0x2c2   : > { %v9626_v54 = vpop.f32.mrb[26].mxu1 }
 0x2c3   : > { %v9628_v38 = vpop.f32.mrb[27].mxu1 }
 0x2c8   : > { %v9630_v7 = vpop.f32.mrb[28].mxu1 }
 0x2c9   : > { %v9632_v6 = vpop.f32.mrb[29].mxu1 }
 0x2ca   : > { %v9634_v43 = vpop.f32.mrb[30].mxu1 }
 0x2cb   : > { %v9636_v1 = vpop.f32.mrb[31].mxu1 }
 0x2d0   : > { %v7712_v27 = vpop.f32.mrb[0].mxu0 }
 0x2d1   : > { %v7790_v20 = vadd.f32 %v7712_v27, %v7312_v32  ;;  %v5341_v49 = vpop.f32.mrb[1].mxu0 }
 0x2d2   : > { %v7791_v0 = vadd.f32 %v5341_v49, %v2611_v41  ;;  %v7713_v5 = vpop.f32.mrb[2].mxu0 }
 0x2d3   : > { %v5854_v30 = vmax.f32 %v7790_v20, 0.0  ;;  %v7792_v36 = vadd.f32 %v7713_v5, %v7313_v31  ;;  %v5344_v55 = vpop.f32.mrb[3].mxu0 }
 0x2d4   : > { %v5852_v15 = vmax.f32 %v7791_v0, 0.0  ;;  %v7793_v19 = vadd.f32 %v5344_v55, %v2614_v47 }
 0x2d5   : > { %v5925_v37 = vmul.f32 %v9642_v51, %v5854_v30  ;;  %v5855_v59 = vmax.f32 %v7792_v36, 0.0 }
 0x2d6   : > { %v5923_v10 = vmul.f32 %v9642_v51, %v5852_v15  ;;  %v5853_v24 = vmax.f32 %v7793_v19, 0.0 }
 0x2d7   : > { %v5996_v28 = vadd.f32 %v9649_v57, %v5925_v37  ;;  %v5926_v29 = vmul.f32 %v9642_v51, %v5855_v59 }
 0x2d8   : > { %v5994_v60 = vadd.f32 %v9649_v57, %v5923_v10  ;;  %v5924_v61 = vmul.f32 %v9642_v51, %v5853_v24  ;;  %v7716_v63 = vpop.f32.mrb[4].mxu0 }
 0x2d9   : > { %6060 = vst [vmem:[%s9657_s19 + $0x10] sm:$0xff] %v5996_v28  ;;  %v5997_v2 = vadd.f32 %v9649_v57, %v5926_v29  ;;  %v7794_v21 = vadd.f32 %v7716_v63, %v7316_v11  ;;  %v5357_v40 = vpop.f32.mrb[5].mxu0 }
 0x2da   : > { %6058 = vst [vmem:[%s9657_s19] sm:$0xff] %v5994_v60  ;;  %v5995_v8 = vadd.f32 %v9649_v57, %v5924_v61  ;;  %v7795_v33 = vadd.f32 %v5357_v40, %v2627_v16  ;;  %v7717_v42 = vpop.f32.mrb[6].mxu0 }
 0x2db   : > { %6061 = vst [vmem:[%s9657_s19 + $0x18] sm:$0xff] %v5997_v2  ;;  %v5858_v3 = vmax.f32 %v7794_v21, 0.0  ;;  %v7796_v17 = vadd.f32 %v7717_v42, %v7317_v9  ;;  %v5360_v22 = vpop.f32.mrb[7].mxu0 }
 0x2dc   : > { %6059 = vst [vmem:[%s9657_s19 + $0x8] sm:$0xff] %v5995_v8  ;;  %v5856_v45 = vmax.f32 %v7795_v33, 0.0  ;;  %v7797_v44 = vadd.f32 %v5360_v22, %v9588_v18 }
 0x2dd   : > { %v5929_v32 = vmul.f32 %v9642_v51, %v5858_v3  ;;  %v5859_v41 = vmax.f32 %v7796_v17, 0.0 }
 0x2de   : > { %v5927_v31 = vmul.f32 %v9642_v51, %v5856_v45  ;;  %v5857_v47 = vmax.f32 %v7797_v44, 0.0 }
 0x2df   : > { %v6000_v11 = vadd.f32 %v9649_v57, %v5929_v32  ;;  %v5930_v16 = vmul.f32 %v9642_v51, %v5859_v41 }
 0x2e0   : > { %v5998_v9 = vadd.f32 %v9649_v57, %v5927_v31  ;;  %v5928_v27 = vmul.f32 %v9642_v51, %v5857_v47  ;;  %v7720_v20 = vpop.f32.mrb[8].mxu0 }
 0x2e1   : > { %6064 = vst [vmem:[%s9657_s19 + $0x30] sm:$0xff] %v6000_v11  ;;  %v6001_v18 = vadd.f32 %v9649_v57, %v5930_v16  ;;  %v7798_v49 = vadd.f32 %v7720_v20, %v9590_v14  ;;  %v5373_v0 = vpop.f32.mrb[9].mxu0 }
 0x2e2   : > { %6062 = vst [vmem:[%s9657_s19 + $0x20] sm:$0xff] %v5998_v9  ;;  %v5999_v5 = vadd.f32 %v9649_v57, %v5928_v27  ;;  %v7799_v30 = vadd.f32 %v5373_v0, %v9592_v23  ;;  %v7721_v36 = vpop.f32.mrb[10].mxu0 }
 0x2e3   : > { %6065 = vst [vmem:[%s9657_s19 + $0x38] sm:$0xff] %v6001_v18  ;;  %v5862_v55 = vmax.f32 %v7798_v49, 0.0  ;;  %v7800_v15 = vadd.f32 %v7721_v36, %v9594_v62  ;;  %v5376_v19 = vpop.f32.mrb[11].mxu0 }
 0x2e4   : > { %6063 = vst [vmem:[%s9657_s19 + $0x28] sm:$0xff] %v5999_v5  ;;  %v5860_v37 = vmax.f32 %v7799_v30, 0.0  ;;  %v7801_v59 = vadd.f32 %v5376_v19, %v9596_v34 }
 0x2e5   : > { %v5933_v14 = vmul.f32 %v9642_v51, %v5862_v55  ;;  %v5863_v10 = vmax.f32 %v7800_v15, 0.0 }
 0x2e6   : > { %v5931_v24 = vmul.f32 %v9642_v51, %v5860_v37  ;;  %v5861_v28 = vmax.f32 %v7801_v59, 0.0 }
 0x2e7   : > { %v6004_v23 = vadd.f32 %v9649_v57, %v5933_v14  ;;  %v5934_v29 = vmul.f32 %v9642_v51, %v5863_v10 }
 0x2e8   : > { %v6002_v62 = vadd.f32 %v9649_v57, %v5931_v24  ;;  %v5932_v60 = vmul.f32 %v9642_v51, %v5861_v28  ;;  %v7724_v61 = vpop.f32.mrb[12].mxu0 }
 0x2e9   : > { %6068 = vst [vmem:[%s9657_s19 + $0x50] sm:$0xff] %v6004_v23  ;;  %v6005_v34 = vadd.f32 %v9649_v57, %v5934_v29  ;;  %v7802_v63 = vadd.f32 %v7724_v61, %v9598_v52  ;;  %v5389_v2 = vpop.f32.mrb[13].mxu0 }
 0x2ea   : > { %6066 = vst [vmem:[%s9657_s19 + $0x40] sm:$0xff] %v6002_v62  ;;  %v6003_v21 = vadd.f32 %v9649_v57, %v5932_v60  ;;  %v7803_v40 = vadd.f32 %v5389_v2, %v9600_v56  ;;  %v7725_v8 = vpop.f32.mrb[14].mxu0 }
 0x2eb   : > { %6069 = vst [vmem:[%s9657_s19 + $0x58] sm:$0xff] %v6005_v34  ;;  %v5866_v33 = vmax.f32 %v7802_v63, 0.0  ;;  %v7804_v42 = vadd.f32 %v7725_v8, %v9602_v35  ;;  %v5392_v3 = vpop.f32.mrb[15].mxu0 }
 0x2ec   : > { %6067 = vst [vmem:[%s9657_s19 + $0x48] sm:$0xff] %v6003_v21  ;;  %v5864_v17 = vmax.f32 %v7803_v40, 0.0  ;;  %v7805_v22 = vadd.f32 %v5392_v3, %v9604_v4 }
 0x2ed   : > { %v5937_v52 = vmul.f32 %v9642_v51, %v5866_v33  ;;  %v5867_v45 = vmax.f32 %v7804_v42, 0.0 }
 0x2ee   : > { %v5935_v44 = vmul.f32 %v9642_v51, %v5864_v17  ;;  %v5865_v32 = vmax.f32 %v7805_v22, 0.0 }
 0x2ef   : > { %v6008_v56 = vadd.f32 %v9649_v57, %v5937_v52  ;;  %v5938_v41 = vmul.f32 %v9642_v51, %v5867_v45 }
 0x2f0   : > { %v6006_v35 = vadd.f32 %v9649_v57, %v5935_v44  ;;  %v5936_v31 = vmul.f32 %v9642_v51, %v5865_v32  ;;  %v7728_v47 = vpop.f32.mrb[16].mxu0 }
 0x2f1   : > { %6072 = vst [vmem:[%s9657_s19 + $0x70] sm:$0xff] %v6008_v56  ;;  %v6009_v4 = vadd.f32 %v9649_v57, %v5938_v41  ;;  %v7806_v11 = vadd.f32 %v7728_v47, %v9606_v46  ;;  %v5405_v16 = vpop.f32.mrb[17].mxu0 }
 0x2f2   : > { %6070 = vst [vmem:[%s9657_s19 + $0x60] sm:$0xff] %v6006_v35  ;;  %v6007_v9 = vadd.f32 %v9649_v57, %v5936_v31  ;;  %v7807_v27 = vadd.f32 %v5405_v16, %v9608_v50  ;;  %v7729_v20 = vpop.f32.mrb[18].mxu0 }
 0x2f3   : > { %6073 = vst [vmem:[%s9657_s19 + $0x78] sm:$0xff] %v6009_v4  ;;  %v5870_v18 = vmax.f32 %v7806_v11, 0.0  ;;  %v7808_v49 = vadd.f32 %v7729_v20, %v9610_v26  ;;  %v5408_v0 = vpop.f32.mrb[19].mxu0 }
 0x2f4   : > { %6071 = vst [vmem:[%s9657_s19 + $0x68] sm:$0xff] %v6007_v9  ;;  %v5868_v5 = vmax.f32 %v7807_v27, 0.0  ;;  %v7809_v30 = vadd.f32 %v5408_v0, %v9612_v39 }
 0x2f5   : > { %v5941_v46 = vmul.f32 %v9642_v51, %v5870_v18  ;;  %v5871_v36 = vmax.f32 %v7808_v49, 0.0 }
 0x2f6   : > { %v5939_v55 = vmul.f32 %v9642_v51, %v5868_v5  ;;  %v5869_v15 = vmax.f32 %v7809_v30, 0.0 }
 0x2f7   : > { %v6012_v50 = vadd.f32 %v9649_v57, %v5941_v46  ;;  %v5942_v19 = vmul.f32 %v9642_v51, %v5871_v36 }
 0x2f8   : > { %v6010_v26 = vadd.f32 %v9649_v57, %v5939_v55  ;;  %v5940_v37 = vmul.f32 %v9642_v51, %v5869_v15  ;;  %v7732_v59 = vpop.f32.mrb[20].mxu0 }
 0x2f9   : > { %6076 = vst [vmem:[%s9657_s19 + $0x90] sm:$0xff] %v6012_v50  ;;  %v6013_v39 = vadd.f32 %v9649_v57, %v5942_v19  ;;  %v7810_v14 = vadd.f32 %v7732_v59, %v9614_v58  ;;  %v5421_v10 = vpop.f32.mrb[21].mxu0 }
 0x2fa   : > { %6074 = vst [vmem:[%s9657_s19 + $0x80] sm:$0xff] %v6010_v26  ;;  %v6011_v24 = vadd.f32 %v9649_v57, %v5940_v37  ;;  %v7811_v28 = vadd.f32 %v5421_v10, %v9616_v48  ;;  %v7733_v23 = vpop.f32.mrb[22].mxu0 }
 0x2fb   : > { %6077 = vst [vmem:[%s9657_s19 + $0x98] sm:$0xff] %v6013_v39  ;;  %v5874_v29 = vmax.f32 %v7810_v14, 0.0  ;;  %v7812_v62 = vadd.f32 %v7733_v23, %v9618_v25  ;;  %v5424_v60 = vpop.f32.mrb[23].mxu0 }
 0x2fc   : > { %6075 = vst [vmem:[%s9657_s19 + $0x88] sm:$0xff] %v6011_v24  ;;  %v5872_v61 = vmax.f32 %v7811_v28, 0.0  ;;  %v7813_v34 = vadd.f32 %v5424_v60, %v9620_v53 }
 0x2fd   : > { %v5945_v58 = vmul.f32 %v9642_v51, %v5874_v29  ;;  %v5875_v63 = vmax.f32 %v7812_v62, 0.0 }
 0x2fe   : > { %v5943_v2 = vmul.f32 %v9642_v51, %v5872_v61  ;;  %v5873_v21 = vmax.f32 %v7813_v34, 0.0 }
 0x2ff   : > { %v6016_v48 = vadd.f32 %v9649_v57, %v5945_v58  ;;  %v5946_v40 = vmul.f32 %v9642_v51, %v5875_v63 }
 0x300   : > { %v6014_v25 = vadd.f32 %v9649_v57, %v5943_v2  ;;  %v5944_v8 = vmul.f32 %v9642_v51, %v5873_v21  ;;  %v7736_v33 = vpop.f32.mrb[24].mxu0 }
 0x301   : > { %6080 = vst [vmem:[%s9657_s19 + $0xb0] sm:$0xff] %v6016_v48  ;;  %v6017_v53 = vadd.f32 %v9649_v57, %v5946_v40  ;;  %v7814_v42 = vadd.f32 %v7736_v33, %v9622_v12  ;;  %v5437_v3 = vpop.f32.mrb[25].mxu0 }
 0x302   : > { %6078 = vst [vmem:[%s9657_s19 + $0xa0] sm:$0xff] %v6014_v25  ;;  %v6015_v17 = vadd.f32 %v9649_v57, %v5944_v8  ;;  %v7815_v22 = vadd.f32 %v5437_v3, %v9624_v13  ;;  %v7737_v52 = vpop.f32.mrb[26].mxu0 }
 0x303   : > { %6081 = vst [vmem:[%s9657_s19 + $0xb8] sm:$0xff] %v6017_v53  ;;  %v5878_v45 = vmax.f32 %v7814_v42, 0.0  ;;  %v7816_v44 = vadd.f32 %v7737_v52, %v9626_v54  ;;  %v5440_v32 = vpop.f32.mrb[27].mxu0 }
 0x304   : > { %6079 = vst [vmem:[%s9657_s19 + $0xa8] sm:$0xff] %v6015_v17  ;;  %v5876_v56 = vmax.f32 %v7815_v22, 0.0  ;;  %v7817_v41 = vadd.f32 %v5440_v32, %v9628_v38 }
 0x305   : > { %v5949_v12 = vmul.f32 %v9642_v51, %v5878_v45  ;;  %v5879_v35 = vmax.f32 %v7816_v44, 0.0 }
 0x306   : > { %v5947_v31 = vmul.f32 %v9642_v51, %v5876_v56  ;;  %v5877_v47 = vmax.f32 %v7817_v41, 0.0 }
 0x307   : > { %v6020_v13 = vadd.f32 %v9649_v57, %v5949_v12  ;;  %v5950_v4 = vmul.f32 %v9642_v51, %v5879_v35 }
 0x308   : > { %v6018_v54 = vadd.f32 %v9649_v57, %v5947_v31  ;;  %v5948_v11 = vmul.f32 %v9642_v51, %v5877_v47  ;;  %v7740_v16 = vpop.f32.mrb[28].mxu0 }
 0x309   : > { %6084 = vst [vmem:[%s9657_s19 + $0xd0] sm:$0xff] %v6020_v13  ;;  %v6021_v38 = vadd.f32 %v9649_v57, %v5950_v4  ;;  %v7818_v9 = vadd.f32 %v7740_v16, %v9630_v7  ;;  %v5453_v27 = vpop.f32.mrb[29].mxu0 }
 0x30a   : > { %6082 = vst [vmem:[%s9657_s19 + $0xc0] sm:$0xff] %v6018_v54  ;;  %v6019_v20 = vadd.f32 %v9649_v57, %v5948_v11  ;;  %v7819_v18 = vadd.f32 %v5453_v27, %v9632_v6  ;;  %v7741_v49 = vpop.f32.mrb[30].mxu0 }
 0x30b   : > { %6085 = vst [vmem:[%s9657_s19 + $0xd8] sm:$0xff] %v6021_v38  ;;  %v5882_v0 = vmax.f32 %v7818_v9, 0.0  ;;  %v7820_v5 = vadd.f32 %v7741_v49, %v9634_v43  ;;  %v5456_v30 = vpop.f32.mrb[31].mxu0 }
 0x30c   : > { %6083 = vst [vmem:[%s9657_s19 + $0xc8] sm:$0xff] %v6019_v20  ;;  %v5880_v46 = vmax.f32 %v7819_v18, 0.0  ;;  %v7821_v36 = vadd.f32 %v5456_v30, %v9636_v1 }
 0x30d   : > { %v5953_v7 = vmul.f32 %v9642_v51, %v5882_v0  ;;  %v5883_v55 = vmax.f32 %v7820_v5, 0.0 }
 0x30e   : > { %v5951_v15 = vmul.f32 %v9642_v51, %v5880_v46  ;;  %v5881_v50 = vmax.f32 %v7821_v36, 0.0 }
 0x30f   : > { %v6024_v6 = vadd.f32 %v9649_v57, %v5953_v7  ;;  %v5954_v19 = vmul.f32 %v9642_v51, %v5883_v55 }
 0x310   : > { %v6022_v26 = vadd.f32 %v9649_v57, %v5951_v15  ;;  %v5952_v43 = vmul.f32 %v9642_v51, %v5881_v50  ;;  %v7744_v37 = vpop.f32.mrb[32].mxu0  ;;  %v7424_v59 = vpop.f32.mrb[32].mxu1 }
 0x311   : > { %6088 = vst [vmem:[%s9657_s19 + $0xf0] sm:$0xff] %v6024_v6  ;;  %v6025_v1 = vadd.f32 %v9649_v57, %v5954_v19  ;;  %v5469_v39 = vpop.f32.mrb[33].mxu0  ;;  %v7822_v10 = vadd.f32 %v7744_v37, %v7424_v59  ;;  %v3285_v24 = vpop.f32.mrb[33].mxu1 }
 0x312   : > { %6086 = vst [vmem:[%s9657_s19 + $0xe0] sm:$0xff] %v6022_v26  ;;  %v6023_v14 = vadd.f32 %v9649_v57, %v5952_v43  ;;  %v7745_v28 = vpop.f32.mrb[34].mxu0  ;;  %v7823_v23 = vadd.f32 %v5469_v39, %v3285_v24  ;;  %v7425_v29 = vpop.f32.mrb[34].mxu1 }
 0x313   : > { %6089 = vst [vmem:[%s9657_s19 + $0xf8] sm:$0xff] %v6025_v1  ;;  %v5472_v62 = vpop.f32.mrb[35].mxu0  ;;  %v5886_v60 = vmax.f32 %v7822_v10, 0.0  ;;  %v7824_v61 = vadd.f32 %v7745_v28, %v7425_v29  ;;  %v3288_v34 = vpop.f32.mrb[35].mxu1 }
 0x314   : > { %6087 = vst [vmem:[%s9657_s19 + $0xe8] sm:$0xff] %v6023_v14  ;;  %v5884_v58 = vmax.f32 %v7823_v23, 0.0  ;;  %v7825_v63 = vadd.f32 %v5472_v62, %v3288_v34 }
 0x315   : > { %v5957_v2 = vmul.f32 %v9642_v51, %v5886_v60  ;;  %v5887_v21 = vmax.f32 %v7824_v61, 0.0 }
 0x316   : > { %v5955_v48 = vmul.f32 %v9642_v51, %v5884_v58  ;;  %v5885_v40 = vmax.f32 %v7825_v63, 0.0 }
 0x317   : > { %v6028_v25 = vadd.f32 %v9649_v57, %v5957_v2  ;;  %v5958_v8 = vmul.f32 %v9642_v51, %v5887_v21 }
 0x318   : > { %v7748_v33 = vpop.f32.mrb[36].mxu0  ;;  %v6026_v53 = vadd.f32 %v9649_v57, %v5955_v48  ;;  %v5956_v42 = vmul.f32 %v9642_v51, %v5885_v40  ;;  %v7428_v3 = vpop.f32.mrb[36].mxu1 }
 0x319   : > { %v5485_v17 = vpop.f32.mrb[37].mxu0  ;;  %6092 = vst [vmem:[%s9657_s19 + $0x110] sm:$0xff] %v6028_v25  ;;  %v6029_v22 = vadd.f32 %v9649_v57, %v5958_v8  ;;  %v7826_v52 = vadd.f32 %v7748_v33, %v7428_v3  ;;  %v3301_v45 = vpop.f32.mrb[37].mxu1 }
 0x31a   : > { %v7749_v44 = vpop.f32.mrb[38].mxu0  ;;  %6090 = vst [vmem:[%s9657_s19 + $0x100] sm:$0xff] %v6026_v53  ;;  %v6027_v32 = vadd.f32 %v9649_v57, %v5956_v42  ;;  %v7827_v56 = vadd.f32 %v5485_v17, %v3301_v45  ;;  %v7429_v41 = vpop.f32.mrb[38].mxu1 }
 0x31b   : > { %v5488_v12 = vpop.f32.mrb[39].mxu0  ;;  %6093 = vst [vmem:[%s9657_s19 + $0x118] sm:$0xff] %v6029_v22  ;;  %v5890_v35 = vmax.f32 %v7826_v52, 0.0  ;;  %v7828_v31 = vadd.f32 %v7749_v44, %v7429_v41  ;;  %v3304_v47 = vpop.f32.mrb[39].mxu1 }
 0x31c   : > { %6091 = vst [vmem:[%s9657_s19 + $0x108] sm:$0xff] %v6027_v32  ;;  %v5888_v13 = vmax.f32 %v7827_v56, 0.0  ;;  %v7829_v4 = vadd.f32 %v5488_v12, %v3304_v47 }
 0x31d   : > { %v5961_v54 = vmul.f32 %v9642_v51, %v5890_v35  ;;  %v5891_v11 = vmax.f32 %v7828_v31, 0.0 }
 0x31e   : > { %v5959_v16 = vmul.f32 %v9642_v51, %v5888_v13  ;;  %v5889_v38 = vmax.f32 %v7829_v4, 0.0 }
 0x31f   : > { %v6032_v9 = vadd.f32 %v9649_v57, %v5961_v54  ;;  %v5962_v27 = vmul.f32 %v9642_v51, %v5891_v11 }
 0x320   : > { %v7752_v20 = vpop.f32.mrb[40].mxu0  ;;  %v6030_v18 = vadd.f32 %v9649_v57, %v5959_v16  ;;  %v5960_v49 = vmul.f32 %v9642_v51, %v5889_v38  ;;  %v7432_v0 = vpop.f32.mrb[40].mxu1 }
 0x321   : > { %v5501_v5 = vpop.f32.mrb[41].mxu0  ;;  %6096 = vst [vmem:[%s9657_s19 + $0x130] sm:$0xff] %v6032_v9  ;;  %v6033_v30 = vadd.f32 %v9649_v57, %v5962_v27  ;;  %v7830_v46 = vadd.f32 %v7752_v20, %v7432_v0  ;;  %v3317_v36 = vpop.f32.mrb[41].mxu1 }
 0x322   : > { %v7753_v7 = vpop.f32.mrb[42].mxu0  ;;  %6094 = vst [vmem:[%s9657_s19 + $0x120] sm:$0xff] %v6030_v18  ;;  %v6031_v55 = vadd.f32 %v9649_v57, %v5960_v49  ;;  %v7831_v15 = vadd.f32 %v5501_v5, %v3317_v36  ;;  %v7433_v50 = vpop.f32.mrb[42].mxu1 }
 0x323   : > { %v5504_v6 = vpop.f32.mrb[43].mxu0  ;;  %6097 = vst [vmem:[%s9657_s19 + $0x138] sm:$0xff] %v6033_v30  ;;  %v5894_v19 = vmax.f32 %v7830_v46, 0.0  ;;  %v7832_v26 = vadd.f32 %v7753_v7, %v7433_v50  ;;  %v3320_v43 = vpop.f32.mrb[43].mxu1 }
 0x324   : > { %6095 = vst [vmem:[%s9657_s19 + $0x128] sm:$0xff] %v6031_v55  ;;  %v5892_v37 = vmax.f32 %v7831_v15, 0.0  ;;  %v7833_v1 = vadd.f32 %v5504_v6, %v3320_v43 }
 0x325   : > { %v5965_v59 = vmul.f32 %v9642_v51, %v5894_v19  ;;  %v5895_v39 = vmax.f32 %v7832_v26, 0.0 }
 0x326   : > { %v5963_v14 = vmul.f32 %v9642_v51, %v5892_v37  ;;  %v5893_v10 = vmax.f32 %v7833_v1, 0.0 }
 0x327   : > { %v6036_v24 = vadd.f32 %v9649_v57, %v5965_v59  ;;  %v5966_v28 = vmul.f32 %v9642_v51, %v5895_v39 }
 0x328   : > { %v7756_v23 = vpop.f32.mrb[44].mxu0  ;;  %v6034_v29 = vadd.f32 %v9649_v57, %v5963_v14  ;;  %v5964_v62 = vmul.f32 %v9642_v51, %v5893_v10  ;;  %v7436_v60 = vpop.f32.mrb[44].mxu1 }
 0x329   : > { %v5517_v61 = vpop.f32.mrb[45].mxu0  ;;  %6100 = vst [vmem:[%s9657_s19 + $0x150] sm:$0xff] %v6036_v24  ;;  %v6037_v34 = vadd.f32 %v9649_v57, %v5966_v28  ;;  %v7834_v58 = vadd.f32 %v7756_v23, %v7436_v60  ;;  %v3333_v63 = vpop.f32.mrb[45].mxu1 }
 0x32a   : > { %v7757_v2 = vpop.f32.mrb[46].mxu0  ;;  %6098 = vst [vmem:[%s9657_s19 + $0x140] sm:$0xff] %v6034_v29  ;;  %v6035_v21 = vadd.f32 %v9649_v57, %v5964_v62  ;;  %v7835_v48 = vadd.f32 %v5517_v61, %v3333_v63  ;;  %v7437_v40 = vpop.f32.mrb[46].mxu1 }
 0x32b   : > { %v5520_v25 = vpop.f32.mrb[47].mxu0  ;;  %6101 = vst [vmem:[%s9657_s19 + $0x158] sm:$0xff] %v6037_v34  ;;  %v5898_v8 = vmax.f32 %v7834_v58, 0.0  ;;  %v7836_v33 = vadd.f32 %v7757_v2, %v7437_v40  ;;  %v3336_v53 = vpop.f32.mrb[47].mxu1 }
 0x32c   : > { %6099 = vst [vmem:[%s9657_s19 + $0x148] sm:$0xff] %v6035_v21  ;;  %v5896_v42 = vmax.f32 %v7835_v48, 0.0  ;;  %v7837_v3 = vadd.f32 %v5520_v25, %v3336_v53 }
 0x32d   : > { %v5969_v17 = vmul.f32 %v9642_v51, %v5898_v8  ;;  %v5899_v22 = vmax.f32 %v7836_v33, 0.0 }
 0x32e   : > { %v5967_v52 = vmul.f32 %v9642_v51, %v5896_v42  ;;  %v5897_v45 = vmax.f32 %v7837_v3, 0.0 }
 0x32f   : > { %v6040_v44 = vadd.f32 %v9649_v57, %v5969_v17  ;;  %v5970_v32 = vmul.f32 %v9642_v51, %v5899_v22 }
 0x330   : > { %v7760_v56 = vpop.f32.mrb[48].mxu0  ;;  %v6038_v41 = vadd.f32 %v9649_v57, %v5967_v52  ;;  %v5968_v12 = vmul.f32 %v9642_v51, %v5897_v45  ;;  %v7440_v35 = vpop.f32.mrb[48].mxu1 }
 0x331   : > { %v5533_v31 = vpop.f32.mrb[49].mxu0  ;;  %6104 = vst [vmem:[%s9657_s19 + $0x170] sm:$0xff] %v6040_v44  ;;  %v6041_v47 = vadd.f32 %v9649_v57, %v5970_v32  ;;  %v7838_v13 = vadd.f32 %v7760_v56, %v7440_v35  ;;  %v3349_v4 = vpop.f32.mrb[49].mxu1 }
 0x332   : > { %v7761_v54 = vpop.f32.mrb[50].mxu0  ;;  %6102 = vst [vmem:[%s9657_s19 + $0x160] sm:$0xff] %v6038_v41  ;;  %v6039_v11 = vadd.f32 %v9649_v57, %v5968_v12  ;;  %v7839_v16 = vadd.f32 %v5533_v31, %v3349_v4  ;;  %v7441_v38 = vpop.f32.mrb[50].mxu1 }
 0x333   : > { %v5536_v9 = vpop.f32.mrb[51].mxu0  ;;  %6105 = vst [vmem:[%s9657_s19 + $0x178] sm:$0xff] %v6041_v47  ;;  %v5902_v27 = vmax.f32 %v7838_v13, 0.0  ;;  %v7840_v20 = vadd.f32 %v7761_v54, %v7441_v38  ;;  %v3352_v18 = vpop.f32.mrb[51].mxu1 }
 0x334   : > { %6103 = vst [vmem:[%s9657_s19 + $0x168] sm:$0xff] %v6039_v11  ;;  %v5900_v49 = vmax.f32 %v7839_v16, 0.0  ;;  %v7841_v0 = vadd.f32 %v5536_v9, %v3352_v18 }
 0x335   : > { %v5973_v5 = vmul.f32 %v9642_v51, %v5902_v27  ;;  %v5903_v30 = vmax.f32 %v7840_v20, 0.0 }
 0x336   : > { %v5971_v46 = vmul.f32 %v9642_v51, %v5900_v49  ;;  %v5901_v36 = vmax.f32 %v7841_v0, 0.0 }
 0x337   : > { %v6044_v7 = vadd.f32 %v9649_v57, %v5973_v5  ;;  %v5974_v55 = vmul.f32 %v9642_v51, %v5903_v30 }
 0x338   : > { %v7764_v15 = vpop.f32.mrb[52].mxu0  ;;  %v6042_v50 = vadd.f32 %v9649_v57, %v5971_v46  ;;  %v5972_v6 = vmul.f32 %v9642_v51, %v5901_v36  ;;  %v7444_v19 = vpop.f32.mrb[52].mxu1 }
 0x339   : > { %v5549_v26 = vpop.f32.mrb[53].mxu0  ;;  %6108 = vst [vmem:[%s9657_s19 + $0x190] sm:$0xff] %v6044_v7  ;;  %v6045_v43 = vadd.f32 %v9649_v57, %v5974_v55  ;;  %v7842_v37 = vadd.f32 %v7764_v15, %v7444_v19  ;;  %v3365_v1 = vpop.f32.mrb[53].mxu1 }
 0x33a   : > { %v7765_v59 = vpop.f32.mrb[54].mxu0  ;;  %6106 = vst [vmem:[%s9657_s19 + $0x180] sm:$0xff] %v6042_v50  ;;  %v6043_v39 = vadd.f32 %v9649_v57, %v5972_v6  ;;  %v7843_v14 = vadd.f32 %v5549_v26, %v3365_v1  ;;  %v7445_v10 = vpop.f32.mrb[54].mxu1 }
 0x33b   : > { %v5552_v24 = vpop.f32.mrb[55].mxu0  ;;  %6109 = vst [vmem:[%s9657_s19 + $0x198] sm:$0xff] %v6045_v43  ;;  %v5906_v28 = vmax.f32 %v7842_v37, 0.0  ;;  %v7844_v23 = vadd.f32 %v7765_v59, %v7445_v10  ;;  %v3368_v29 = vpop.f32.mrb[55].mxu1 }
 0x33c   : > { %6107 = vst [vmem:[%s9657_s19 + $0x188] sm:$0xff] %v6043_v39  ;;  %v5904_v62 = vmax.f32 %v7843_v14, 0.0  ;;  %v7845_v60 = vadd.f32 %v5552_v24, %v3368_v29 }
 0x33d   : > { %v5977_v61 = vmul.f32 %v9642_v51, %v5906_v28  ;;  %v5907_v34 = vmax.f32 %v7844_v23, 0.0 }
 0x33e   : > { %v5975_v58 = vmul.f32 %v9642_v51, %v5904_v62  ;;  %v5905_v63 = vmax.f32 %v7845_v60, 0.0 }
 0x33f   : > { %v6048_v2 = vadd.f32 %v9649_v57, %v5977_v61  ;;  %v5978_v21 = vmul.f32 %v9642_v51, %v5907_v34 }
 0x340   : > { %v7768_v48 = vpop.f32.mrb[56].mxu0  ;;  %v6046_v40 = vadd.f32 %v9649_v57, %v5975_v58  ;;  %v5976_v25 = vmul.f32 %v9642_v51, %v5905_v63  ;;  %v7448_v8 = vpop.f32.mrb[56].mxu1 }
 0x341   : > { %v5565_v33 = vpop.f32.mrb[57].mxu0  ;;  %6112 = vst [vmem:[%s9657_s19 + $0x1b0] sm:$0xff] %v6048_v2  ;;  %v6049_v53 = vadd.f32 %v9649_v57, %v5978_v21  ;;  %v7846_v42 = vadd.f32 %v7768_v48, %v7448_v8  ;;  %v3381_v3 = vpop.f32.mrb[57].mxu1 }
 0x342   : > { %v7769_v17 = vpop.f32.mrb[58].mxu0  ;;  %6110 = vst [vmem:[%s9657_s19 + $0x1a0] sm:$0xff] %v6046_v40  ;;  %v6047_v22 = vadd.f32 %v9649_v57, %v5976_v25  ;;  %v7847_v52 = vadd.f32 %v5565_v33, %v3381_v3  ;;  %v7449_v45 = vpop.f32.mrb[58].mxu1 }
 0x343   : > { %v5568_v44 = vpop.f32.mrb[59].mxu0  ;;  %6113 = vst [vmem:[%s9657_s19 + $0x1b8] sm:$0xff] %v6049_v53  ;;  %v5910_v32 = vmax.f32 %v7846_v42, 0.0  ;;  %v7848_v56 = vadd.f32 %v7769_v17, %v7449_v45  ;;  %v3384_v41 = vpop.f32.mrb[59].mxu1 }
 0x344   : > { %6111 = vst [vmem:[%s9657_s19 + $0x1a8] sm:$0xff] %v6047_v22  ;;  %v5908_v12 = vmax.f32 %v7847_v52, 0.0  ;;  %v7849_v35 = vadd.f32 %v5568_v44, %v3384_v41 }
 0x345   : > { %v5981_v31 = vmul.f32 %v9642_v51, %v5910_v32  ;;  %v5911_v47 = vmax.f32 %v7848_v56, 0.0 }
 0x346   : > { %v5979_v13 = vmul.f32 %v9642_v51, %v5908_v12  ;;  %v5909_v4 = vmax.f32 %v7849_v35, 0.0 }
 0x347   : > { %v6052_v54 = vadd.f32 %v9649_v57, %v5981_v31  ;;  %v5982_v11 = vmul.f32 %v9642_v51, %v5911_v47 }
 0x348   : > { %v7772_v16 = vpop.f32.mrb[60].mxu0  ;;  %v6050_v38 = vadd.f32 %v9649_v57, %v5979_v13  ;;  %v5980_v9 = vmul.f32 %v9642_v51, %v5909_v4  ;;  %v7452_v27 = vpop.f32.mrb[60].mxu1 }
 0x349   : > { %v5581_v20 = vpop.f32.mrb[61].mxu0  ;;  %6116 = vst [vmem:[%s9657_s19 + $0x1d0] sm:$0xff] %v6052_v54  ;;  %v6053_v18 = vadd.f32 %v9649_v57, %v5982_v11  ;;  %v7850_v49 = vadd.f32 %v7772_v16, %v7452_v27  ;;  %v3397_v0 = vpop.f32.mrb[61].mxu1 }
 0x34a   : > { %v7773_v5 = vpop.f32.mrb[62].mxu0  ;;  %6114 = vst [vmem:[%s9657_s19 + $0x1c0] sm:$0xff] %v6050_v38  ;;  %v6051_v30 = vadd.f32 %v9649_v57, %v5980_v9  ;;  %v7851_v46 = vadd.f32 %v5581_v20, %v3397_v0  ;;  %v7453_v36 = vpop.f32.mrb[62].mxu1 }
 0x34b   : > { %v5584_v7 = vpop.f32.mrb[63].mxu0  ;;  %6117 = vst [vmem:[%s9657_s19 + $0x1d8] sm:$0xff] %v6053_v18  ;;  %v5914_v55 = vmax.f32 %v7850_v49, 0.0  ;;  %v7852_v15 = vadd.f32 %v7773_v5, %v7453_v36  ;;  %v3400_v50 = vpop.f32.mrb[63].mxu1 }
 0x34c   : > { %6115 = vst [vmem:[%s9657_s19 + $0x1c8] sm:$0xff] %v6051_v30  ;;  %v5912_v6 = vmax.f32 %v7851_v46, 0.0  ;;  %v7853_v19 = vadd.f32 %v5584_v7, %v3400_v50 }
 0x34d   : > { %v5985_v26 = vmul.f32 %v9642_v51, %v5914_v55  ;;  %v5915_v43 = vmax.f32 %v7852_v15, 0.0 }
 0x34e   : > { %v5983_v37 = vmul.f32 %v9642_v51, %v5912_v6  ;;  %v5913_v1 = vmax.f32 %v7853_v19, 0.0 }
 0x34f   : > { %v6056_v59 = vadd.f32 %v9649_v57, %v5985_v26  ;;  %v5986_v39 = vmul.f32 %v9642_v51, %v5915_v43 }
 0x350   : > { %v6054_v14 = vadd.f32 %v9649_v57, %v5983_v37  ;;  %v5984_v10 = vmul.f32 %v9642_v51, %v5913_v1 }
 0x351   : > { %6120 = vst [vmem:[%s9657_s19 + $0x1f0] sm:$0xff] %v6056_v59  ;;  %v6057_v24 = vadd.f32 %v9649_v57, %v5986_v39 }
 0x352   : > { %6118 = vst [vmem:[%s9657_s19 + $0x1e0] sm:$0xff] %v6054_v14  ;;  %v6055_v28 = vadd.f32 %v9649_v57, %v5984_v10 }
 0x353   : > { %6121 = vst [vmem:[%s9657_s19 + $0x1f8] sm:$0xff] %v6057_v24 }
 0x354   : > { %6119 = vst [vmem:[%s9657_s19 + $0x1e8] sm:$0xff] %v6055_v28 }
 0x355   : > { %8526 = shalt.err (!%p8523_p13)
}
 0x356   : > { %s8527_s7 = scalar_lea.hbm %s9872_s18, 8192  ;;  %s8531_s29 = scalar_lea.hbm %s9940_s6, 32768 }
 0x357   : > { %p8528_p0 = scmp.ne.s32.totalorder %s9872_s18, %s8527_s7  ;;  %p8532_p4 = scmp.lt.u32.totalorder %s9872_s18, %s9940_s6 }
 0x358   : > { %p8533_p5 = scmp.lt.u32.totalorder %s8531_s29, %s8527_s7  ;;  %p8535_p7 = scmp.lt.u32.totalorder %s8527_s7, %s9872_s18 }
 0x359   : > { %p8529_p1 = pnand %p8528_p0, %p8699_p3 }
 0x35a   : > { %p8534_p6 = por %p8533_p5, %p8532_p4 }
 0x35b   : > { %p8530_p2 = pneg %p8529_p1 }
 0x35c   : > { %p8536_p9 = por %p8535_p7, %p8534_p6 }
 0x35e   : > { %p8537_p10 = pnand %p8536_p9, %p8530_p2 }
 0x360   : > { %8540 = shalt.err (!%p8537_p10)
}
 0x361   : > { %s8611_s25 = smov 128   ;;  %s8612_s12 = smov 8  }
 0x362   : > { %8302 = dma.vmem_to_hbm [thread:$0]  (%p8699_p3), %s9874_s30, 8192, %s9872_s18, %s9882_s27, %s8611_s25, %s8611_s25, %s8612_s12  }
 0x363 PF: > { %p8308_p11 = scmp.ge.s32.totalorder %s8607_s28, 2  ;;  %s6154_s13 = sand.u32 1, %s8579_s21  }
 0x364   : > { %s6155_s14 = scalar_lea.sflag [#allocation5], %s6154_s13 }
 0x365   : > { %p8305_p12 = pnand %p8308_p11, %p8708_p8 }
 0x367   : > { %8574 = dma.done.wait (!%p8305_p12), %s6155_s14, 8192  }
 0x368   : > { %8576 = vsyncadd (!%p8305_p12), %s6155_s14, 4294959104  ;;  %s19_s28 = sadd.s32 1, %s8607_s28   ;;  %s10078_s25 = sld [smem:[#allocation7_spill]] }
 0x369   : > { %p16_p13 = scmp.ge.s32.totalorder %s19_s28, 6   ;;  %s10079_s10 = sld [smem:[#allocation8_spill]] }
 0x36a   : > { %s10080_s27 = sld [smem:[#allocation9_spill]]  ;;  %s10081_s21 = smov %s8583_s22 }
 0x36b   : > { %s10082_s22 = smov %s8587_s23  ;;  %s10083_s23 = smov %s8717_s15 }
 0x36c   : > { %s10084_s24 = smov %s8599_s26  ;;  %18 = sbr.rel (!%p16_p13) target bundleno = 5 (0x5), region = 95 }
 0x36f   : > { %s10085_s26 = smov %s10079_s10 }
 0x373   :  { %6160 = vsyncpa [#allocation5], 1 }
 0x374   :  { %6162 = vsyncpa [#allocation5 + $0x1], 1 }

</bundles_post_ra>
